<compile_context>
chip_gen: v7x
topology: tpu7x:2x2x1
jax: 0.10.0
libtpu: 0.0.40
codegen_flags: <defaults>
</compile_context>

<pallas_src>
import functools

import jax
import jax.numpy as jnp
from jax.experimental import pallas as pl
from jax.experimental.pallas import tpu as pltpu


# ---------------------------------------------------------------------------
# Fused Pallas kernel (TB batch elements per grid step)
# ---------------------------------------------------------------------------

def _fused_kernel(z_ref, w1_ref, b1_ref, w2_ref, b2_ref,
                  wse_ref, bse_ref, wl1_ref, bl1_ref, wl2_ref, bl2_ref,
                  wh1_ref, bh1_ref, wh2_ref, bh2_ref, wh3_ref, bh3_ref,
                  alphas_ref, out_ref):
    a_c1 = alphas_ref[0]
    a_c2 = alphas_ref[1]
    a_se = alphas_ref[2]
    a_h1 = alphas_ref[3]
    a_h2 = alphas_ref[4]

    def prelu(v, a):
        return jnp.where(v > 0, v, a * v)

    bf16 = jnp.bfloat16
    f32 = jnp.float32

    tb = out_ref.shape[1]                 # out block is (1, TB, 2)

    # Z was built in bf16 on the host; rows are (element, conv-row-block a).
    z = z_ref[0]                                                  # (TB*19, 512)

    # conv1: all 32 residue classes of output positions as one banded matmul,
    # BN folded into weights/bias, then PReLU.
    y1 = jnp.dot(z, w1_ref[...], preferred_element_type=f32)     # (TB*19, 2048)
    y1 = prelu(y1 + b1_ref[...], a_c1)

    # conv2: block-diagonal matmul + folded BN + PReLU.
    # TODO(synk): w2 is 4x(512,32) block-diagonal; 75% of these MACs / weight
    # bytes multiply structural zeros (low priority vs. batching).
    y2 = jnp.dot(y1.astype(bf16), w2_ref[...],
                 preferred_element_type=f32)                      # (TB*19, 128)
    y2 = prelu(y2 + b2_ref[...], a_c2)

    # Flatten: one relayout (TB*19,128)->(TB,2432).  Flat column m = a*128 +
    # b*32 + c corresponds to PyTorch flatten index c*76 + (4a+b); the FC
    # weights were row-permuted on the host to consume this layout directly.
    xf = y2.reshape(tb, 19 * 128)                                 # (TB, 2432)

    # SE module: conv(1x76)-as-matmul -> Linear(32,8) -> PReLU -> Linear(8,32)
    # -> sigmoid.  TODO(synk): Dropout(0.2)/Dropout(0.5) are eval-mode identity.
    s = jnp.dot(xf.astype(bf16), wse_ref[...],
                preferred_element_type=f32) + bse_ref[...]        # (TB, 32)
    h = prelu(jnp.dot(s, wl1_ref[...], preferred_element_type=f32)
              + bl1_ref[...], a_se)                               # (TB, 8)
    h = jnp.dot(h, wl2_ref[...], preferred_element_type=f32) + bl2_ref[...]
    gate = jax.nn.sigmoid(h)                                      # (TB, 32)

    # Per-channel gating on the flat vector: channel = column % 32.
    g128 = jnp.concatenate([gate, gate, gate, gate], axis=1)      # (TB, 128)
    gate_flat = jnp.concatenate([g128] * 19, axis=1)              # (TB, 2432)
    xg = xf * gate_flat

    # Head MLP 2432 -> 256 -> 64 -> 2 (Dropouts are identity in eval).
    h1 = prelu(jnp.dot(xg.astype(bf16), wh1_ref[...],
                       preferred_element_type=f32) + bh1_ref[...], a_h1)
    h2 = prelu(jnp.dot(h1, wh2_ref[...], preferred_element_type=f32)
               + bh2_ref[...], a_h2)
    out = jnp.dot(h2, wh3_ref[...], preferred_element_type=f32) + bh3_ref[...]
    out_ref[0] = out                                              # (TB, 2)


def _full(shape):
    """Whole-array VMEM block, constant index map (never re-fetched)."""
    return pl.BlockSpec(shape, lambda b: (0,) * len(shape))


# ---------------------------------------------------------------------------
# Parameters: torch-like raw params + one-time host-side preparation
# ---------------------------------------------------------------------------

def init_params(key):
    ks = jax.random.split(key, 12)

    def trunc_normal(k, shape, std=0.01):
        return jnp.clip(std * jax.random.normal(k, shape, jnp.float32),
                        -2.0 * std, 2.0 * std)

    eps = 1e-5
    p = {}
    # features_1: Conv2d(1, 64, (2,128), stride=4) + BatchNorm2d(64) + PReLU
    p["conv1_w"] = 0.05 * jax.random.normal(ks[0], (64, 1, 2, 128), jnp.float32)
    p["conv1_b"] = jnp.zeros((64,), jnp.float32)
    p["bn1_scale"] = jnp.ones((64,), jnp.float32) / jnp.sqrt(1.0 + eps)
    p["bn1_shift"] = jnp.zeros((64,), jnp.float32)
    p["prelu1_a"] = jnp.float32(0.25)
    # features_2: Conv2d(64, 32, (1,8), stride=8) + BatchNorm2d(32) + PReLU
    p["conv2_w"] = 0.05 * jax.random.normal(ks[1], (32, 64, 1, 8), jnp.float32)
    p["conv2_b"] = jnp.zeros((32,), jnp.float32)
    p["bn2_scale"] = jnp.ones((32,), jnp.float32) / jnp.sqrt(1.0 + eps)
    p["bn2_shift"] = jnp.zeros((32,), jnp.float32)
    p["prelu2_a"] = jnp.float32(0.25)
    # SE module: Conv2d(32, 32, (1,76)), Linear(32,8), PReLU, Linear(8,32)
    p["se_conv_w"] = 0.05 * jax.random.normal(ks[2], (32, 32, 1, 76), jnp.float32)
    p["se_conv_b"] = jnp.zeros((32,), jnp.float32)
    p["se_l1_w"] = trunc_normal(ks[3], (8, 32))      # (out, in) like PyTorch
    p["se_l1_b"] = jnp.zeros((8,), jnp.float32)
    p["se_prelu_a"] = jnp.float32(0.25)
    p["se_l2_w"] = trunc_normal(ks[4], (32, 8))
    p["se_l2_b"] = jnp.zeros((32,), jnp.float32)
    # head: Linear(2432,256), PReLU, Linear(256,64), PReLU, Linear(64,2)
    p["h1_w"] = trunc_normal(ks[5], (256, 2432))
    p["h1_b"] = jnp.zeros((256,), jnp.float32)
    p["h_prelu1_a"] = jnp.float32(0.25)
    p["h2_w"] = trunc_normal(ks[6], (64, 256))
    p["h2_b"] = jnp.zeros((64,), jnp.float32)
    p["h_prelu2_a"] = jnp.float32(0.25)
    p["h3_w"] = trunc_normal(ks[7], (2, 64))
    p["h3_b"] = jnp.zeros((2,), jnp.float32)
    return p


def prepare_params(p):
    """One-time host-side folding/permutation into kernel-ready layout."""
    f32 = jnp.float32
    bf16 = jnp.bfloat16
    q = {}

    # conv1: fold BN, permute rows to the group-of-4 interleaved Z-window order,
    # then expand into the banded (512, 2048) matrix covering all 32 residue
    # classes (output column q*64 + c).
    w1 = p["conv1_w"].reshape(64, 256).T.astype(f32)          # rows = r*128 + k
    w1 = w1 * p["bn1_scale"][None, :]
    b1 = p["conv1_b"] * p["bn1_scale"] + p["bn1_shift"]       # (64,)
    pos = jnp.arange(256)
    src = (pos % 8 // 4) * 128 + 4 * (pos // 8) + pos % 4     # Z order -> torch order
    w1p = w1[src, :]                                          # (256, 64)
    big1 = jnp.zeros((512, 2048), f32)
    for qq in range(32):
        big1 = big1.at[8 * qq:8 * qq + 256, 64 * qq:64 * qq + 64].set(w1p)
    q["w1"] = big1.astype(bf16)
    q["b1"] = jnp.tile(b1, 32).reshape(1, 2048).astype(f32)

    # conv2: fold BN, rows ordered u*64 + c, block-diagonal over the 4 offsets b.
    w2 = jnp.transpose(p["conv2_w"].reshape(32, 64, 8), (2, 1, 0)).reshape(512, 32)
    w2 = w2.astype(f32) * p["bn2_scale"][None, :]
    b2 = p["conv2_b"] * p["bn2_scale"] + p["bn2_shift"]       # (32,)
    big2 = jnp.zeros((2048, 128), f32)
    for bb in range(4):
        big2 = big2.at[512 * bb:512 * bb + 512, 32 * bb:32 * bb + 32].set(w2)
    q["w2"] = big2.astype(bf16)
    q["b2"] = jnp.tile(b2, 4).reshape(1, 128).astype(f32)

    # Permutation: kernel flat index m = a*128 + b*32 + c  <->  PyTorch
    # channel-major flatten index c*76 + t with t = 4a + b.
    a_i = jnp.arange(19)[:, None, None]
    b_i = jnp.arange(4)[None, :, None]
    c_i = jnp.arange(32)[None, None, :]
    tidx = (c_i * 76 + 4 * a_i + b_i).reshape(-1)             # (2432,)

    wse = p["se_conv_w"].reshape(32, 2432).T.astype(f32)      # (2432, 32)
    q["wse"] = wse[tidx, :].astype(bf16)
    q["bse"] = p["se_conv_b"].reshape(1, 32).astype(f32)
    q["wl1"] = p["se_l1_w"].T.astype(f32)                     # (32, 8)
    q["bl1"] = p["se_l1_b"].reshape(1, 8).astype(f32)
    q["wl2"] = p["se_l2_w"].T.astype(f32)                     # (8, 32)
    q["bl2"] = p["se_l2_b"].reshape(1, 32).astype(f32)

    q["wh1"] = p["h1_w"].T.astype(f32)[tidx, :].astype(bf16)  # (2432, 256)
    q["bh1"] = p["h1_b"].reshape(1, 256).astype(f32)
    q["wh2"] = p["h2_w"].T.astype(f32)                        # (256, 64)
    q["bh2"] = p["h2_b"].reshape(1, 64).astype(f32)
    q["wh3"] = p["h3_w"].T.astype(f32)                        # (64, 2)
    q["bh3"] = p["h3_b"].reshape(1, 2).astype(f32)

    q["alphas"] = jnp.stack(
        [p["prelu1_a"], p["prelu2_a"], p["se_prelu_a"],
         p["h_prelu1_a"], p["h_prelu2_a"],
         jnp.float32(0.0), jnp.float32(0.0), jnp.float32(0.0)]).astype(f32)
    return q


# ---------------------------------------------------------------------------
# Forward pass: tiny host-side layout prep + one fused Pallas kernel
# ---------------------------------------------------------------------------

def _cdiv(a, b):
    return -(-a // b)


def forward(prep, x_complex, tb=16):
    """tb: batch elements per grid step (>=14 fills the 256-wide MXU on
    v6e/v7x; use 8 on v5e).  Capped at ceil(B/2) so the grid keeps >= 2 steps
    and the "parallel" axis can shard over v7x's 2 TensorCores."""
    B = x_complex.shape[0]
    tb = max(1, min(tb, _cdiv(B, 2)))
    steps = _cdiv(B, tb)
    Bp = steps * tb

    # ReadOFDMSymbol: split complex signal into [real; imag] rows.
    real = jnp.real(x_complex).astype(jnp.float32)             # (B, 2560)
    imag = jnp.imag(x_complex).astype(jnp.float32)
    if Bp != B:
        pad = ((0, Bp - B), (0, 0))
        real = jnp.pad(real, pad)
        imag = jnp.pad(imag, pad)

    # Interleaved window view Z (Bp, 19, 512):
    #   Z[i, 8g + p]     = real[128*i + 4g + p]
    #   Z[i, 8g + 4 + p] = imag[128*i + 4g + p]
    # so the conv1 patch for output w = q + 32*i is the window Z[i, 8q : 8q+256].
    xr = real.reshape(Bp, 20, 128)
    xi = imag.reshape(Bp, 20, 128)
    xxr = jnp.concatenate([xr[:, :19, :], xr[:, 1:, :]], axis=2)   # (Bp,19,256)
    xxi = jnp.concatenate([xi[:, :19, :], xi[:, 1:, :]], axis=2)
    z = jnp.stack([xxr.reshape(Bp, 19, 64, 4),
                   xxi.reshape(Bp, 19, 64, 4)], axis=3).reshape(Bp, 19, 512)
    # bf16 on the host (halves input DMA); rows grouped per grid step.
    z = z.astype(jnp.bfloat16).reshape(steps, tb * 19, 512)

    in_specs = [
        pl.BlockSpec((1, tb * 19, 512), lambda b: (b, 0, 0)),   # Z (TB elements)
        _full((512, 2048)), _full((1, 2048)),                   # conv1 banded + bias
        _full((2048, 128)), _full((1, 128)),                    # conv2 block-diag + bias
        _full((2432, 32)), _full((1, 32)),                      # SE conv
        _full((32, 8)), _full((1, 8)),                          # SE linear1
        _full((8, 32)), _full((1, 32)),                         # SE linear2
        _full((2432, 256)), _full((1, 256)),                    # head linear1
        _full((256, 64)), _full((1, 64)),                       # head linear2
        _full((64, 2)), _full((1, 2)),                          # head linear3
        pl.BlockSpec(memory_space=pltpu.MemorySpace.SMEM),      # PReLU alphas
    ]

    out = pl.pallas_call(
        _fused_kernel,
        out_shape=jax.ShapeDtypeStruct((steps, tb, 2), jnp.float32),
        grid=(steps,),
        in_specs=in_specs,
        out_specs=pl.BlockSpec((1, tb, 2), lambda b: (b, 0, 0)),
        compiler_params=pltpu.CompilerParams(
            dimension_semantics=("parallel",),
            # VMEM budget: ~4 MiB weights (x2 pipeline buffers) + ~0.6 MiB Z
            # blocks + a few MiB of f32 activations at tb=16; 48 MiB is safe on
            # v7x (64 MiB physical) and leaves room for larger tb on v5e/v6e.
            vmem_limit_bytes=48 * 1024 * 1024),
    )(z,
      prep["w1"], prep["b1"], prep["w2"], prep["b2"],
      prep["wse"], prep["bse"], prep["wl1"], prep["bl1"],
      prep["wl2"], prep["bl2"], prep["wh1"], prep["bh1"],
      prep["wh2"], prep["bh2"], prep["wh3"], prep["bh3"],
      prep["alphas"])
    return out.reshape(Bp, 2)[:B]


# ---------------------------------------------------------------------------

if __name__ == "__main__":
    key = jax.random.PRNGKey(0)
    kp, kr, ki = jax.random.split(key, 3)
    raw_params = init_params(kp)
    prep = prepare_params(raw_params)          # one-time fold/permute on host

    B, L = 8, 2560                             # L is fixed by the architecture
    x = (jax.random.normal(kr, (B, L), jnp.float32)
         + 1j * jax.random.normal(ki, (B, L), jnp.float32)).astype(jnp.complex64)

    fwd = jax.jit(functools.partial(forward, tb=16))
    out = jax.block_until_ready(fwd(prep, x))

    assert out.shape == (B, 2), out.shape
    assert bool(jnp.all(jnp.isfinite(out)))
    print("KERNEL_OK")
</pallas_src>

<mosaic_0001>
module attributes {stable_mosaic.version = 11 : i64} {
  func.func @_fused_kernel(%arg0: i32, %arg1: memref<1x76x512xbf16, #tpu.memory_space<vmem>>, %arg2: memref<512x2048xbf16, #tpu.memory_space<vmem>>, %arg3: memref<1x2048xf32, #tpu.memory_space<vmem>>, %arg4: memref<2048x128xbf16, #tpu.memory_space<vmem>>, %arg5: memref<1x128xf32, #tpu.memory_space<vmem>>, %arg6: memref<2432x32xbf16, #tpu.memory_space<vmem>>, %arg7: memref<1x32xf32, #tpu.memory_space<vmem>>, %arg8: memref<32x8xf32, #tpu.memory_space<vmem>>, %arg9: memref<1x8xf32, #tpu.memory_space<vmem>>, %arg10: memref<8x32xf32, #tpu.memory_space<vmem>>, %arg11: memref<1x32xf32, #tpu.memory_space<vmem>>, %arg12: memref<2432x256xbf16, #tpu.memory_space<vmem>>, %arg13: memref<1x256xf32, #tpu.memory_space<vmem>>, %arg14: memref<256x64xf32, #tpu.memory_space<vmem>>, %arg15: memref<1x64xf32, #tpu.memory_space<vmem>>, %arg16: memref<64x2xf32, #tpu.memory_space<vmem>>, %arg17: memref<1x2xf32, #tpu.memory_space<vmem>>, %arg18: memref<8xf32, #tpu.memory_space<smem>>, %arg19: memref<1x4x2xf32, #tpu.memory_space<vmem>>) attributes {dimension_semantics = [#tpu.dimension_semantics<parallel>], iteration_bounds = array<i64: 2>, scalar_prefetch = 0 : i64, scratch_operands = 0 : i64, tpu.core_type = #tpu.core_type<tc>, window_params = [{transform_indices = @transform_0, window_bounds = array<i64: 1, 76, 512>}, {pipeline_mode = #tpu.pipeline_mode<synchronous>, transform_indices = @transform_1, window_bounds = array<i64: 512, 2048>}, {pipeline_mode = #tpu.pipeline_mode<synchronous>, transform_indices = @transform_2, window_bounds = array<i64: 1, 2048>}, {pipeline_mode = #tpu.pipeline_mode<synchronous>, transform_indices = @transform_3, window_bounds = array<i64: 2048, 128>}, {pipeline_mode = #tpu.pipeline_mode<synchronous>, transform_indices = @transform_4, window_bounds = array<i64: 1, 128>}, {pipeline_mode = #tpu.pipeline_mode<synchronous>, transform_indices = @transform_5, window_bounds = array<i64: 2432, 32>}, {pipeline_mode = #tpu.pipeline_mode<synchronous>, transform_indices = @transform_6, window_bounds = array<i64: 1, 32>}, {pipeline_mode = #tpu.pipeline_mode<synchronous>, transform_indices = @transform_7, window_bounds = array<i64: 32, 8>}, {pipeline_mode = #tpu.pipeline_mode<synchronous>, transform_indices = @transform_8, window_bounds = array<i64: 1, 8>}, {pipeline_mode = #tpu.pipeline_mode<synchronous>, transform_indices = @transform_9, window_bounds = array<i64: 8, 32>}, {pipeline_mode = #tpu.pipeline_mode<synchronous>, transform_indices = @transform_10, window_bounds = array<i64: 1, 32>}, {pipeline_mode = #tpu.pipeline_mode<synchronous>, transform_indices = @transform_11, window_bounds = array<i64: 2432, 256>}, {pipeline_mode = #tpu.pipeline_mode<synchronous>, transform_indices = @transform_12, window_bounds = array<i64: 1, 256>}, {pipeline_mode = #tpu.pipeline_mode<synchronous>, transform_indices = @transform_13, window_bounds = array<i64: 256, 64>}, {pipeline_mode = #tpu.pipeline_mode<synchronous>, transform_indices = @transform_14, window_bounds = array<i64: 1, 64>}, {pipeline_mode = #tpu.pipeline_mode<synchronous>, transform_indices = @transform_15, window_bounds = array<i64: 64, 2>}, {pipeline_mode = #tpu.pipeline_mode<synchronous>, transform_indices = @transform_16, window_bounds = array<i64: 1, 2>}, {transform_indices = @transform_17, window_bounds = array<i64: 8>}, {transform_indices = @transform_18, window_bounds = array<i64: 1, 4, 2>}]} {
    %c0 = arith.constant 0 : index
    %0 = memref.load %arg18[%c0] : memref<8xf32, #tpu.memory_space<smem>>
    %c1 = arith.constant 1 : index
    %1 = memref.load %arg18[%c1] : memref<8xf32, #tpu.memory_space<smem>>
    %c2 = arith.constant 2 : index
    %2 = memref.load %arg18[%c2] : memref<8xf32, #tpu.memory_space<smem>>
    %c3 = arith.constant 3 : index
    %3 = memref.load %arg18[%c3] : memref<8xf32, #tpu.memory_space<smem>>
    %c4 = arith.constant 4 : index
    %4 = memref.load %arg18[%c4] : memref<8xf32, #tpu.memory_space<smem>>
    %c0_0 = arith.constant 0 : index
    %c0_1 = arith.constant 0 : index
    %c0_2 = arith.constant 0 : index
    %5 = vector.load %arg1[%c0_0, %c0_1, %c0_2] : memref<1x76x512xbf16, #tpu.memory_space<vmem>>, vector<1x76x512xbf16>
    %6 = vector.shape_cast %5 : vector<1x76x512xbf16> to vector<76x512xbf16>
    %c0_3 = arith.constant 0 : index
    %c0_4 = arith.constant 0 : index
    %7 = vector.load %arg2[%c0_3, %c0_4] : memref<512x2048xbf16, #tpu.memory_space<vmem>>, vector<512x2048xbf16>
    %cst = arith.constant dense<0.000000e+00> : vector<76x2048xf32>
    %8 = tpu.matmul %6, %7, %cst {dimension_numbers = #tpu.dot_dimension_numbers<[1], [0], [0], [1], [0, 0, 1, 1], [], []>} : vector<76x512xbf16>, vector<512x2048xbf16>, vector<76x2048xf32> -> vector<76x2048xf32>
    %c0_5 = arith.constant 0 : index
    %c0_6 = arith.constant 0 : index
    %9 = vector.load %arg3[%c0_5, %c0_6] : memref<1x2048xf32, #tpu.memory_space<vmem>>, vector<1x2048xf32>
    %10 = vector.broadcast %9 : vector<1x2048xf32> to vector<76x2048xf32>
    %11 = arith.addf %8, %10 : vector<76x2048xf32>
    %cst_7 = arith.constant 0.000000e+00 : f32
    %12 = vector.broadcast %cst_7 : f32 to vector<76x2048xf32>
    %13 = arith.cmpf ogt, %11, %12 : vector<76x2048xf32>
    %14 = vector.broadcast %0 : f32 to vector<76x2048xf32>
    %15 = arith.mulf %14, %11 : vector<76x2048xf32>
    %16 = arith.select %13, %11, %15 : vector<76x2048xi1>, vector<76x2048xf32>
    %17 = arith.truncf %16 : vector<76x2048xf32> to vector<76x2048xbf16>
    %c0_8 = arith.constant 0 : index
    %c0_9 = arith.constant 0 : index
    %18 = vector.load %arg4[%c0_8, %c0_9] : memref<2048x128xbf16, #tpu.memory_space<vmem>>, vector<2048x128xbf16>
    %cst_10 = arith.constant dense<0.000000e+00> : vector<76x128xf32>
    %19 = tpu.matmul %17, %18, %cst_10 {dimension_numbers = #tpu.dot_dimension_numbers<[1], [0], [0], [1], [0, 0, 1, 1], [], []>} : vector<76x2048xbf16>, vector<2048x128xbf16>, vector<76x128xf32> -> vector<76x128xf32>
    %c0_11 = arith.constant 0 : index
    %c0_12 = arith.constant 0 : index
    %20 = vector.load %arg5[%c0_11, %c0_12] : memref<1x128xf32, #tpu.memory_space<vmem>>, vector<1x128xf32>
    %21 = vector.broadcast %20 : vector<1x128xf32> to vector<76x128xf32>
    %22 = arith.addf %19, %21 : vector<76x128xf32>
    %cst_13 = arith.constant 0.000000e+00 : f32
    %23 = vector.broadcast %cst_13 : f32 to vector<76x128xf32>
    %24 = arith.cmpf ogt, %22, %23 : vector<76x128xf32>
    %25 = vector.broadcast %1 : f32 to vector<76x128xf32>
    %26 = arith.mulf %25, %22 : vector<76x128xf32>
    %27 = arith.select %24, %22, %26 : vector<76x128xi1>, vector<76x128xf32>
    %28 = vector.shape_cast %27 : vector<76x128xf32> to vector<4x2432xf32>
    %29 = arith.truncf %28 : vector<4x2432xf32> to vector<4x2432xbf16>
    %c0_14 = arith.constant 0 : index
    %c0_15 = arith.constant 0 : index
    %30 = vector.load %arg6[%c0_14, %c0_15] : memref<2432x32xbf16, #tpu.memory_space<vmem>>, vector<2432x32xbf16>
    %cst_16 = arith.constant dense<0.000000e+00> : vector<4x32xf32>
    %31 = tpu.matmul %29, %30, %cst_16 {dimension_numbers = #tpu.dot_dimension_numbers<[1], [0], [0], [1], [0, 0, 1, 1], [], []>} : vector<4x2432xbf16>, vector<2432x32xbf16>, vector<4x32xf32> -> vector<4x32xf32>
    %c0_17 = arith.constant 0 : index
    %c0_18 = arith.constant 0 : index
    %32 = vector.load %arg7[%c0_17, %c0_18] : memref<1x32xf32, #tpu.memory_space<vmem>>, vector<1x32xf32>
    %33 = vector.broadcast %32 : vector<1x32xf32> to vector<4x32xf32>
    %34 = arith.addf %31, %33 : vector<4x32xf32>
    %c0_19 = arith.constant 0 : index
    %c0_20 = arith.constant 0 : index
    %35 = vector.load %arg8[%c0_19, %c0_20] : memref<32x8xf32, #tpu.memory_space<vmem>>, vector<32x8xf32>
    %cst_21 = arith.constant dense<0.000000e+00> : vector<4x8xf32>
    %36 = tpu.matmul %34, %35, %cst_21 {dimension_numbers = #tpu.dot_dimension_numbers<[1], [0], [0], [1], [0, 0, 1, 1], [], []>} : vector<4x32xf32>, vector<32x8xf32>, vector<4x8xf32> -> vector<4x8xf32>
    %c0_22 = arith.constant 0 : index
    %c0_23 = arith.constant 0 : index
    %37 = vector.load %arg9[%c0_22, %c0_23] : memref<1x8xf32, #tpu.memory_space<vmem>>, vector<1x8xf32>
    %38 = vector.broadcast %37 : vector<1x8xf32> to vector<4x8xf32>
    %39 = arith.addf %36, %38 : vector<4x8xf32>
    %cst_24 = arith.constant 0.000000e+00 : f32
    %40 = vector.broadcast %cst_24 : f32 to vector<4x8xf32>
    %41 = arith.cmpf ogt, %39, %40 : vector<4x8xf32>
    %42 = vector.broadcast %2 : f32 to vector<4x8xf32>
    %43 = arith.mulf %42, %39 : vector<4x8xf32>
    %44 = arith.select %41, %39, %43 : vector<4x8xi1>, vector<4x8xf32>
    %c0_25 = arith.constant 0 : index
    %c0_26 = arith.constant 0 : index
    %45 = vector.load %arg10[%c0_25, %c0_26] : memref<8x32xf32, #tpu.memory_space<vmem>>, vector<8x32xf32>
    %cst_27 = arith.constant dense<0.000000e+00> : vector<4x32xf32>
    %46 = tpu.matmul %44, %45, %cst_27 {dimension_numbers = #tpu.dot_dimension_numbers<[1], [0], [0], [1], [0, 0, 1, 1], [], []>} : vector<4x8xf32>, vector<8x32xf32>, vector<4x32xf32> -> vector<4x32xf32>
    %c0_28 = arith.constant 0 : index
    %c0_29 = arith.constant 0 : index
    %47 = vector.load %arg11[%c0_28, %c0_29] : memref<1x32xf32, #tpu.memory_space<vmem>>, vector<1x32xf32>
    %48 = vector.broadcast %47 : vector<1x32xf32> to vector<4x32xf32>
    %49 = arith.addf %46, %48 : vector<4x32xf32>
    %50 = arith.negf %49 : vector<4x32xf32>
    %51 = math.exp %50 : vector<4x32xf32>
    %cst_30 = arith.constant 1.000000e+00 : f32
    %52 = vector.broadcast %cst_30 : f32 to vector<4x32xf32>
    %53 = arith.addf %52, %51 : vector<4x32xf32>
    %54 = arith.divf %52, %53 : vector<4x32xf32>
    %55 = tpu.concatenate %54, %54, %54, %54 in 1 : vector<4x32xf32>, vector<4x32xf32>, vector<4x32xf32>, vector<4x32xf32> -> vector<4x128xf32>
    %56 = tpu.concatenate %55, %55, %55, %55, %55, %55, %55, %55, %55, %55, %55, %55, %55, %55, %55, %55 in 1 : vector<4x128xf32>, vector<4x128xf32>, vector<4x128xf32>, vector<4x128xf32>, vector<4x128xf32>, vector<4x128xf32>, vector<4x128xf32>, vector<4x128xf32>, vector<4x128xf32>, vector<4x128xf32>, vector<4x128xf32>, vector<4x128xf32>, vector<4x128xf32>, vector<4x128xf32>, vector<4x128xf32>, vector<4x128xf32> -> vector<4x2048xf32>
    %57 = tpu.concatenate %55, %55, %55 in 1 : vector<4x128xf32>, vector<4x128xf32>, vector<4x128xf32> -> vector<4x384xf32>
    %58 = tpu.concatenate %56, %57 in 1 : vector<4x2048xf32>, vector<4x384xf32> -> vector<4x2432xf32>
    %59 = arith.mulf %28, %58 : vector<4x2432xf32>
    %60 = arith.truncf %59 : vector<4x2432xf32> to vector<4x2432xbf16>
    %c0_31 = arith.constant 0 : index
    %c0_32 = arith.constant 0 : index
    %61 = vector.load %arg12[%c0_31, %c0_32] : memref<2432x256xbf16, #tpu.memory_space<vmem>>, vector<2432x256xbf16>
    %cst_33 = arith.constant dense<0.000000e+00> : vector<4x256xf32>
    %62 = tpu.matmul %60, %61, %cst_33 {dimension_numbers = #tpu.dot_dimension_numbers<[1], [0], [0], [1], [0, 0, 1, 1], [], []>} : vector<4x2432xbf16>, vector<2432x256xbf16>, vector<4x256xf32> -> vector<4x256xf32>
    %c0_34 = arith.constant 0 : index
    %c0_35 = arith.constant 0 : index
    %63 = vector.load %arg13[%c0_34, %c0_35] : memref<1x256xf32, #tpu.memory_space<vmem>>, vector<1x256xf32>
    %64 = vector.broadcast %63 : vector<1x256xf32> to vector<4x256xf32>
    %65 = arith.addf %62, %64 : vector<4x256xf32>
    %cst_36 = arith.constant 0.000000e+00 : f32
    %66 = vector.broadcast %cst_36 : f32 to vector<4x256xf32>
    %67 = arith.cmpf ogt, %65, %66 : vector<4x256xf32>
    %68 = vector.broadcast %3 : f32 to vector<4x256xf32>
    %69 = arith.mulf %68, %65 : vector<4x256xf32>
    %70 = arith.select %67, %65, %69 : vector<4x256xi1>, vector<4x256xf32>
    %c0_37 = arith.constant 0 : index
    %c0_38 = arith.constant 0 : index
    %71 = vector.load %arg14[%c0_37, %c0_38] : memref<256x64xf32, #tpu.memory_space<vmem>>, vector<256x64xf32>
    %cst_39 = arith.constant dense<0.000000e+00> : vector<4x64xf32>
    %72 = tpu.matmul %70, %71, %cst_39 {dimension_numbers = #tpu.dot_dimension_numbers<[1], [0], [0], [1], [0, 0, 1, 1], [], []>} : vector<4x256xf32>, vector<256x64xf32>, vector<4x64xf32> -> vector<4x64xf32>
    %c0_40 = arith.constant 0 : index
    %c0_41 = arith.constant 0 : index
    %73 = vector.load %arg15[%c0_40, %c0_41] : memref<1x64xf32, #tpu.memory_space<vmem>>, vector<1x64xf32>
    %74 = vector.broadcast %73 : vector<1x64xf32> to vector<4x64xf32>
    %75 = arith.addf %72, %74 : vector<4x64xf32>
    %cst_42 = arith.constant 0.000000e+00 : f32
    %76 = vector.broadcast %cst_42 : f32 to vector<4x64xf32>
    %77 = arith.cmpf ogt, %75, %76 : vector<4x64xf32>
    %78 = vector.broadcast %4 : f32 to vector<4x64xf32>
    %79 = arith.mulf %78, %75 : vector<4x64xf32>
    %80 = arith.select %77, %75, %79 : vector<4x64xi1>, vector<4x64xf32>
    %c0_43 = arith.constant 0 : index
    %c0_44 = arith.constant 0 : index
    %81 = vector.load %arg16[%c0_43, %c0_44] : memref<64x2xf32, #tpu.memory_space<vmem>>, vector<64x2xf32>
    %cst_45 = arith.constant dense<0.000000e+00> : vector<4x2xf32>
    %82 = tpu.matmul %80, %81, %cst_45 {dimension_numbers = #tpu.dot_dimension_numbers<[1], [0], [0], [1], [0, 0, 1, 1], [], []>} : vector<4x64xf32>, vector<64x2xf32>, vector<4x2xf32> -> vector<4x2xf32>
    %c0_46 = arith.constant 0 : index
    %c0_47 = arith.constant 0 : index
    %83 = vector.load %arg17[%c0_46, %c0_47] : memref<1x2xf32, #tpu.memory_space<vmem>>, vector<1x2xf32>
    %84 = vector.broadcast %83 : vector<1x2xf32> to vector<4x2xf32>
    %85 = arith.addf %82, %84 : vector<4x2xf32>
    %c0_48 = arith.constant 0 : index
    %c0_49 = arith.constant 0 : index
    %c0_50 = arith.constant 0 : index
    %86 = vector.load %arg19[%c0_48, %c0_49, %c0_50] : memref<1x4x2xf32, #tpu.memory_space<vmem>>, vector<1x4x2xf32>
    %87 = vector.shape_cast %86 : vector<1x4x2xf32> to vector<4x2xf32>
    %88 = vector.shape_cast %85 : vector<4x2xf32> to vector<1x4x2xf32>
    tpu.vector_store %arg19[%c0_48, %c0_49, %c0_50], %88 {strides = array<i32>} : memref<1x4x2xf32, #tpu.memory_space<vmem>>, vector<1x4x2xf32>,
    return
  }
  func.func @transform_0(%arg0: i32) -> (i32, i32, i32) {
    %c0_i32 = arith.constant 0 : i32
    %c0_i32_0 = arith.constant 0 : i32
    %c0_i32_1 = arith.constant 0 : i32
    return %arg0, %c0_i32, %c0_i32_0 : i32, i32, i32
  }
  func.func @transform_1(%arg0: i32) -> (i32, i32) {
    %c0_i32 = arith.constant 0 : i32
    %c0_i32_0 = arith.constant 0 : i32
    %c0_i32_1 = arith.constant 0 : i32
    return %c0_i32, %c0_i32_0 : i32, i32
  }
  func.func @transform_2(%arg0: i32) -> (i32, i32) {
    %c0_i32 = arith.constant 0 : i32
    %c0_i32_0 = arith.constant 0 : i32
    %c0_i32_1 = arith.constant 0 : i32
    return %c0_i32, %c0_i32_0 : i32, i32
  }
  func.func @transform_3(%arg0: i32) -> (i32, i32) {
    %c0_i32 = arith.constant 0 : i32
    %c0_i32_0 = arith.constant 0 : i32
    %c0_i32_1 = arith.constant 0 : i32
    return %c0_i32, %c0_i32_0 : i32, i32
  }
  func.func @transform_4(%arg0: i32) -> (i32, i32) {
    %c0_i32 = arith.constant 0 : i32
    %c0_i32_0 = arith.constant 0 : i32
    %c0_i32_1 = arith.constant 0 : i32
    return %c0_i32, %c0_i32_0 : i32, i32
  }
  func.func @transform_5(%arg0: i32) -> (i32, i32) {
    %c0_i32 = arith.constant 0 : i32
    %c0_i32_0 = arith.constant 0 : i32
    %c0_i32_1 = arith.constant 0 : i32
    return %c0_i32, %c0_i32_0 : i32, i32
  }
  func.func @transform_6(%arg0: i32) -> (i32, i32) {
    %c0_i32 = arith.constant 0 : i32
    %c0_i32_0 = arith.constant 0 : i32
    %c0_i32_1 = arith.constant 0 : i32
    return %c0_i32, %c0_i32_0 : i32, i32
  }
  func.func @transform_7(%arg0: i32) -> (i32, i32) {
    %c0_i32 = arith.constant 0 : i32
    %c0_i32_0 = arith.constant 0 : i32
    %c0_i32_1 = arith.constant 0 : i32
    return %c0_i32, %c0_i32_0 : i32, i32
  }
  func.func @transform_8(%arg0: i32) -> (i32, i32) {
    %c0_i32 = arith.constant 0 : i32
    %c0_i32_0 = arith.constant 0 : i32
    %c0_i32_1 = arith.constant 0 : i32
    return %c0_i32, %c0_i32_0 : i32, i32
  }
  func.func @transform_9(%arg0: i32) -> (i32, i32) {
    %c0_i32 = arith.constant 0 : i32
    %c0_i32_0 = arith.constant 0 : i32
    %c0_i32_1 = arith.constant 0 : i32
    return %c0_i32, %c0_i32_0 : i32, i32
  }
  func.func @transform_10(%arg0: i32) -> (i32, i32) {
    %c0_i32 = arith.constant 0 : i32
    %c0_i32_0 = arith.constant 0 : i32
    %c0_i32_1 = arith.constant 0 : i32
    return %c0_i32, %c0_i32_0 : i32, i32
  }
  func.func @transform_11(%arg0: i32) -> (i32, i32) {
    %c0_i32 = arith.constant 0 : i32
    %c0_i32_0 = arith.constant 0 : i32
    %c0_i32_1 = arith.constant 0 : i32
    return %c0_i32, %c0_i32_0 : i32, i32
  }
  func.func @transform_12(%arg0: i32) -> (i32, i32) {
    %c0_i32 = arith.constant 0 : i32
    %c0_i32_0 = arith.constant 0 : i32
    %c0_i32_1 = arith.constant 0 : i32
    return %c0_i32, %c0_i32_0 : i32, i32
  }
  func.func @transform_13(%arg0: i32) -> (i32, i32) {
    %c0_i32 = arith.constant 0 : i32
    %c0_i32_0 = arith.constant 0 : i32
    %c0_i32_1 = arith.constant 0 : i32
    return %c0_i32, %c0_i32_0 : i32, i32
  }
  func.func @transform_14(%arg0: i32) -> (i32, i32) {
    %c0_i32 = arith.constant 0 : i32
    %c0_i32_0 = arith.constant 0 : i32
    %c0_i32_1 = arith.constant 0 : i32
    return %c0_i32, %c0_i32_0 : i32, i32
  }
  func.func @transform_15(%arg0: i32) -> (i32, i32) {
    %c0_i32 = arith.constant 0 : i32
    %c0_i32_0 = arith.constant 0 : i32
    %c0_i32_1 = arith.constant 0 : i32
    return %c0_i32, %c0_i32_0 : i32, i32
  }
  func.func @transform_16(%arg0: i32) -> (i32, i32) {
    %c0_i32 = arith.constant 0 : i32
    %c0_i32_0 = arith.constant 0 : i32
    %c0_i32_1 = arith.constant 0 : i32
    return %c0_i32, %c0_i32_0 : i32, i32
  }
  func.func @transform_17(%arg0: i32) -> i32 {
    %c0_i32 = arith.constant 0 : i32
    %c0_i32_0 = arith.constant 0 : i32
    return %c0_i32 : i32
  }
  func.func @transform_18(%arg0: i32) -> (i32, i32, i32) {
    %c0_i32 = arith.constant 0 : i32
    %c0_i32_0 = arith.constant 0 : i32
    %c0_i32_1 = arith.constant 0 : i32
    return %arg0, %c0_i32, %c0_i32_0 : i32, i32, i32
  }
}

</mosaic_0001>

<bundles_post_ra>
// kernel: custom-call
= control target key start
LH: loop header
LB: loop body
LE: loop exit
PB: predicated region body
PF: predicated region fallthrough
CT: control target
= control target key end

     0   :  { %2 = vsyncpa [#allocation0], 0  ;;  %s61_s0 = inlined_call_operand.hbm [shape: c64[8,2560], index: 0, kind: input, shape index: {}]   ;;  %s62_s1 = inlined_call_operand.vmem [shape: f32[8,2560], index: 1, kind: output, shape index: {}]  }
   0x1   :  { %s3_s8 = sshll.u32 %s62_s1, 4  ;;  %s9_s11 = scalar_lea.hbm %s61_s0, 2560  ;;  %s4_s8 = int_to_ptr.vmem [resolvable:$true] %s3_s8 }
   0x2   :  { %p10_p0 = scmp.ne.s32.totalorder %s61_s0, %s9_s11  ;;  %s11_s16 = scalar_lea.hbm %s61_s0, 5120 }
   0x3   :  { %p12_p1 = scmp.lt.u32.totalorder %s11_s16, %s9_s11  ;;  %p13_p2 = scmp.lt.u32.totalorder %s9_s11, %s61_s0 }
   0x5   :  { %p14_p3 = por %p13_p2, %p12_p1 }
   0x7   :  { %p15_p4 = pnand %p14_p3, %p10_p0 }
   0x9   :  { %18 = shalt.err (!%p15_p4)  }
   0xa   :  { %s19_s1 = scalar_lea.vmem %s4_s8, 2560  ;;  %p24_p6 = scmp.lt.s32.totalorder %s4_s8, %s4_s8 }
   0xb   :  { %p20_p5 = scmp.ne.s32.totalorder %s4_s8, %s19_s1  ;;  %p25_p7 = scmp.lt.s32.totalorder %s19_s1, %s19_s1 }
   0xd   :  { %p26_p8 = por %p25_p7, %p24_p6 }
   0xf   :  { %p27_p9 = pnand %p26_p8, %p20_p5 }
  0x11   :  { %30 = shalt.err (!%p27_p9)  }
  0x12   :  { %6 = dma.hbm_to_vmem [thread:$0]  %s61_s0, 2560, %s4_s8, [#allocation0] }
  0x13   :  { %31 = dma.done.wait [#allocation0], 2560  }
  0x14   :  { %32 = vsyncadd [#allocation0], 4294964736 }
  0x15   :  { %8 = vsyncpa [#allocation0], 1 }

// kernel: custom-call.1
= control target key start
LH: loop header
LB: loop body
LE: loop exit
PB: predicated region body
PF: predicated region fallthrough
CT: control target
= control target key end

     0   :  { %s59_s0 = inlined_call_operand.hbm [shape: c64[8,2560], index: 0, kind: input, shape index: {}]   ;;  %s60_s1 = inlined_call_operand.vmem [shape: f32[8,2560], index: 1, kind: output, shape index: {}]  }
   0x1   :  { %s2_s8 = scalar_lea.hbm %s59_s0, 2560 }
   0x2   :  { %3 = vsyncpa [#allocation0], 0  ;;  %s4_s11 = sshll.u32 %s60_s1, 4  ;;  %s34_s14 = scalar_lea.hbm %s59_s0, 5120  ;;  %s5_s11 = int_to_ptr.vmem [resolvable:$true] %s4_s11 }
   0x3   :  { %p11_p0 = scmp.ne.s32.totalorder %s2_s8, %s34_s14  ;;  %p13_p1 = scmp.lt.u32.totalorder %s2_s8, %s59_s0 }
   0x4   :  { %p14_p2 = scmp.lt.u32.totalorder %s34_s14, %s34_s14  ;;  %p16_p4 = scmp.lt.u32.totalorder %s34_s14, %s2_s8 }
   0x6   :  { %p15_p3 = por %p14_p2, %p13_p1 }
   0x8   :  { %p17_p5 = por %p16_p4, %p15_p3 }
   0xa   :  { %p18_p6 = pnand %p17_p5, %p11_p0 }
   0xc   :  { %21 = shalt.err (!%p18_p6)  }
   0xd   :  { %s22_s17 = scalar_lea.vmem %s5_s11, 2560  ;;  %p27_p8 = scmp.lt.s32.totalorder %s5_s11, %s5_s11 }
   0xe   :  { %p23_p7 = scmp.ne.s32.totalorder %s5_s11, %s22_s17  ;;  %p28_p9 = scmp.lt.s32.totalorder %s22_s17, %s22_s17 }
  0x10   :  { %p29_p10 = por %p28_p9, %p27_p8 }
  0x12   :  { %p30_p11 = pnand %p29_p10, %p23_p7 }
  0x14   :  { %33 = shalt.err (!%p30_p11)  }
  0x15   :  { %7 = dma.hbm_to_vmem [thread:$0]  %s2_s8, 2560, %s5_s11, [#allocation0] }
  0x16   :  { %35 = dma.done.wait [#allocation0], 2560  }
  0x17   :  { %36 = vsyncadd [#allocation0], 4294964736 }
  0x18   :  { %9 = vsyncpa [#allocation0], 1 }

// kernel: forward.1
= control target key start
LH: loop header
LB: loop body
LE: loop exit
PB: predicated region body
PF: predicated region fallthrough
CT: control target
= control target key end

     0   :  { %s20336_s0 = inlined_call_operand.vmem [shape: bf16[2,76,512], index: 0, kind: input, shape index: {}]   ;;  %s20337_s1 = inlined_call_operand.vmem [shape: bf16[512,2048], index: 1, kind: input, shape index: {}]   ;;  %s20338_s2 = inlined_call_operand.vmem [shape: f32[1,2048], index: 2, kind: input, shape index: {}]   ;;  %s20339_s3 = inlined_call_operand.vmem [shape: bf16[2048,128], index: 3, kind: input, shape index: {}]   ;;  %s20340_s4 = inlined_call_operand.vmem [shape: f32[1,128], index: 4, kind: input, shape index: {}]   ;;  %s20341_s5 = inlined_call_operand.vmem [shape: bf16[2432,32], index: 5, kind: input, shape index: {}]   ;;  %s20342_s6 = inlined_call_operand.vmem [shape: f32[1,32], index: 6, kind: input, shape index: {}]   ;;  %s20343_s7 = inlined_call_operand.vmem [shape: f32[32,8], index: 7, kind: input, shape index: {}]   ;;  %s20344_s8 = inlined_call_operand.vmem [shape: f32[1,8], index: 8, kind: input, shape index: {}]   ;;  %s20345_s9 = inlined_call_operand.vmem [shape: f32[8,32], index: 9, kind: input, shape index: {}]   ;;  %s20346_s10 = inlined_call_operand.vmem [shape: f32[1,32], index: 10, kind: input, shape index: {}]   ;;  %s20347_s11 = inlined_call_operand.vmem [shape: bf16[2432,256], index: 11, kind: input, shape index: {}]   ;;  %s20348_s12 = inlined_call_operand.vmem [shape: f32[1,256], index: 12, kind: input, shape index: {}]   ;;  %s20349_s13 = inlined_call_operand.vmem [shape: f32[256,64], index: 13, kind: input, shape index: {}]   ;;  %s20350_s14 = inlined_call_operand.vmem [shape: f32[1,64], index: 14, kind: input, shape index: {}]   ;;  %s20351_s15 = inlined_call_operand.vmem [shape: f32[64,2], index: 15, kind: input, shape index: {}]   ;;  %s20352_s16 = inlined_call_operand.vmem [shape: f32[1,2], index: 16, kind: input, shape index: {}]   ;;  %s20353_s17 = inlined_call_operand.vmem [shape: f32[8], index: 17, kind: input, shape index: {}]   ;;  %s20354_s18 = inlined_call_operand.vmem [shape: f32[2,4,2], index: 18, kind: output, shape index: {}]  }
   0x1   :  { %20390 = sst [smem:[#allocation52_spill]] %s20336_s0 }
   0x2   :  { %20391 = sst [smem:[#allocation53_spill]] %s20337_s1 }
   0x3   :  { %20392 = sst [smem:[#allocation54_spill]] %s20338_s2 }
   0x4   :  { %20393 = sst [smem:[#allocation55_spill]] %s20353_s17 }
   0x5   :  { %23 = vsyncpa [#allocation3], 0  ;;  %s15180_s27 = smov 0  }
   0x6 LB: > { %s15186_s28 = sadd.s32 4294967295, %s15075_s27   ;;  %p11943_p0 = scmp.ge.s32.totalorder %s15075_s27, 1  ;;  %s15075_s27 = sphi %s15180_s27, %s29_s27  }
   0x7   : > { %p443_p1 = scmp.lt.s32.totalorder %s15075_s27, 3  ;;  %s20394_s17 = sld [smem:[#allocation55_spill]] }
   0x8   : > { %p14180_p3 = scmp.eq.s32.totalorder %s15186_s28, 0 }
   0x9   : > { %p15193_p2 = pnand %p11943_p0, %p443_p1 }
   0xb   : > { %p14176_p4 = pneg %p15193_p2 }
   0xd   : > { %s504_s0 = sshll.u32 %s20394_s17, 4  ;;  %p14177_p5 = pnand %p14180_p3, %p14176_p4  ;;  %s505_s0 = int_to_ptr.vmem [resolvable:$true] %s504_s0 }
   0xe   : > { %s15050_s1 = scalar_lea.vmem %s505_s0, 16  ;;  %p15058_p10 = scmp.lt.s32.totalorder %s505_s0, %s505_s0 }
   0xf   : > { %p15051_p6 = scmp.ne.s32.totalorder %s505_s0, %s15050_s1  ;;  %p15052_p7 = pneg %p14177_p5 }
  0x10   : > { %p15059_p11 = scmp.lt.s32.totalorder %s15050_s1, %s15050_s1 }
  0x11   : > { %p15053_p8 = pnand %p15052_p7, %p15051_p6 }
  0x12   : > { %p15060_p12 = por %p15059_p11, %p15058_p10 }
  0x13   : > { %p15054_p9 = pneg %p15053_p8 }
  0x15   : > { %p15061_p13 = pnand %p15060_p12, %p15054_p9 }
  0x17   : > { %15064 = shalt.err (!%p15061_p13)
}
  0x18   : > { %s15077_s20 = smov [#allocation2]   ;;  %525 = sbr.rel (%p15193_p2) target bundleno = 3446 (0xd76), region = 92 }
  0x19   : > { %14179 = dma.vmem_to_smem (!%p14177_p5), %s505_s0, 16, %s15077_s20, [#allocation3]  }
  0x1f   : > { %15070 = dma.done.wait (%p14180_p3), [#allocation3], 16  }
  0x20   : > { %15072 = vsyncadd (%p14180_p3), [#allocation3], 4294967280 }
  0x21   : > { %531 = sfence }
  0x22   : > { %s20396_s2 = sld [smem:[#allocation53_spill]]  ;;  %p579_p0 = scmp.lt.s32.totalorder %s15186_s28, 1 }
  0x23   : > { %s20397_s29 = sld [smem:[#allocation52_spill]]  ;;  %s20398_s24 = sld [smem:[#allocation54_spill]] }
  0x24   : > { %s20520_s28 = smov (!%p579_p0, %s15186_s28), 1  ;;  %s11951_s22 = sld [smem:[#allocation2 + $0x2]] }
  0x25   : > { %s14171_s25 = smul.u32 160, %s20520_s28  ;;  %s15081_s21 = smov 96  }
  0x26   : > { %s15083_s23 = smov 64   ;;  %s11952_s1 = sld [smem:[#allocation2 + $0x3]] }
  0x27   : > { %s11949_s0 = sshll.u32 %s20520_s28, 2 }
  0x28   : > { %v614_v0 = vld [vmem:[%s20396_s2] sm:$0xff] }
  0x29   : > { %v622_v1 = vld [vmem:[%s20396_s2 + $0x40] sm:$0xff]  ;;  %s15255_s17 = scalar_lea.vmem %s20397_s29, %s14171_s25  ;;  %s589_s25 = sld [smem:[#allocation2]] }
  0x2a   : > { %v630_v2 = vld [vmem:[%s20396_s2 + $0x80] sm:$0xff]  ;;  %v11975_v3 = vcombine.high %v614_v0, %v622_v1  ;;  %v11974_v4 = vcombine.low %v614_v0, %v622_v1  ;;  %s11950_s29 = sld [smem:[#allocation2 + $0x1]] }
  0x2b   : > { %v638_v5 = vld [vmem:[%s20396_s2 + $0xc0] sm:$0xff] }
  0x2c   : > { %v11991_v6 = vcombine.high %v630_v2, %v638_v5  ;;  %v646_v7 = vld [vmem:[%s20396_s2 + $0x100] sm:$0xff]  ;;  %3870 = vmatprep.subr.bf16.mxu1 %v11975_v3  ;;  %v11990_v9 = vcombine.low %v630_v2, %v638_v5 }
  0x2d   : > { %v654_v8 = vld [vmem:[%s20396_s2 + $0x140] sm:$0xff]  ;;  %3871 = vmatpush1.bf16.msra.mxu1 %v11974_v4 }
  0x2e   : > { %3872 = vmatprep.subr.bf16.mxu1 %v11991_v6  ;;  %v12007_v10 = vcombine.high %v646_v7, %v654_v8  ;;  %v662_v11 = vld [vmem:[%s20396_s2 + $0x180] sm:$0xff]  ;;  %v12006_v13 = vcombine.low %v646_v7, %v654_v8 }
  0x2f   : > { %v670_v12 = vld [vmem:[%s20396_s2 + $0x1c0] sm:$0xff] }
  0x30   : > { %v12023_v14 = vcombine.high %v662_v11, %v670_v12  ;;  %v618_v15 = vld [vmem:[%s20396_s2 + $0x20] sm:$0xff]  ;;  %v12022_v23 = vcombine.low %v662_v11, %v670_v12 }
  0x31   : > { %3873 = vmatpush1.bf16.msra.mxu1 %v11990_v9  ;;  %v626_v16 = vld [vmem:[%s20396_s2 + $0x60] sm:$0xff] }
  0x32   : > { %3874 = vmatprep.subr.bf16.mxu1 %v12007_v10  ;;  %v678_v17 = vld [vmem:[%s20396_s2 + $0x200] sm:$0xff]  ;;  %v11983_v19 = vcombine.high %v618_v15, %v626_v16  ;;  %v11982_v20 = vcombine.low %v618_v15, %v626_v16 }
  0x33   : > { %v686_v18 = vld [vmem:[%s20396_s2 + $0x240] sm:$0xff] }
  0x34   : > { %v634_v21 = vld [vmem:[%s20396_s2 + $0xa0] sm:$0xff]  ;;  %4534 = vmatprep.subr.bf16.mxu0 %v11983_v19  ;;  %v12039_v27 = vcombine.high %v678_v17, %v686_v18  ;;  %v12038_v35 = vcombine.low %v678_v17, %v686_v18 }
  0x35   : > { %v642_v22 = vld [vmem:[%s20396_s2 + $0xe0] sm:$0xff]  ;;  %3875 = vmatpush1.bf16.msra.mxu1 %v12006_v13  ;;  %4535 = vmatpush1.bf16.msra.mxu0 %v11982_v20 }
  0x36   : > { %v11999_v24 = vcombine.high %v634_v21, %v642_v22  ;;  %v650_v25 = vld [vmem:[%s20396_s2 + $0x120] sm:$0xff]  ;;  %3876 = vmatprep.subr.bf16.mxu1 %v12023_v14  ;;  %v11998_v28 = vcombine.low %v634_v21, %v642_v22 }
  0x37   : > { %v658_v26 = vld [vmem:[%s20396_s2 + $0x160] sm:$0xff] }
  0x38   : > { %v14198_v29 = vld [vmem:[%s15255_s17 + $0x4] ss:$16 sps:$4 sm:$0xff]   ;;  %4536 = vmatprep.subr.bf16.mxu0 %v11999_v24  ;;  %v12015_v32 = vcombine.high %v650_v25, %v658_v26  ;;  %v12014_v37 = vcombine.low %v650_v25, %v658_v26 }
  0x39   : > { %v694_v30 = vld [vmem:[%s20396_s2 + $0x280] sm:$0xff]  ;;  %3902 = vmatprep.mubr.bf16.mxu1 %v14198_v29  ;;  %4566 = vmatprep.mubr.bf16.mxu0 %v14198_v29 }
  0x3a   : > { %v702_v31 = vld [vmem:[%s20396_s2 + $0x2c0] sm:$0xff]  ;;  %3877 = vmatpush1.bf16.msra.mxu1 %v12022_v23  ;;  %4537 = vmatpush1.bf16.msra.mxu0 %v11998_v28 }
  0x3b   : > { %v666_v33 = vld [vmem:[%s20396_s2 + $0x1a0] sm:$0xff]  ;;  %3878 = vmatprep.subr.bf16.mxu1 %v12039_v27  ;;  %v12055_v36 = vcombine.high %v694_v30, %v702_v31  ;;  %4538 = vmatprep.subr.bf16.mxu0 %v12015_v32  ;;  %v12054_v43 = vcombine.low %v694_v30, %v702_v31 }
  0x3c   : > { %v674_v34 = vld [vmem:[%s20396_s2 + $0x1e0] sm:$0xff] }
  0x3d   : > { %v710_v38 = vld [vmem:[%s20396_s2 + $0x300] sm:$0xff]  ;;  %v12031_v40 = vcombine.high %v666_v33, %v674_v34  ;;  %v12030_v45 = vcombine.low %v666_v33, %v674_v34 }
  0x3e   : > { %v718_v39 = vld [vmem:[%s20396_s2 + $0x340] sm:$0xff]  ;;  %3879 = vmatpush1.bf16.msra.mxu1 %v12038_v35  ;;  %4539 = vmatpush1.bf16.msra.mxu0 %v12014_v37 }
  0x3f   : > { %v682_v41 = vld [vmem:[%s20396_s2 + $0x220] sm:$0xff]  ;;  %3880 = vmatprep.subr.bf16.mxu1 %v12055_v36  ;;  %v12071_v44 = vcombine.high %v710_v38, %v718_v39  ;;  %4540 = vmatprep.subr.bf16.mxu0 %v12031_v40  ;;  %v12070_v51 = vcombine.low %v710_v38, %v718_v39 }
  0x40   : > { %v690_v42 = vld [vmem:[%s20396_s2 + $0x260] sm:$0xff] }
  0x41   : > { %v726_v46 = vld [vmem:[%s20396_s2 + $0x380] sm:$0xff]  ;;  %v12047_v48 = vcombine.high %v682_v41, %v690_v42  ;;  %v12046_v53 = vcombine.low %v682_v41, %v690_v42 }
  0x42   : > { %v734_v47 = vld [vmem:[%s20396_s2 + $0x3c0] sm:$0xff]  ;;  %3881 = vmatpush1.bf16.msra.mxu1 %v12054_v43  ;;  %4541 = vmatpush1.bf16.msra.mxu0 %v12030_v45 }
  0x43   : > { %v698_v49 = vld [vmem:[%s20396_s2 + $0x2a0] sm:$0xff]  ;;  %3882 = vmatprep.subr.bf16.mxu1 %v12071_v44  ;;  %v12087_v52 = vcombine.high %v726_v46, %v734_v47  ;;  %4542 = vmatprep.subr.bf16.mxu0 %v12047_v48  ;;  %v12086_v59 = vcombine.low %v726_v46, %v734_v47 }
  0x44   : > { %v706_v50 = vld [vmem:[%s20396_s2 + $0x2e0] sm:$0xff] }
  0x45   : > { %v742_v54 = vld [vmem:[%s20396_s2 + $0x400] sm:$0xff]  ;;  %v12063_v56 = vcombine.high %v698_v49, %v706_v50  ;;  %v12062_v61 = vcombine.low %v698_v49, %v706_v50 }
  0x46   : > { %v750_v55 = vld [vmem:[%s20396_s2 + $0x440] sm:$0xff]  ;;  %3883 = vmatpush1.bf16.msra.mxu1 %v12070_v51  ;;  %4543 = vmatpush1.bf16.msra.mxu0 %v12046_v53 }
  0x47   : > { %v714_v57 = vld [vmem:[%s20396_s2 + $0x320] sm:$0xff]  ;;  %3884 = vmatprep.subr.bf16.mxu1 %v12087_v52  ;;  %v12103_v60 = vcombine.high %v742_v54, %v750_v55  ;;  %4544 = vmatprep.subr.bf16.mxu0 %v12063_v56  ;;  %v12102_v3 = vcombine.low %v742_v54, %v750_v55 }
  0x48   : > { %v722_v58 = vld [vmem:[%s20396_s2 + $0x360] sm:$0xff] }
  0x49   : > { %v758_v62 = vld [vmem:[%s20396_s2 + $0x480] sm:$0xff]  ;;  %v12079_v0 = vcombine.high %v714_v57, %v722_v58  ;;  %v12078_v5 = vcombine.low %v714_v57, %v722_v58 }
  0x4a   : > { %v766_v63 = vld [vmem:[%s20396_s2 + $0x4c0] sm:$0xff]  ;;  %3885 = vmatpush1.bf16.msra.mxu1 %v12086_v59  ;;  %4545 = vmatpush1.bf16.msra.mxu0 %v12062_v61 }
  0x4b   : > { %v730_v1 = vld [vmem:[%s20396_s2 + $0x3a0] sm:$0xff]  ;;  %3886 = vmatprep.subr.bf16.mxu1 %v12103_v60  ;;  %v12119_v4 = vcombine.high %v758_v62, %v766_v63  ;;  %4546 = vmatprep.subr.bf16.mxu0 %v12079_v0  ;;  %v12118_v11 = vcombine.low %v758_v62, %v766_v63 }
  0x4c   : > { %v738_v2 = vld [vmem:[%s20396_s2 + $0x3e0] sm:$0xff] }
  0x4d   : > { %v774_v6 = vld [vmem:[%s20396_s2 + $0x500] sm:$0xff]  ;;  %v12095_v8 = vcombine.high %v730_v1, %v738_v2  ;;  %v12094_v13 = vcombine.low %v730_v1, %v738_v2 }
  0x4e   : > { %v782_v7 = vld [vmem:[%s20396_s2 + $0x540] sm:$0xff]  ;;  %3887 = vmatpush1.bf16.msra.mxu1 %v12102_v3  ;;  %4547 = vmatpush1.bf16.msra.mxu0 %v12078_v5 }
  0x4f   : > { %v746_v9 = vld [vmem:[%s20396_s2 + $0x420] sm:$0xff]  ;;  %3888 = vmatprep.subr.bf16.mxu1 %v12119_v4  ;;  %v12135_v12 = vcombine.high %v774_v6, %v782_v7  ;;  %4548 = vmatprep.subr.bf16.mxu0 %v12095_v8  ;;  %v12134_v19 = vcombine.low %v774_v6, %v782_v7 }
  0x50   : > { %v754_v10 = vld [vmem:[%s20396_s2 + $0x460] sm:$0xff] }
  0x51   : > { %v790_v14 = vld [vmem:[%s20396_s2 + $0x580] sm:$0xff]  ;;  %v12111_v16 = vcombine.high %v746_v9, %v754_v10  ;;  %v12110_v21 = vcombine.low %v746_v9, %v754_v10 }
  0x52   : > { %v798_v15 = vld [vmem:[%s20396_s2 + $0x5c0] sm:$0xff]  ;;  %3889 = vmatpush1.bf16.msra.mxu1 %v12118_v11  ;;  %4549 = vmatpush1.bf16.msra.mxu0 %v12094_v13 }
  0x53   : > { %v762_v17 = vld [vmem:[%s20396_s2 + $0x4a0] sm:$0xff]  ;;  %3890 = vmatprep.subr.bf16.mxu1 %v12135_v12  ;;  %v12151_v20 = vcombine.high %v790_v14, %v798_v15  ;;  %4550 = vmatprep.subr.bf16.mxu0 %v12111_v16  ;;  %v12150_v27 = vcombine.low %v790_v14, %v798_v15 }
  0x54   : > { %v770_v18 = vld [vmem:[%s20396_s2 + $0x4e0] sm:$0xff] }
  0x55   : > { %v806_v22 = vld [vmem:[%s20396_s2 + $0x600] sm:$0xff]  ;;  %v12127_v24 = vcombine.high %v762_v17, %v770_v18  ;;  %v12126_v29 = vcombine.low %v762_v17, %v770_v18 }
  0x56   : > { %v814_v23 = vld [vmem:[%s20396_s2 + $0x640] sm:$0xff]  ;;  %3891 = vmatpush1.bf16.msra.mxu1 %v12134_v19  ;;  %4551 = vmatpush1.bf16.msra.mxu0 %v12110_v21 }
  0x57   : > { %v778_v25 = vld [vmem:[%s20396_s2 + $0x520] sm:$0xff]  ;;  %3892 = vmatprep.subr.bf16.mxu1 %v12151_v20  ;;  %v12167_v28 = vcombine.high %v806_v22, %v814_v23  ;;  %4552 = vmatprep.subr.bf16.mxu0 %v12127_v24  ;;  %v12166_v35 = vcombine.low %v806_v22, %v814_v23 }
  0x58   : > { %v786_v26 = vld [vmem:[%s20396_s2 + $0x560] sm:$0xff] }
  0x59   : > { %v822_v30 = vld [vmem:[%s20396_s2 + $0x680] sm:$0xff]  ;;  %v12143_v32 = vcombine.high %v778_v25, %v786_v26  ;;  %v12142_v37 = vcombine.low %v778_v25, %v786_v26 }
  0x5a   : > { %v830_v31 = vld [vmem:[%s20396_s2 + $0x6c0] sm:$0xff]  ;;  %3893 = vmatpush1.bf16.msra.mxu1 %v12150_v27  ;;  %4553 = vmatpush1.bf16.msra.mxu0 %v12126_v29 }
  0x5b   : > { %v794_v33 = vld [vmem:[%s20396_s2 + $0x5a0] sm:$0xff]  ;;  %3894 = vmatprep.subr.bf16.mxu1 %v12167_v28  ;;  %v12183_v36 = vcombine.high %v822_v30, %v830_v31  ;;  %4554 = vmatprep.subr.bf16.mxu0 %v12143_v32  ;;  %v12182_v43 = vcombine.low %v822_v30, %v830_v31 }
  0x5c   : > { %v802_v34 = vld [vmem:[%s20396_s2 + $0x5e0] sm:$0xff] }
  0x5d   : > { %v838_v38 = vld [vmem:[%s20396_s2 + $0x700] sm:$0xff]  ;;  %v12159_v40 = vcombine.high %v794_v33, %v802_v34  ;;  %v12158_v45 = vcombine.low %v794_v33, %v802_v34 }
  0x5e   : > { %v846_v39 = vld [vmem:[%s20396_s2 + $0x740] sm:$0xff]  ;;  %3895 = vmatpush1.bf16.msra.mxu1 %v12166_v35  ;;  %4555 = vmatpush1.bf16.msra.mxu0 %v12142_v37 }
  0x5f   : > { %v810_v41 = vld [vmem:[%s20396_s2 + $0x620] sm:$0xff]  ;;  %3896 = vmatprep.subr.bf16.mxu1 %v12183_v36  ;;  %v12199_v44 = vcombine.high %v838_v38, %v846_v39  ;;  %4556 = vmatprep.subr.bf16.mxu0 %v12159_v40  ;;  %v12198_v51 = vcombine.low %v838_v38, %v846_v39 }
  0x60   : > { %v818_v42 = vld [vmem:[%s20396_s2 + $0x660] sm:$0xff] }
  0x61   : > { %v854_v46 = vld [vmem:[%s20396_s2 + $0x780] sm:$0xff]  ;;  %v12175_v48 = vcombine.high %v810_v41, %v818_v42  ;;  %v12174_v53 = vcombine.low %v810_v41, %v818_v42 }
  0x62   : > { %v862_v47 = vld [vmem:[%s20396_s2 + $0x7c0] sm:$0xff]  ;;  %3897 = vmatpush1.bf16.msra.mxu1 %v12182_v43  ;;  %4557 = vmatpush1.bf16.msra.mxu0 %v12158_v45 }
  0x63   : > { %v826_v49 = vld [vmem:[%s20396_s2 + $0x6a0] sm:$0xff]  ;;  %3898 = vmatprep.subr.bf16.mxu1 %v12199_v44  ;;  %v12215_v52 = vcombine.high %v854_v46, %v862_v47  ;;  %4558 = vmatprep.subr.bf16.mxu0 %v12175_v48  ;;  %v12214_v59 = vcombine.low %v854_v46, %v862_v47 }
  0x64   : > { %v834_v50 = vld [vmem:[%s20396_s2 + $0x6e0] sm:$0xff] }
  0x65   : > { %v870_v54 = vld [vmem:[%s20396_s2 + $0x800] sm:$0xff]  ;;  %v12191_v56 = vcombine.high %v826_v49, %v834_v50  ;;  %v12190_v61 = vcombine.low %v826_v49, %v834_v50 }
  0x66   : > { %v878_v55 = vld [vmem:[%s20396_s2 + $0x840] sm:$0xff]  ;;  %3899 = vmatpush1.bf16.msra.mxu1 %v12198_v51  ;;  %4559 = vmatpush1.bf16.msra.mxu0 %v12174_v53 }
  0x67   : > { %v842_v57 = vld [vmem:[%s20396_s2 + $0x720] sm:$0xff]  ;;  %3900 = vmatprep.subr.bf16.mxu1 %v12215_v52  ;;  %v12231_v60 = vcombine.high %v870_v54, %v878_v55  ;;  %4560 = vmatprep.subr.bf16.mxu0 %v12191_v56  ;;  %v12230_v4 = vcombine.low %v870_v54, %v878_v55 }
  0x68   : > { %v850_v58 = vld [vmem:[%s20396_s2 + $0x760] sm:$0xff] }
  0x69   : > { %v886_v62 = vld [vmem:[%s20396_s2 + $0x880] sm:$0xff]  ;;  %v12207_v0 = vcombine.high %v842_v57, %v850_v58  ;;  %v12206_v7 = vcombine.low %v842_v57, %v850_v58 }
  0x6a   : > { %v894_v63 = vld [vmem:[%s20396_s2 + $0x8c0] sm:$0xff]  ;;  %3901 = vmatpush1.bf16.msra.mxu1 %v12214_v59  ;;  %4561 = vmatpush1.bf16.msra.mxu0 %v12190_v61 }
  0x6b   : > { %v14200_v1 = vld [vmem:[%s15255_s17] ss:$16 sps:$4 sm:$0xff]   ;;  %v14201_v5 = vld [vmem:[%s15255_s17 + $0x24] ss:$16 sps:$4 sm:$0xff]   ;;  %3953 = vmatprep.subr.bf16.mxu1 %v12231_v60  ;;  %v12247_v6 = vcombine.high %v886_v62, %v894_v63  ;;  %4562 = vmatprep.subr.bf16.mxu0 %v12207_v0  ;;  %v12246_v13 = vcombine.low %v886_v62, %v894_v63 }
  0x6c   : > { %v858_v2 = vld [vmem:[%s20396_s2 + $0x7a0] sm:$0xff] }
  0x6d   : > { %v866_v3 = vld [vmem:[%s20396_s2 + $0x7e0] sm:$0xff]  ;;  %3903 = vmatmul.mubr.bf16.vlgmr.msra.gmra.mrb[0].mxu1 %v14200_v1 }
  0x6e   : > { %v902_v8 = vld [vmem:[%s20396_s2 + $0x900] sm:$0xff]  ;;  %v12223_v10 = vcombine.high %v858_v2, %v866_v3  ;;  %3954 = vmatpush1.bf16.msra.mxu1 %v12230_v4  ;;  %3912 = vmatprep.mubr.bf16.mxu1 %v14201_v5  ;;  %v12222_v15 = vcombine.low %v858_v2, %v866_v3 }
  0x6f   : > { %v910_v9 = vld [vmem:[%s20396_s2 + $0x940] sm:$0xff]  ;;  %3955 = vmatprep.subr.bf16.mxu1 %v12247_v6  ;;  %4563 = vmatpush1.bf16.msra.mxu0 %v12206_v7 }
  0x70   : > { %v874_v11 = vld [vmem:[%s20396_s2 + $0x820] sm:$0xff]  ;;  %v12263_v14 = vcombine.high %v902_v8, %v910_v9  ;;  %4564 = vmatprep.subr.bf16.mxu0 %v12223_v10  ;;  %v12262_v21 = vcombine.low %v902_v8, %v910_v9  ;;  %v14213_v9 = vld [vmem:[%s15255_s17 + $0xc] ss:$16 sps:$4 sm:$0xff]  }
  0x71   : > { %v882_v12 = vld [vmem:[%s20396_s2 + $0x860] sm:$0xff] }
  0x72   : > { %v918_v16 = vld [vmem:[%s20396_s2 + $0x980] sm:$0xff]  ;;  %v12239_v18 = vcombine.high %v874_v11, %v882_v12  ;;  %3956 = vmatpush1.bf16.msra.mxu1 %v12246_v13  ;;  %v12238_v27 = vcombine.low %v874_v11, %v882_v12 }
  0x73   : > { %v926_v17 = vld [vmem:[%s20396_s2 + $0x9c0] sm:$0xff]  ;;  %3957 = vmatprep.subr.bf16.mxu1 %v12263_v14  ;;  %4565 = vmatpush1.bf16.msra.mxu0 %v12222_v15 }
  0x74   : > { %v14203_v19 = vld [vmem:[%s15255_s17 + $0x20] ss:$16 sps:$4 sm:$0xff]   ;;  %v14204_v20 = vld [vmem:[%s15255_s17 + $0x44] ss:$16 sps:$4 sm:$0xff]   ;;  %v12279_v26 = vcombine.high %v918_v16, %v926_v17  ;;  %4617 = vmatprep.subr.bf16.mxu0 %v12239_v18  ;;  %v12278_v29 = vcombine.low %v918_v16, %v926_v17 }
  0x75   : > { %v934_v22 = vld [vmem:[%s20396_s2 + $0xa00] sm:$0xff]  ;;  %3913 = vmatmul.mubr.bf16.gmra.mrb[4].mxu1 %v14203_v19 }
  0x76   : > { %v942_v23 = vld [vmem:[%s20396_s2 + $0xa40] sm:$0xff]  ;;  %3958 = vmatpush1.bf16.msra.mxu1 %v12262_v21  ;;  %3922 = vmatprep.mubr.bf16.mxu1 %v14204_v20 }
  0x77   : > { %v890_v24 = vld [vmem:[%s20396_s2 + $0x8a0] sm:$0xff]  ;;  %3959 = vmatprep.subr.bf16.mxu1 %v12279_v26  ;;  %v12295_v34 = vcombine.high %v934_v22, %v942_v23  ;;  %4567 = vmatmul.mubr.bf16.vlgmr.msra.gmra.mrb[0].mxu0 %v14200_v1  ;;  %v12294_v39 = vcombine.low %v934_v22, %v942_v23 }
  0x78   : > { %v898_v25 = vld [vmem:[%s20396_s2 + $0x8e0] sm:$0xff]  ;;  %4618 = vmatpush1.bf16.msra.mxu0 %v12238_v27  ;;  %4576 = vmatprep.mubr.bf16.mxu0 %v14201_v5 }
  0x79   : > { %v12255_v28 = vcombine.high %v890_v24, %v898_v25  ;;  %v950_v30 = vld [vmem:[%s20396_s2 + $0xa80] sm:$0xff]  ;;  %v12254_v35 = vcombine.low %v890_v24, %v898_v25 }
  0x7a   : > { %v958_v31 = vld [vmem:[%s20396_s2 + $0xac0] sm:$0xff]  ;;  %3960 = vmatpush1.bf16.msra.mxu1 %v12278_v29 }
  0x7b   : > { %v906_v32 = vld [vmem:[%s20396_s2 + $0x920] sm:$0xff]  ;;  %4619 = vmatprep.subr.bf16.mxu0 %v12255_v28  ;;  %3961 = vmatprep.subr.bf16.mxu1 %v12295_v34  ;;  %v12311_v44 = vcombine.high %v950_v30, %v958_v31  ;;  %v12310_v47 = vcombine.low %v950_v30, %v958_v31 }
  0x7c   : > { %v914_v33 = vld [vmem:[%s20396_s2 + $0x960] sm:$0xff]  ;;  %4620 = vmatpush1.bf16.msra.mxu0 %v12254_v35 }
  0x7d   : > { %v14206_v36 = vld [vmem:[%s15255_s17 + $0x40] ss:$16 sps:$4 sm:$0xff]   ;;  %v14207_v37 = vld [vmem:[%s15255_s17 + $0x64] ss:$16 sps:$4 sm:$0xff]   ;;  %v12271_v38 = vcombine.high %v906_v32, %v914_v33  ;;  %v12270_v45 = vcombine.low %v906_v32, %v914_v33 }
  0x7e   : > { %v966_v40 = vld [vmem:[%s20396_s2 + $0xb00] sm:$0xff]  ;;  %3923 = vmatmul.mubr.bf16.gmra.mrb[8].mxu1 %v14206_v36 }
  0x7f   : > { %v974_v41 = vld [vmem:[%s20396_s2 + $0xb40] sm:$0xff]  ;;  %4621 = vmatprep.subr.bf16.mxu0 %v12271_v38  ;;  %3962 = vmatpush1.bf16.msra.mxu1 %v12294_v39 }
  0x80   : > { %v922_v42 = vld [vmem:[%s20396_s2 + $0x9a0] sm:$0xff]  ;;  %3932 = vmatprep.mubr.bf16.mxu1 %v14207_v37  ;;  %3963 = vmatprep.subr.bf16.mxu1 %v12311_v44  ;;  %v12327_v52 = vcombine.high %v966_v40, %v974_v41  ;;  %v12326_v57 = vcombine.low %v966_v40, %v974_v41 }
  0x81   : > { %v930_v43 = vld [vmem:[%s20396_s2 + $0x9e0] sm:$0xff]  ;;  %4577 = vmatmul.mubr.bf16.gmra.mrb[4].mxu0 %v14203_v19 }
  0x82   : > { %v12287_v46 = vcombine.high %v922_v42, %v930_v43  ;;  %v982_v48 = vld [vmem:[%s20396_s2 + $0xb80] sm:$0xff]  ;;  %4622 = vmatpush1.bf16.msra.mxu0 %v12270_v45  ;;  %v12286_v54 = vcombine.low %v922_v42, %v930_v43  ;;  %4586 = vmatprep.mubr.bf16.mxu0 %v14204_v20 }
  0x83   : > { %v990_v49 = vld [vmem:[%s20396_s2 + $0xbc0] sm:$0xff]  ;;  %3964 = vmatpush1.bf16.msra.mxu1 %v12310_v47 }
  0x84   : > { %v938_v50 = vld [vmem:[%s20396_s2 + $0xa20] sm:$0xff]  ;;  %4623 = vmatprep.subr.bf16.mxu0 %v12287_v46  ;;  %3965 = vmatprep.subr.bf16.mxu1 %v12327_v52  ;;  %v12343_v62 = vcombine.high %v982_v48, %v990_v49  ;;  %v12342_v1 = vcombine.low %v982_v48, %v990_v49 }
  0x85   : > { %v946_v51 = vld [vmem:[%s20396_s2 + $0xa60] sm:$0xff] }
  0x86   : > { %v14209_v53 = vld [vmem:[%s15255_s17 + $0x60] ss:$16 sps:$4 sm:$0xff]   ;;  %v14210_v55 = vld [vmem:[%s15255_s17 + $0x84] ss:$16 sps:$4 sm:$0x3f]   ;;  %v12303_v56 = vcombine.high %v938_v50, %v946_v51  ;;  %4624 = vmatpush1.bf16.msra.mxu0 %v12286_v54  ;;  %v12302_v63 = vcombine.low %v938_v50, %v946_v51 }
  0x87   : > { %v998_v58 = vld [vmem:[%s20396_s2 + $0xc00] sm:$0xff]  ;;  %3933 = vmatmul.mubr.bf16.gmra.mrb[12].mxu1 %v14209_v53 }
  0x88   : > { %v1006_v59 = vld [vmem:[%s20396_s2 + $0xc40] sm:$0xff]  ;;  %4625 = vmatprep.subr.bf16.mxu0 %v12303_v56  ;;  %3966 = vmatpush1.bf16.msra.mxu1 %v12326_v57 }
  0x89   : > { %v954_v60 = vld [vmem:[%s20396_s2 + $0xaa0] sm:$0xff]  ;;  %3942 = vmatprep.mubr.bf16.mxu1 %v14210_v55  ;;  %3967 = vmatprep.subr.bf16.mxu1 %v12343_v62  ;;  %v12359_v6 = vcombine.high %v998_v58, %v1006_v59  ;;  %v12358_v11 = vcombine.low %v998_v58, %v1006_v59 }
  0x8a   : > { %v962_v61 = vld [vmem:[%s20396_s2 + $0xae0] sm:$0xff]  ;;  %4587 = vmatmul.mubr.bf16.gmra.mrb[8].mxu0 %v14206_v36 }
  0x8b   : > { %v12319_v0 = vcombine.high %v954_v60, %v962_v61  ;;  %v1014_v2 = vld [vmem:[%s20396_s2 + $0xc80] sm:$0xff]  ;;  %4626 = vmatpush1.bf16.msra.mxu0 %v12302_v63  ;;  %v12318_v8 = vcombine.low %v954_v60, %v962_v61  ;;  %4596 = vmatprep.mubr.bf16.mxu0 %v14207_v37  ;;  %v615_v60 = vld [vmem:[%s20396_s2 + $0x8] sm:$0xff] }
  0x8c   : > { %v1022_v3 = vld [vmem:[%s20396_s2 + $0xcc0] sm:$0xff]  ;;  %3968 = vmatpush1.bf16.msra.mxu1 %v12342_v1  ;;  %v623_v61 = vld [vmem:[%s20396_s2 + $0x48] sm:$0xff] }
  0x8d   : > { %v970_v4 = vld [vmem:[%s20396_s2 + $0xb20] sm:$0xff]  ;;  %4627 = vmatprep.subr.bf16.mxu0 %v12319_v0  ;;  %3969 = vmatprep.subr.bf16.mxu1 %v12359_v6  ;;  %v12375_v16 = vcombine.high %v1014_v2, %v1022_v3  ;;  %v12374_v19 = vcombine.low %v1014_v2, %v1022_v3 }
  0x8e   : > { %v978_v5 = vld [vmem:[%s20396_s2 + $0xb60] sm:$0xff] }
  0x8f   : > { %v14212_v7 = vld [vmem:[%s15255_s17 + $0x80] ss:$16 sps:$4 sm:$0x3f]   ;;  %v12335_v10 = vcombine.high %v970_v4, %v978_v5  ;;  %4628 = vmatpush1.bf16.msra.mxu0 %v12318_v8  ;;  %v12334_v17 = vcombine.low %v970_v4, %v978_v5  ;;  %v631_v4 = vld [vmem:[%s20396_s2 + $0x88] sm:$0xff]  ;;  %v11977_v8 = vcombine.high %v615_v60, %v623_v61 }
  0x90   : > { %v1030_v12 = vld [vmem:[%s20396_s2 + $0xd00] sm:$0xff]  ;;  %3943 = vmatmul.mubr.bf16.gmra.mrb[16].mxu1 %v14212_v7  ;;  %v639_v5 = vld [vmem:[%s20396_s2 + $0xc8] sm:$0xff] }
  0x91   : > { %v1038_v13 = vld [vmem:[%s20396_s2 + $0xd40] sm:$0xff]  ;;  %4629 = vmatprep.subr.bf16.mxu0 %v12335_v10  ;;  %3970 = vmatpush1.bf16.msra.mxu1 %v12358_v11  ;;  %v14215_v10 = vld [vmem:[%s15255_s17 + $0x8] ss:$16 sps:$4 sm:$0xff]   ;;  %v14216_v11 = vld [vmem:[%s15255_s17 + $0x2c] ss:$16 sps:$4 sm:$0xff]  }
  0x92   : > { %v986_v14 = vld [vmem:[%s20396_s2 + $0xba0] sm:$0xff]  ;;  %3985 = vmatprep.mubr.bf16.mxu1 %v14213_v9  ;;  %3971 = vmatprep.subr.bf16.mxu1 %v12375_v16  ;;  %v12391_v24 = vcombine.high %v1030_v12, %v1038_v13  ;;  %v12390_v27 = vcombine.low %v1030_v12, %v1038_v13  ;;  %v11976_v13 = vcombine.low %v615_v60, %v623_v61  ;;  %v684_v60 = vld [vmem:[%s20396_s2 + $0x230] sm:$0xff] }
  0x93   : > { %v994_v15 = vld [vmem:[%s20396_s2 + $0xbe0] sm:$0xff]  ;;  %4597 = vmatmul.mubr.bf16.gmra.mrb[12].mxu0 %v14209_v53  ;;  %v692_v61 = vld [vmem:[%s20396_s2 + $0x270] sm:$0xff] }
  0x94   : > { %v12351_v18 = vcombine.high %v986_v14, %v994_v15  ;;  %v1046_v20 = vld [vmem:[%s20396_s2 + $0xd80] sm:$0xff]  ;;  %4630 = vmatpush1.bf16.msra.mxu0 %v12334_v17  ;;  %v12350_v25 = vcombine.low %v986_v14, %v994_v15  ;;  %4606 = vmatprep.mubr.bf16.mxu0 %v14210_v55  ;;  %v647_v14 = vld [vmem:[%s20396_s2 + $0x108] sm:$0xff] }
  0x95   : > { %v1054_v21 = vld [vmem:[%s20396_s2 + $0xdc0] sm:$0xff]  ;;  %3972 = vmatpush1.bf16.msra.mxu1 %v12374_v19  ;;  %v655_v15 = vld [vmem:[%s20396_s2 + $0x148] sm:$0xff] }
  0x96   : > { %v1002_v22 = vld [vmem:[%s20396_s2 + $0xc20] sm:$0xff]  ;;  %4631 = vmatprep.subr.bf16.mxu0 %v12351_v18  ;;  %3973 = vmatprep.subr.bf16.mxu1 %v12391_v24  ;;  %v12407_v32 = vcombine.high %v1046_v20, %v1054_v21  ;;  %v12406_v35 = vcombine.low %v1046_v20, %v1054_v21  ;;  %v11993_v18 = vcombine.high %v631_v4, %v639_v5  ;;  %v620_v24 = vld [vmem:[%s20396_s2 + $0x30] sm:$0xff] }
  0x97   : > { %v1010_v23 = vld [vmem:[%s20396_s2 + $0xc60] sm:$0xff]  ;;  %v11992_v21 = vcombine.low %v631_v4, %v639_v5  ;;  %v743_v4 = vld [vmem:[%s20396_s2 + $0x408] sm:$0xff] }
  0x98   : > { %v12367_v26 = vcombine.high %v1002_v22, %v1010_v23  ;;  %v1062_v28 = vld [vmem:[%s20396_s2 + $0xe00] sm:$0xff]  ;;  %4632 = vmatpush1.bf16.msra.mxu0 %v12350_v25  ;;  %v12366_v33 = vcombine.low %v1002_v22, %v1010_v23  ;;  %v663_v22 = vld [vmem:[%s20396_s2 + $0x188] sm:$0xff]  ;;  %v628_v25 = vld [vmem:[%s20396_s2 + $0x70] sm:$0xff] }
  0x99   : > { %v1070_v29 = vld [vmem:[%s20396_s2 + $0xe40] sm:$0xff]  ;;  %3974 = vmatpush1.bf16.msra.mxu1 %v12390_v27  ;;  %v671_v23 = vld [vmem:[%s20396_s2 + $0x1c8] sm:$0xff] }
  0x9a   : > { %v1018_v30 = vld [vmem:[%s20396_s2 + $0xca0] sm:$0xff]  ;;  %4633 = vmatprep.subr.bf16.mxu0 %v12367_v26  ;;  %3975 = vmatprep.subr.bf16.mxu1 %v12407_v32  ;;  %v12423_v40 = vcombine.high %v1062_v28, %v1070_v29  ;;  %v12422_v43 = vcombine.low %v1062_v28, %v1070_v29  ;;  %v12009_v26 = vcombine.high %v647_v14, %v655_v15  ;;  %v14218_v28 = vld [vmem:[%s15255_s17 + $0x28] ss:$16 sps:$4 sm:$0xff]   ;;  %v14219_v29 = vld [vmem:[%s15255_s17 + $0x4c] ss:$16 sps:$4 sm:$0xff]  }
  0x9b   : > { %v1026_v31 = vld [vmem:[%s20396_s2 + $0xce0] sm:$0xff]  ;;  %4607 = vmatmul.mubr.bf16.gmra.mrb[16].mxu0 %v14212_v7  ;;  %v679_v32 = vld [vmem:[%s20396_s2 + $0x208] sm:$0xff] }
  0x9c   : > { %v12383_v34 = vcombine.high %v1018_v30, %v1026_v31  ;;  %v1078_v36 = vld [vmem:[%s20396_s2 + $0xe80] sm:$0xff]  ;;  %4634 = vmatpush1.bf16.msra.mxu0 %v12366_v33  ;;  %v12382_v41 = vcombine.low %v1018_v30, %v1026_v31  ;;  %4649 = vmatprep.mubr.bf16.mxu0 %v14213_v9  ;;  %v11987_v30 = vcombine.high %v620_v24, %v628_v25  ;;  %v687_v33 = vld [vmem:[%s20396_s2 + $0x248] sm:$0xff] }
  0x9d   : > { %v1086_v37 = vld [vmem:[%s20396_s2 + $0xec0] sm:$0xff]  ;;  %3976 = vmatpush1.bf16.msra.mxu1 %v12406_v35  ;;  %v12008_v31 = vcombine.low %v647_v14, %v655_v15  ;;  %v644_v35 = vld [vmem:[%s20396_s2 + $0xf0] sm:$0xff]  ;;  %v751_v5 = vld [vmem:[%s20396_s2 + $0x448] sm:$0xff] }
  0x9e   : > { %v1034_v38 = vld [vmem:[%s20396_s2 + $0xd20] sm:$0xff]  ;;  %4635 = vmatprep.subr.bf16.mxu0 %v12383_v34  ;;  %3977 = vmatprep.subr.bf16.mxu1 %v12423_v40  ;;  %v12439_v48 = vcombine.high %v1078_v36, %v1086_v37  ;;  %v12438_v51 = vcombine.low %v1078_v36, %v1086_v37  ;;  %v636_v34 = vld [vmem:[%s20396_s2 + $0xb0] sm:$0xff]  ;;  %v12025_v36 = vcombine.high %v663_v22, %v671_v23  ;;  %v695_v40 = vld [vmem:[%s20396_s2 + $0x288] sm:$0xff] }
  0x9f   : > { %v1042_v39 = vld [vmem:[%s20396_s2 + $0xd60] sm:$0xff]  ;;  %v11986_v37 = vcombine.low %v620_v24, %v628_v25  ;;  %v716_v14 = vld [vmem:[%s20396_s2 + $0x330] sm:$0xff] }
  0xa0   : > { %v12399_v42 = vcombine.high %v1034_v38, %v1042_v39  ;;  %v1094_v44 = vld [vmem:[%s20396_s2 + $0xf00] sm:$0xff]  ;;  %4636 = vmatpush1.bf16.msra.mxu0 %v12382_v41  ;;  %v12398_v49 = vcombine.low %v1034_v38, %v1042_v39  ;;  %v12003_v38 = vcombine.high %v636_v34, %v644_v35  ;;  %v12024_v39 = vcombine.low %v663_v22, %v671_v23  ;;  %v703_v41 = vld [vmem:[%s20396_s2 + $0x2c8] sm:$0xff]  ;;  %v724_v15 = vld [vmem:[%s20396_s2 + $0x370] sm:$0xff] }
  0xa1   : > { %v1102_v45 = vld [vmem:[%s20396_s2 + $0xf40] sm:$0xff]  ;;  %3978 = vmatpush1.bf16.msra.mxu1 %v12422_v43  ;;  %v660_v43 = vld [vmem:[%s20396_s2 + $0x170] sm:$0xff]  ;;  %v783_v22 = vld [vmem:[%s20396_s2 + $0x548] sm:$0xff] }
  0xa2   : > { %v1050_v46 = vld [vmem:[%s20396_s2 + $0xda0] sm:$0xff]  ;;  %4637 = vmatprep.subr.bf16.mxu0 %v12399_v42  ;;  %3979 = vmatprep.subr.bf16.mxu1 %v12439_v48  ;;  %v12455_v56 = vcombine.high %v1094_v44, %v1102_v45  ;;  %v12454_v59 = vcombine.low %v1094_v44, %v1102_v45  ;;  %v652_v42 = vld [vmem:[%s20396_s2 + $0x130] sm:$0xff]  ;;  %v12041_v44 = vcombine.high %v679_v32, %v687_v33 }
  0xa3   : > { %v1058_v47 = vld [vmem:[%s20396_s2 + $0xde0] sm:$0xff]  ;;  %v12002_v45 = vcombine.low %v636_v34, %v644_v35  ;;  %v12019_v48 = vcombine.high %v652_v42, %v660_v43  ;;  %v732_v23 = vld [vmem:[%s20396_s2 + $0x3b0] sm:$0xff] }
  0xa4   : > { %v12415_v50 = vcombine.high %v1050_v46, %v1058_v47  ;;  %v1110_v52 = vld [vmem:[%s20396_s2 + $0xf80] sm:$0xff]  ;;  %4638 = vmatpush1.bf16.msra.mxu0 %v12398_v49  ;;  %v12414_v57 = vcombine.low %v1050_v46, %v1058_v47  ;;  %v14221_v46 = vld [vmem:[%s15255_s17 + $0x48] ss:$16 sps:$4 sm:$0xff]   ;;  %v14222_v47 = vld [vmem:[%s15255_s17 + $0x6c] ss:$16 sps:$4 sm:$0xff]   ;;  %v12040_v49 = vcombine.low %v679_v32, %v687_v33 }
  0xa5   : > { %v1118_v53 = vld [vmem:[%s20396_s2 + $0xfc0] sm:$0xff]  ;;  %3980 = vmatpush1.bf16.msra.mxu1 %v12438_v51  ;;  %v719_v51 = vld [vmem:[%s20396_s2 + $0x348] sm:$0xff]  ;;  %v740_v24 = vld [vmem:[%s20396_s2 + $0x3f0] sm:$0xff] }
  0xa6   : > { %v1066_v54 = vld [vmem:[%s20396_s2 + $0xe20] sm:$0xff]  ;;  %4639 = vmatprep.subr.bf16.mxu0 %v12415_v50  ;;  %3981 = vmatprep.subr.bf16.mxu1 %v12455_v56  ;;  %v12471_v0 = vcombine.high %v1110_v52, %v1118_v53  ;;  %v12470_v3 = vcombine.low %v1110_v52, %v1118_v53  ;;  %v711_v50 = vld [vmem:[%s20396_s2 + $0x308] sm:$0xff]  ;;  %v668_v52 = vld [vmem:[%s20396_s2 + $0x1b0] sm:$0xff]  ;;  %v12098_v35 = vcombine.low %v732_v23, %v740_v24 }
  0xa7   : > { %v1074_v55 = vld [vmem:[%s20396_s2 + $0xe60] sm:$0xff]  ;;  %v676_v53 = vld [vmem:[%s20396_s2 + $0x1f0] sm:$0xff] }
  0xa8   : > { %v12431_v58 = vcombine.high %v1066_v54, %v1074_v55  ;;  %v1082_v62 = vld [vmem:[%s20396_s2 + $0xea0] sm:$0xff]  ;;  %4640 = vmatpush1.bf16.msra.mxu0 %v12414_v57  ;;  %v12430_v1 = vcombine.low %v1066_v54, %v1074_v55  ;;  %v12057_v54 = vcombine.high %v695_v40, %v703_v41  ;;  %v12018_v55 = vcombine.low %v652_v42, %v660_v43  ;;  %v748_v32 = vld [vmem:[%s20396_s2 + $0x430] sm:$0xff] }
  0xa9   : > { %v1090_v63 = vld [vmem:[%s20396_s2 + $0xee0] sm:$0xff]  ;;  %3982 = vmatpush1.bf16.msra.mxu1 %v12454_v59  ;;  %v12035_v56 = vcombine.high %v668_v52, %v676_v53  ;;  %v12056_v57 = vcombine.low %v695_v40, %v703_v41  ;;  %v735_v59 = vld [vmem:[%s20396_s2 + $0x3c8] sm:$0xff]  ;;  %v756_v33 = vld [vmem:[%s20396_s2 + $0x470] sm:$0xff] }
  0xaa   : > { %4641 = vmatprep.subr.bf16.mxu0 %v12431_v58  ;;  %v12447_v2 = vcombine.high %v1082_v62, %v1090_v63  ;;  %v1098_v6 = vld [vmem:[%s20396_s2 + $0xf20] sm:$0xff]  ;;  %3983 = vmatprep.subr.bf16.mxu1 %v12471_v0  ;;  %v12446_v9 = vcombine.low %v1082_v62, %v1090_v63  ;;  %v727_v58 = vld [vmem:[%s20396_s2 + $0x388] sm:$0xff]  ;;  %v12073_v63 = vcombine.high %v711_v50, %v719_v51  ;;  %v764_v40 = vld [vmem:[%s20396_s2 + $0x4b0] sm:$0xff] }
  0xab   : > { %v1106_v7 = vld [vmem:[%s20396_s2 + $0xf60] sm:$0xff]  ;;  %v14224_v62 = vld [vmem:[%s15255_s17 + $0x68] ss:$16 sps:$4 sm:$0xff]   ;;  %v12034_v0 = vcombine.low %v668_v52, %v676_v53  ;;  %v772_v41 = vld [vmem:[%s20396_s2 + $0x4f0] sm:$0xff]  ;;  %v12114_v43 = vcombine.low %v748_v32, %v756_v33 }
  0xac   : > { %4642 = vmatpush1.bf16.msra.mxu0 %v12430_v1  ;;  %v12463_v12 = vcombine.high %v1098_v6, %v1106_v7  ;;  %v1114_v16 = vld [vmem:[%s20396_s2 + $0xfa0] sm:$0xff]  ;;  %v12462_v19 = vcombine.low %v1098_v6, %v1106_v7  ;;  %v14225_v1 = vld [vmem:[%s15255_s17 + $0x8c] ss:$16 sps:$4 sm:$0x3f]   ;;  %v700_v6 = vld [vmem:[%s20396_s2 + $0x2b0] sm:$0xff] }
  0xad   : > { %4643 = vmatprep.subr.bf16.mxu0 %v12447_v2  ;;  %3984 = vmatpush1.bf16.msra.mxu1 %v12470_v3  ;;  %v1122_v17 = vld [vmem:[%s20396_s2 + $0xfe0] sm:$0xff]  ;;  %v12051_v2 = vcombine.high %v684_v60, %v692_v61  ;;  %v12072_v3 = vcombine.low %v711_v50, %v719_v51  ;;  %v708_v7 = vld [vmem:[%s20396_s2 + $0x2f0] sm:$0xff]  ;;  %v12130_v51 = vcombine.low %v764_v40, %v772_v41 }
  0xae   : > { %4036 = vmatprep.subr.bf16.mxu1 %v11977_v8  ;;  %v12479_v20 = vcombine.high %v1114_v16, %v1122_v17  ;;  %v12478_v27 = vcombine.low %v1114_v16, %v1122_v17  ;;  %v12089_v8 = vcombine.high %v727_v58, %v735_v59  ;;  %v12105_v16 = vcombine.high %v743_v4, %v751_v5 }
  0xaf   : > { %v12066_v17 = vcombine.low %v700_v6, %v708_v7 }
  0xb0   : > { %4644 = vmatpush1.bf16.msra.mxu0 %v12446_v9  ;;  %3986 = vmatmul.mubr.bf16.vlgmr.msra.gmra.mrb[0].mxu1 %v14215_v10  ;;  %v12050_v9 = vcombine.low %v684_v60, %v692_v61 }
  0xb1   : > { %4645 = vmatprep.subr.bf16.mxu0 %v12463_v12  ;;  %4037 = vmatpush1.bf16.msra.mxu1 %v11976_v13  ;;  %v759_v12 = vld [vmem:[%s20396_s2 + $0x488] sm:$0xff] }
  0xb2   : > { %3995 = vmatprep.mubr.bf16.mxu1 %v14216_v11  ;;  %4038 = vmatprep.subr.bf16.mxu1 %v11993_v18  ;;  %v767_v13 = vld [vmem:[%s20396_s2 + $0x4c8] sm:$0xff] }
  0xb3   : > { %v14227_v18 = vld [vmem:[%s15255_s17 + $0x88] ss:$16 sps:$4 sm:$0x3f]   ;;  %v12121_v25 = vcombine.high %v759_v12, %v767_v13 }
  0xb4   : > { %4646 = vmatpush1.bf16.msra.mxu0 %v12462_v19  ;;  %v12083_v19 = vcombine.high %v716_v14, %v724_v15 }
  0xb5   : > { %4647 = vmatprep.subr.bf16.mxu0 %v12479_v20  ;;  %4039 = vmatpush1.bf16.msra.mxu1 %v11992_v21  ;;  %v12104_v20 = vcombine.low %v743_v4, %v751_v5  ;;  %v775_v21 = vld [vmem:[%s20396_s2 + $0x508] sm:$0xff] }
  0xb6   : > { %4040 = vmatprep.subr.bf16.mxu1 %v12009_v26  ;;  %v12082_v26 = vcombine.low %v716_v14, %v724_v15  ;;  %v12137_v34 = vcombine.high %v775_v21, %v783_v22  ;;  %v887_v14 = vld [vmem:[%s20396_s2 + $0x888] sm:$0xff] }
  0xb7   : > { %v895_v15 = vld [vmem:[%s20396_s2 + $0x8c8] sm:$0xff] }
  0xb8   : > { %4648 = vmatpush1.bf16.msra.mxu0 %v12478_v27  ;;  %3996 = vmatmul.mubr.bf16.gmra.mrb[4].mxu1 %v14218_v28  ;;  %v12099_v27 = vcombine.high %v732_v23, %v740_v24  ;;  %v860_v23 = vld [vmem:[%s20396_s2 + $0x7b0] sm:$0xff] }
  0xb9   : > { %4866 = vmatprep.subr.bf16.mxu0 %v11987_v30  ;;  %4041 = vmatpush1.bf16.msra.mxu1 %v12008_v31  ;;  %v799_v30 = vld [vmem:[%s20396_s2 + $0x5c8] sm:$0xff]  ;;  %v14968_v31 = vld [vmem:[%s15255_s17 + $0x4] ss:$16 sps:$4 sm:$0xff]  }
  0xba   : > { %4005 = vmatprep.mubr.bf16.mxu1 %v14219_v29  ;;  %4042 = vmatprep.subr.bf16.mxu1 %v12025_v36  ;;  %v12115_v36 = vcombine.high %v748_v32, %v756_v33  ;;  %v868_v24 = vld [vmem:[%s20396_s2 + $0x7f0] sm:$0xff] }
  0xbb   : > { %4650 = vmatmul.mubr.bf16.vlgmr.msra.gmra.mrb[0].mxu0 %v14215_v10  ;;  %v12067_v10 = vcombine.high %v700_v6, %v708_v7  ;;  %v871_v6 = vld [vmem:[%s20396_s2 + $0x808] sm:$0xff]  ;;  %v14970_v32 = vld [vmem:[%s15255_s17 + $0x24] ss:$16 sps:$4 sm:$0xff]  }
  0xbc   : > { %4867 = vmatpush1.bf16.msra.mxu0 %v11986_v37  ;;  %4659 = vmatprep.mubr.bf16.mxu0 %v14216_v11  ;;  %v12088_v11 = vcombine.low %v727_v58, %v735_v59  ;;  %v12136_v37 = vcombine.low %v775_v21, %v783_v22  ;;  %v879_v7 = vld [vmem:[%s20396_s2 + $0x848] sm:$0xff]  ;;  %v876_v33 = vld [vmem:[%s20396_s2 + $0x830] sm:$0xff] }
  0xbd   : > { %4868 = vmatprep.subr.bf16.mxu0 %v12003_v38  ;;  %4043 = vmatpush1.bf16.msra.mxu1 %v12024_v39  ;;  %v807_v38 = vld [vmem:[%s20396_s2 + $0x608] sm:$0xff]  ;;  %v12232_v21 = vcombine.low %v871_v6, %v879_v7 }
  0xbe   : > { %4044 = vmatprep.subr.bf16.mxu1 %v12041_v44  ;;  %v815_v39 = vld [vmem:[%s20396_s2 + $0x648] sm:$0xff]  ;;  %v12131_v44 = vcombine.high %v764_v40, %v772_v41  ;;  %v892_v41 = vld [vmem:[%s20396_s2 + $0x8b0] sm:$0xff] }
  0xbf   : > { %v12169_v50 = vcombine.high %v807_v38, %v815_v39  ;;  %v12168_v53 = vcombine.low %v807_v38, %v815_v39  ;;  %v903_v22 = vld [vmem:[%s20396_s2 + $0x908] sm:$0xff] }
  0xc0   : > { %4869 = vmatpush1.bf16.msra.mxu0 %v12002_v45  ;;  %4006 = vmatmul.mubr.bf16.gmra.mrb[8].mxu1 %v14221_v46  ;;  %v935_v40 = vld [vmem:[%s20396_s2 + $0xa08] sm:$0xff] }
  0xc1   : > { %4870 = vmatprep.subr.bf16.mxu0 %v12019_v48  ;;  %4045 = vmatpush1.bf16.msra.mxu1 %v12040_v49  ;;  %v780_v48 = vld [vmem:[%s20396_s2 + $0x530] sm:$0xff] }
  0xc2   : > { %4015 = vmatprep.mubr.bf16.mxu1 %v14222_v47  ;;  %4046 = vmatprep.subr.bf16.mxu1 %v12057_v54  ;;  %v788_v49 = vld [vmem:[%s20396_s2 + $0x570] sm:$0xff]  ;;  %v839_v54 = vld [vmem:[%s20396_s2 + $0x708] sm:$0xff] }
  0xc3   : > { %4660 = vmatmul.mubr.bf16.gmra.mrb[4].mxu0 %v14218_v28  ;;  %v12120_v28 = vcombine.low %v759_v12, %v767_v13  ;;  %v12147_v52 = vcombine.high %v780_v48, %v788_v49  ;;  %v12146_v59 = vcombine.low %v780_v48, %v788_v49  ;;  %v951_v49 = vld [vmem:[%s20396_s2 + $0xa88] sm:$0xff] }
  0xc4   : > { %4871 = vmatpush1.bf16.msra.mxu0 %v12018_v55  ;;  %4669 = vmatprep.mubr.bf16.mxu0 %v14219_v29  ;;  %v791_v29 = vld [vmem:[%s20396_s2 + $0x588] sm:$0xff] }
  0xc5   : > { %4872 = vmatprep.subr.bf16.mxu0 %v12035_v56  ;;  %4047 = vmatpush1.bf16.msra.mxu1 %v12056_v57  ;;  %v12153_v42 = vcombine.high %v791_v29, %v799_v30  ;;  %v12152_v45 = vcombine.low %v791_v29, %v799_v30  ;;  %v847_v55 = vld [vmem:[%s20396_s2 + $0x748] sm:$0xff]  ;;  %v796_v56 = vld [vmem:[%s20396_s2 + $0x5b0] sm:$0xff]  ;;  %v12227_v29 = vcombine.high %v860_v23, %v868_v24 }
  0xc6   : > { %4048 = vmatprep.subr.bf16.mxu1 %v12073_v63  ;;  %v804_v57 = vld [vmem:[%s20396_s2 + $0x5f0] sm:$0xff]  ;;  %v863_v63 = vld [vmem:[%s20396_s2 + $0x7c8] sm:$0xff]  ;;  %v12200_v5 = vcombine.low %v839_v54, %v847_v55  ;;  %v12248_v30 = vcombine.low %v887_v14, %v895_v15 }
  0xc7   : > { %v12163_v60 = vcombine.high %v796_v56, %v804_v57 }
  0xc8   : > { %4873 = vmatpush1.bf16.msra.mxu0 %v12034_v0  ;;  %4016 = vmatmul.mubr.bf16.gmra.mrb[12].mxu1 %v14224_v62  ;;  %v812_v0 = vld [vmem:[%s20396_s2 + $0x630] sm:$0xff] }
  0xc9   : > { %4874 = vmatprep.subr.bf16.mxu0 %v12051_v2  ;;  %4049 = vmatpush1.bf16.msra.mxu1 %v12072_v3  ;;  %v12201_v2 = vcombine.high %v839_v54, %v847_v55  ;;  %v12162_v3 = vcombine.low %v796_v56, %v804_v57  ;;  %v959_v54 = vld [vmem:[%s20396_s2 + $0xac8] sm:$0xff] }
  0xca   : > { %4025 = vmatprep.mubr.bf16.mxu1 %v14225_v1  ;;  %4050 = vmatprep.subr.bf16.mxu1 %v12089_v8  ;;  %v828_v8 = vld [vmem:[%s20396_s2 + $0x6b0] sm:$0xff] }
  0xcb   : > { %4670 = vmatmul.mubr.bf16.gmra.mrb[8].mxu0 %v14221_v46  ;;  %v823_v46 = vld [vmem:[%s20396_s2 + $0x688] sm:$0xff] }
  0xcc   : > { %4875 = vmatpush1.bf16.msra.mxu0 %v12050_v9  ;;  %4679 = vmatprep.mubr.bf16.mxu0 %v14222_v47  ;;  %v831_v47 = vld [vmem:[%s20396_s2 + $0x6c8] sm:$0xff]  ;;  %v836_v9 = vld [vmem:[%s20396_s2 + $0x6f0] sm:$0xff] }
  0xcd   : > { %4876 = vmatprep.subr.bf16.mxu0 %v12067_v10  ;;  %4051 = vmatpush1.bf16.msra.mxu1 %v12088_v11  ;;  %v12185_v58 = vcombine.high %v823_v46, %v831_v47  ;;  %v12184_v61 = vcombine.low %v823_v46, %v831_v47  ;;  %v12195_v12 = vcombine.high %v828_v8, %v836_v9  ;;  %v14971_v46 = vld [vmem:[%s15255_s17 + $0x20] ss:$16 sps:$4 sm:$0xff]  }
  0xce   : > { %4052 = vmatprep.subr.bf16.mxu1 %v12105_v16  ;;  %v844_v16 = vld [vmem:[%s20396_s2 + $0x730] sm:$0xff] }
  0xd0   : > { %4877 = vmatpush1.bf16.msra.mxu0 %v12066_v17  ;;  %4026 = vmatmul.mubr.bf16.gmra.mrb[16].mxu1 %v14227_v18  ;;  %v852_v17 = vld [vmem:[%s20396_s2 + $0x770] sm:$0xff] }
  0xd1   : > { %4878 = vmatprep.subr.bf16.mxu0 %v12083_v19  ;;  %4053 = vmatpush1.bf16.msra.mxu1 %v12104_v20  ;;  %v12194_v19 = vcombine.low %v828_v8, %v836_v9  ;;  %v12211_v20 = vcombine.high %v844_v16, %v852_v17  ;;  %v991_v8 = vld [vmem:[%s20396_s2 + $0xbc8] sm:$0xff] }
  0xd2   : > { %4068 = vmatprep.mubr.bf16.mxu1 %v14968_v31  ;;  %4054 = vmatprep.subr.bf16.mxu1 %v12121_v25  ;;  %v12249_v25 = vcombine.high %v887_v14, %v895_v15  ;;  %v964_v14 = vld [vmem:[%s20396_s2 + $0xaf0] sm:$0xff] }
  0xd3   : > { %4680 = vmatmul.mubr.bf16.gmra.mrb[12].mxu0 %v14224_v62  ;;  %v855_v62 = vld [vmem:[%s20396_s2 + $0x788] sm:$0xff] }
  0xd4   : > { %4879 = vmatpush1.bf16.msra.mxu0 %v12082_v26  ;;  %4689 = vmatprep.mubr.bf16.mxu0 %v14225_v1  ;;  %v820_v1 = vld [vmem:[%s20396_s2 + $0x670] sm:$0xff]  ;;  %v12217_v10 = vcombine.high %v855_v62, %v863_v63  ;;  %v12216_v13 = vcombine.low %v855_v62, %v863_v63  ;;  %v911_v26 = vld [vmem:[%s20396_s2 + $0x948] sm:$0xff] }
  0xd5   : > { %4880 = vmatprep.subr.bf16.mxu0 %v12099_v27  ;;  %4055 = vmatpush1.bf16.msra.mxu1 %v12120_v28  ;;  %v12179_v4 = vcombine.high %v812_v0, %v820_v1  ;;  %v12178_v11 = vcombine.low %v812_v0, %v820_v1  ;;  %v12210_v27 = vcombine.low %v844_v16, %v852_v17  ;;  %v14969_v28 = vld [vmem:[%s15255_s17] ss:$16 sps:$4 sm:$0xff]   ;;  %v975_v62 = vld [vmem:[%s20396_s2 + $0xb48] sm:$0xff] }
  0xd6   : > { %4056 = vmatprep.subr.bf16.mxu1 %v12137_v34  ;;  %v884_v34 = vld [vmem:[%s20396_s2 + $0x870] sm:$0xff]  ;;  %v12264_v39 = vcombine.low %v903_v22, %v911_v26  ;;  %v1007_v16 = vld [vmem:[%s20396_s2 + $0xc48] sm:$0xff] }
  0xd7   : > { %v12243_v38 = vcombine.high %v876_v33, %v884_v34  ;;  %v14973_v0 = vld [vmem:[%s15255_s17 + $0x40] ss:$16 sps:$4 sm:$0xff]  }
  0xd8   : > { %4881 = vmatpush1.bf16.msra.mxu0 %v12098_v35  ;;  %v12265_v35 = vcombine.high %v903_v22, %v911_v26  ;;  %v14976_v22 = vld [vmem:[%s15255_s17 + $0x84] ss:$16 sps:$4 sm:$0x3f]   ;;  %v1023_v26 = vld [vmem:[%s20396_s2 + $0xcc8] sm:$0xff] }
  0xd9   : > { %4882 = vmatprep.subr.bf16.mxu0 %v12115_v36  ;;  %4057 = vmatpush1.bf16.msra.mxu1 %v12136_v37  ;;  %v927_v36 = vld [vmem:[%s20396_s2 + $0x9c8] sm:$0xff]  ;;  %v12226_v37 = vcombine.low %v860_v23, %v868_v24  ;;  %v972_v23 = vld [vmem:[%s20396_s2 + $0xb30] sm:$0xff] }
  0xda   : > { %4058 = vmatprep.subr.bf16.mxu1 %v12153_v42  ;;  %v900_v42 = vld [vmem:[%s20396_s2 + $0x8f0] sm:$0xff] }
  0xdb   : > { %4690 = vmatmul.mubr.bf16.gmra.mrb[16].mxu0 %v14227_v18  ;;  %v12233_v18 = vcombine.high %v871_v6, %v879_v7  ;;  %v12259_v47 = vcombine.high %v892_v41, %v900_v42  ;;  %v12258_v55 = vcombine.low %v892_v41, %v900_v42  ;;  %v983_v7 = vld [vmem:[%s20396_s2 + $0xb88] sm:$0xff]  ;;  %v980_v24 = vld [vmem:[%s20396_s2 + $0xb70] sm:$0xff] }
  0xdc   : > { %4883 = vmatpush1.bf16.msra.mxu0 %v12114_v43  ;;  %4898 = vmatprep.mubr.bf16.mxu0 %v14968_v31  ;;  %v919_v31 = vld [vmem:[%s20396_s2 + $0x988] sm:$0xff]  ;;  %v12345_v15 = vcombine.high %v983_v7, %v991_v8  ;;  %v1004_v42 = vld [vmem:[%s20396_s2 + $0xc30] sm:$0xff] }
  0xdd   : > { %4884 = vmatprep.subr.bf16.mxu0 %v12131_v44  ;;  %4059 = vmatpush1.bf16.msra.mxu1 %v12152_v45  ;;  %v12281_v43 = vcombine.high %v919_v31, %v927_v36  ;;  %v943_v44 = vld [vmem:[%s20396_s2 + $0xa48] sm:$0xff]  ;;  %v12242_v45 = vcombine.low %v876_v33, %v884_v34  ;;  %v12280_v48 = vcombine.low %v919_v31, %v927_v36  ;;  %v996_v33 = vld [vmem:[%s20396_s2 + $0xbf0] sm:$0xff] }
  0xde   : > { %4060 = vmatprep.subr.bf16.mxu1 %v12169_v50  ;;  %v14972_v50 = vld [vmem:[%s15255_s17 + $0x44] ss:$16 sps:$4 sm:$0xff]   ;;  %v12296_v57 = vcombine.low %v935_v40, %v943_v44  ;;  %v1039_v31 = vld [vmem:[%s20396_s2 + $0xd48] sm:$0xff]  ;;  %v14977_v36 = vld [vmem:[%s15255_s17 + $0x80] ss:$16 sps:$4 sm:$0x3f]  }
  0xdf   : > { %v14978_v41 = vld [vmem:[%s15255_s17 + $0xc] ss:$16 sps:$4 sm:$0xff]  }
  0xe0   : > { %4885 = vmatpush1.bf16.msra.mxu0 %v12130_v51  ;;  %v908_v51 = vld [vmem:[%s20396_s2 + $0x930] sm:$0xff] }
  0xe1   : > { %4886 = vmatprep.subr.bf16.mxu0 %v12147_v52  ;;  %4061 = vmatpush1.bf16.msra.mxu1 %v12168_v53  ;;  %v916_v52 = vld [vmem:[%s20396_s2 + $0x970] sm:$0xff]  ;;  %v12297_v53 = vcombine.high %v935_v40, %v943_v44  ;;  %v1055_v40 = vld [vmem:[%s20396_s2 + $0xdc8] sm:$0xff] }
  0xe2   : > { %4062 = vmatprep.subr.bf16.mxu1 %v12185_v58  ;;  %v12275_v56 = vcombine.high %v908_v51, %v916_v52  ;;  %v924_v58 = vld [vmem:[%s20396_s2 + $0x9b0] sm:$0xff]  ;;  %v12274_v63 = vcombine.low %v908_v51, %v916_v52 }
  0xe3   : > { %v1028_v51 = vld [vmem:[%s20396_s2 + $0xcf0] sm:$0xff] }
  0xe4   : > { %4887 = vmatpush1.bf16.msra.mxu0 %v12146_v59  ;;  %v932_v59 = vld [vmem:[%s20396_s2 + $0x9f0] sm:$0xff] }
  0xe5   : > { %4888 = vmatprep.subr.bf16.mxu0 %v12163_v60  ;;  %4063 = vmatpush1.bf16.msra.mxu1 %v12184_v61  ;;  %v12313_v60 = vcombine.high %v951_v49, %v959_v54  ;;  %v967_v61 = vld [vmem:[%s20396_s2 + $0xb08] sm:$0xff]  ;;  %v12291_v1 = vcombine.high %v924_v58, %v932_v59  ;;  %v12290_v9 = vcombine.low %v924_v58, %v932_v59  ;;  %v1036_v58 = vld [vmem:[%s20396_s2 + $0xd30] sm:$0xff] }
  0xe6   : > { %4064 = vmatprep.subr.bf16.mxu1 %v12201_v2  ;;  %v12312_v2 = vcombine.low %v951_v49, %v959_v54  ;;  %v12329_v6 = vcombine.high %v967_v61, %v975_v62  ;;  %v1071_v49 = vld [vmem:[%s20396_s2 + $0xe48] sm:$0xff]  ;;  %v1044_v59 = vld [vmem:[%s20396_s2 + $0xd70] sm:$0xff] }
  0xe8   : > { %4889 = vmatpush1.bf16.msra.mxu0 %v12162_v3  ;;  %v14974_v3 = vld [vmem:[%s15255_s17 + $0x64] ss:$16 sps:$4 sm:$0xff]  }
  0xe9   : > { %4890 = vmatprep.subr.bf16.mxu0 %v12179_v4  ;;  %4065 = vmatpush1.bf16.msra.mxu1 %v12200_v5  ;;  %v940_v4 = vld [vmem:[%s20396_s2 + $0xa30] sm:$0xff] }
  0xea   : > { %4066 = vmatprep.subr.bf16.mxu1 %v12217_v10  ;;  %v948_v5 = vld [vmem:[%s20396_s2 + $0xa70] sm:$0xff] }
  0xeb   : > { %v12307_v10 = vcombine.high %v940_v4, %v948_v5  ;;  %v12306_v17 = vcombine.low %v940_v4, %v948_v5  ;;  %v12402_v5 = vcombine.low %v1036_v58, %v1044_v59 }
  0xec   : > { %4891 = vmatpush1.bf16.msra.mxu0 %v12178_v11  ;;  %v12328_v11 = vcombine.low %v967_v61, %v975_v62  ;;  %v12403_v62 = vcombine.high %v1036_v58, %v1044_v59  ;;  %v14231_v58 = vld [vmem:[%s20339_s3 + $0x8] sm:$0xff]  }
  0xed   : > { %4892 = vmatprep.subr.bf16.mxu0 %v12195_v12  ;;  %4067 = vmatpush1.bf16.msra.mxu1 %v12216_v13  ;;  %v999_v12 = vld [vmem:[%s20396_s2 + $0xc08] sm:$0xff]  ;;  %v956_v13 = vld [vmem:[%s20396_s2 + $0xab0] sm:$0xff] }
  0xee   : > { %4119 = vmatprep.subr.bf16.mxu1 %v12233_v18  ;;  %v14975_v18 = vld [vmem:[%s15255_s17 + $0x60] ss:$16 sps:$4 sm:$0xff]  }
  0xf0   : > { %4893 = vmatpush1.bf16.msra.mxu0 %v12194_v19  ;;  %4069 = vmatmul.mubr.bf16.vlgmr.msra.gmra.mrb[20].mxu1 %v14969_v28  ;;  %v12323_v19 = vcombine.high %v956_v13, %v964_v14 }
  0xf1   : > { %4894 = vmatprep.subr.bf16.mxu0 %v12211_v20  ;;  %4120 = vmatpush1.bf16.msra.mxu1 %v12232_v21  ;;  %v12344_v20 = vcombine.low %v983_v7, %v991_v8  ;;  %v1015_v21 = vld [vmem:[%s20396_s2 + $0xc88] sm:$0xff] }
  0xf2   : > { %4078 = vmatprep.mubr.bf16.mxu1 %v14970_v32  ;;  %4121 = vmatprep.subr.bf16.mxu1 %v12249_v25  ;;  %v12361_v25 = vcombine.high %v999_v12, %v1007_v16  ;;  %v12377_v34 = vcombine.high %v1015_v21, %v1023_v26  ;;  %v1111_v8 = vld [vmem:[%s20396_s2 + $0xf88] sm:$0xff] }
  0xf4   : > { %4895 = vmatpush1.bf16.msra.mxu0 %v12210_v27  ;;  %v12322_v27 = vcombine.low %v956_v13, %v964_v14 }
  0xf5   : > { %4896 = vmatprep.subr.bf16.mxu0 %v12227_v29  ;;  %4122 = vmatpush1.bf16.msra.mxu1 %v12248_v30  ;;  %v12360_v29 = vcombine.low %v999_v12, %v1007_v16  ;;  %v1031_v30 = vld [vmem:[%s20396_s2 + $0xd08] sm:$0xff]  ;;  %v616_v16 = vld [vmem:[%s20396_s2 + $0x10] sm:$0xff] }
  0xf6   : > { %4123 = vmatprep.subr.bf16.mxu1 %v12265_v35  ;;  %v12338_v35 = vcombine.low %v972_v23, %v980_v24  ;;  %v12393_v44 = vcombine.high %v1031_v30, %v1039_v31 }
  0xf8   : > { %4897 = vmatpush1.bf16.msra.mxu0 %v12226_v37  ;;  %4079 = vmatmul.mubr.bf16.gmra.mrb[24].mxu1 %v14971_v46 }
  0xf9   : > { %4949 = vmatprep.subr.bf16.mxu0 %v12243_v38  ;;  %4124 = vmatpush1.bf16.msra.mxu1 %v12264_v39  ;;  %v12376_v38 = vcombine.low %v1015_v21, %v1023_v26  ;;  %v1047_v39 = vld [vmem:[%s20396_s2 + $0xd88] sm:$0xff]  ;;  %v1100_v26 = vld [vmem:[%s20396_s2 + $0xf30] sm:$0xff] }
  0xfa   : > { %4088 = vmatprep.mubr.bf16.mxu1 %v14972_v50  ;;  %4125 = vmatprep.subr.bf16.mxu1 %v12281_v43  ;;  %v1012_v43 = vld [vmem:[%s20396_s2 + $0xc70] sm:$0xff]  ;;  %v12409_v52 = vcombine.high %v1047_v39, %v1055_v40 }
  0xfb   : > { %4899 = vmatmul.mubr.bf16.vlgmr.msra.gmra.mrb[20].mxu0 %v14969_v28  ;;  %v12339_v28 = vcombine.high %v972_v23, %v980_v24  ;;  %v632_v24 = vld [vmem:[%s20396_s2 + $0x90] sm:$0xff] }
  0xfc   : > { %4950 = vmatpush1.bf16.msra.mxu0 %v12242_v45  ;;  %4908 = vmatprep.mubr.bf16.mxu0 %v14970_v32  ;;  %v988_v32 = vld [vmem:[%s20396_s2 + $0xbb0] sm:$0xff] }
  0xfd   : > { %4951 = vmatprep.subr.bf16.mxu0 %v12259_v47  ;;  %4126 = vmatpush1.bf16.msra.mxu1 %v12280_v48  ;;  %v12355_v37 = vcombine.high %v988_v32, %v996_v33  ;;  %v12354_v45 = vcombine.low %v988_v32, %v996_v33  ;;  %v12392_v47 = vcombine.low %v1031_v30, %v1039_v31  ;;  %v1063_v48 = vld [vmem:[%s20396_s2 + $0xe08] sm:$0xff]  ;;  %v648_v32 = vld [vmem:[%s20396_s2 + $0x110] sm:$0xff] }
  0xfe   : > { %4127 = vmatprep.subr.bf16.mxu1 %v12297_v53  ;;  %v12370_v53 = vcombine.low %v1004_v42, %v1012_v43  ;;  %v656_v33 = vld [vmem:[%s20396_s2 + $0x150] sm:$0xff] }
 0x100   : > { %4952 = vmatpush1.bf16.msra.mxu0 %v12258_v55  ;;  %4089 = vmatmul.mubr.bf16.gmra.mrb[28].mxu1 %v14973_v0  ;;  %v12408_v55 = vcombine.low %v1047_v39, %v1055_v40 }
 0x101   : > { %4953 = vmatprep.subr.bf16.mxu0 %v12275_v56  ;;  %4128 = vmatpush1.bf16.msra.mxu1 %v12296_v57  ;;  %v1079_v56 = vld [vmem:[%s20396_s2 + $0xe88] sm:$0xff] }
 0x102   : > { %4098 = vmatprep.mubr.bf16.mxu1 %v14974_v3  ;;  %4129 = vmatprep.subr.bf16.mxu1 %v12313_v60  ;;  %v1087_v57 = vld [vmem:[%s20396_s2 + $0xec8] sm:$0xff]  ;;  %v12425_v60 = vcombine.high %v1063_v48, %v1071_v49 }
 0x103   : > { %4909 = vmatmul.mubr.bf16.gmra.mrb[24].mxu0 %v14971_v46  ;;  %v12371_v46 = vcombine.high %v1004_v42, %v1012_v43  ;;  %v12441_v4 = vcombine.high %v1079_v56, %v1087_v57  ;;  %v12440_v7 = vcombine.low %v1079_v56, %v1087_v57  ;;  %v664_v42 = vld [vmem:[%s20396_s2 + $0x190] sm:$0xff] }
 0x104   : > { %4954 = vmatpush1.bf16.msra.mxu0 %v12274_v63  ;;  %4918 = vmatprep.mubr.bf16.mxu0 %v14972_v50  ;;  %v1020_v50 = vld [vmem:[%s20396_s2 + $0xcb0] sm:$0xff]  ;;  %v12424_v63 = vcombine.low %v1063_v48, %v1071_v49 }
 0x105   : > { %4955 = vmatprep.subr.bf16.mxu0 %v12291_v1  ;;  %4130 = vmatpush1.bf16.msra.mxu1 %v12312_v2  ;;  %v12387_v54 = vcombine.high %v1020_v50, %v1028_v51  ;;  %v12386_v61 = vcombine.low %v1020_v50, %v1028_v51  ;;  %v1103_v1 = vld [vmem:[%s20396_s2 + $0xf48] sm:$0xff]  ;;  %v1052_v2 = vld [vmem:[%s20396_s2 + $0xdb0] sm:$0xff]  ;;  %v14229_v50 = vld [vmem:[%s20339_s3] sm:$0xff]  }
 0x106   : > { %4131 = vmatprep.subr.bf16.mxu1 %v12329_v6  ;;  %v672_v43 = vld [vmem:[%s20396_s2 + $0x1d0] sm:$0xff] }
 0x107   : > { %v680_v48 = vld [vmem:[%s20396_s2 + $0x210] sm:$0xff]  ;;  %v12027_v51 = vcombine.high %v664_v42, %v672_v43 }
 0x108   : > { %4956 = vmatpush1.bf16.msra.mxu0 %v12290_v9  ;;  %4099 = vmatmul.mubr.bf16.gmra.mrb[32].mxu1 %v14975_v18  ;;  %v1119_v9 = vld [vmem:[%s20396_s2 + $0xfc8] sm:$0xff]  ;;  %v688_v49 = vld [vmem:[%s20396_s2 + $0x250] sm:$0xff] }
 0x109   : > { %4957 = vmatprep.subr.bf16.mxu0 %v12307_v10  ;;  %4132 = vmatpush1.bf16.msra.mxu1 %v12328_v11  ;;  %v1068_v10 = vld [vmem:[%s20396_s2 + $0xe30] sm:$0xff]  ;;  %v12472_v23 = vcombine.low %v1111_v8, %v1119_v9  ;;  %v12043_v59 = vcombine.high %v680_v48, %v688_v49 }
 0x10a   : > { %4108 = vmatprep.mubr.bf16.mxu1 %v14976_v22  ;;  %4133 = vmatprep.subr.bf16.mxu1 %v12345_v15  ;;  %v1076_v11 = vld [vmem:[%s20396_s2 + $0xe70] sm:$0xff] }
 0x10b   : > { %4919 = vmatmul.mubr.bf16.gmra.mrb[28].mxu0 %v14973_v0  ;;  %v1095_v0 = vld [vmem:[%s20396_s2 + $0xf08] sm:$0xff]  ;;  %v12435_v14 = vcombine.high %v1068_v10, %v1076_v11  ;;  %v12434_v21 = vcombine.low %v1068_v10, %v1076_v11  ;;  %v696_v56 = vld [vmem:[%s20396_s2 + $0x290] sm:$0xff]  ;;  %v14236_v10 = vld [vmem:[%s20339_s3 + $0x60] sm:$0xff]  }
 0x10c   : > { %4958 = vmatpush1.bf16.msra.mxu0 %v12306_v17  ;;  %4928 = vmatprep.mubr.bf16.mxu0 %v14974_v3  ;;  %v1060_v3 = vld [vmem:[%s20396_s2 + $0xdf0] sm:$0xff]  ;;  %v12457_v12 = vcombine.high %v1095_v0, %v1103_v1  ;;  %v12456_v15 = vcombine.low %v1095_v0, %v1103_v1 }
 0x10d   : > { %4959 = vmatprep.subr.bf16.mxu0 %v12323_v19  ;;  %4134 = vmatpush1.bf16.msra.mxu1 %v12344_v20  ;;  %v12419_v6 = vcombine.high %v1052_v2, %v1060_v3  ;;  %v12418_v13 = vcombine.low %v1052_v2, %v1060_v3  ;;  %v624_v17 = vld [vmem:[%s20396_s2 + $0x50] sm:$0xff]  ;;  %v12473_v20 = vcombine.high %v1111_v8, %v1119_v9  ;;  %v14234_v2 = vld [vmem:[%s20339_s3 + $0x58] sm:$0xff]  }
 0x10e   : > { %4135 = vmatprep.subr.bf16.mxu1 %v12361_v25  ;;  %v1092_v19 = vld [vmem:[%s20396_s2 + $0xef0] sm:$0xff]  ;;  %v11978_v31 = vcombine.low %v616_v16, %v624_v17  ;;  %v14983_v3 = vld [vmem:[%s15255_s17 + $0x48] ss:$16 sps:$4 sm:$0xff]  }
 0x10f   : > { %v640_v25 = vld [vmem:[%s20396_s2 + $0xd0] sm:$0xff]  ;;  %v14235_v8 = vld [vmem:[%s20339_s3 + $0x18] sm:$0xff]  }
 0x110   : > { %4960 = vmatpush1.bf16.msra.mxu0 %v12322_v27  ;;  %4109 = vmatmul.mubr.bf16.gmra.mrb[36].mxu1 %v14977_v36  ;;  %v1108_v27 = vld [vmem:[%s20396_s2 + $0xf70] sm:$0xff]  ;;  %v11994_v40 = vcombine.low %v632_v24, %v640_v25 }
 0x111   : > { %4961 = vmatprep.subr.bf16.mxu0 %v12339_v28  ;;  %4136 = vmatpush1.bf16.msra.mxu1 %v12360_v29  ;;  %v11979_v28 = vcombine.high %v616_v16, %v624_v17  ;;  %v12467_v30 = vcombine.high %v1100_v26, %v1108_v27  ;;  %v704_v57 = vld [vmem:[%s20396_s2 + $0x2d0] sm:$0xff]  ;;  %v14238_v16 = vld [vmem:[%s20339_s3 + $0x68] sm:$0xff]  }
 0x112   : > { %4151 = vmatprep.mubr.bf16.mxu1 %v14978_v41  ;;  %4137 = vmatprep.subr.bf16.mxu1 %v12377_v34  ;;  %v1116_v34 = vld [vmem:[%s20396_s2 + $0xfb0] sm:$0xff]  ;;  %v12059_v1 = vcombine.high %v696_v56, %v704_v57  ;;  %v14985_v17 = vld [vmem:[%s15255_s17 + $0x68] ss:$16 sps:$4 sm:$0xff]  }
 0x113   : > { %4929 = vmatmul.mubr.bf16.gmra.mrb[32].mxu0 %v14975_v18  ;;  %v1084_v18 = vld [vmem:[%s20396_s2 + $0xeb0] sm:$0xff] }
 0x114   : > { %4962 = vmatpush1.bf16.msra.mxu0 %v12338_v35  ;;  %4938 = vmatprep.mubr.bf16.mxu0 %v14976_v22  ;;  %v12451_v22 = vcombine.high %v1084_v18, %v1092_v19  ;;  %v12450_v29 = vcombine.low %v1084_v18, %v1092_v19  ;;  %v1124_v35 = vld [vmem:[%s20396_s2 + $0xff0] sm:$0xff]  ;;  %v14986_v19 = vld [vmem:[%s15255_s17 + $0x8c] ss:$16 sps:$4 sm:$0x3f]  }
 0x115   : > { %4963 = vmatprep.subr.bf16.mxu0 %v12355_v37  ;;  %4138 = vmatpush1.bf16.msra.mxu1 %v12376_v38  ;;  %v12466_v37 = vcombine.low %v1100_v26, %v1108_v27  ;;  %v14979_v38 = vld [vmem:[%s15255_s17 + $0x8] ss:$16 sps:$4 sm:$0xff]   ;;  %v12483_v39 = vcombine.high %v1116_v34, %v1124_v35  ;;  %v14233_v0 = vld [vmem:[%s20339_s3 + $0x10] sm:$0xff]  }
 0x116   : > { %4139 = vmatprep.subr.bf16.mxu1 %v12393_v44  ;;  %v12011_v44 = vcombine.high %v648_v32, %v656_v33  ;;  %v776_v26 = vld [vmem:[%s20396_s2 + $0x510] sm:$0xff] }
 0x117   : > { %v784_v27 = vld [vmem:[%s20396_s2 + $0x550] sm:$0xff] }
 0x118   : > { %4964 = vmatpush1.bf16.msra.mxu0 %v12354_v45  ;;  %v14228_v45 = vld [vmem:[%s20339_s3 + $0x40] sm:$0xff]  }
 0x119   : > { %4965 = vmatprep.subr.bf16.mxu0 %v12371_v46  ;;  %4140 = vmatpush1.bf16.msra.mxu1 %v12392_v47  ;;  %v12482_v46 = vcombine.low %v1116_v34, %v1124_v35  ;;  %v12010_v47 = vcombine.low %v648_v32, %v656_v33  ;;  %v792_v33 = vld [vmem:[%s20396_s2 + $0x590] sm:$0xff] }
 0x11a   : > { %4141 = vmatprep.subr.bf16.mxu1 %v12409_v52  ;;  %v14230_v52 = vld [vmem:[%s20339_s3 + $0x48] sm:$0xff]   ;;  %v800_v34 = vld [vmem:[%s20396_s2 + $0x5d0] sm:$0xff] }
 0x11b   : > { %4939 = vmatmul.mubr.bf16.gmra.mrb[36].mxu0 %v14977_v36  ;;  %v11995_v36 = vcombine.high %v632_v24, %v640_v25  ;;  %v14240_v24 = vld [vmem:[%s20339_s3 + $0x70] sm:$0xff]  }
 0x11c   : > { %4966 = vmatpush1.bf16.msra.mxu0 %v12370_v53  ;;  %4981 = vmatprep.mubr.bf16.mxu0 %v14978_v41  ;;  %v14980_v41 = vld [vmem:[%s15255_s17 + $0x2c] ss:$16 sps:$4 sm:$0xff]   ;;  %v14981_v53 = vld [vmem:[%s15255_s17 + $0x28] ss:$16 sps:$4 sm:$0xff]   ;;  %v14988_v35 = vld [vmem:[%s15255_s17 + $0x4] ss:$16 sps:$4 sm:$0xff]  }
 0x11d   : > { %4967 = vmatprep.subr.bf16.mxu0 %v12387_v54  ;;  %4142 = vmatpush1.bf16.msra.mxu1 %v12408_v55  ;;  %v12026_v54 = vcombine.low %v664_v42, %v672_v43  ;;  %v14982_v55 = vld [vmem:[%s15255_s17 + $0x4c] ss:$16 sps:$4 sm:$0xff]   ;;  %v12154_v42 = vcombine.low %v792_v33, %v800_v34  ;;  %v824_v43 = vld [vmem:[%s20396_s2 + $0x690] sm:$0xff] }
 0x11e   : > { %4143 = vmatprep.subr.bf16.mxu1 %v12425_v60  ;;  %v14232_v60 = vld [vmem:[%s20339_s3 + $0x50] sm:$0xff]  }
 0x120   : > { %4968 = vmatpush1.bf16.msra.mxu0 %v12386_v61  ;;  %v12042_v61 = vcombine.low %v680_v48, %v688_v49  ;;  %v848_v48 = vld [vmem:[%s20396_s2 + $0x750] sm:$0xff] }
 0x121   : > { %4969 = vmatprep.subr.bf16.mxu0 %v12403_v62  ;;  %4144 = vmatpush1.bf16.msra.mxu1 %v12424_v63  ;;  %v712_v62 = vld [vmem:[%s20396_s2 + $0x310] sm:$0xff] }
 0x122   : > { %4145 = vmatprep.subr.bf16.mxu1 %v12441_v4  ;;  %v720_v63 = vld [vmem:[%s20396_s2 + $0x350] sm:$0xff]  ;;  %v12058_v4 = vcombine.low %v696_v56, %v704_v57 }
 0x123   : > { %v12075_v9 = vcombine.high %v712_v62, %v720_v63  ;;  %v12074_v11 = vcombine.low %v712_v62, %v720_v63  ;;  %v880_v56 = vld [vmem:[%s20396_s2 + $0x850] sm:$0xff] }
 0x124   : > { %4970 = vmatpush1.bf16.msra.mxu0 %v12402_v5  ;;  %v14984_v5 = vld [vmem:[%s15255_s17 + $0x6c] ss:$16 sps:$4 sm:$0xff]   ;;  %v904_v63 = vld [vmem:[%s20396_s2 + $0x910] sm:$0xff] }
 0x125   : > { %4971 = vmatprep.subr.bf16.mxu0 %v12419_v6  ;;  %4146 = vmatpush1.bf16.msra.mxu1 %v12440_v7  ;;  %v728_v6 = vld [vmem:[%s20396_s2 + $0x390] sm:$0xff] }
 0x126   : > { %4147 = vmatprep.subr.bf16.mxu1 %v12457_v12  ;;  %v736_v7 = vld [vmem:[%s20396_s2 + $0x3d0] sm:$0xff] }
 0x127   : > { %v744_v12 = vld [vmem:[%s20396_s2 + $0x410] sm:$0xff]  ;;  %v12090_v18 = vcombine.low %v728_v6, %v736_v7 }
 0x128   : > { %4972 = vmatpush1.bf16.msra.mxu0 %v12418_v13  ;;  %v752_v13 = vld [vmem:[%s20396_s2 + $0x450] sm:$0xff] }
 0x129   : > { %4973 = vmatprep.subr.bf16.mxu0 %v12435_v14  ;;  %4148 = vmatpush1.bf16.msra.mxu1 %v12456_v15  ;;  %v14237_v14 = vld [vmem:[%s20339_s3 + $0x20] sm:$0xff]   ;;  %v12091_v15 = vcombine.high %v728_v6, %v736_v7  ;;  %v12106_v25 = vcombine.low %v744_v12, %v752_v13 }
 0x12a   : > { %4149 = vmatprep.subr.bf16.mxu1 %v12473_v20  ;;  %v760_v20 = vld [vmem:[%s20396_s2 + $0x490] sm:$0xff] }
 0x12b   : > { %v14990_v6 = vld [vmem:[%s15255_s17 + $0x24] ss:$16 sps:$4 sm:$0xff]  }
 0x12c   : > { %4974 = vmatpush1.bf16.msra.mxu0 %v12434_v21  ;;  %v768_v21 = vld [vmem:[%s20396_s2 + $0x4d0] sm:$0xff] }
 0x12d   : > { %4975 = vmatprep.subr.bf16.mxu0 %v12451_v22  ;;  %4150 = vmatpush1.bf16.msra.mxu1 %v12472_v23  ;;  %v14239_v22 = vld [vmem:[%s20339_s3 + $0x28] sm:$0xff]   ;;  %v12107_v23 = vcombine.high %v744_v12, %v752_v13  ;;  %v12122_v32 = vcombine.low %v760_v20, %v768_v21 }
 0x12e   : > { %4202 = vmatprep.subr.bf16.mxu1 %v11979_v28  ;;  %v14241_v28 = vld [vmem:[%s20339_s3 + $0x30] sm:$0xff]  }
 0x130   : > { %4976 = vmatpush1.bf16.msra.mxu0 %v12450_v29  ;;  %4152 = vmatmul.mubr.bf16.vlgmr.msra.gmra.mrb[20].mxu1 %v14979_v38  ;;  %v12123_v29 = vcombine.high %v760_v20, %v768_v21  ;;  %v1126_v20 = vld [vmem:[%s20398_s24] sm:$0xff] }
 0x131   : > { %4977 = vmatprep.subr.bf16.mxu0 %v12467_v30  ;;  %4203 = vmatpush1.bf16.msra.mxu1 %v11978_v31  ;;  %v14242_v30 = vld [vmem:[%s20339_s3 + $0x78] sm:$0xff]  }
 0x132   : > { %4161 = vmatprep.mubr.bf16.mxu1 %v14980_v41  ;;  %4204 = vmatprep.subr.bf16.mxu1 %v11995_v36  ;;  %v14987_v31 = vld [vmem:[%s15255_s17 + $0x88] ss:$16 sps:$4 sm:$0x3f]  }
 0x133   : > { %v14243_v36 = vld [vmem:[%s20339_s3 + $0x38] sm:$0xff]  }
 0x134   : > { %4978 = vmatpush1.bf16.msra.mxu0 %v12466_v37  ;;  %v12139_v37 = vcombine.high %v776_v26, %v784_v27 }
 0x135   : > { %4979 = vmatprep.subr.bf16.mxu0 %v12483_v39  ;;  %4205 = vmatpush1.bf16.msra.mxu1 %v11994_v40  ;;  %v808_v39 = vld [vmem:[%s20396_s2 + $0x610] sm:$0xff] }
 0x136   : > { %4206 = vmatprep.subr.bf16.mxu1 %v12011_v44  ;;  %v816_v40 = vld [vmem:[%s20396_s2 + $0x650] sm:$0xff] }
 0x137   : > { %v832_v44 = vld [vmem:[%s20396_s2 + $0x6d0] sm:$0xff] }
 0x138   : > { %4980 = vmatpush1.bf16.msra.mxu0 %v12482_v46  ;;  %4162 = vmatmul.mubr.bf16.gmra.mrb[24].mxu1 %v14981_v53  ;;  %v12170_v46 = vcombine.low %v808_v39, %v816_v40  ;;  %v12187_v49 = vcombine.high %v824_v43, %v832_v44 }
 0x139   : > { %13082 = vmatprep.subr.bf16.mxu0 %v14228_v45  ;;  %4207 = vmatpush1.bf16.msra.mxu1 %v12010_v47  ;;  %v12171_v45 = vcombine.high %v808_v39, %v816_v40  ;;  %v840_v47 = vld [vmem:[%s20396_s2 + $0x710] sm:$0xff] }
 0x13a   : > { %4171 = vmatprep.mubr.bf16.mxu1 %v14982_v55  ;;  %4208 = vmatprep.subr.bf16.mxu1 %v12027_v51  ;;  %v856_v51 = vld [vmem:[%s20396_s2 + $0x790] sm:$0xff] }
 0x13b   : > { %4982 = vmatmul.mubr.bf16.vlgmr.msra.gmra.mrb[20].mxu0 %v14979_v38  ;;  %v12138_v38 = vcombine.low %v776_v26, %v784_v27 }
 0x13c   : > { %4991 = vmatprep.mubr.bf16.mxu0 %v14980_v41  ;;  %13083 = vmatpush3.bf16.msra.mxu0 %v14229_v50  ;;  %v12155_v41 = vcombine.high %v792_v33, %v800_v34  ;;  %v12186_v50 = vcombine.low %v824_v43, %v832_v44  ;;  %v14994_v33 = vld [vmem:[%s15255_s17 + $0x64] ss:$16 sps:$4 sm:$0xff]  }
 0x13d   : > { %13084 = vmatprep.subr.bf16.mxu0 %v14230_v52  ;;  %4209 = vmatpush1.bf16.msra.mxu1 %v12026_v54  ;;  %v864_v52 = vld [vmem:[%s20396_s2 + $0x7d0] sm:$0xff]  ;;  %v12202_v54 = vcombine.low %v840_v47, %v848_v48 }
 0x13e   : > { %4210 = vmatprep.subr.bf16.mxu1 %v12043_v59  ;;  %v12219_v57 = vcombine.high %v856_v51, %v864_v52  ;;  %v888_v59 = vld [vmem:[%s20396_s2 + $0x890] sm:$0xff] }
 0x13f   : > { %v1008_v43 = vld [vmem:[%s20396_s2 + $0xc50] sm:$0xff] }
 0x140   : > { %13085 = vmatpush3.bf16.msra.mxu0 %v14231_v58  ;;  %4172 = vmatmul.mubr.bf16.gmra.mrb[28].mxu1 %v14983_v3  ;;  %v12218_v58 = vcombine.low %v856_v51, %v864_v52  ;;  %v14995_v51 = vld [vmem:[%s15255_s17 + $0x60] ss:$16 sps:$4 sm:$0xff]  }
 0x141   : > { %13086 = vmatprep.subr.bf16.mxu0 %v14232_v60  ;;  %4211 = vmatpush1.bf16.msra.mxu1 %v12042_v61  ;;  %v896_v60 = vld [vmem:[%s20396_s2 + $0x8d0] sm:$0xff] }
 0x142   : > { %4181 = vmatprep.mubr.bf16.mxu1 %v14984_v5  ;;  %4212 = vmatprep.subr.bf16.mxu1 %v12059_v1  ;;  %v12251_v1 = vcombine.high %v888_v59, %v896_v60 }
 0x143   : > { %4992 = vmatmul.mubr.bf16.gmra.mrb[24].mxu0 %v14981_v53  ;;  %v12203_v53 = vcombine.high %v840_v47, %v848_v48 }
 0x144   : > { %5001 = vmatprep.mubr.bf16.mxu0 %v14982_v55  ;;  %13087 = vmatpush3.bf16.msra.mxu0 %v14233_v0  ;;  %v872_v55 = vld [vmem:[%s20396_s2 + $0x810] sm:$0xff] }
 0x145   : > { %13088 = vmatprep.subr.bf16.mxu0 %v14234_v2  ;;  %4213 = vmatpush1.bf16.msra.mxu1 %v12058_v4  ;;  %v12235_v61 = vcombine.high %v872_v55, %v880_v56  ;;  %v12234_v62 = vcombine.low %v872_v55, %v880_v56  ;;  %v912_v0 = vld [vmem:[%s20396_s2 + $0x950] sm:$0xff] }
 0x146   : > { %4214 = vmatprep.subr.bf16.mxu1 %v12075_v9  ;;  %v14989_v2 = vld [vmem:[%s15255_s17] ss:$16 sps:$4 sm:$0xff]   ;;  %v12267_v7 = vcombine.high %v904_v63, %v912_v0  ;;  %v12266_v9 = vcombine.low %v904_v63, %v912_v0  ;;  %v14996_v56 = vld [vmem:[%s15255_s17 + $0x84] ss:$16 sps:$4 sm:$0x3f]  }
 0x147   : > { %v920_v4 = vld [vmem:[%s20396_s2 + $0x990] sm:$0xff] }
 0x148   : > { %13089 = vmatpush3.bf16.msra.mxu0 %v14235_v8  ;;  %4182 = vmatmul.mubr.bf16.gmra.mrb[32].mxu1 %v14985_v17  ;;  %v1130_v8 = vlaneseq  ;;  %v1024_v55 = vld [vmem:[%s20396_s2 + $0xcd0] sm:$0xff] }
 0x149   : > { %13090 = vmatprep.subr.bf16.mxu0 %v14236_v10  ;;  %4215 = vmatpush1.bf16.msra.mxu1 %v12074_v11  ;;  %v936_v10 = vld [vmem:[%s20396_s2 + $0xa10] sm:$0xff] }
 0x14a   : > { %4191 = vmatprep.mubr.bf16.mxu1 %v14986_v19  ;;  %4216 = vmatprep.subr.bf16.mxu1 %v12091_v15  ;;  %v944_v11 = vld [vmem:[%s20396_s2 + $0xa50] sm:$0xff]  ;;  %v16203_v13 = vshrl.u32 %v1130_v8, 7 }
 0x14b   : > { %5002 = vmatmul.mubr.bf16.gmra.mrb[28].mxu0 %v14983_v3  ;;  %v12250_v3 = vcombine.low %v888_v59, %v896_v60 }
 0x14c   : > { %5011 = vmatprep.mubr.bf16.mxu0 %v14984_v5  ;;  %13091 = vmatpush3.bf16.msra.mxu0 %v14237_v14  ;;  %v928_v5 = vld [vmem:[%s20396_s2 + $0x9d0] sm:$0xff]  ;;  %v16217_v21 = vsub.s32 0, %v16203_v13 }
 0x14d   : > { %13092 = vmatprep.subr.bf16.mxu0 %v14238_v16  ;;  %4217 = vmatpush1.bf16.msra.mxu1 %v12090_v18  ;;  %v12283_v12 = vcombine.high %v920_v4, %v928_v5  ;;  %v14991_v14 = vld [vmem:[%s15255_s17 + $0x20] ss:$16 sps:$4 sm:$0xff]   ;;  %v12282_v15 = vcombine.low %v920_v4, %v928_v5  ;;  %v14992_v18 = vld [vmem:[%s15255_s17 + $0x44] ss:$16 sps:$4 sm:$0xff]  }
 0x14e   : > { %4218 = vmatprep.subr.bf16.mxu1 %v12107_v23  ;;  %v952_v16 = vld [vmem:[%s20396_s2 + $0xa90] sm:$0xff]  ;;  %20399 = vst [vmem:[#allocation5_spill] sm:$0xff] %v16217_v21  ;;  %v16220_v23 = vsub.s32 1, %v16203_v13  ;;  %v16229_v27 = vrot.slane %v1126_v20, %v16217_v21 }
 0x150   : > { %13093 = vmatpush3.bf16.msra.mxu0 %v14239_v22  ;;  %4192 = vmatmul.mubr.bf16.gmra.mrb[36].mxu1 %v14987_v31  ;;  %v12298_v22 = vcombine.low %v936_v10, %v944_v11 }
 0x151   : > { %13094 = vmatprep.subr.bf16.mxu0 %v14240_v24  ;;  %4219 = vmatpush1.bf16.msra.mxu1 %v12106_v25  ;;  %v968_v24 = vld [vmem:[%s20396_s2 + $0xb10] sm:$0xff] }
 0x152   : > { %4234 = vmatprep.mubr.bf16.mxu1 %v14988_v35  ;;  %4220 = vmatprep.subr.bf16.mxu1 %v12123_v29  ;;  %v976_v25 = vld [vmem:[%s20396_s2 + $0xb50] sm:$0xff]  ;;  %v16233_v29 = vrot.slane %v1126_v20, %v16220_v23 }
 0x153   : > { %5012 = vmatmul.mubr.bf16.gmra.mrb[32].mxu0 %v14985_v17  ;;  %v960_v17 = vld [vmem:[%s20396_s2 + $0xad0] sm:$0xff]  ;;  %v12331_v34 = vcombine.high %v968_v24, %v976_v25 }
 0x154   : > { %5021 = vmatprep.mubr.bf16.mxu0 %v14986_v19  ;;  %13095 = vmatpush3.bf16.msra.mxu0 %v14241_v28  ;;  %v12299_v19 = vcombine.high %v936_v10, %v944_v11  ;;  %v12315_v26 = vcombine.high %v952_v16, %v960_v17  ;;  %v14993_v28 = vld [vmem:[%s15255_s17 + $0x40] ss:$16 sps:$4 sm:$0xff]  }
 0x155   : > { %13096 = vmatprep.subr.bf16.mxu0 %v14242_v30  ;;  %4221 = vmatpush1.bf16.msra.mxu1 %v12122_v32  ;;  %v12314_v30 = vcombine.low %v952_v16, %v960_v17  ;;  %v992_v32 = vld [vmem:[%s20396_s2 + $0xbd0] sm:$0xff] }
 0x156   : > { %4222 = vmatprep.subr.bf16.mxu1 %v12139_v37  ;;  %v14997_v16 = vld [vmem:[%s15255_s17 + $0x80] ss:$16 sps:$4 sm:$0x3f]  }
 0x157   : > { %v1056_v20 = vld [vmem:[%s20396_s2 + $0xdd0] sm:$0xff] }
 0x158   : > { %13097 = vmatpush3.bf16.msra.mxu0 %v14243_v36  ;;  %v16242_v36 = vstv %s589_s25 }
 0x159   : > { %4223 = vmatpush1.bf16.msra.mxu1 %v12138_v38 }
 0x15a   : > { %4224 = vmatprep.subr.bf16.mxu1 %v12155_v41  ;;  %v12330_v41 = vcombine.low %v968_v24, %v976_v25 }
 0x15b   : > { %5022 = vmatmul.mubr.bf16.gmra.mrb[36].mxu0 %v14987_v31  ;;  %v984_v31 = vld [vmem:[%s20396_s2 + $0xb90] sm:$0xff] }
 0x15c   : > { %v12347_v47 = vcombine.high %v984_v31, %v992_v32 }
 0x15d   : > { %4225 = vmatpush1.bf16.msra.mxu1 %v12154_v42  ;;  %v1000_v42 = vld [vmem:[%s20396_s2 + $0xc10] sm:$0xff] }
 0x15e   : > { %4226 = vmatprep.subr.bf16.mxu1 %v12171_v45  ;;  %v12363_v59 = vcombine.high %v1000_v42, %v1008_v43  ;;  %v12362_v5 = vcombine.low %v1000_v42, %v1008_v43 }
 0x161   : > { %4227 = vmatpush1.bf16.msra.mxu1 %v12170_v46 }
 0x162   : > { %4228 = vmatprep.subr.bf16.mxu1 %v12187_v49 }
 0x165   : > { %4229 = vmatpush1.bf16.msra.mxu1 %v12186_v50 }
 0x166   : > { %4230 = vmatprep.subr.bf16.mxu1 %v12203_v53  ;;  %v12346_v53 = vcombine.low %v984_v31, %v992_v32 }
 0x169   : > { %4231 = vmatpush1.bf16.msra.mxu1 %v12202_v54  ;;  %v1016_v54 = vld [vmem:[%s20396_s2 + $0xc90] sm:$0xff] }
 0x16a   : > { %4232 = vmatprep.subr.bf16.mxu1 %v12219_v57  ;;  %v12379_v11 = vcombine.high %v1016_v54, %v1024_v55 }
 0x16d   : > { %4233 = vmatpush1.bf16.msra.mxu1 %v12218_v58 }
 0x16e   : > { %4285 = vmatprep.subr.bf16.mxu1 %v12235_v61 }
 0x170   : > { %4235 = vmatmul.mubr.bf16.vlgmr.msra.gmra.mrb[40].mxu1 %v14989_v2 }
 0x171   : > { %4286 = vmatpush1.bf16.msra.mxu1 %v12234_v62  ;;  %4244 = vmatprep.mubr.bf16.mxu1 %v14990_v6  ;;  %v1032_v6 = vld [vmem:[%s20396_s2 + $0xd10] sm:$0xff] }
 0x172   : > { %4287 = vmatprep.subr.bf16.mxu1 %v12251_v1 }
 0x175   : > { %4288 = vmatpush1.bf16.msra.mxu1 %v12250_v3 }
 0x176   : > { %4289 = vmatprep.subr.bf16.mxu1 %v12267_v7  ;;  %v1040_v7 = vld [vmem:[%s20396_s2 + $0xd50] sm:$0xff] }
 0x178   : > { %4245 = vmatmul.mubr.bf16.gmra.mrb[44].mxu1 %v14991_v14 }
 0x179   : > { %4290 = vmatpush1.bf16.msra.mxu1 %v12266_v9  ;;  %4254 = vmatprep.mubr.bf16.mxu1 %v14992_v18  ;;  %v12378_v18 = vcombine.low %v1016_v54, %v1024_v55 }
 0x17a   : > { %4291 = vmatprep.subr.bf16.mxu1 %v12283_v12 }
 0x17d   : > { %4292 = vmatpush1.bf16.msra.mxu1 %v12282_v15 }
 0x17e   : > { %4293 = vmatprep.subr.bf16.mxu1 %v12299_v19  ;;  %v1048_v19 = vld [vmem:[%s20396_s2 + $0xd90] sm:$0xff] }
 0x180   : > { %4255 = vmatmul.mubr.bf16.gmra.mrb[48].mxu1 %v14993_v28 }
 0x181   : > { %4294 = vmatpush1.bf16.msra.mxu1 %v12298_v22  ;;  %4264 = vmatprep.mubr.bf16.mxu1 %v14994_v33  ;;  %v14998_v22 = vld [vmem:[%s15255_s17 + $0xc] ss:$16 sps:$4 sm:$0xff]  }
 0x182   : > { %4295 = vmatprep.subr.bf16.mxu1 %v12315_v26  ;;  %v12395_v26 = vcombine.high %v1032_v6, %v1040_v7 }
 0x183   : > { %v3987_v35 = vpop.f32.mrb[0].mxu1 }
 0x184   : > { %v13813_v37 = vadd.f32 %v3987_v35, %v16229_v27  ;;  %v3989_v38 = vpop.f32.mrb[1].mxu1 }
 0x185   : > { %v13814_v39 = vadd.f32 %v3989_v38, %v16233_v29  ;;  %v3991_v40 = vpop.f32.mrb[2].mxu1  ;;  %4296 = vmatpush1.bf16.msra.mxu1 %v12314_v30 }
 0x186   : > { %v5359_v44 = vmul.f32 %v13813_v37, %v16242_v36  ;;  %v13815_v45 = vadd.f32 %v3991_v40, %v16229_v27  ;;  %v3993_v46 = vpop.f32.mrb[3].mxu1  ;;  %4297 = vmatprep.subr.bf16.mxu1 %v12331_v34  ;;  %vm5198_vm0 = vcmp.gt.f32.partialorder %v13813_v37, 0.0  ;;  %v1064_v40 = vld [vmem:[%s20396_s2 + $0xe10] sm:$0xff] }
 0x187   : > { %v5360_v48 = vmul.f32 %v13814_v39, %v16242_v36  ;;  %v13816_v49 = vadd.f32 %v3993_v46, %v16233_v29  ;;  %vm5199_vm1 = vcmp.gt.f32.partialorder %v13814_v39, 0.0 }
 0x188   : > { %vm5214_vm2 = vcmp.gt.f32.partialorder %v13815_v45, 0.0  ;;  %v5375_v50 = vmul.f32 %v13815_v45, %v16242_v36  ;;  %4265 = vmatmul.mubr.bf16.gmra.mrb[52].mxu1 %v14995_v51  ;;  %v5519_v57 = vsel %vm5198_vm0, %v13813_v37, %v5359_v44  ;;  %v1080_v51 = vld [vmem:[%s20396_s2 + $0xe90] sm:$0xff] }
 0x189   : > { %vm5215_vm3 = vcmp.gt.f32.partialorder %v13816_v49, 0.0  ;;  %v5376_v52 = vmul.f32 %v13816_v49, %v16242_v36  ;;  %4298 = vmatpush1.bf16.msra.mxu1 %v12330_v41  ;;  %4274 = vmatprep.mubr.bf16.mxu1 %v14996_v56  ;;  %v5520_v62 = vsel %vm5199_vm1, %v13814_v39, %v5360_v48  ;;  %v12394_v39 = vcombine.low %v1032_v6, %v1040_v7  ;;  %v1072_v41 = vld [vmem:[%s20396_s2 + $0xe50] sm:$0xff] }
 0x18a   : > { %v5535_v58 = vsel %vm5214_vm2, %v13815_v45, %v5375_v50  ;;  %4299 = vmatprep.subr.bf16.mxu1 %v12347_v47  ;;  %v12411_v45 = vcombine.high %v1048_v19, %v1056_v20  ;;  %v12410_v50 = vcombine.low %v1048_v19, %v1056_v20  ;;  %v12427_v55 = vcombine.high %v1064_v40, %v1072_v41 }
 0x18b   : > { %v5679_v60 = vpack.c.bf16 %v5535_v58, %v5519_v57  ;;  %v3997_v61 = vpop.f32.mrb[4].mxu1  ;;  %v5536_v63 = vsel %vm5215_vm3, %v13816_v49, %v5376_v52  ;;  %v1088_v52 = vld [vmem:[%s20396_s2 + $0xed0] sm:$0xff] }
 0x18c   : > { %v13817_v0 = vadd.f32 %v3997_v61, %v16229_v27  ;;  %v3999_v1 = vpop.f32.mrb[5].mxu1  ;;  %v5680_v2 = vpack.c.bf16 %v5536_v63, %v5520_v62  ;;  %v12443_v7 = vcombine.high %v1080_v51, %v1088_v52 }
 0x18d   : > { %v13818_v3 = vadd.f32 %v3999_v1, %v16233_v29  ;;  %v4001_v4 = vpop.f32.mrb[6].mxu1  ;;  %4300 = vmatpush1.bf16.msra.mxu1 %v12346_v53  ;;  %v12426_v1 = vcombine.low %v1064_v40, %v1072_v41 }
 0x18e   : > { %v5391_v8 = vmul.f32 %v13817_v0, %v16242_v36  ;;  %v13819_v9 = vadd.f32 %v4001_v4, %v16229_v27  ;;  %v4003_v10 = vpop.f32.mrb[7].mxu1  ;;  %6822 = vmatprep.mubr.bf16.mxu0 %v5680_v2  ;;  %4301 = vmatprep.subr.bf16.mxu1 %v12363_v59  ;;  %vm5230_vm4 = vcmp.gt.f32.partialorder %v13817_v0, 0.0  ;;  %v1096_v2 = vld [vmem:[%s20396_s2 + $0xf10] sm:$0xff] }
 0x18f   : > { %v5392_v12 = vmul.f32 %v13818_v3, %v16242_v36  ;;  %v13820_v14 = vadd.f32 %v4003_v10, %v16233_v29  ;;  %6823 = vmatmul.mubr.bf16.vlgmr.msra.gmra.mrb[40].mxu0 %v5679_v60  ;;  %vm5231_vm5 = vcmp.gt.f32.partialorder %v13818_v3, 0.0 }
 0x190   : > { %vm5246_vm6 = vcmp.gt.f32.partialorder %v13819_v9, 0.0  ;;  %v5407_v15 = vmul.f32 %v13819_v9, %v16242_v36  ;;  %4275 = vmatmul.mubr.bf16.gmra.mrb[56].mxu1 %v14997_v16  ;;  %v5551_v24 = vsel %vm5230_vm4, %v13817_v0, %v5391_v8 }
 0x191   : > { %vm5247_vm7 = vcmp.gt.f32.partialorder %v13820_v14, 0.0  ;;  %v5408_v17 = vmul.f32 %v13820_v14, %v16242_v36  ;;  %4302 = vmatpush1.bf16.msra.mxu1 %v12362_v5  ;;  %4317 = vmatprep.mubr.bf16.mxu1 %v14998_v22  ;;  %v5552_v30 = vsel %vm5231_vm5, %v13818_v3, %v5392_v12  ;;  %v1104_v3 = vld [vmem:[%s20396_s2 + $0xf50] sm:$0xff]  ;;  %v12442_v12 = vcombine.low %v1080_v51, %v1088_v52 }
 0x192   : > { %4303 = vmatprep.subr.bf16.mxu1 %v12379_v11  ;;  %v5567_v25 = vsel %vm5246_vm6, %v13819_v9, %v5407_v15  ;;  %v1120_v15 = vld [vmem:[%s20396_s2 + $0xfd0] sm:$0xff] }
 0x193   : > { %v4007_v28 = vpop.f32.mrb[8].mxu1  ;;  %v5568_v31 = vsel %vm5247_vm7, %v13820_v14, %v5408_v17  ;;  %v5695_v32 = vpack.c.bf16 %v5567_v25, %v5551_v24  ;;  %v1112_v14 = vld [vmem:[%s20396_s2 + $0xf90] sm:$0xff] }
 0x194   : > { %v13821_v33 = vadd.f32 %v4007_v28, %v16229_v27  ;;  %v4009_v34 = vpop.f32.mrb[9].mxu1  ;;  %v5696_v35 = vpack.c.bf16 %v5568_v31, %v5552_v30 }
 0x195   : > { %v13822_v37 = vadd.f32 %v4009_v34, %v16233_v29  ;;  %v4011_v38 = vpop.f32.mrb[10].mxu1  ;;  %4304 = vmatpush1.bf16.msra.mxu1 %v12378_v18  ;;  %v12459_v18 = vcombine.high %v1096_v2, %v1104_v3  ;;  %v625_v34 = vld [vmem:[%s20396_s2 + $0x58] sm:$0xff] }
 0x196   : > { %v5423_v42 = vmul.f32 %v13821_v33, %v16242_v36  ;;  %v13823_v43 = vadd.f32 %v4011_v38, %v16229_v27  ;;  %v4013_v44 = vpop.f32.mrb[11].mxu1  ;;  %6830 = vmatprep.mubr.bf16.mxu0 %v5696_v35  ;;  %4305 = vmatprep.subr.bf16.mxu1 %v12395_v26  ;;  %vm5262_vm8 = vcmp.gt.f32.partialorder %v13821_v33, 0.0 }
 0x197   : > { %v5424_v46 = vmul.f32 %v13822_v37, %v16242_v36  ;;  %v13824_v47 = vadd.f32 %v4013_v44, %v16233_v29  ;;  %6831 = vmatmul.mubr.bf16.gmra.mrb[44].mxu0 %v5695_v32  ;;  %vm5263_vm9 = vcmp.gt.f32.partialorder %v13822_v37, 0.0  ;;  %v12458_v32 = vcombine.low %v1096_v2, %v1104_v3  ;;  %v15001_v2 = vld [vmem:[%s15255_s17 + $0x28] ss:$16 sps:$4 sm:$0xff]  }
 0x198   : > { %vm5278_vm10 = vcmp.gt.f32.partialorder %v13823_v43, 0.0  ;;  %v5439_v48 = vmul.f32 %v13823_v43, %v16242_v36  ;;  %v5583_v53 = vsel %vm5262_vm8, %v13821_v33, %v5423_v42  ;;  %v617_v33 = vld [vmem:[%s20396_s2 + $0x18] sm:$0xff]  ;;  %v12474_v44 = vcombine.low %v1112_v14, %v1120_v15 }
 0x199   : > { %vm5279_vm11 = vcmp.gt.f32.partialorder %v13824_v47, 0.0  ;;  %v5440_v49 = vmul.f32 %v13824_v47, %v16242_v36  ;;  %4306 = vmatpush1.bf16.msra.mxu1 %v12394_v39  ;;  %v5584_v57 = vsel %vm5263_vm9, %v13822_v37, %v5424_v46  ;;  %v12475_v39 = vcombine.high %v1112_v14, %v1120_v15 }
 0x19a   : > { %4307 = vmatprep.subr.bf16.mxu1 %v12411_v45  ;;  %v5599_v54 = vsel %vm5278_vm10, %v13823_v43, %v5439_v48  ;;  %v641_v45 = vld [vmem:[%s20396_s2 + $0xd8] sm:$0xff]  ;;  %v11980_v52 = vcombine.low %v617_v33, %v625_v34 }
 0x19b   : > { %v4017_v56 = vpop.f32.mrb[12].mxu1  ;;  %v5600_v58 = vsel %vm5279_vm11, %v13824_v47, %v5440_v49  ;;  %v5711_v59 = vpack.c.bf16 %v5599_v54, %v5583_v53  ;;  %v11981_v47 = vcombine.high %v617_v33, %v625_v34  ;;  %v649_v53 = vld [vmem:[%s20396_s2 + $0x118] sm:$0xff] }
 0x19c   : > { %v13825_v60 = vadd.f32 %v4017_v56, %v16229_v27  ;;  %v4019_v61 = vpop.f32.mrb[13].mxu1  ;;  %v5712_v62 = vpack.c.bf16 %v5600_v58, %v5584_v57  ;;  %v657_v54 = vld [vmem:[%s20396_s2 + $0x158] sm:$0xff] }
 0x19d   : > { %v13826_v63 = vadd.f32 %v4019_v61, %v16233_v29  ;;  %v4021_v0 = vpop.f32.mrb[14].mxu1  ;;  %4308 = vmatpush1.bf16.msra.mxu1 %v12410_v50  ;;  %v14999_v56 = vld [vmem:[%s15255_s17 + $0x8] ss:$16 sps:$4 sm:$0xff]   ;;  %v15000_v58 = vld [vmem:[%s15255_s17 + $0x2c] ss:$16 sps:$4 sm:$0xff]   ;;  %v12013_v61 = vcombine.high %v649_v53, %v657_v54 }
 0x19e   : > { %v5455_v4 = vmul.f32 %v13825_v60, %v16242_v36  ;;  %v13827_v5 = vadd.f32 %v4021_v0, %v16229_v27  ;;  %v4023_v6 = vpop.f32.mrb[15].mxu1  ;;  %6838 = vmatprep.mubr.bf16.mxu0 %v5712_v62  ;;  %4309 = vmatprep.subr.bf16.mxu1 %v12427_v55  ;;  %vm5294_vm12 = vcmp.gt.f32.partialorder %v13825_v60, 0.0  ;;  %v12012_v62 = vcombine.low %v649_v53, %v657_v54  ;;  %v689_v0 = vld [vmem:[%s20396_s2 + $0x258] sm:$0xff] }
 0x19f   : > { %v5456_v8 = vmul.f32 %v13826_v63, %v16242_v36  ;;  %v13828_v9 = vadd.f32 %v4023_v6, %v16233_v29  ;;  %6839 = vmatmul.mubr.bf16.gmra.mrb[48].mxu0 %v5711_v59  ;;  %vm5295_vm13 = vcmp.gt.f32.partialorder %v13826_v63, 0.0  ;;  %v665_v59 = vld [vmem:[%s20396_s2 + $0x198] sm:$0xff] }
 0x1a0   : > { %vm5310_vm14 = vcmp.gt.f32.partialorder %v13827_v5, 0.0  ;;  %v5471_v10 = vmul.f32 %v13827_v5, %v16242_v36  ;;  %v5615_v16 = vsel %vm5294_vm12, %v13825_v60, %v5455_v4  ;;  %v673_v60 = vld [vmem:[%s20396_s2 + $0x1d8] sm:$0xff] }
 0x1a1   : > { %vm5311_vm15 = vcmp.gt.f32.partialorder %v13828_v9, 0.0  ;;  %v5472_v11 = vmul.f32 %v13828_v9, %v16242_v36  ;;  %4310 = vmatpush1.bf16.msra.mxu1 %v12426_v1  ;;  %v5616_v20 = vsel %vm5295_vm13, %v13826_v63, %v5456_v8  ;;  %v681_v63 = vld [vmem:[%s20396_s2 + $0x218] sm:$0xff]  ;;  %v12029_v1 = vcombine.high %v665_v59, %v673_v60  ;;  %v4651_v8 = vpop.f32.mrb[0].mxu0 }
 0x1a2   : > { %4311 = vmatprep.subr.bf16.mxu1 %v12443_v7  ;;  %v5631_v17 = vsel %vm5310_vm14, %v13827_v5, %v5471_v10  ;;  %v12028_v3 = vcombine.low %v665_v59, %v673_v60  ;;  %v15002_v4 = vld [vmem:[%s15255_s17 + $0x4c] ss:$16 sps:$4 sm:$0xff]  }
 0x1a3   : > { %v4027_v19 = vpop.f32.mrb[16].mxu1  ;;  %v5632_v22 = vsel %vm5311_vm15, %v13828_v9, %v5472_v11  ;;  %v5727_v24 = vpack.c.bf16 %v5631_v17, %v5615_v16  ;;  %v697_v5 = vld [vmem:[%s20396_s2 + $0x298] sm:$0xff]  ;;  %v16383_v7 = vld [vmem:[%s20398_s24 + $0x8] sm:$0xff]  ;;  %v12045_v9 = vcombine.high %v681_v63, %v689_v0  ;;  %v16389_v11 = vpop.f32.mrb[1].mxu0  ;;  %v12044_v17 = vcombine.low %v681_v63, %v689_v0 }
 0x1a4   : > { %v13829_v25 = vadd.f32 %v4027_v19, %v16229_v27  ;;  %v4029_v26 = vpop.f32.mrb[17].mxu1  ;;  %v5728_v28 = vpack.c.bf16 %v5632_v22, %v5616_v20  ;;  %v705_v6 = vld [vmem:[%s20396_s2 + $0x2d8] sm:$0xff]  ;;  %v16387_v10 = vrot.slane %v16383_v7, %v16217_v21 }
 0x1a5   : > { %v13830_v30 = vadd.f32 %v4029_v26, %v16233_v29  ;;  %v4031_v31 = vpop.f32.mrb[18].mxu1  ;;  %4312 = vmatpush1.bf16.msra.mxu1 %v12442_v12  ;;  %v4655_v12 = vpop.f32.mrb[2].mxu0  ;;  %v721_v19 = vld [vmem:[%s20396_s2 + $0x358] sm:$0xff]  ;;  %v12061_v22 = vcombine.high %v697_v5, %v705_v6 }
 0x1a6   : > { %v5487_v35 = vmul.f32 %v13829_v25, %v16242_v36  ;;  %v13831_v37 = vadd.f32 %v4031_v31, %v16229_v27  ;;  %v4033_v38 = vpop.f32.mrb[19].mxu1  ;;  %6846 = vmatprep.mubr.bf16.mxu0 %v5728_v28  ;;  %4313 = vmatprep.subr.bf16.mxu1 %v12459_v18  ;;  %vm5326_vm0 = vcmp.gt.f32.partialorder %v13829_v25, 0.0  ;;  %v633_v27 = vld [vmem:[%s20396_s2 + $0x98] sm:$0xff]  ;;  %v13893_v14 = vadd.f32 %v4651_v8, %v16387_v10  ;;  %v16393_v16 = vpop.f32.mrb[3].mxu0 }
 0x1a7   : > { %v5488_v40 = vmul.f32 %v13830_v30, %v16242_v36  ;;  %v13832_v41 = vadd.f32 %v4033_v38, %v16233_v29  ;;  %6847 = vmatmul.mubr.bf16.gmra.mrb[52].mxu0 %v5727_v24  ;;  %vm5327_vm1 = vcmp.gt.f32.partialorder %v13830_v30, 0.0  ;;  %v11997_v55 = vcombine.high %v633_v27, %v641_v45  ;;  %v713_v18 = vld [vmem:[%s20396_s2 + $0x318] sm:$0xff]  ;;  %v16401_v20 = vpop.f32.mrb[4].mxu0 }
 0x1a8   : > { %vm5342_vm2 = vcmp.gt.f32.partialorder %v13831_v37, 0.0  ;;  %v5503_v42 = vmul.f32 %v13831_v37, %v16242_v36  ;;  %v5647_v29 = vsel %vm5326_vm0, %v13829_v25, %v5487_v35  ;;  %v11996_v57 = vcombine.low %v633_v27, %v641_v45  ;;  %v16404_v25 = vpop.f32.mrb[5].mxu0  ;;  %v15003_v28 = vld [vmem:[%s15255_s17 + $0x48] ss:$16 sps:$4 sm:$0xff]   ;;  %v15004_v33 = vld [vmem:[%s15255_s17 + $0x6c] ss:$16 sps:$4 sm:$0xff]  }
 0x1a9   : > { %vm5343_vm3 = vcmp.gt.f32.partialorder %v13832_v41, 0.0  ;;  %v5504_v43 = vmul.f32 %v13832_v41, %v16242_v36  ;;  %4314 = vmatpush1.bf16.msra.mxu1 %v12458_v32  ;;  %v5648_v48 = vsel %vm5327_vm1, %v13830_v30, %v5488_v40  ;;  %v13895_v15 = vadd.f32 %v4655_v12, %v16387_v10  ;;  %v16410_v31 = vpop.f32.mrb[6].mxu0  ;;  %v729_v34 = vld [vmem:[%s20396_s2 + $0x398] sm:$0xff] }
 0x1aa   : > { %4315 = vmatprep.subr.bf16.mxu1 %v12475_v39  ;;  %v5663_v46 = vsel %vm5342_vm2, %v13831_v37, %v5503_v42  ;;  %vm5206_vm4 = vcmp.gt.f32.partialorder %v13893_v14, 0.0  ;;  %v5367_v24 = vmul.f32 %v13893_v14, %v16242_v36  ;;  %v12060_v32 = vcombine.low %v697_v5, %v705_v6  ;;  %v737_v35 = vld [vmem:[%s20396_s2 + $0x3d8] sm:$0xff]  ;;  %v16421_v38 = vpop.f32.mrb[7].mxu0  ;;  %v16486_v5 = vld [vmem:[%s15255_s17 + $0x4] ss:$16 sps:$4 sm:$0xff]  }
 0x1ab   : > { %v5664_v49 = vsel %vm5343_vm3, %v13832_v41, %v5504_v43  ;;  %v5743_v50 = vpack.c.bf16 %v5663_v46, %v5647_v29  ;;  %vm5222_vm5 = vcmp.gt.f32.partialorder %v13895_v15, 0.0  ;;  %v5383_v26 = vmul.f32 %v13895_v15, %v16242_v36  ;;  %v16425_v41 = vpop.f32.mrb[8].mxu0  ;;  %v745_v27 = vld [vmem:[%s20396_s2 + $0x418] sm:$0xff] }
 0x1ac   : > { %v5744_v51 = vpack.c.bf16 %v5664_v49, %v5648_v48  ;;  %v16408_v30 = vsel %vm5206_vm4, %v13893_v14, %v5367_v24  ;;  %v12077_v39 = vcombine.high %v713_v18, %v721_v19  ;;  %20400 = vst [vmem:[#allocation6_spill] sm:$0xff] %v16425_v41  ;;  %v16427_v42 = vpop.f32.mrb[9].mxu0  ;;  %v753_v45 = vld [vmem:[%s20396_s2 + $0x458] sm:$0xff]  ;;  %v12093_v46 = vcombine.high %v729_v34, %v737_v35 }
 0x1ad   : > { %4316 = vmatpush1.bf16.msra.mxu1 %v12474_v44  ;;  %v16419_v37 = vsel %vm5222_vm5, %v13895_v15, %v5383_v26  ;;  %v16429_v43 = vpop.f32.mrb[10].mxu0  ;;  %v12076_v44 = vcombine.low %v713_v18, %v721_v19  ;;  %v16444_v49 = vld [vmem:[%s15255_s17 + $0x68] ss:$16 sps:$4 sm:$0xff]   ;;  %v12108_v60 = vcombine.low %v745_v27, %v753_v45 }
 0x1ae   : > { %6854 = vmatprep.mubr.bf16.mxu0 %v5744_v51  ;;  %4368 = vmatprep.subr.bf16.mxu1 %v11981_v47  ;;  %20401 = vst [vmem:[#allocation7_spill] sm:$0xff] %v16429_v43  ;;  %v16437_v29 = vpop.f32.mrb[11].mxu0  ;;  %v12092_v51 = vcombine.low %v729_v34, %v737_v35  ;;  %v761_v53 = vld [vmem:[%s20396_s2 + $0x498] sm:$0xff]  ;;  %v16840_v43 = vld [vmem:[%s20396_s2 + $0x68] sm:$0xff] }
 0x1af   : > { %6855 = vmatmul.mubr.bf16.gmra.mrb[56].mxu0 %v5743_v50  ;;  %20402 = vst [vmem:[#allocation8_spill] sm:$0xff] %v16437_v29  ;;  %v16439_v47 = vpop.f32.mrb[12].mxu0  ;;  %v769_v54 = vld [vmem:[%s20396_s2 + $0x4d8] sm:$0xff] }
 0x1b0   : > { %4318 = vmatmul.mubr.bf16.vlgmr.msra.gmra.mrb[40].mxu1 %v14999_v56  ;;  %20403 = vst [vmem:[#allocation9_spill] sm:$0xff] %v16439_v47  ;;  %v16441_v48 = vpop.f32.mrb[13].mxu0  ;;  %v12109_v56 = vcombine.high %v745_v27, %v753_v45  ;;  %v12125_v0 = vcombine.high %v761_v53, %v769_v54  ;;  %v817_v12 = vld [vmem:[%s20396_s2 + $0x658] sm:$0xff] }
 0x1b1   : > { %4369 = vmatpush1.bf16.msra.mxu1 %v11980_v52  ;;  %4327 = vmatprep.mubr.bf16.mxu1 %v15000_v58  ;;  %20404 = vst [vmem:[#allocation10_spill] sm:$0xff] %v16441_v48  ;;  %v16447_v50 = vpop.f32.mrb[14].mxu0  ;;  %v16450_v52 = vld [vmem:[%s15255_s17 + $0x8c] ss:$16 sps:$4 sm:$0x3f]  }
 0x1b2   : > { %4370 = vmatprep.subr.bf16.mxu1 %v11997_v55  ;;  %20405 = vst [vmem:[#allocation11_spill] sm:$0xff] %v16447_v50  ;;  %v16459_v55 = vpop.f32.mrb[15].mxu0  ;;  %v833_v18 = vld [vmem:[%s20396_s2 + $0x6d8] sm:$0xff]  ;;  %v16835_v48 = vld [vmem:[%s20396_s2 + $0x28] sm:$0xff] }
 0x1b3   : > { %20406 = vst [vmem:[#allocation12_spill] sm:$0xff] %v16459_v55  ;;  %v841_v24 = vld [vmem:[%s20396_s2 + $0x718] sm:$0xff] }
 0x1b4   : > { %v849_v26 = vld [vmem:[%s20396_s2 + $0x758] sm:$0xff] }
 0x1b5   : > { %4371 = vmatpush1.bf16.msra.mxu1 %v11996_v57  ;;  %v16461_v57 = vpop.f32.mrb[16].mxu0  ;;  %v12205_v34 = vcombine.high %v841_v24, %v849_v26  ;;  %v865_v35 = vld [vmem:[%s20396_s2 + $0x7d8] sm:$0xff] }
 0x1b6   : > { %4372 = vmatprep.subr.bf16.mxu1 %v12013_v61  ;;  %20407 = vst [vmem:[#allocation13_spill] sm:$0xff] %v16461_v57  ;;  %v16463_v58 = vpop.f32.mrb[17].mxu0  ;;  %v777_v61 = vld [vmem:[%s20396_s2 + $0x518] sm:$0xff] }
 0x1b7   : > { %20408 = vst [vmem:[#allocation14_spill] sm:$0xff] %v16463_v58  ;;  %v16465_v59 = vpop.f32.mrb[18].mxu0  ;;  %v881_v27 = vld [vmem:[%s20396_s2 + $0x858] sm:$0xff] }
 0x1b8   : > { %4328 = vmatmul.mubr.bf16.gmra.mrb[44].mxu1 %v15001_v2  ;;  %20409 = vst [vmem:[#allocation15_spill] sm:$0xff] %v16465_v59  ;;  %v16473_v63 = vpop.f32.mrb[19].mxu0  ;;  %v12124_v2 = vcombine.low %v761_v53, %v769_v54  ;;  %v897_v54 = vld [vmem:[%s20396_s2 + $0x8d8] sm:$0xff] }
 0x1b9   : > { %4373 = vmatpush1.bf16.msra.mxu1 %v12012_v62  ;;  %4337 = vmatprep.mubr.bf16.mxu1 %v15002_v4  ;;  %v785_v62 = vld [vmem:[%s20396_s2 + $0x558] sm:$0xff]  ;;  %20410 = vst [vmem:[#allocation16_spill] sm:$0xff] %v16473_v63 }
 0x1ba   : > { %4374 = vmatprep.subr.bf16.mxu1 %v12029_v1  ;;  %v16476_v1 = vld [vmem:[%s15255_s17 + $0x88] ss:$16 sps:$4 sm:$0x3f]   ;;  %v12141_v6 = vcombine.high %v777_v61, %v785_v62  ;;  %v12140_v8 = vcombine.low %v777_v61, %v785_v62  ;;  %v14245_v62 = vld [vmem:[%s20339_s3 + $0x100] sm:$0xff]  }
 0x1bb   : > { %v801_v4 = vld [vmem:[%s20396_s2 + $0x5d8] sm:$0xff] }
 0x1bd   : > { %4375 = vmatpush1.bf16.msra.mxu1 %v12028_v3  ;;  %v793_v3 = vld [vmem:[%s20396_s2 + $0x598] sm:$0xff] }
 0x1be   : > { %4376 = vmatprep.subr.bf16.mxu1 %v12045_v9  ;;  %v809_v9 = vld [vmem:[%s20396_s2 + $0x618] sm:$0xff]  ;;  %v12157_v14 = vcombine.high %v793_v3, %v801_v4  ;;  %v12156_v15 = vcombine.low %v793_v3, %v801_v4  ;;  %v16538_v3 = vld [vmem:[%s15255_s17] ss:$16 sps:$4 sm:$0xff]  }
 0x1bf   : > { %v12173_v19 = vcombine.high %v809_v9, %v817_v12 }
 0x1c0   : > { %4338 = vmatmul.mubr.bf16.gmra.mrb[48].mxu1 %v15003_v28 }
 0x1c1   : > { %4377 = vmatpush1.bf16.msra.mxu1 %v12044_v17  ;;  %4347 = vmatprep.mubr.bf16.mxu1 %v15004_v33  ;;  %v825_v17 = vld [vmem:[%s20396_s2 + $0x698] sm:$0xff] }
 0x1c2   : > { %4378 = vmatprep.subr.bf16.mxu1 %v12061_v22  ;;  %v12172_v22 = vcombine.low %v809_v9, %v817_v12  ;;  %v12189_v28 = vcombine.high %v825_v17, %v833_v18  ;;  %v857_v33 = vld [vmem:[%s20396_s2 + $0x798] sm:$0xff]  ;;  %v14247_v12 = vld [vmem:[%s20339_s3 + $0x108] sm:$0xff]  }
 0x1c3   : > { %v12221_v45 = vcombine.high %v857_v33, %v865_v35 }
 0x1c5   : > { %4379 = vmatpush1.bf16.msra.mxu1 %v12060_v32  ;;  %v12188_v32 = vcombine.low %v825_v17, %v833_v18  ;;  %v14248_v18 = vld [vmem:[%s20339_s3 + $0x150] sm:$0xff]  }
 0x1c6   : > { %4380 = vmatprep.subr.bf16.mxu1 %v12077_v39  ;;  %v12204_v39 = vcombine.low %v841_v24, %v849_v26  ;;  %v937_v24 = vld [vmem:[%s20396_s2 + $0xa18] sm:$0xff] }
 0x1c7   : > { %v945_v26 = vld [vmem:[%s20396_s2 + $0xa58] sm:$0xff] }
 0x1c8   : > { %4348 = vmatmul.mubr.bf16.gmra.mrb[52].mxu1 %v16444_v49 }
 0x1c9   : > { %4381 = vmatpush1.bf16.msra.mxu1 %v12076_v44  ;;  %4357 = vmatprep.mubr.bf16.mxu1 %v16450_v52  ;;  %v873_v44 = vld [vmem:[%s20396_s2 + $0x818] sm:$0xff] }
 0x1ca   : > { %4382 = vmatprep.subr.bf16.mxu1 %v12093_v46  ;;  %v12220_v46 = vcombine.low %v857_v33, %v865_v35  ;;  %v12237_v53 = vcombine.high %v873_v44, %v881_v27  ;;  %v16574_v33 = vld [vmem:[%s15255_s17 + $0x44] ss:$16 sps:$4 sm:$0xff]   ;;  %v12301_v35 = vcombine.high %v937_v24, %v945_v26 }
 0x1cd   : > { %4383 = vmatpush1.bf16.msra.mxu1 %v12092_v51  ;;  %v889_v51 = vld [vmem:[%s20396_s2 + $0x898] sm:$0xff] }
 0x1ce   : > { %4384 = vmatprep.subr.bf16.mxu1 %v12109_v56  ;;  %v12236_v56 = vcombine.low %v873_v44, %v881_v27  ;;  %v12253_v61 = vcombine.high %v889_v51, %v897_v54  ;;  %v12252_v4 = vcombine.low %v889_v51, %v897_v54  ;;  %v953_v44 = vld [vmem:[%s20396_s2 + $0xa98] sm:$0xff]  ;;  %v20357_v51 = vsub.s32 3, %v16203_v13 }
 0x1cf   : > { %v961_v27 = vld [vmem:[%s20396_s2 + $0xad8] sm:$0xff] }
 0x1d0   : > { %4358 = vmatmul.mubr.bf16.gmra.mrb[56].mxu1 %v16476_v1  ;;  %v12317_v54 = vcombine.high %v953_v44, %v961_v27 }
 0x1d1   : > { %4385 = vmatpush1.bf16.msra.mxu1 %v12108_v60  ;;  %4400 = vmatprep.mubr.bf16.mxu1 %v16486_v5  ;;  %v14244_v60 = vld [vmem:[%s20339_s3 + $0x140] sm:$0xff]  }
 0x1d2   : > { %4386 = vmatprep.subr.bf16.mxu1 %v12125_v0  ;;  %v905_v0 = vld [vmem:[%s20396_s2 + $0x918] sm:$0xff]  ;;  %13174 = vmatprep.subr.bf16.mxu0 %v14244_v60 }
 0x1d3   : > { %13175 = vmatpush3.bf16.msra.mxu0 %v14245_v62  ;;  %v969_v60 = vld [vmem:[%s20396_s2 + $0xb18] sm:$0xff]  ;;  %v16606_v62 = vld [vmem:[%s20398_s24] sm:$0xff] }
 0x1d5   : > { %4387 = vmatpush1.bf16.msra.mxu1 %v12124_v2  ;;  %v913_v2 = vld [vmem:[%s20396_s2 + $0x958] sm:$0xff] }
 0x1d6   : > { %4388 = vmatprep.subr.bf16.mxu1 %v12141_v6  ;;  %v16542_v6 = vld [vmem:[%s15255_s17 + $0x24] ss:$16 sps:$4 sm:$0xff]   ;;  %v12269_v9 = vcombine.high %v905_v0, %v913_v2  ;;  %v12268_v17 = vcombine.low %v905_v0, %v913_v2  ;;  %v16614_v2 = vld [vmem:[%s15255_s17 + $0x40] ss:$16 sps:$4 sm:$0xff]  }
 0x1d9   : > { %4389 = vmatpush1.bf16.msra.mxu1 %v12140_v8  ;;  %v14246_v8 = vld [vmem:[%s20339_s3 + $0x148] sm:$0xff]  }
 0x1da   : > { %4390 = vmatprep.subr.bf16.mxu1 %v12157_v14  ;;  %v921_v14 = vld [vmem:[%s20396_s2 + $0x998] sm:$0xff]  ;;  %13176 = vmatprep.subr.bf16.mxu0 %v14246_v8  ;;  %v12316_v8 = vcombine.low %v953_v44, %v961_v27 }
 0x1db   : > { %13177 = vmatpush3.bf16.msra.mxu0 %v14247_v12  ;;  %v14254_v12 = vld [vmem:[%s20339_s3 + $0x168] sm:$0xff]  }
 0x1dc   : > { %13178 = vmatprep.subr.bf16.mxu0 %v14248_v18  ;;  %v985_v18 = vld [vmem:[%s20396_s2 + $0xb98] sm:$0xff] }
 0x1dd   : > { %4391 = vmatpush1.bf16.msra.mxu1 %v12156_v15  ;;  %v929_v15 = vld [vmem:[%s20396_s2 + $0x9d8] sm:$0xff] }
 0x1de   : > { %4392 = vmatprep.subr.bf16.mxu1 %v12173_v19  ;;  %v12285_v19 = vcombine.high %v921_v14, %v929_v15 }
 0x1e1   : > { %4393 = vmatpush1.bf16.msra.mxu1 %v12172_v22  ;;  %v14249_v22 = vld [vmem:[%s20339_s3 + $0x110] sm:$0xff]  }
 0x1e2   : > { %4394 = vmatprep.subr.bf16.mxu1 %v12189_v28  ;;  %v16570_v28 = vld [vmem:[%s15255_s17 + $0x20] ss:$16 sps:$4 sm:$0xff]   ;;  %13179 = vmatpush3.bf16.msra.mxu0 %v14249_v22 }
 0x1e5   : > { %4395 = vmatpush1.bf16.msra.mxu1 %v12188_v32  ;;  %v12284_v32 = vcombine.low %v921_v14, %v929_v15  ;;  %v14255_v15 = vld [vmem:[%s20339_s3 + $0x128] sm:$0xff]  }
 0x1e6   : > { %4396 = vmatprep.subr.bf16.mxu1 %v12205_v34  ;;  %v14250_v34 = vld [vmem:[%s20339_s3 + $0x158] sm:$0xff]  }
 0x1e7   : > { %13180 = vmatprep.subr.bf16.mxu0 %v14250_v34 }
 0x1e9   : > { %4397 = vmatpush1.bf16.msra.mxu1 %v12204_v39  ;;  %v14251_v39 = vld [vmem:[%s20339_s3 + $0x118] sm:$0xff]  }
 0x1ea   : > { %4398 = vmatprep.subr.bf16.mxu1 %v12221_v45  ;;  %v20358_v45 = vsub.s32 2, %v16203_v13  ;;  %13181 = vmatpush3.bf16.msra.mxu0 %v14251_v39 }
 0x1ec   : > { %v16611_v0 = vrot.slane %v16606_v62, %v20358_v45 }
 0x1ed   : > { %4399 = vmatpush1.bf16.msra.mxu1 %v12220_v46  ;;  %v12300_v46 = vcombine.low %v937_v24, %v945_v26 }
 0x1ee   : > { %4451 = vmatprep.subr.bf16.mxu1 %v12237_v53  ;;  %v14252_v53 = vld [vmem:[%s20339_s3 + $0x160] sm:$0xff]  }
 0x1ef   : > { %13182 = vmatprep.subr.bf16.mxu0 %v14252_v53  ;;  %v16650_v53 = vld [vmem:[%s20396_s2 + $0xc58] sm:$0xff] }
 0x1f0   : > { %4401 = vmatmul.mubr.bf16.vlgmr.msra.gmra.mrb[60].mxu1 %v16538_v3 }
 0x1f1   : > { %4452 = vmatpush1.bf16.msra.mxu1 %v12236_v56  ;;  %4410 = vmatprep.mubr.bf16.mxu1 %v16542_v6  ;;  %v14253_v56 = vld [vmem:[%s20339_s3 + $0x120] sm:$0xff]  }
 0x1f2   : > { %4453 = vmatprep.subr.bf16.mxu1 %v12253_v61  ;;  %v977_v61 = vld [vmem:[%s20396_s2 + $0xb58] sm:$0xff]  ;;  %13183 = vmatpush3.bf16.msra.mxu0 %v14253_v56 }
 0x1f3   : > { %v12333_v14 = vcombine.high %v969_v60, %v977_v61  ;;  %13184 = vmatprep.subr.bf16.mxu0 %v14254_v12  ;;  %v12332_v34 = vcombine.low %v969_v60, %v977_v61 }
 0x1f5   : > { %4454 = vmatpush1.bf16.msra.mxu1 %v12252_v4  ;;  %v16620_v4 = vrot.slane %v16606_v62, %v20357_v51 }
 0x1f6   : > { %4455 = vmatprep.subr.bf16.mxu1 %v12269_v9  ;;  %v16623_v9 = vld [vmem:[%s15255_s17 + $0x64] ss:$16 sps:$4 sm:$0xff]   ;;  %13185 = vmatpush3.bf16.msra.mxu0 %v14255_v15  ;;  %v20359_v15 = vsub.s32 4, %v16203_v13 }
 0x1f8   : > { %4411 = vmatmul.mubr.bf16.gmra.mrb[64].mxu1 %v16570_v28 }
 0x1f9   : > { %4456 = vmatpush1.bf16.msra.mxu1 %v12268_v17  ;;  %4420 = vmatprep.mubr.bf16.mxu1 %v16574_v33 }
 0x1fa   : > { %4457 = vmatprep.subr.bf16.mxu1 %v12285_v19  ;;  %v993_v19 = vld [vmem:[%s20396_s2 + $0xbd8] sm:$0xff] }
 0x1fb   : > { %v12349_v27 = vcombine.high %v985_v18, %v993_v19  ;;  %v12348_v61 = vcombine.low %v985_v18, %v993_v19  ;;  %v16670_v19 = vld [vmem:[%s15255_s17 + $0x84] ss:$16 sps:$4 sm:$0x3f]  }
 0x1fd   : > { %4458 = vmatpush1.bf16.msra.mxu1 %v12284_v32 }
 0x1fe   : > { %4459 = vmatprep.subr.bf16.mxu1 %v12301_v35 }
 0x200   : > { %4421 = vmatmul.mubr.bf16.gmra.mrb[68].mxu1 %v16614_v2 }
 0x201   : > { %4460 = vmatpush1.bf16.msra.mxu1 %v12300_v46  ;;  %4430 = vmatprep.mubr.bf16.mxu1 %v16623_v9  ;;  %v16645_v46 = vld [vmem:[%s20396_s2 + $0xc18] sm:$0xff] }
 0x202   : > { %4461 = vmatprep.subr.bf16.mxu1 %v12317_v54  ;;  %v14256_v54 = vld [vmem:[%s20339_s3 + $0x170] sm:$0xff]   ;;  %v12365_v18 = vcombine.high %v16645_v46, %v16650_v53 }
 0x203   : > { %v4153_v17 = vpop.f32.mrb[20].mxu1  ;;  %13186 = vmatprep.subr.bf16.mxu0 %v14256_v54  ;;  %v16682_v54 = vrot.slane %v16383_v7, %v20359_v15 }
 0x204   : > { %v13833_v22 = vadd.f32 %v4153_v17, %v16611_v0  ;;  %v4155_v24 = vpop.f32.mrb[21].mxu1 }
 0x205   : > { %v13834_v26 = vadd.f32 %v4155_v24, %v16620_v4  ;;  %v4157_v32 = vpop.f32.mrb[22].mxu1  ;;  %4462 = vmatpush1.bf16.msra.mxu1 %v12316_v8  ;;  %v14257_v8 = vld [vmem:[%s20339_s3 + $0x130] sm:$0xff]   ;;  %v20361_v24 = vsub.s32 5, %v16203_v13 }
 0x206   : > { %v5361_v35 = vmul.f32 %v13833_v22, %v16242_v36  ;;  %v13835_v39 = vadd.f32 %v4157_v32, %v16611_v0  ;;  %v4159_v44 = vpop.f32.mrb[23].mxu1  ;;  %4463 = vmatprep.subr.bf16.mxu1 %v12333_v14  ;;  %vm5200_vm6 = vcmp.gt.f32.partialorder %v13833_v22, 0.0  ;;  %v16662_v14 = vld [vmem:[%s15255_s17 + $0x60] ss:$16 sps:$4 sm:$0xff]   ;;  %13187 = vmatpush3.bf16.msra.mxu0 %v14257_v8 }
 0x207   : > { %v5362_v56 = vmul.f32 %v13834_v26, %v16242_v36  ;;  %v13836_v60 = vadd.f32 %v4159_v44, %v16620_v4  ;;  %vm5201_vm7 = vcmp.gt.f32.partialorder %v13834_v26, 0.0 }
 0x208   : > { %vm5216_vm8 = vcmp.gt.f32.partialorder %v13835_v39, 0.0  ;;  %v5377_v12 = vmul.f32 %v13835_v39, %v16242_v36  ;;  %4431 = vmatmul.mubr.bf16.gmra.mrb[72].mxu1 %v16662_v14  ;;  %v16675_v32 = vsel %vm5200_vm6, %v13833_v22, %v5361_v35  ;;  %v1017_v22 = vld [vmem:[%s20396_s2 + $0xc98] sm:$0xff] }
 0x209   : > { %vm5217_vm9 = vcmp.gt.f32.partialorder %v13836_v60, 0.0  ;;  %v5378_v17 = vmul.f32 %v13836_v60, %v16242_v36  ;;  %4464 = vmatpush1.bf16.msra.mxu1 %v12332_v34  ;;  %4440 = vmatprep.mubr.bf16.mxu1 %v16670_v19  ;;  %20411 = vst [vmem:[#allocation17_spill] sm:$0xff] %v16675_v32  ;;  %v14258_v34 = vld [vmem:[%s20339_s3 + $0x178] sm:$0xff]   ;;  %v16706_v8 = vsel %vm5201_vm7, %v13834_v26, %v5362_v56 }
 0x20a   : > { %v16677_v44 = vsel %vm5216_vm8, %v13835_v39, %v5377_v12  ;;  %4465 = vmatprep.subr.bf16.mxu1 %v12349_v27  ;;  %v1025_v35 = vld [vmem:[%s20396_s2 + $0xcd8] sm:$0xff]  ;;  %v16700_v39 = vrot.slane %v16383_v7, %v20361_v24  ;;  %20413 = vst [vmem:[#allocation19_spill] sm:$0xff] %v16706_v8  ;;  %13188 = vmatprep.subr.bf16.mxu0 %v14258_v34  ;;  %v16729_v34 = vld [vmem:[%s15255_s17 + $0x80] ss:$16 sps:$4 sm:$0x3f]  }
 0x20b   : > { %20412 = vst [vmem:[#allocation18_spill] sm:$0xff] %v16677_v44  ;;  %v16689_v45 = vpop.f32.mrb[24].mxu1  ;;  %v14259_v27 = vld [vmem:[%s20339_s3 + $0x138] sm:$0xff]   ;;  %v16709_v12 = vsel %vm5217_vm9, %v13836_v60, %v5378_v17  ;;  %v12364_v7 = vcombine.low %v16645_v46, %v16650_v53  ;;  %v12381_v26 = vcombine.high %v1017_v22, %v1025_v35 }
 0x20c   : > { %20414 = vst [vmem:[#allocation20_spill] sm:$0xff] %v16709_v12  ;;  %v4165_v51 = vpop.f32.mrb[25].mxu1  ;;  %13189 = vmatpush3.bf16.msra.mxu0 %v14259_v27  ;;  %v16735_v44 = vld [vmem:[%s15255_s17 + $0xc] ss:$16 sps:$4 sm:$0xff]  }
 0x20d   : > { %v13838_v15 = vadd.f32 %v4165_v51, %v16620_v4  ;;  %v4167_v21 = vpop.f32.mrb[26].mxu1  ;;  %4466 = vmatpush1.bf16.msra.mxu1 %v12348_v61  ;;  %v1033_v51 = vld [vmem:[%s20396_s2 + $0xd18] sm:$0xff] }
 0x20e   : > { %v4983_v24 = vpop.f32.mrb[20].mxu0  ;;  %v4169_v32 = vpop.f32.mrb[27].mxu1  ;;  %4467 = vmatprep.subr.bf16.mxu1 %v12365_v18  ;;  %v1041_v61 = vld [vmem:[%s20396_s2 + $0xd58] sm:$0xff] }
 0x20f   : > { %v13933_v56 = vadd.f32 %v4983_v24, %v16682_v54  ;;  %v4985_v60 = vpop.f32.mrb[21].mxu0  ;;  %v13840_v17 = vadd.f32 %v4169_v32, %v16620_v4  ;;  %v5394_v18 = vmul.f32 %v13838_v15, %v16242_v36  ;;  %v12380_v24 = vcombine.low %v1017_v22, %v1025_v35  ;;  %v1049_v12 = vld [vmem:[%s20396_s2 + $0xd98] sm:$0xff] }
 0x210   : > { %v16725_v46 = vadd.f32 %v4985_v60, %v16700_v39  ;;  %v4987_v53 = vpop.f32.mrb[22].mxu0  ;;  %4441 = vmatmul.mubr.bf16.gmra.mrb[76].mxu1 %v16729_v34  ;;  %vm5233_vm10 = vcmp.gt.f32.partialorder %v13838_v15, 0.0  ;;  %v12397_v60 = vcombine.high %v1033_v51, %v1041_v61  ;;  %v12396_v57 = vcombine.low %v1033_v51, %v1041_v61 }
 0x211   : > { %v5371_v32 = vmul.f32 %v13933_v56, %v16242_v36  ;;  %v4989_v27 = vpop.f32.mrb[23].mxu0  ;;  %vm5249_vm11 = vcmp.gt.f32.partialorder %v13840_v17, 0.0  ;;  %v5410_v40 = vmul.f32 %v13840_v17, %v16242_v36  ;;  %4468 = vmatpush1.bf16.msra.mxu1 %v12364_v7  ;;  %4483 = vmatprep.mubr.bf16.mxu1 %v16735_v44  ;;  %vm5210_vm12 = vcmp.gt.f32.partialorder %v13933_v56, 0.0  ;;  %v1057_v7 = vld [vmem:[%s20396_s2 + $0xdd8] sm:$0xff] }
 0x212   : > { %20415 = vst [vmem:[#allocation21_spill] sm:$0xff] %v16725_v46  ;;  %4469 = vmatprep.subr.bf16.mxu1 %v12381_v26  ;;  %v13935_v22 = vadd.f32 %v4987_v53, %v16682_v54  ;;  %v16740_v35 = vadd.f32 %v4989_v27, %v16700_v39  ;;  %v16756_v27 = vsel %vm5233_vm10, %v13838_v15, %v5394_v18  ;;  %v1073_v15 = vld [vmem:[%s20396_s2 + $0xe58] sm:$0xff] }
 0x213   : > { %v16742_v8 = vpop.f32.mrb[28].mxu1  ;;  %v16750_v46 = vsel %vm5249_vm11, %v13840_v17, %v5410_v40  ;;  %v16752_v26 = vsel %vm5210_vm12, %v13933_v56, %v5371_v32  ;;  %20419 = vst [vmem:[#allocation25_spill] sm:$0xff] %v16756_v27  ;;  %v12413_v40 = vcombine.high %v1049_v12, %v1057_v7  ;;  %v1065_v32 = vld [vmem:[%s20396_s2 + $0xe18] sm:$0xff]  ;;  %v13839_v18 = vadd.f32 %v4167_v21, %v16611_v0 }
 0x214   : > { %20416 = vst [vmem:[#allocation22_spill] sm:$0xff] %v16740_v35  ;;  %20417 = vst [vmem:[#allocation23_spill] sm:$0xff] %v16750_v46  ;;  %v4175_v59 = vpop.f32.mrb[29].mxu1  ;;  %vm5226_vm13 = vcmp.gt.f32.partialorder %v13935_v22, 0.0  ;;  %v5387_v53 = vmul.f32 %v13935_v22, %v16242_v36  ;;  %v13837_v51 = vadd.f32 %v16689_v45, %v16611_v0  ;;  %v12429_v21 = vcombine.high %v1065_v32, %v1073_v15 }
 0x215   : > { %20418 = vst [vmem:[#allocation24_spill] sm:$0xff] %v16752_v26  ;;  %v16758_v35 = vpop.f32.mrb[30].mxu1  ;;  %4470 = vmatpush1.bf16.msra.mxu1 %v12380_v24  ;;  %vm5248_vm14 = vcmp.gt.f32.partialorder %v13839_v18, 0.0 }
 0x216   : > { %v4993_v63 = vpop.f32.mrb[24].mxu0  ;;  %v4179_v50 = vpop.f32.mrb[31].mxu1  ;;  %4471 = vmatprep.subr.bf16.mxu1 %v12397_v60  ;;  %v16762_v17 = vsel %vm5226_vm13, %v13935_v22, %v5387_v53  ;;  %v12412_v53 = vcombine.low %v1049_v12, %v1057_v7  ;;  %v5409_v12 = vmul.f32 %v13839_v18, %v16242_v36  ;;  %v13842_v7 = vadd.f32 %v4175_v59, %v16620_v4  ;;  %v16805_v59 = vld [vmem:[%s20396_s2 + $0xf58] sm:$0xff] }
 0x217   : > { %20420 = vst [vmem:[#allocation26_spill] sm:$0xff] %v16762_v17  ;;  %v4995_v56 = vpop.f32.mrb[25].mxu0  ;;  %v16774_v24 = vadd.f32 %v4993_v63, %v16682_v54  ;;  %v13844_v63 = vadd.f32 %v4179_v50, %v16620_v4  ;;  %v5393_v50 = vmul.f32 %v13837_v51, %v16242_v36  ;;  %vm5232_vm15 = vcmp.gt.f32.partialorder %v13837_v51, 0.0 }
 0x218   : > { %v4997_v61 = vpop.f32.mrb[26].mxu0  ;;  %v16777_v60 = vadd.f32 %v4995_v56, %v16700_v39  ;;  %v1081_v56 = vld [vmem:[%s20396_s2 + $0xe98] sm:$0xff]  ;;  %v16826_v47 = vsel %vm5248_vm14, %v13839_v18, %v5409_v12  ;;  %vm5265_vm1 = vcmp.gt.f32.partialorder %v13842_v7, 0.0  ;;  %v13841_v18 = vadd.f32 %v16742_v8, %v16611_v0  ;;  %v16860_v8 = vld [vmem:[%s20396_s2 + $0xa8] sm:$0xff] }
 0x219   : > { %20421 = vst [vmem:[#allocation27_spill] sm:$0xff] %v16774_v24  ;;  %v4999_v22 = vpop.f32.mrb[27].mxu0  ;;  %4472 = vmatpush1.bf16.msra.mxu1 %v12396_v57  ;;  %v16780_v58 = vadd.f32 %v4997_v61, %v16682_v54  ;;  %v1089_v57 = vld [vmem:[%s20396_s2 + $0xed8] sm:$0xff]  ;;  %vm5281_vm0 = vcmp.gt.f32.partialorder %v13844_v63, 0.0  ;;  %20427 = vst [vmem:[#allocation33_spill] sm:$0xff] %v16826_v47  ;;  %v13843_v12 = vadd.f32 %v16758_v35, %v16611_v0 }
 0x21a   : > { %20422 = vst [vmem:[#allocation28_spill] sm:$0xff] %v16777_v60  ;;  %v16783_v27 = vadd.f32 %v4999_v22, %v16700_v39  ;;  %4473 = vmatprep.subr.bf16.mxu1 %v12413_v40  ;;  %v12428_v40 = vcombine.low %v1065_v32, %v1073_v15  ;;  %v12445_v17 = vcombine.high %v1081_v56, %v1089_v57  ;;  %v16818_v24 = vld [vmem:[%s20396_s2 + $0xf98] sm:$0xff]  ;;  %vm5264_vm2 = vcmp.gt.f32.partialorder %v13841_v18, 0.0 }
 0x21b   : > { %20423 = vst [vmem:[#allocation29_spill] sm:$0xff] %v16780_v58  ;;  %v4183_v46 = vpop.f32.mrb[32].mxu1  ;;  %v16800_v58 = vld [vmem:[%s20396_s2 + $0xf18] sm:$0xff]  ;;  %v5442_v15 = vmul.f32 %v13844_v63, %v16242_v36  ;;  %v5426_v60 = vmul.f32 %v13842_v7, %v16242_v36  ;;  %vm5280_vm3 = vcmp.gt.f32.partialorder %v13843_v12, 0.0 }
 0x21c   : > { %20424 = vst [vmem:[#allocation30_spill] sm:$0xff] %v16783_v27  ;;  %v4185_v61 = vpop.f32.mrb[33].mxu1  ;;  %v12461_v55 = vcombine.high %v16800_v58, %v16805_v59  ;;  %v13845_v35 = vadd.f32 %v4183_v46, %v16611_v0 }
 0x21d   : > { %v4187_v45 = vpop.f32.mrb[34].mxu1  ;;  %4474 = vmatpush1.bf16.msra.mxu1 %v12412_v53  ;;  %v13846_v41 = vadd.f32 %v4185_v61, %v16620_v4  ;;  %v5425_v61 = vmul.f32 %v13841_v18, %v16242_v36 }
 0x21e   : > { %v5003_v22 = vpop.f32.mrb[28].mxu0  ;;  %v4189_v26 = vpop.f32.mrb[35].mxu1  ;;  %4475 = vmatprep.subr.bf16.mxu1 %v12429_v21  ;;  %vm5296_vm4 = vcmp.gt.f32.partialorder %v13845_v35, 0.0 }
 0x21f   : > { %v16808_v27 = vadd.f32 %v5003_v22, %v16682_v54  ;;  %v5005_v32 = vpop.f32.mrb[29].mxu0  ;;  %v16823_v22 = vld [vmem:[%s20396_s2 + $0xfd8] sm:$0xff]  ;;  %v13848_v29 = vadd.f32 %v4189_v26, %v16620_v4  ;;  %vm5297_vm5 = vcmp.gt.f32.partialorder %v13846_v41, 0.0 }
 0x220   : > { %v16812_v53 = vadd.f32 %v5005_v32, %v16700_v39  ;;  %v5007_v21 = vpop.f32.mrb[30].mxu0  ;;  %v12444_v32 = vcombine.low %v1081_v56, %v1089_v57 }
 0x221   : > { %20425 = vst [vmem:[#allocation31_spill] sm:$0xff] %v16808_v27  ;;  %v5009_v27 = vpop.f32.mrb[31].mxu0  ;;  %4476 = vmatpush1.bf16.msra.mxu1 %v12428_v40  ;;  %v16845_v56 = vadd.f32 %v5007_v21, %v16682_v54  ;;  %v12477_v21 = vcombine.high %v16818_v24, %v16823_v22  ;;  %vm5313_vm6 = vcmp.gt.f32.partialorder %v13848_v29, 0.0 }
 0x222   : > { %20426 = vst [vmem:[#allocation32_spill] sm:$0xff] %v16812_v53  ;;  %v12460_v53 = vcombine.low %v16800_v58, %v16805_v59  ;;  %4477 = vmatprep.subr.bf16.mxu1 %v12445_v17  ;;  %v16848_v57 = vadd.f32 %v5009_v27, %v16700_v39  ;;  %v16851_v58 = vsel %vm5232_vm15, %v13837_v51, %v5393_v50  ;;  %v16865_v27 = vld [vmem:[%s20396_s2 + $0xe8] sm:$0xff] }
 0x223   : > { %20428 = vst [vmem:[#allocation34_spill] sm:$0xff] %v16845_v56  ;;  %20430 = vst [vmem:[#allocation36_spill] sm:$0xff] %v16851_v58  ;;  %v4193_v40 = vpop.f32.mrb[36].mxu1  ;;  %v12476_v59 = vcombine.low %v16818_v24, %v16823_v22  ;;  %v16870_v51 = vsel %vm5281_vm0, %v13844_v63, %v5442_v15  ;;  %v11985_v56 = vcombine.high %v16835_v48, %v16840_v43 }
 0x224   : > { %20429 = vst [vmem:[#allocation35_spill] sm:$0xff] %v16848_v57  ;;  %20431 = vst [vmem:[#allocation37_spill] sm:$0xff] %v16870_v51  ;;  %v4195_v50 = vpop.f32.mrb[37].mxu1  ;;  %v16878_v57 = vsel %vm5265_vm1, %v13842_v7, %v5426_v60  ;;  %v13847_v24 = vadd.f32 %v4187_v45, %v16611_v0  ;;  %v5458_v51 = vmul.f32 %v13846_v41, %v16242_v36 }
 0x225   : > { %20432 = vst [vmem:[#allocation38_spill] sm:$0xff] %v16878_v57  ;;  %v4197_v17 = vpop.f32.mrb[38].mxu1  ;;  %4478 = vmatpush1.bf16.msra.mxu1 %v12444_v32  ;;  %v5441_v32 = vmul.f32 %v13843_v12, %v16242_v36  ;;  %v13850_v45 = vadd.f32 %v4195_v50, %v16620_v4  ;;  %v5474_v58 = vmul.f32 %v13848_v29, %v16242_v36 }
 0x226   : > { %v5013_v46 = vpop.f32.mrb[32].mxu0  ;;  %v4199_v22 = vpop.f32.mrb[39].mxu1  ;;  %4479 = vmatprep.subr.bf16.mxu1 %v12461_v55  ;;  %v13849_v55 = vadd.f32 %v4193_v40, %v16611_v0  ;;  %vm5312_vm7 = vcmp.gt.f32.partialorder %v13847_v24, 0.0 }
 0x227   : > { %v16890_v7 = vadd.f32 %v5013_v46, %v16682_v54  ;;  %v5015_v26 = vpop.f32.mrb[33].mxu0  ;;  %v13852_v63 = vadd.f32 %v4199_v22, %v16620_v4  ;;  %v5457_v46 = vmul.f32 %v13845_v35, %v16242_v36  ;;  %v5473_v22 = vmul.f32 %v13847_v24, %v16242_v36 }
 0x228   : > { %v16896_v15 = vadd.f32 %v5015_v26, %v16700_v39  ;;  %v5017_v57 = vpop.f32.mrb[34].mxu0  ;;  %v13851_v4 = vadd.f32 %v4197_v17, %v16611_v0  ;;  %v16913_v47 = vsel %vm5280_vm3, %v13843_v12, %v5441_v32  ;;  %vm5329_vm9 = vcmp.gt.f32.partialorder %v13850_v45, 0.0 }
 0x229   : > { %v5019_v60 = vpop.f32.mrb[35].mxu0  ;;  %4480 = vmatpush1.bf16.msra.mxu1 %v12460_v53  ;;  %v16905_v26 = vadd.f32 %v5017_v57, %v16682_v54  ;;  %v5506_v50 = vmul.f32 %v13852_v63, %v16242_v36  ;;  %v5489_v53 = vmul.f32 %v13849_v55, %v16242_v36  ;;  %vm5345_vm8 = vcmp.gt.f32.partialorder %v13852_v63, 0.0 }
 0x22a   : > { %20433 = vst [vmem:[#allocation39_spill] sm:$0xff] %v16896_v15  ;;  %4481 = vmatprep.subr.bf16.mxu1 %v12477_v21  ;;  %v16908_v40 = vadd.f32 %v5019_v60, %v16700_v39  ;;  %v5490_v15 = vmul.f32 %v13850_v45, %v16242_v36  ;;  %v16918_v21 = vsel %vm5264_vm2, %v13841_v18, %v5425_v61  ;;  %vm5328_vm10 = vcmp.gt.f32.partialorder %v13849_v55, 0.0 }
 0x22b   : > { %v16923_v0 = vsel %vm5297_vm5, %v13846_v41, %v5458_v51  ;;  %v16926_v12 = vsel %vm5313_vm6, %v13848_v29, %v5474_v58  ;;  %v16937_v61 = vsel %vm5312_vm7, %v13847_v24, %v5473_v22  ;;  %v5505_v41 = vmul.f32 %v13851_v4, %v16242_v36  ;;  %v651_v29 = vld [vmem:[%s20396_s2 + $0x128] sm:$0xff] }
 0x22c   : > { %v16952_v24 = vsel %vm5345_vm8, %v13852_v63, %v5506_v50  ;;  %vm5344_vm11 = vcmp.gt.f32.partialorder %v13851_v4, 0.0  ;;  %v20435_v18 = vcombine.low %v16835_v48, %v16840_v43  ;;  %v12000_v63 = vcombine.low %v16860_v8, %v16865_v27  ;;  %v16970_v50 = vld [vmem:[%s15255_s17 + $0x2c] ss:$16 sps:$4 sm:$0xff]  }
 0x22d   : > { %4482 = vmatpush1.bf16.msra.mxu1 %v12476_v59  ;;  %v16934_v59 = vsel %vm5296_vm4, %v13845_v35, %v5457_v46  ;;  %v16955_v46 = vld [vmem:[%s15255_s17 + $0x8] ss:$16 sps:$4 sm:$0xff]  }
 0x22e   : > { %v5023_v57 = vpop.f32.mrb[36].mxu0  ;;  %4700 = vmatprep.subr.bf16.mxu1 %v11985_v56  ;;  %v659_v56 = vld [vmem:[%s20396_s2 + $0x168] sm:$0xff] }
 0x22f   : > { %v16929_v17 = vadd.f32 %v5023_v57, %v16682_v54  ;;  %v5025_v32 = vpop.f32.mrb[37].mxu0  ;;  %v12017_v43 = vcombine.high %v651_v29, %v659_v56  ;;  %v667_v48 = vld [vmem:[%s20396_s2 + $0x1a8] sm:$0xff] }
 0x230   : > { %v16947_v58 = vadd.f32 %v5025_v32, %v16700_v39  ;;  %v5027_v51 = vpop.f32.mrb[38].mxu0  ;;  %4484 = vmatmul.mubr.bf16.vlgmr.msra.gmra.mrb[60].mxu1 %v16955_v46  ;;  %v16962_v32 = vsel %vm5329_vm9, %v13850_v45, %v5490_v15  ;;  %v20436_v15 = vcombine.high %v16860_v8, %v16865_v27  ;;  %v675_v45 = vld [vmem:[%s20396_s2 + $0x1e8] sm:$0xff]  ;;  %v12016_v27 = vcombine.low %v651_v29, %v659_v56 }
 0x231   : > { %v16959_v22 = vadd.f32 %v5027_v51, %v16682_v54  ;;  %v5029_v57 = vpop.f32.mrb[39].mxu0  ;;  %20434 = vst [vmem:[#allocation40_spill] sm:$0xff] %v16962_v32  ;;  %4701 = vmatpush1.bf16.msra.mxu1 %v20435_v18  ;;  %4493 = vmatprep.mubr.bf16.mxu1 %v16970_v50  ;;  %v16991_v18 = vsel %vm5344_vm11, %v13851_v4, %v5505_v41  ;;  %v699_v29 = vld [vmem:[%s20396_s2 + $0x2a8] sm:$0xff] }
 0x232   : > { %v16974_v35 = vadd.f32 %v5029_v57, %v16700_v39  ;;  %4702 = vmatprep.subr.bf16.mxu1 %v20436_v15  ;;  %v16988_v39 = vsel %vm5328_vm10, %v13849_v55, %v5489_v53  ;;  %20438 = vst [vmem:[#allocation42_spill] sm:$0xff] %v16991_v18  ;;  %v12033_v51 = vcombine.high %v667_v48, %v675_v45  ;;  %v683_v57 = vld [vmem:[%s20396_s2 + $0x228] sm:$0xff] }
 0x233   : > { %20437 = vst [vmem:[#allocation41_spill] sm:$0xff] %v16988_v39  ;;  %v691_v15 = vld [vmem:[%s20396_s2 + $0x268] sm:$0xff]  ;;  %v12032_v4 = vcombine.low %v667_v48, %v675_v45 }
 0x234   : > { %v17002_v55 = vld [vmem:[%s15255_s17 + $0x28] ss:$16 sps:$4 sm:$0xff]   ;;  %v17006_v53 = vld [vmem:[%s15255_s17 + $0x4c] ss:$16 sps:$4 sm:$0xff]   ;;  %v12049_v41 = vcombine.high %v683_v57, %v691_v15 }
 0x235   : > { %4703 = vmatpush1.bf16.msra.mxu1 %v12000_v63  ;;  %v707_v56 = vld [vmem:[%s20396_s2 + $0x2e8] sm:$0xff]  ;;  %v12048_v63 = vcombine.low %v683_v57, %v691_v15 }
 0x236   : > { %4704 = vmatprep.subr.bf16.mxu1 %v12017_v43  ;;  %v12065_v43 = vcombine.high %v699_v29, %v707_v56  ;;  %v715_v48 = vld [vmem:[%s20396_s2 + $0x328] sm:$0xff] }
 0x237   : > { %v723_v45 = vld [vmem:[%s20396_s2 + $0x368] sm:$0xff] }
 0x238   : > { %4494 = vmatmul.mubr.bf16.gmra.mrb[64].mxu1 %v17002_v55  ;;  %v17026_v8 = vld [vmem:[%s15255_s17 + $0x6c] ss:$16 sps:$4 sm:$0xff]   ;;  %v12081_v57 = vcombine.high %v715_v48, %v723_v45 }
 0x239   : > { %4705 = vmatpush1.bf16.msra.mxu1 %v12016_v27  ;;  %4503 = vmatprep.mubr.bf16.mxu1 %v17006_v53  ;;  %v17022_v27 = vld [vmem:[%s15255_s17 + $0x48] ss:$16 sps:$4 sm:$0xff]  }
 0x23a   : > { %4706 = vmatprep.subr.bf16.mxu1 %v12033_v51  ;;  %v12064_v51 = vcombine.low %v699_v29, %v707_v56  ;;  %v731_v15 = vld [vmem:[%s20396_s2 + $0x3a8] sm:$0xff] }
 0x23b   : > { %v747_v29 = vld [vmem:[%s20396_s2 + $0x428] sm:$0xff] }
 0x23c   : > { %v755_v56 = vld [vmem:[%s20396_s2 + $0x468] sm:$0xff] }
 0x23d   : > { %4707 = vmatpush1.bf16.msra.mxu1 %v12032_v4  ;;  %v739_v4 = vld [vmem:[%s20396_s2 + $0x3e8] sm:$0xff] }
 0x23e   : > { %4708 = vmatprep.subr.bf16.mxu1 %v12049_v41  ;;  %v12080_v41 = vcombine.low %v715_v48, %v723_v45  ;;  %v12097_v54 = vcombine.high %v731_v15, %v739_v4  ;;  %v763_v48 = vld [vmem:[%s20396_s2 + $0x4a8] sm:$0xff] }
 0x23f   : > { %v771_v45 = vld [vmem:[%s20396_s2 + $0x4e8] sm:$0xff] }
 0x240   : > { %4504 = vmatmul.mubr.bf16.gmra.mrb[68].mxu1 %v17022_v27 }
 0x241   : > { %4709 = vmatpush1.bf16.msra.mxu1 %v12048_v63  ;;  %4513 = vmatprep.mubr.bf16.mxu1 %v17026_v8  ;;  %v12096_v63 = vcombine.low %v731_v15, %v739_v4  ;;  %v795_v4 = vld [vmem:[%s20396_s2 + $0x5a8] sm:$0xff] }
 0x242   : > { %4710 = vmatprep.subr.bf16.mxu1 %v12065_v43  ;;  %v12113_v43 = vcombine.high %v747_v29, %v755_v56 }
 0x245   : > { %4711 = vmatpush1.bf16.msra.mxu1 %v12064_v51  ;;  %v12112_v51 = vcombine.low %v747_v29, %v755_v56 }
 0x246   : > { %4712 = vmatprep.subr.bf16.mxu1 %v12081_v57  ;;  %v12129_v57 = vcombine.high %v763_v48, %v771_v45 }
 0x248   : > { %4514 = vmatmul.mubr.bf16.gmra.mrb[72].mxu1 %v16444_v49  ;;  %v779_v49 = vld [vmem:[%s20396_s2 + $0x528] sm:$0xff] }
 0x249   : > { %4713 = vmatpush1.bf16.msra.mxu1 %v12080_v41  ;;  %4523 = vmatprep.mubr.bf16.mxu1 %v16450_v52  ;;  %v787_v52 = vld [vmem:[%s20396_s2 + $0x568] sm:$0xff] }
 0x24a   : > { %4714 = vmatprep.subr.bf16.mxu1 %v12097_v54  ;;  %v12128_v54 = vcombine.low %v763_v48, %v771_v45  ;;  %v12145_v15 = vcombine.high %v779_v49, %v787_v52  ;;  %v803_v41 = vld [vmem:[%s20396_s2 + $0x5e8] sm:$0xff]  ;;  %v12144_v29 = vcombine.low %v779_v49, %v787_v52 }
 0x24b   : > { %v12161_v56 = vcombine.high %v795_v4, %v803_v41  ;;  %v827_v48 = vld [vmem:[%s20396_s2 + $0x6a8] sm:$0xff] }
 0x24c   : > { %v835_v45 = vld [vmem:[%s20396_s2 + $0x6e8] sm:$0xff] }
 0x24d   : > { %4715 = vmatpush1.bf16.msra.mxu1 %v12096_v63  ;;  %v12160_v63 = vcombine.low %v795_v4, %v803_v41  ;;  %v843_v49 = vld [vmem:[%s20396_s2 + $0x728] sm:$0xff] }
 0x24e   : > { %4716 = vmatprep.subr.bf16.mxu1 %v12113_v43  ;;  %v851_v52 = vld [vmem:[%s20396_s2 + $0x768] sm:$0xff] }
 0x24f   : > { %v12209_v4 = vcombine.high %v843_v49, %v851_v52 }
 0x250   : > { %4524 = vmatmul.mubr.bf16.gmra.mrb[76].mxu1 %v16476_v1  ;;  %v811_v1 = vld [vmem:[%s20396_s2 + $0x628] sm:$0xff] }
 0x251   : > { %4717 = vmatpush1.bf16.msra.mxu1 %v12112_v51  ;;  %4732 = vmatprep.mubr.bf16.mxu1 %v16486_v5  ;;  %v819_v5 = vld [vmem:[%s20396_s2 + $0x668] sm:$0xff] }
 0x252   : > { %4718 = vmatprep.subr.bf16.mxu1 %v12129_v57  ;;  %v12177_v43 = vcombine.high %v811_v1, %v819_v5  ;;  %v12176_v51 = vcombine.low %v811_v1, %v819_v5  ;;  %v12193_v57 = vcombine.high %v827_v48, %v835_v45 }
 0x255   : > { %4719 = vmatpush1.bf16.msra.mxu1 %v12128_v54  ;;  %v12192_v54 = vcombine.low %v827_v48, %v835_v45  ;;  %v875_v45 = vld [vmem:[%s20396_s2 + $0x828] sm:$0xff] }
 0x256   : > { %4720 = vmatprep.subr.bf16.mxu1 %v12145_v15 }
 0x259   : > { %4721 = vmatpush1.bf16.msra.mxu1 %v12144_v29  ;;  %v859_v29 = vld [vmem:[%s20396_s2 + $0x7a8] sm:$0xff] }
 0x25a   : > { %4722 = vmatprep.subr.bf16.mxu1 %v12161_v56  ;;  %v867_v56 = vld [vmem:[%s20396_s2 + $0x7e8] sm:$0xff] }
 0x25b   : > { %v12225_v48 = vcombine.high %v859_v29, %v867_v56  ;;  %v12224_v60 = vcombine.low %v859_v29, %v867_v56  ;;  %v907_v56 = vld [vmem:[%s20396_s2 + $0x928] sm:$0xff] }
 0x25d   : > { %4723 = vmatpush1.bf16.msra.mxu1 %v12160_v63 }
 0x25e   : > { %4724 = vmatprep.subr.bf16.mxu1 %v12177_v43  ;;  %v12208_v43 = vcombine.low %v843_v49, %v851_v52  ;;  %v891_v49 = vld [vmem:[%s20396_s2 + $0x8a8] sm:$0xff] }
 0x25f   : > { %v899_v52 = vld [vmem:[%s20396_s2 + $0x8e8] sm:$0xff] }
 0x260   : > { %v12257_v29 = vcombine.high %v891_v49, %v899_v52 }
 0x261   : > { %4725 = vmatpush1.bf16.msra.mxu1 %v12176_v51 }
 0x262   : > { %v13098_v15 = vpop.f32.mrb[40].mxu0  ;;  %4726 = vmatprep.subr.bf16.mxu1 %v12193_v57  ;;  %v883_v57 = vld [vmem:[%s20396_s2 + $0x868] sm:$0xff] }
 0x263   : > { %v13099_v41 = vpop.f32.mrb[41].mxu0 }
 0x264   : > { %v17087_v1 = vadd.f32 %v13099_v41, %v13098_v15  ;;  %v13101_v5 = vpop.f32.mrb[42].mxu0  ;;  %v12241_v41 = vcombine.high %v875_v45, %v883_v57 }
 0x265   : > { %4727 = vmatpush1.bf16.msra.mxu1 %v12192_v54  ;;  %v13102_v63 = vpop.f32.mrb[43].mxu0 }
 0x266   : > { %20439 = vst [vmem:[#allocation43_spill] sm:$0xff] %v17087_v1  ;;  %v17089_v51 = vadd.f32 %v13102_v63, %v13101_v5  ;;  %4728 = vmatprep.subr.bf16.mxu1 %v12209_v4 }
 0x268   : > { %20440 = vst [vmem:[#allocation44_spill] sm:$0xff] %v17089_v51  ;;  %v12240_v51 = vcombine.low %v875_v45, %v883_v57 }
 0x269   : > { %4729 = vmatpush1.bf16.msra.mxu1 %v12208_v43 }
 0x26a   : > { %v13104_v15 = vpop.f32.mrb[44].mxu0  ;;  %4730 = vmatprep.subr.bf16.mxu1 %v12225_v48  ;;  %v915_v48 = vld [vmem:[%s20396_s2 + $0x968] sm:$0xff] }
 0x26b   : > { %v13105_v54 = vpop.f32.mrb[45].mxu0  ;;  %v12273_v45 = vcombine.high %v907_v56, %v915_v48 }
 0x26c   : > { %v17103_v4 = vadd.f32 %v13105_v54, %v13104_v15  ;;  %v13107_v5 = vpop.f32.mrb[46].mxu0  ;;  %v12256_v15 = vcombine.low %v891_v49, %v899_v52  ;;  %v931_v54 = vld [vmem:[%s20396_s2 + $0x9e8] sm:$0xff] }
 0x26d   : > { %4731 = vmatpush1.bf16.msra.mxu1 %v12224_v60  ;;  %v13108_v63 = vpop.f32.mrb[47].mxu0  ;;  %v939_v52 = vld [vmem:[%s20396_s2 + $0xa28] sm:$0xff] }
 0x26e   : > { %20441 = vst [vmem:[#allocation45_spill] sm:$0xff] %v17103_v4  ;;  %v17105_v43 = vadd.f32 %v13108_v63, %v13107_v5  ;;  %4783 = vmatprep.subr.bf16.mxu1 %v12241_v41  ;;  %v923_v41 = vld [vmem:[%s20396_s2 + $0x9a8] sm:$0xff] }
 0x270   : > { %20442 = vst [vmem:[#allocation46_spill] sm:$0xff] %v17105_v43  ;;  %4733 = vmatmul.mubr.bf16.vlgmr.msra.gmra.mrb[80].mxu1 %v16538_v3 }
 0x271   : > { %4784 = vmatpush1.bf16.msra.mxu1 %v12240_v51  ;;  %4742 = vmatprep.mubr.bf16.mxu1 %v16542_v6  ;;  %v12272_v51 = vcombine.low %v907_v56, %v915_v48  ;;  %v12289_v6 = vcombine.high %v923_v41, %v931_v54 }
 0x272   : > { %v13110_v60 = vpop.f32.mrb[48].mxu0  ;;  %4785 = vmatprep.subr.bf16.mxu1 %v12257_v29  ;;  %v947_v29 = vld [vmem:[%s20396_s2 + $0xa68] sm:$0xff] }
 0x273   : > { %v13111_v57 = vpop.f32.mrb[49].mxu0  ;;  %v12305_v56 = vcombine.high %v939_v52, %v947_v29 }
 0x274   : > { %v17121_v5 = vadd.f32 %v13111_v57, %v13110_v60  ;;  %v13113_v63 = vpop.f32.mrb[50].mxu0  ;;  %v12288_v60 = vcombine.low %v923_v41, %v931_v54  ;;  %v963_v57 = vld [vmem:[%s20396_s2 + $0xae8] sm:$0xff]  ;;  %v12304_v41 = vcombine.low %v939_v52, %v947_v29  ;;  %v20448_v52 = vsub.s32 5, %v16203_v13 }
 0x275   : > { %4786 = vmatpush1.bf16.msra.mxu1 %v12256_v15  ;;  %v13114_v3 = vpop.f32.mrb[51].mxu0 }
 0x276   : > { %20443 = vst [vmem:[#allocation47_spill] sm:$0xff] %v17121_v5  ;;  %v17123_v49 = vadd.f32 %v13114_v3, %v13113_v63  ;;  %4787 = vmatprep.subr.bf16.mxu1 %v12273_v45  ;;  %v955_v45 = vld [vmem:[%s20396_s2 + $0xaa8] sm:$0xff]  ;;  %v17158_v29 = vrot.slane %v16606_v62, %v20448_v52 }
 0x278   : > { %20444 = vst [vmem:[#allocation48_spill] sm:$0xff] %v17123_v49  ;;  %4743 = vmatmul.mubr.bf16.gmra.mrb[84].mxu1 %v16570_v28  ;;  %v20447_v49 = vsub.s32 4, %v16203_v13 }
 0x279   : > { %4788 = vmatpush1.bf16.msra.mxu1 %v12272_v51  ;;  %4752 = vmatprep.mubr.bf16.mxu1 %v16574_v33  ;;  %v12321_v33 = vcombine.high %v955_v45, %v963_v57  ;;  %v971_v51 = vld [vmem:[%s20396_s2 + $0xb28] sm:$0xff] }
 0x27a   : > { %v13116_v15 = vpop.f32.mrb[52].mxu0  ;;  %4789 = vmatprep.subr.bf16.mxu1 %v12289_v6  ;;  %v979_v6 = vld [vmem:[%s20396_s2 + $0xb68] sm:$0xff] }
 0x27b   : > { %v13117_v48 = vpop.f32.mrb[53].mxu0 }
 0x27c   : > { %v17139_v63 = vadd.f32 %v13117_v48, %v13116_v15  ;;  %v13119_v3 = vpop.f32.mrb[54].mxu0  ;;  %v17152_v15 = vrot.slane %v16606_v62, %v20447_v49  ;;  %v12337_v48 = vcombine.high %v971_v51, %v979_v6  ;;  %v987_v49 = vld [vmem:[%s20396_s2 + $0xba8] sm:$0xff] }
 0x27d   : > { %4790 = vmatpush1.bf16.msra.mxu1 %v12288_v60  ;;  %v13120_v28 = vpop.f32.mrb[55].mxu0  ;;  %v12320_v60 = vcombine.low %v955_v45, %v963_v57 }
 0x27e   : > { %20445 = vst [vmem:[#allocation49_spill] sm:$0xff] %v17139_v63  ;;  %v17141_v54 = vadd.f32 %v13120_v28, %v13119_v3  ;;  %4791 = vmatprep.subr.bf16.mxu1 %v12305_v56 }
 0x280   : > { %20446 = vst [vmem:[#allocation50_spill] sm:$0xff] %v17141_v54  ;;  %4753 = vmatmul.mubr.bf16.gmra.mrb[88].mxu1 %v16614_v2  ;;  %v995_v2 = vld [vmem:[%s20396_s2 + $0xbe8] sm:$0xff]  ;;  %v12336_v54 = vcombine.low %v971_v51, %v979_v6  ;;  %v12486_v6 = vld [vmem:[%s20340_s4] ss:$0 sm:$0xff] }
 0x281   : > { %4792 = vmatpush1.bf16.msra.mxu1 %v12304_v41  ;;  %4762 = vmatprep.mubr.bf16.mxu1 %v16623_v9  ;;  %v12353_v4 = vcombine.high %v987_v49, %v995_v2  ;;  %v1011_v51 = vld [vmem:[%s20396_s2 + $0xc68] sm:$0xff] }
 0x282   : > { %v13122_v56 = vpop.f32.mrb[56].mxu0  ;;  %4793 = vmatprep.subr.bf16.mxu1 %v12321_v33 }
 0x283   : > { %v4319_v3 = vpop.f32.mrb[40].mxu1  ;;  %v13123_v28 = vpop.f32.mrb[57].mxu0 }
 0x284   : > { %v13853_v41 = vadd.f32 %v4319_v3, %v17152_v15  ;;  %v17168_v62 = vadd.f32 %v13123_v28, %v13122_v56  ;;  %v4321_v45 = vpop.f32.mrb[41].mxu1  ;;  %v13125_v57 = vpop.f32.mrb[58].mxu0 }
 0x285   : > { %v13854_v9 = vadd.f32 %v4321_v45, %v17158_v29  ;;  %v4323_v33 = vpop.f32.mrb[42].mxu1  ;;  %4794 = vmatpush1.bf16.msra.mxu1 %v12320_v60  ;;  %v13126_v52 = vpop.f32.mrb[59].mxu0  ;;  %v1003_v45 = vld [vmem:[%s20396_s2 + $0xc28] sm:$0xff] }
 0x286   : > { %20449 = vst [vmem:[#allocation51_spill] sm:$0xff] %v17168_v62  ;;  %v5363_v63 = vmul.f32 %v13853_v41, %v16242_v36  ;;  %v13855_v5 = vadd.f32 %v4323_v33, %v17152_v15  ;;  %v4325_v43 = vpop.f32.mrb[43].mxu1  ;;  %4795 = vmatprep.subr.bf16.mxu1 %v12337_v48  ;;  %vm5202_vm12 = vcmp.gt.f32.partialorder %v13853_v41, 0.0  ;;  %v13127_v56 = vadd.f32 %v13126_v52, %v13125_v57 }
 0x287   : > { %v5364_v3 = vmul.f32 %v13854_v9, %v16242_v36  ;;  %v13856_v28 = vadd.f32 %v4325_v43, %v17158_v29  ;;  %vm5203_vm13 = vcmp.gt.f32.partialorder %v13854_v9, 0.0  ;;  %v12352_v57 = vcombine.low %v987_v49, %v995_v2 }
 0x288   : > { %vm5218_vm14 = vcmp.gt.f32.partialorder %v13855_v5, 0.0  ;;  %v5379_v60 = vmul.f32 %v13855_v5, %v16242_v36  ;;  %4763 = vmatmul.mubr.bf16.gmra.mrb[92].mxu1 %v16662_v14  ;;  %v17186_v48 = vadd.f32 %v13127_v56, %v12486_v6  ;;  %v5523_v33 = vsel %vm5202_vm12, %v13853_v41, %v5363_v63  ;;  %v1019_v14 = vld [vmem:[%s20396_s2 + $0xca8] sm:$0xff] }
 0x289   : > { %vm5219_vm15 = vcmp.gt.f32.partialorder %v13856_v28, 0.0  ;;  %v5380_v43 = vmul.f32 %v13856_v28, %v16242_v36  ;;  %4796 = vmatpush1.bf16.msra.mxu1 %v12336_v54  ;;  %4772 = vmatprep.mubr.bf16.mxu1 %v16670_v19  ;;  %v12369_v62 = vcombine.high %v1003_v45, %v1011_v51  ;;  %v5524_v18 = vsel %vm5203_vm13, %v13854_v9, %v5364_v3  ;;  %v1027_v54 = vld [vmem:[%s20396_s2 + $0xce8] sm:$0xff] }
 0x28a   : > { %v5539_v52 = vsel %vm5218_vm14, %v13855_v5, %v5379_v60  ;;  %4797 = vmatprep.subr.bf16.mxu1 %v12353_v4  ;;  %v12368_v2 = vcombine.low %v1003_v45, %v1011_v51  ;;  %v12385_v56 = vcombine.high %v1019_v14, %v1027_v54  ;;  %v12384_v51 = vcombine.low %v1019_v14, %v1027_v54 }
 0x28b   : > { %v5683_v1 = vpack.c.bf16 %v5539_v52, %v5523_v33  ;;  %v4329_v39 = vpop.f32.mrb[44].mxu1  ;;  %v5540_v32 = vsel %vm5219_vm15, %v13856_v28, %v5380_v43 }
 0x28c   : > { %v13857_v19 = vadd.f32 %v4329_v39, %v17152_v15  ;;  %v4331_v49 = vpop.f32.mrb[45].mxu1  ;;  %v5684_v63 = vpack.c.bf16 %v5540_v32, %v5524_v18  ;;  %v1035_v32 = vld [vmem:[%s20396_s2 + $0xd28] sm:$0xff] }
 0x28d   : > { %v13858_v4 = vadd.f32 %v4331_v49, %v17158_v29  ;;  %v4333_v5 = vpop.f32.mrb[46].mxu1  ;;  %4798 = vmatpush1.bf16.msra.mxu1 %v12352_v57  ;;  %v1043_v18 = vld [vmem:[%s20396_s2 + $0xd68] sm:$0xff] }
 0x28e   : > { %v5395_v41 = vmul.f32 %v13857_v19, %v16242_v36  ;;  %v13859_v9 = vadd.f32 %v4333_v5, %v17152_v15  ;;  %v4335_v3 = vpop.f32.mrb[47].mxu1  ;;  %6968 = vmatprep.mubr.bf16.mxu0 %v5684_v63  ;;  %4799 = vmatprep.subr.bf16.mxu1 %v12369_v62  ;;  %vm5234_vm0 = vcmp.gt.f32.partialorder %v13857_v19, 0.0  ;;  %v12401_v60 = vcombine.high %v1035_v32, %v1043_v18  ;;  %v1059_v49 = vld [vmem:[%s20396_s2 + $0xde8] sm:$0xff] }
 0x28f   : > { %v5396_v28 = vmul.f32 %v13858_v4, %v16242_v36  ;;  %v13860_v39 = vadd.f32 %v4335_v3, %v17158_v29  ;;  %6969 = vmatmul.mubr.bf16.vlgmr.msra.gmra.mrb[60].mxu0 %v5683_v1  ;;  %vm5235_vm1 = vcmp.gt.f32.partialorder %v13858_v4, 0.0  ;;  %v12400_v5 = vcombine.low %v1035_v32, %v1043_v18 }
 0x290   : > { %vm5250_vm2 = vcmp.gt.f32.partialorder %v13859_v9, 0.0  ;;  %v5411_v45 = vmul.f32 %v13859_v9, %v16242_v36  ;;  %4773 = vmatmul.mubr.bf16.gmra.mrb[96].mxu1 %v16729_v34  ;;  %v5555_v1 = vsel %vm5234_vm0, %v13857_v19, %v5395_v41  ;;  %v1051_v34 = vld [vmem:[%s20396_s2 + $0xda8] sm:$0xff] }
 0x291   : > { %vm5251_vm3 = vcmp.gt.f32.partialorder %v13860_v39, 0.0  ;;  %v5412_v62 = vmul.f32 %v13860_v39, %v16242_v36  ;;  %4800 = vmatpush1.bf16.msra.mxu1 %v12368_v2  ;;  %4815 = vmatprep.mubr.bf16.mxu1 %v16735_v44  ;;  %v5556_v57 = vsel %vm5235_vm1, %v13858_v4, %v5396_v28  ;;  %v1067_v28 = vld [vmem:[%s20396_s2 + $0xe28] sm:$0xff] }
 0x292   : > { %4801 = vmatprep.subr.bf16.mxu1 %v12385_v56  ;;  %v5571_v6 = vsel %vm5250_vm2, %v13859_v9, %v5411_v45  ;;  %v12417_v9 = vcombine.high %v1051_v34, %v1059_v49  ;;  %v12416_v45 = vcombine.low %v1051_v34, %v1059_v49 }
 0x293   : > { %v4339_v43 = vpop.f32.mrb[48].mxu1  ;;  %v5572_v33 = vsel %vm5251_vm3, %v13860_v39, %v5412_v62  ;;  %v5699_v52 = vpack.c.bf16 %v5571_v6, %v5555_v1  ;;  %v1075_v39 = vld [vmem:[%s20396_s2 + $0xe68] sm:$0xff] }
 0x294   : > { %v13861_v14 = vadd.f32 %v4339_v43, %v17152_v15  ;;  %v4341_v44 = vpop.f32.mrb[49].mxu1  ;;  %v5700_v54 = vpack.c.bf16 %v5572_v33, %v5556_v57  ;;  %v12433_v1 = vcombine.high %v1067_v28, %v1075_v39  ;;  %v1083_v33 = vld [vmem:[%s20396_s2 + $0xea8] sm:$0xff] }
 0x295   : > { %v13862_v19 = vadd.f32 %v4341_v44, %v17158_v29  ;;  %v4343_v63 = vpop.f32.mrb[50].mxu1  ;;  %4802 = vmatpush1.bf16.msra.mxu1 %v12384_v51 }
 0x296   : > { %v5427_v4 = vmul.f32 %v13861_v14, %v16242_v36  ;;  %v13863_v2 = vadd.f32 %v4343_v63, %v17152_v15  ;;  %v4345_v41 = vpop.f32.mrb[51].mxu1  ;;  %6976 = vmatprep.mubr.bf16.mxu0 %v5700_v54  ;;  %4803 = vmatprep.subr.bf16.mxu1 %v12401_v60  ;;  %vm5266_vm4 = vcmp.gt.f32.partialorder %v13861_v14, 0.0  ;;  %v12432_v63 = vcombine.low %v1067_v28, %v1075_v39 }
 0x297   : > { %v5428_v3 = vmul.f32 %v13862_v19, %v16242_v36  ;;  %v13864_v56 = vadd.f32 %v4345_v41, %v17158_v29  ;;  %6977 = vmatmul.mubr.bf16.gmra.mrb[64].mxu0 %v5699_v52  ;;  %vm5267_vm5 = vcmp.gt.f32.partialorder %v13862_v19, 0.0  ;;  %v1091_v52 = vld [vmem:[%s20396_s2 + $0xee8] sm:$0xff] }
 0x298   : > { %vm5282_vm6 = vcmp.gt.f32.partialorder %v13863_v2, 0.0  ;;  %v5443_v32 = vmul.f32 %v13863_v2, %v16242_v36  ;;  %v5587_v62 = vsel %vm5266_vm4, %v13861_v14, %v5427_v4 }
 0x299   : > { %vm5283_vm7 = vcmp.gt.f32.partialorder %v13864_v56, 0.0  ;;  %v5444_v18 = vmul.f32 %v13864_v56, %v16242_v36  ;;  %4804 = vmatpush1.bf16.msra.mxu1 %v12400_v5  ;;  %v5588_v60 = vsel %vm5267_vm5, %v13862_v19, %v5428_v3  ;;  %v1099_v3 = vld [vmem:[%s20396_s2 + $0xf28] sm:$0xff] }
 0x29a   : > { %4805 = vmatprep.subr.bf16.mxu1 %v12417_v9  ;;  %v5603_v51 = vsel %vm5282_vm6, %v13863_v2, %v5443_v32  ;;  %v12449_v2 = vcombine.high %v1083_v33, %v1091_v52  ;;  %v12448_v32 = vcombine.low %v1083_v33, %v1091_v52  ;;  %v14260_v52 = vld [vmem:[%s20339_s3 + $0x240] sm:$0xff]  }
 0x29b   : > { %v4349_v6 = vpop.f32.mrb[52].mxu1  ;;  %v5604_v43 = vsel %vm5283_vm7, %v13864_v56, %v5444_v18  ;;  %v5715_v57 = vpack.c.bf16 %v5603_v51, %v5587_v62  ;;  %v1107_v56 = vld [vmem:[%s20396_s2 + $0xf68] sm:$0xff]  ;;  %13266 = vmatprep.subr.bf16.mxu0 %v14260_v52 }
 0x29c   : > { %v13865_v44 = vadd.f32 %v4349_v6, %v17152_v15  ;;  %v4351_v54 = vpop.f32.mrb[53].mxu1  ;;  %v5716_v34 = vpack.c.bf16 %v5604_v43, %v5588_v60  ;;  %v12465_v62 = vcombine.high %v1099_v3, %v1107_v56  ;;  %v1115_v43 = vld [vmem:[%s20396_s2 + $0xfa8] sm:$0xff] }
 0x29d   : > { %v13866_v49 = vadd.f32 %v4351_v54, %v17158_v29  ;;  %v4353_v14 = vpop.f32.mrb[54].mxu1  ;;  %4806 = vmatpush1.bf16.msra.mxu1 %v12416_v45 }
 0x29e   : > { %v5459_v19 = vmul.f32 %v13865_v44, %v16242_v36  ;;  %v13867_v5 = vadd.f32 %v4353_v14, %v17152_v15  ;;  %v4355_v4 = vpop.f32.mrb[55].mxu1  ;;  %6984 = vmatprep.mubr.bf16.mxu0 %v5716_v34  ;;  %4807 = vmatprep.subr.bf16.mxu1 %v12433_v1  ;;  %vm5298_vm8 = vcmp.gt.f32.partialorder %v13865_v44, 0.0  ;;  %v12464_v14 = vcombine.low %v1099_v3, %v1107_v56  ;;  %v621_v3 = vld [vmem:[%s20396_s2 + $0x38] sm:$0xff] }
 0x29f   : > { %v5460_v41 = vmul.f32 %v13866_v49, %v16242_v36  ;;  %v13868_v9 = vadd.f32 %v4355_v4, %v17158_v29  ;;  %6985 = vmatmul.mubr.bf16.gmra.mrb[68].mxu0 %v5715_v57  ;;  %vm5299_vm9 = vcmp.gt.f32.partialorder %v13866_v49, 0.0  ;;  %v1123_v57 = vld [vmem:[%s20396_s2 + $0xfe8] sm:$0xff]  ;;  %v629_v56 = vld [vmem:[%s20396_s2 + $0x78] sm:$0xff] }
 0x2a0   : > { %vm5314_vm10 = vcmp.gt.f32.partialorder %v13867_v5, 0.0  ;;  %v5475_v28 = vmul.f32 %v13867_v5, %v16242_v36  ;;  %v5619_v18 = vsel %vm5298_vm8, %v13865_v44, %v5459_v19 }
 0x2a1   : > { %vm5315_vm11 = vcmp.gt.f32.partialorder %v13868_v9, 0.0  ;;  %v5476_v39 = vmul.f32 %v13868_v9, %v16242_v36  ;;  %4808 = vmatpush1.bf16.msra.mxu1 %v12432_v63  ;;  %v5620_v1 = vsel %vm5299_vm9, %v13866_v49, %v5460_v41  ;;  %v14261_v63 = vld [vmem:[%s20339_s3 + $0x200] sm:$0xff]  }
 0x2a2   : > { %4809 = vmatprep.subr.bf16.mxu1 %v12449_v2  ;;  %v5635_v45 = vsel %vm5314_vm10, %v13867_v5, %v5475_v28  ;;  %v12481_v2 = vcombine.high %v1115_v43, %v1123_v57  ;;  %13267 = vmatpush3.bf16.msra.mxu0 %v14261_v63  ;;  %v14262_v28 = vld [vmem:[%s20339_s3 + $0x248] sm:$0xff]   ;;  %v14267_v63 = vld [vmem:[%s20339_s3 + $0x218] sm:$0xff]  }
 0x2a3   : > { %v4359_v51 = vpop.f32.mrb[56].mxu1  ;;  %v5636_v6 = vsel %vm5315_vm11, %v13868_v9, %v5476_v39  ;;  %v5731_v60 = vpack.c.bf16 %v5635_v45, %v5619_v18  ;;  %v12480_v39 = vcombine.low %v1115_v43, %v1123_v57  ;;  %13268 = vmatprep.subr.bf16.mxu0 %v14262_v28  ;;  %v645_v43 = vld [vmem:[%s20396_s2 + $0xf8] sm:$0xff] }
 0x2a4   : > { %v13869_v54 = vadd.f32 %v4359_v51, %v17152_v15  ;;  %v4361_v34 = vpop.f32.mrb[57].mxu1  ;;  %v5732_v33 = vpack.c.bf16 %v5636_v6, %v5620_v1  ;;  %v693_v28 = vld [vmem:[%s20396_s2 + $0x278] sm:$0xff] }
 0x2a5   : > { %v13870_v44 = vadd.f32 %v4361_v34, %v17158_v29  ;;  %v4363_v49 = vpop.f32.mrb[58].mxu1  ;;  %4810 = vmatpush1.bf16.msra.mxu1 %v12448_v32  ;;  %v14263_v32 = vld [vmem:[%s20339_s3 + $0x208] sm:$0xff]   ;;  %v11988_v34 = vcombine.low %v621_v3, %v629_v56 }
 0x2a6   : > { %v5491_v19 = vmul.f32 %v13869_v54, %v16242_v36  ;;  %v13871_v5 = vadd.f32 %v4363_v49, %v17152_v15  ;;  %v4365_v4 = vpop.f32.mrb[59].mxu1  ;;  %6992 = vmatprep.mubr.bf16.mxu0 %v5732_v33  ;;  %4811 = vmatprep.subr.bf16.mxu1 %v12465_v62  ;;  %vm5330_vm12 = vcmp.gt.f32.partialorder %v13869_v54, 0.0  ;;  %v11989_v62 = vcombine.high %v621_v3, %v629_v56  ;;  %v14265_v33 = vld [vmem:[%s20339_s3 + $0x210] sm:$0xff]   ;;  %v661_v49 = vld [vmem:[%s20396_s2 + $0x178] sm:$0xff] }
 0x2a7   : > { %v5492_v41 = vmul.f32 %v13870_v44, %v16242_v36  ;;  %v13872_v9 = vadd.f32 %v4365_v4, %v17158_v29  ;;  %6993 = vmatmul.mubr.bf16.gmra.mrb[72].mxu0 %v5731_v60  ;;  %vm5331_vm13 = vcmp.gt.f32.partialorder %v13870_v44, 0.0  ;;  %v637_v60 = vld [vmem:[%s20396_s2 + $0xb8] sm:$0xff] }
 0x2a8   : > { %vm5346_vm14 = vcmp.gt.f32.partialorder %v13871_v5, 0.0  ;;  %v5507_v15 = vmul.f32 %v13871_v5, %v16242_v36  ;;  %v5651_v18 = vsel %vm5330_vm12, %v13869_v54, %v5491_v19  ;;  %13269 = vmatpush3.bf16.msra.mxu0 %v14263_v32  ;;  %v14264_v54 = vld [vmem:[%s20339_s3 + $0x250] sm:$0xff]   ;;  %v12005_v52 = vcombine.high %v637_v60, %v645_v43  ;;  %v14272_v32 = vld [vmem:[%s20339_s3 + $0x268] sm:$0xff]  }
 0x2a9   : > { %vm5347_vm15 = vcmp.gt.f32.partialorder %v13872_v9, 0.0  ;;  %v5508_v29 = vmul.f32 %v13872_v9, %v16242_v36  ;;  %4812 = vmatpush1.bf16.msra.mxu1 %v12464_v14  ;;  %v5652_v51 = vsel %vm5331_vm13, %v13870_v44, %v5492_v41  ;;  %v653_v44 = vld [vmem:[%s20396_s2 + $0x138] sm:$0xff]  ;;  %13270 = vmatprep.subr.bf16.mxu0 %v14264_v54  ;;  %v12004_v19 = vcombine.low %v637_v60, %v645_v43  ;;  %v15026_v41 = vld [vmem:[%s20398_s24 + $0x8] sm:$0xff] }
 0x2aa   : > { %4813 = vmatprep.subr.bf16.mxu1 %v12481_v2  ;;  %v5667_v45 = vsel %vm5346_vm14, %v13871_v5, %v5507_v15  ;;  %v14266_v14 = vld [vmem:[%s20339_s3 + $0x258] sm:$0xff]   ;;  %v14268_v5 = vld [vmem:[%s20339_s3 + $0x260] sm:$0xff]   ;;  %v12021_v4 = vcombine.high %v653_v44, %v661_v49  ;;  %v12020_v3 = vcombine.low %v653_v44, %v661_v49 }
 0x2ab   : > { %v5668_v1 = vsel %vm5347_vm15, %v13872_v9, %v5508_v29  ;;  %v5747_v6 = vpack.c.bf16 %v5667_v45, %v5651_v18  ;;  %v677_v2 = vld [vmem:[%s20396_s2 + $0x1f8] sm:$0xff]  ;;  %v14269_v9 = vld [vmem:[%s20339_s3 + $0x220] sm:$0xff]   ;;  %v14273_v18 = vld [vmem:[%s20339_s3 + $0x228] sm:$0xff]  }
 0x2ac   : > { %v5748_v57 = vpack.c.bf16 %v5668_v1, %v5652_v51  ;;  %13271 = vmatpush3.bf16.msra.mxu0 %v14265_v33  ;;  %v685_v15 = vld [vmem:[%s20396_s2 + $0x238] sm:$0xff] }
 0x2ad   : > { %4814 = vmatpush1.bf16.msra.mxu1 %v12480_v39  ;;  %13272 = vmatprep.subr.bf16.mxu0 %v14266_v14  ;;  %v717_v43 = vld [vmem:[%s20396_s2 + $0x338] sm:$0xff] }
 0x2ae   : > { %7000 = vmatprep.mubr.bf16.mxu0 %v5748_v57  ;;  %5032 = vmatprep.subr.bf16.mxu1 %v11989_v62  ;;  %v709_v62 = vld [vmem:[%s20396_s2 + $0x2f8] sm:$0xff] }
 0x2af   : > { %7001 = vmatmul.mubr.bf16.gmra.mrb[76].mxu0 %v5747_v6  ;;  %v12052_v6 = vcombine.low %v685_v15, %v693_v28  ;;  %v725_v57 = vld [vmem:[%s20396_s2 + $0x378] sm:$0xff] }
 0x2b0   : > { %4816 = vmatmul.mubr.bf16.vlgmr.msra.gmra.mrb[80].mxu1 %v16955_v46  ;;  %v669_v46 = vld [vmem:[%s20396_s2 + $0x1b8] sm:$0xff]  ;;  %13273 = vmatpush3.bf16.msra.mxu0 %v14267_v63  ;;  %v12085_v14 = vcombine.high %v717_v43, %v725_v57 }
 0x2b1   : > { %5033 = vmatpush1.bf16.msra.mxu1 %v11988_v34  ;;  %4825 = vmatprep.mubr.bf16.mxu1 %v16970_v50  ;;  %v17327_v50 = vrot.slane %v15026_v41, %v16220_v23  ;;  %v12037_v56 = vcombine.high %v669_v46, %v677_v2  ;;  %v12036_v45 = vcombine.low %v669_v46, %v677_v2  ;;  %v14280_v54 = vld [vmem:[%s20339_s3 + $0x278] sm:$0xff]  }
 0x2b2   : > { %5034 = vmatprep.subr.bf16.mxu1 %v12005_v52  ;;  %13274 = vmatprep.subr.bf16.mxu0 %v14268_v5  ;;  %v14281_v34 = vld [vmem:[%s20339_s3 + $0x238] sm:$0xff]   ;;  %v20450_v46 = vpack.c.bf16 %v16419_v37, %v16408_v30 }
 0x2b3   : > { %v13894_v29 = vadd.f32 %v16389_v11, %v17327_v50  ;;  %v13896_v39 = vadd.f32 %v16393_v16, %v17327_v50  ;;  %v14276_v11 = vld [vmem:[%s20339_s3 + $0x270] sm:$0xff]   ;;  %v12053_v16 = vcombine.high %v685_v15, %v693_v28  ;;  %v741_v63 = vld [vmem:[%s20396_s2 + $0x3f8] sm:$0xff] }
 0x2b4   : > { %13275 = vmatpush3.bf16.msra.mxu0 %v14269_v9  ;;  %v749_v5 = vld [vmem:[%s20396_s2 + $0x438] sm:$0xff] }
 0x2b5   : > { %5035 = vmatpush1.bf16.msra.mxu1 %v12004_v19  ;;  %13276 = vmatprep.subr.bf16.mxu0 %v14272_v32  ;;  %v5368_v51 = vmul.f32 %v13894_v29, %v16242_v36  ;;  %v5384_v1 = vmul.f32 %v13896_v39, %v16242_v36  ;;  %vm5207_vm0 = vcmp.gt.f32.partialorder %v13894_v29, 0.0  ;;  %vm5223_vm1 = vcmp.gt.f32.partialorder %v13896_v39, 0.0  ;;  %v17394_v2 = vld [vmem:[%s15255_s17 + $0x68] ss:$16 sps:$4 sm:$0xff]  }
 0x2b6   : > { %5036 = vmatprep.subr.bf16.mxu1 %v12021_v4  ;;  %v12084_v19 = vcombine.low %v717_v43, %v725_v57  ;;  %v757_v4 = vld [vmem:[%s20396_s2 + $0x478] sm:$0xff]  ;;  %v13898_v57 = vadd.f32 %v16404_v25, %v17327_v50 }
 0x2b7   : > { %v5528_v33 = vsel %vm5207_vm0, %v13894_v29, %v5368_v51  ;;  %v5544_v52 = vsel %vm5223_vm1, %v13896_v39, %v5384_v1  ;;  %v17398_v9 = vld [vmem:[%s15255_s17 + $0x8c] ss:$16 sps:$4 sm:$0x3f]   ;;  %v12116_v37 = vcombine.low %v749_v5, %v757_v4  ;;  %v17414_v39 = vld [vmem:[%s15255_s17 + $0x88] ss:$16 sps:$4 sm:$0x3f]  }
 0x2b8   : > { %4826 = vmatmul.mubr.bf16.gmra.mrb[84].mxu1 %v17002_v55  ;;  %v701_v55 = vld [vmem:[%s20396_s2 + $0x2b8] sm:$0xff]  ;;  %13277 = vmatpush3.bf16.msra.mxu0 %v14273_v18  ;;  %v5688_v49 = vpack.c.bf16 %v5544_v52, %v5528_v33  ;;  %v15030_v18 = vld [vmem:[%s15255_s17 + $0x4] ss:$16 sps:$4 sm:$0xff]   ;;  %v13897_v33 = vadd.f32 %v16401_v20, %v16387_v10  ;;  %v13899_v52 = vadd.f32 %v16410_v31, %v16387_v10  ;;  %vm5239_vm2 = vcmp.gt.f32.partialorder %v13898_v57, 0.0 }
 0x2b9   : > { %5037 = vmatpush1.bf16.msra.mxu1 %v12020_v3  ;;  %4835 = vmatprep.mubr.bf16.mxu1 %v17006_v53  ;;  %v14277_v53 = vld [vmem:[%s20339_s3 + $0x230] sm:$0xff]   ;;  %v12069_v60 = vcombine.high %v701_v55, %v709_v62  ;;  %v12068_v44 = vcombine.low %v701_v55, %v709_v62  ;;  %v12117_v3 = vcombine.high %v749_v5, %v757_v4  ;;  %v773_v30 = vld [vmem:[%s20396_s2 + $0x4f8] sm:$0xff] }
 0x2ba   : > { %5038 = vmatprep.subr.bf16.mxu1 %v12037_v56  ;;  %13278 = vmatprep.subr.bf16.mxu0 %v14276_v11  ;;  %v765_v56 = vld [vmem:[%s20396_s2 + $0x4b8] sm:$0xff]  ;;  %v5399_v31 = vmul.f32 %v13897_v33, %v16242_v36  ;;  %vm5238_vm4 = vcmp.gt.f32.partialorder %v13897_v33, 0.0  ;;  %vm5254_vm5 = vcmp.gt.f32.partialorder %v13899_v52, 0.0  ;;  %v13902_v5 = vadd.f32 %v16427_v42, %v17327_v50 }
 0x2bb   : > { %7114 = vmatprep.mubr.bf16.mxu0 %v5688_v49  ;;  %v12133_v15 = vcombine.high %v765_v56, %v773_v30  ;;  %v781_v28 = vld [vmem:[%s20396_s2 + $0x538] sm:$0xff]  ;;  %v12132_v32 = vcombine.low %v765_v56, %v773_v30  ;;  %v20452_v56 = vld [vmem:[#allocation6_spill] sm:$0xff] }
 0x2bc   : > { %13279 = vmatpush3.bf16.msra.mxu0 %v14277_v53  ;;  %v789_v29 = vld [vmem:[%s20396_s2 + $0x578] sm:$0xff]  ;;  %v13901_v30 = vadd.f32 %v20452_v56, %v16387_v10  ;;  %vm5271_vm6 = vcmp.gt.f32.partialorder %v13902_v5, 0.0 }
 0x2bd   : > { %5039 = vmatpush1.bf16.msra.mxu1 %v12036_v45  ;;  %13280 = vmatprep.subr.bf16.mxu0 %v14280_v54  ;;  %v12149_v45 = vcombine.high %v781_v28, %v789_v29  ;;  %v797_v11 = vld [vmem:[%s20396_s2 + $0x5b8] sm:$0xff]  ;;  %v12148_v55 = vcombine.low %v781_v28, %v789_v29  ;;  %v13900_v54 = vadd.f32 %v16421_v38, %v17327_v50  ;;  %v20453_v28 = vld [vmem:[#allocation7_spill] sm:$0xff] }
 0x2be   : > { %5040 = vmatprep.subr.bf16.mxu1 %v12053_v16  ;;  %v805_v16 = vld [vmem:[%s20396_s2 + $0x5f8] sm:$0xff]  ;;  %v5400_v38 = vmul.f32 %v13898_v57, %v16242_v36  ;;  %v13903_v29 = vadd.f32 %v20453_v28, %v16387_v10  ;;  %vm5270_vm8 = vcmp.gt.f32.partialorder %v13901_v30, 0.0 }
 0x2bf   : > { %v12165_v62 = vcombine.high %v797_v11, %v805_v16  ;;  %v813_v51 = vld [vmem:[%s20396_s2 + $0x638] sm:$0xff]  ;;  %v12164_v53 = vcombine.low %v797_v11, %v805_v16  ;;  %vm5255_vm3 = vcmp.gt.f32.partialorder %v13900_v54, 0.0 }
 0x2c0   : > { %4836 = vmatmul.mubr.bf16.gmra.mrb[88].mxu1 %v17022_v27  ;;  %v733_v27 = vld [vmem:[%s20396_s2 + $0x3b8] sm:$0xff]  ;;  %13281 = vmatpush3.bf16.msra.mxu0 %v14281_v34  ;;  %vm5286_vm9 = vcmp.gt.f32.partialorder %v13903_v29, 0.0 }
 0x2c1   : > { %5041 = vmatpush1.bf16.msra.mxu1 %v12052_v6  ;;  %4845 = vmatprep.mubr.bf16.mxu1 %v17026_v8  ;;  %v12101_v8 = vcombine.high %v733_v27, %v741_v63  ;;  %v12100_v41 = vcombine.low %v733_v27, %v741_v63  ;;  %v821_v1 = vld [vmem:[%s20396_s2 + $0x678] sm:$0xff]  ;;  %v5415_v27 = vmul.f32 %v13899_v52, %v16242_v36 }
 0x2c2   : > { %5042 = vmatprep.subr.bf16.mxu1 %v12069_v60  ;;  %v12181_v6 = vcombine.high %v813_v51, %v821_v1  ;;  %v829_v60 = vld [vmem:[%s20396_s2 + $0x6b8] sm:$0xff]  ;;  %v12180_v34 = vcombine.low %v813_v51, %v821_v1  ;;  %v5431_v1 = vmul.f32 %v13901_v30, %v16242_v36 }
 0x2c3   : > { %7115 = vmatmul.mubr.bf16.vlgmr.msra.gmra.mrb[80].mxu0 %v20450_v46  ;;  %v837_v43 = vld [vmem:[%s20396_s2 + $0x6f8] sm:$0xff] }
 0x2c4   : > { %v845_v49 = vld [vmem:[%s20396_s2 + $0x738] sm:$0xff]  ;;  %v12196_v20 = vcombine.low %v829_v60, %v837_v43 }
 0x2c5   : > { %5043 = vmatpush1.bf16.msra.mxu1 %v12068_v44  ;;  %v12197_v44 = vcombine.high %v829_v60, %v837_v43  ;;  %v853_v25 = vld [vmem:[%s20396_s2 + $0x778] sm:$0xff] }
 0x2c6   : > { %5044 = vmatprep.subr.bf16.mxu1 %v12085_v14  ;;  %v5416_v14 = vmul.f32 %v13900_v54, %v16242_v36  ;;  %v12213_v63 = vcombine.high %v845_v49, %v853_v25  ;;  %v20451_v4 = vld [vmem:[#allocation8_spill] sm:$0xff] }
 0x2c7   : > { %v13904_v46 = vadd.f32 %v20451_v4, %v17327_v50  ;;  %v877_v42 = vld [vmem:[%s20396_s2 + $0x838] sm:$0xff] }
 0x2c8   : > { %4846 = vmatmul.mubr.bf16.gmra.mrb[92].mxu1 %v17394_v2  ;;  %v885_v11 = vld [vmem:[%s20396_s2 + $0x878] sm:$0xff] }
 0x2c9   : > { %5045 = vmatpush1.bf16.msra.mxu1 %v12084_v19  ;;  %4855 = vmatprep.mubr.bf16.mxu1 %v17398_v9  ;;  %v861_v19 = vld [vmem:[%s20396_s2 + $0x7b8] sm:$0xff]  ;;  %vm5287_vm7 = vcmp.gt.f32.partialorder %v13904_v46, 0.0 }
 0x2ca   : > { %5046 = vmatprep.subr.bf16.mxu1 %v12101_v8  ;;  %v869_v8 = vld [vmem:[%s20396_s2 + $0x7f8] sm:$0xff] }
 0x2cb   : > { %v12228_v51 = vcombine.low %v861_v19, %v869_v8  ;;  %v893_v60 = vld [vmem:[%s20396_s2 + $0x8b8] sm:$0xff] }
 0x2cc   : > { %v901_v43 = vld [vmem:[%s20396_s2 + $0x8f8] sm:$0xff] }
 0x2cd   : > { %5047 = vmatpush1.bf16.msra.mxu1 %v12100_v41  ;;  %v5560_v41 = vsel %vm5239_vm2, %v13898_v57, %v5400_v38  ;;  %v20454_v57 = vld [vmem:[#allocation10_spill] sm:$0xff]  ;;  %v12244_v38 = vcombine.low %v877_v42, %v885_v11  ;;  %v12260_v56 = vcombine.low %v893_v60, %v901_v43 }
 0x2ce   : > { %5048 = vmatprep.subr.bf16.mxu1 %v12117_v3  ;;  %v5576_v3 = vsel %vm5255_vm3, %v13900_v54, %v5416_v14  ;;  %v13906_v54 = vadd.f32 %v20454_v57, %v17327_v50 }
 0x2d0   : > { %4856 = vmatmul.mubr.bf16.gmra.mrb[96].mxu1 %v17414_v39  ;;  %vm5303_vm10 = vcmp.gt.f32.partialorder %v13906_v54, 0.0 }
 0x2d1   : > { %5049 = vmatpush1.bf16.msra.mxu1 %v12116_v37  ;;  %5064 = vmatprep.mubr.bf16.mxu1 %v15030_v18  ;;  %v12212_v37 = vcombine.low %v845_v49, %v853_v25  ;;  %v5559_v18 = vsel %vm5238_vm4, %v13897_v33, %v5399_v31  ;;  %v20456_v49 = vld [vmem:[#allocation9_spill] sm:$0xff] }
 0x2d2   : > { %5050 = vmatprep.subr.bf16.mxu1 %v12133_v15  ;;  %v5704_v15 = vpack.c.bf16 %v5576_v3, %v5560_v41  ;;  %v13905_v25 = vadd.f32 %v20456_v49, %v16387_v10  ;;  %v15031_v3 = vld [vmem:[%s15255_s17] ss:$16 sps:$4 sm:$0xff]  }
 0x2d4   : > { %7122 = vmatprep.mubr.bf16.mxu0 %v5704_v15  ;;  %vm5302_vm12 = vcmp.gt.f32.partialorder %v13905_v25, 0.0 }
 0x2d5   : > { %5051 = vmatpush1.bf16.msra.mxu1 %v12132_v32  ;;  %v12229_v32 = vcombine.high %v861_v19, %v869_v8  ;;  %v909_v8 = vld [vmem:[%s20396_s2 + $0x938] sm:$0xff] }
 0x2d6   : > { %5052 = vmatprep.subr.bf16.mxu1 %v12149_v45  ;;  %v5575_v45 = vsel %vm5254_vm5, %v13899_v52, %v5415_v27  ;;  %v12261_v27 = vcombine.high %v893_v60, %v901_v43 }
 0x2d7   : > { %v5703_v16 = vpack.c.bf16 %v5575_v45, %v5559_v18  ;;  %v20458_v18 = vld [vmem:[#allocation14_spill] sm:$0xff] }
 0x2d8   : > { %v13910_v45 = vadd.f32 %v20458_v18, %v17327_v50 }
 0x2d9   : > { %5053 = vmatpush1.bf16.msra.mxu1 %v12148_v55  ;;  %v5432_v55 = vmul.f32 %v13902_v5, %v16242_v36  ;;  %7123 = vmatmul.mubr.bf16.gmra.mrb[84].mxu0 %v5703_v16 }
 0x2da   : > { %5054 = vmatprep.subr.bf16.mxu1 %v12165_v62  ;;  %v5448_v62 = vmul.f32 %v13904_v46, %v16242_v36  ;;  %vm5335_vm14 = vcmp.gt.f32.partialorder %v13910_v45, 0.0 }
 0x2db   : > { %v5592_v52 = vsel %vm5271_vm6, %v13902_v5, %v5432_v55  ;;  %v917_v5 = vld [vmem:[%s20396_s2 + $0x978] sm:$0xff] }
 0x2dc   : > { %v12277_v28 = vcombine.high %v909_v8, %v917_v5 }
 0x2dd   : > { %5055 = vmatpush1.bf16.msra.mxu1 %v12164_v53  ;;  %v5447_v53 = vmul.f32 %v13903_v29, %v16242_v36 }
 0x2de   : > { %5056 = vmatprep.subr.bf16.mxu1 %v12181_v6  ;;  %v12245_v6 = vcombine.high %v877_v42, %v885_v11  ;;  %v20459_v42 = vld [vmem:[#allocation16_spill] sm:$0xff] }
 0x2df   : > { %v5607_v19 = vsel %vm5286_vm9, %v13903_v29, %v5447_v53  ;;  %v925_v29 = vld [vmem:[%s20396_s2 + $0x9b8] sm:$0xff]  ;;  %v13912_v11 = vadd.f32 %v20459_v42, %v17327_v50  ;;  %v15037_v42 = vld [vmem:[%s15255_s17 + $0x64] ss:$16 sps:$4 sm:$0xff]  }
 0x2e1   : > { %5057 = vmatpush1.bf16.msra.mxu1 %v12180_v34  ;;  %v20455_v34 = vld [vmem:[#allocation12_spill] sm:$0xff]  ;;  %vm5351_vm15 = vcmp.gt.f32.partialorder %v13912_v11, 0.0 }
 0x2e2   : > { %5058 = vmatprep.subr.bf16.mxu1 %v12197_v44  ;;  %v13908_v33 = vadd.f32 %v20455_v34, %v17327_v50  ;;  %v5608_v44 = vsel %vm5287_vm7, %v13904_v46, %v5448_v62  ;;  %v5464_v46 = vmul.f32 %v13906_v54, %v16242_v36  ;;  %v20460_v62 = vld [vmem:[#allocation13_spill] sm:$0xff]  ;;  %v941_v50 = vld [vmem:[%s20396_s2 + $0xa38] sm:$0xff] }
 0x2e3   : > { %v5720_v14 = vpack.c.bf16 %v5608_v44, %v5592_v52  ;;  %v5496_v52 = vmul.f32 %v13910_v45, %v16242_v36  ;;  %v5512_v44 = vmul.f32 %v13912_v11, %v16242_v36 }
 0x2e4   : > { %v5480_v41 = vmul.f32 %v13908_v33, %v16242_v36  ;;  %vm5319_vm11 = vcmp.gt.f32.partialorder %v13908_v33, 0.0  ;;  %v5624_v16 = vsel %vm5303_vm10, %v13906_v54, %v5464_v46  ;;  %v949_v54 = vld [vmem:[%s20396_s2 + $0xa78] sm:$0xff] }
 0x2e5   : > { %5059 = vmatpush1.bf16.msra.mxu1 %v12196_v20  ;;  %v20457_v20 = vld [vmem:[#allocation11_spill] sm:$0xff]  ;;  %7130 = vmatprep.mubr.bf16.mxu0 %v5720_v14 }
 0x2e6   : > { %5060 = vmatprep.subr.bf16.mxu1 %v12213_v63  ;;  %v13907_v31 = vadd.f32 %v20457_v20, %v16387_v10  ;;  %v5591_v63 = vsel %vm5270_vm8, %v13901_v30, %v5431_v1  ;;  %v15032_v30 = vld [vmem:[%s15255_s17 + $0x24] ss:$16 sps:$4 sm:$0xff]   ;;  %v5640_v55 = vsel %vm5319_vm11, %v13908_v33, %v5480_v41  ;;  %v12276_v1 = vcombine.low %v909_v8, %v917_v5 }
 0x2e7   : > { %v5719_v4 = vpack.c.bf16 %v5607_v19, %v5591_v63  ;;  %v5736_v53 = vpack.c.bf16 %v5640_v55, %v5624_v16  ;;  %v12309_v20 = vcombine.high %v941_v50, %v949_v54  ;;  %v20389_v63 = vsub.s32 6, %v16203_v13  ;;  %v989_v55 = vld [vmem:[%s20396_s2 + $0xbb8] sm:$0xff] }
 0x2e8   : > { %v5479_v15 = vmul.f32 %v13907_v31, %v16242_v36  ;;  %vm5318_vm13 = vcmp.gt.f32.partialorder %v13907_v31, 0.0  ;;  %v5656_v19 = vsel %vm5335_vm14, %v13910_v45, %v5496_v52  ;;  %v5672_v8 = vsel %vm5351_vm15, %v13912_v11, %v5512_v44  ;;  %v1005_v52 = vld [vmem:[%s20396_s2 + $0xc38] sm:$0xff] }
 0x2e9   : > { %5061 = vmatpush1.bf16.msra.mxu1 %v12212_v37  ;;  %v5463_v37 = vmul.f32 %v13905_v25, %v16242_v36  ;;  %7131 = vmatmul.mubr.bf16.gmra.mrb[88].mxu0 %v5719_v4  ;;  %v12308_v5 = vcombine.low %v941_v50, %v949_v54  ;;  %v20388_v4 = vsub.s32 7, %v16203_v13  ;;  %v5752_v46 = vpack.c.bf16 %v5672_v8, %v5656_v19  ;;  %v1013_v44 = vld [vmem:[%s20396_s2 + $0xc78] sm:$0xff] }
 0x2ea   : > { %5062 = vmatprep.subr.bf16.mxu1 %v12229_v32  ;;  %v933_v32 = vld [vmem:[%s20396_s2 + $0x9f8] sm:$0xff]  ;;  %v5639_v34 = vsel %vm5318_vm13, %v13907_v31, %v5479_v15  ;;  %7138 = vmatprep.mubr.bf16.mxu0 %v5736_v53 }
 0x2eb   : > { %v12293_v43 = vcombine.high %v925_v29, %v933_v32  ;;  %v5623_v57 = vsel %vm5302_vm12, %v13905_v25, %v5463_v37  ;;  %v12292_v49 = vcombine.low %v925_v29, %v933_v32  ;;  %v15034_v25 = vld [vmem:[%s15255_s17 + $0x44] ss:$16 sps:$4 sm:$0xff]   ;;  %v957_v31 = vld [vmem:[%s20396_s2 + $0xab8] sm:$0xff]  ;;  %v15036_v32 = vld [vmem:[%s15255_s17 + $0x40] ss:$16 sps:$4 sm:$0xff]  }
 0x2ec   : > { %v5735_v33 = vpack.c.bf16 %v5639_v34, %v5623_v57  ;;  %v981_v37 = vld [vmem:[%s20396_s2 + $0xb78] sm:$0xff] }
 0x2ed   : > { %5063 = vmatpush1.bf16.msra.mxu1 %v12228_v51  ;;  %v13909_v51 = vadd.f32 %v20460_v62, %v16387_v10  ;;  %v997_v62 = vld [vmem:[%s20396_s2 + $0xbf8] sm:$0xff] }
 0x2ee   : > { %5115 = vmatprep.subr.bf16.mxu1 %v12245_v6  ;;  %v20461_v6 = vld [vmem:[#allocation15_spill] sm:$0xff]  ;;  %v12357_v50 = vcombine.high %v989_v55, %v997_v62 }
 0x2ef   : > { %v13911_v60 = vadd.f32 %v20461_v6, %v16387_v10  ;;  %v15033_v10 = vld [vmem:[%s15255_s17 + $0x20] ss:$16 sps:$4 sm:$0xff]   ;;  %vm5334_vm0 = vcmp.gt.f32.partialorder %v13909_v51, 0.0 }
 0x2f0   : > { %5065 = vmatmul.mubr.bf16.vlgmr.msra.gmra.mrb[100].mxu1 %v15031_v3 }
 0x2f1   : > { %5116 = vmatpush1.bf16.msra.mxu1 %v12244_v38  ;;  %5074 = vmatprep.mubr.bf16.mxu1 %v15032_v30  ;;  %v5495_v38 = vmul.f32 %v13909_v51, %v16242_v36  ;;  %v5511_v14 = vmul.f32 %v13911_v60, %v16242_v36  ;;  %vm5350_vm1 = vcmp.gt.f32.partialorder %v13911_v60, 0.0  ;;  %v973_v30 = vld [vmem:[%s20396_s2 + $0xb38] sm:$0xff] }
 0x2f2   : > { %5117 = vmatprep.subr.bf16.mxu1 %v12261_v27  ;;  %7139 = vmatmul.mubr.bf16.gmra.mrb[92].mxu0 %v5735_v33  ;;  %v965_v27 = vld [vmem:[%s20396_s2 + $0xaf8] sm:$0xff]  ;;  %v12341_v11 = vcombine.high %v973_v30, %v981_v37 }
 0x2f3   : > { %v12325_v41 = vcombine.high %v957_v31, %v965_v27  ;;  %v5655_v3 = vsel %vm5334_vm0, %v13909_v51, %v5495_v38  ;;  %7146 = vmatprep.mubr.bf16.mxu0 %v5752_v46  ;;  %v12324_v45 = vcombine.low %v957_v31, %v965_v27  ;;  %v12356_v38 = vcombine.low %v989_v55, %v997_v62  ;;  %v1029_v46 = vld [vmem:[%s20396_s2 + $0xcf8] sm:$0xff]  ;;  %v14311_v62 = vld [vmem:[%s20339_s3 + $0x300] sm:$0xff]  }
 0x2f4   : > { %v12373_v27 = vcombine.high %v1005_v52, %v1013_v44 }
 0x2f5   : > { %5118 = vmatpush1.bf16.msra.mxu1 %v12260_v56  ;;  %v5671_v56 = vsel %vm5350_vm1, %v13911_v60, %v5511_v14  ;;  %v12340_v60 = vcombine.low %v973_v30, %v981_v37  ;;  %v15039_v14 = vld [vmem:[%s15255_s17 + $0x84] ss:$16 sps:$4 sm:$0x3f]  }
 0x2f6   : > { %5119 = vmatprep.subr.bf16.mxu1 %v12277_v28  ;;  %v5751_v15 = vpack.c.bf16 %v5671_v56, %v5655_v3  ;;  %v15035_v28 = vld [vmem:[%s20398_s24] sm:$0xff] }
 0x2f7   : > { %v17553_v29 = vrot.slane %v15035_v28, %v20389_v63  ;;  %v17558_v18 = vrot.slane %v15035_v28, %v20388_v4  ;;  %v14310_v56 = vld [vmem:[%s20339_s3 + $0x340] sm:$0xff]  }
 0x2f8   : > { %5075 = vmatmul.mubr.bf16.gmra.mrb[104].mxu1 %v15033_v10  ;;  %13358 = vmatprep.subr.bf16.mxu0 %v14310_v56  ;;  %v20462_v63 = vld [vmem:[#allocation21_spill] sm:$0xff] }
 0x2f9   : > { %5120 = vmatpush1.bf16.msra.mxu1 %v12276_v1  ;;  %5084 = vmatprep.mubr.bf16.mxu1 %v15034_v25 }
 0x2fa   : > { %5121 = vmatprep.subr.bf16.mxu1 %v12293_v43  ;;  %7147 = vmatmul.mubr.bf16.gmra.mrb[96].mxu0 %v5751_v15 }
 0x2fb   : > { %13359 = vmatpush3.bf16.msra.mxu0 %v14311_v62 }
 0x2fd   : > { %5122 = vmatpush1.bf16.msra.mxu1 %v12292_v49  ;;  %v15038_v49 = vld [vmem:[%s15255_s17 + $0x60] ss:$16 sps:$4 sm:$0xff]  }
 0x2fe   : > { %5123 = vmatprep.subr.bf16.mxu1 %v12309_v20 }
 0x300   : > { %5085 = vmatmul.mubr.bf16.gmra.mrb[108].mxu1 %v15036_v32 }
 0x301   : > { %5124 = vmatpush1.bf16.msra.mxu1 %v12308_v5  ;;  %5094 = vmatprep.mubr.bf16.mxu1 %v15037_v42  ;;  %v1021_v5 = vld [vmem:[%s20396_s2 + $0xcb8] sm:$0xff] }
 0x302   : > { %5125 = vmatprep.subr.bf16.mxu1 %v12325_v41  ;;  %v12389_v55 = vcombine.high %v1021_v5, %v1029_v46 }
 0x303   : > { %v4485_v16 = vpop.f32.mrb[60].mxu1 }
 0x304   : > { %v13873_v51 = vadd.f32 %v4485_v16, %v17553_v29  ;;  %v4487_v1 = vpop.f32.mrb[61].mxu1 }
 0x305   : > { %v13874_v53 = vadd.f32 %v4487_v1, %v17558_v18  ;;  %v4489_v6 = vpop.f32.mrb[62].mxu1  ;;  %5126 = vmatpush1.bf16.msra.mxu1 %v12324_v45  ;;  %v12372_v45 = vcombine.low %v1005_v52, %v1013_v44 }
 0x306   : > { %v5365_v43 = vmul.f32 %v13873_v51, %v16242_v36  ;;  %v13875_v57 = vadd.f32 %v4489_v6, %v17553_v29  ;;  %v4491_v34 = vpop.f32.mrb[63].mxu1  ;;  %5127 = vmatprep.subr.bf16.mxu1 %v12341_v11  ;;  %vm5204_vm2 = vcmp.gt.f32.partialorder %v13873_v51, 0.0  ;;  %v1045_v6 = vld [vmem:[%s20396_s2 + $0xd78] sm:$0xff] }
 0x307   : > { %v5366_v54 = vmul.f32 %v13874_v53, %v16242_v36  ;;  %v13876_v33 = vadd.f32 %v4491_v34, %v17558_v18  ;;  %vm5205_vm3 = vcmp.gt.f32.partialorder %v13874_v53, 0.0  ;;  %v12388_v34 = vcombine.low %v1021_v5, %v1029_v46 }
 0x308   : > { %vm5220_vm4 = vcmp.gt.f32.partialorder %v13875_v57, 0.0  ;;  %v5381_v10 = vmul.f32 %v13875_v57, %v16242_v36  ;;  %5095 = vmatmul.mubr.bf16.gmra.mrb[112].mxu1 %v15038_v49  ;;  %v17584_v20 = vsel %vm5204_vm2, %v13873_v51, %v5365_v43  ;;  %v15040_v43 = vld [vmem:[%s15255_s17 + $0x80] ss:$16 sps:$4 sm:$0x3f]   ;;  %vm5211_vm2 = vcmp.gt.f32.partialorder %v20462_v63, 0.0 }
 0x309   : > { %vm5221_vm5 = vcmp.gt.f32.partialorder %v13876_v33, 0.0  ;;  %v5382_v25 = vmul.f32 %v13876_v33, %v16242_v36  ;;  %5128 = vmatpush1.bf16.msra.mxu1 %v12340_v60  ;;  %5104 = vmatprep.mubr.bf16.mxu1 %v15039_v14  ;;  %v17597_v41 = vsel %vm5205_vm3, %v13874_v53, %v5366_v54  ;;  %v1037_v53 = vld [vmem:[%s20396_s2 + $0xd38] sm:$0xff]  ;;  %v14314_v54 = vld [vmem:[%s20339_s3 + $0x348] sm:$0xff]   ;;  %v14318_v49 = vld [vmem:[%s20339_s3 + $0x350] sm:$0xff]  }
 0x30a   : > { %v17586_v31 = vsel %vm5220_vm4, %v13875_v57, %v5381_v10  ;;  %5129 = vmatprep.subr.bf16.mxu1 %v12357_v50  ;;  %v15041_v50 = vld [vmem:[%s15255_s17 + $0xc] ss:$16 sps:$4 sm:$0xff]   ;;  %v12405_v52 = vcombine.high %v1037_v53, %v1045_v6  ;;  %13360 = vmatprep.subr.bf16.mxu0 %v14314_v54 }
 0x30b   : > { %v5685_v19 = vpack.c.bf16 %v17586_v31, %v17584_v20  ;;  %v4495_v8 = vpop.f32.mrb[64].mxu1  ;;  %v17599_v3 = vsel %vm5221_vm5, %v13876_v33, %v5382_v25  ;;  %v14315_v33 = vld [vmem:[%s20339_s3 + $0x308] sm:$0xff]   ;;  %v1061_v14 = vld [vmem:[%s20396_s2 + $0xdf8] sm:$0xff] }
 0x30c   : > { %v13877_v30 = vadd.f32 %v4495_v8, %v17553_v29  ;;  %v4497_v37 = vpop.f32.mrb[65].mxu1  ;;  %v5686_v15 = vpack.c.bf16 %v17599_v3, %v17597_v41  ;;  %13361 = vmatpush3.bf16.msra.mxu0 %v14315_v33  ;;  %v18033_v41 = vld [vmem:[%s20398_s24 + $0x8] sm:$0xff]  ;;  %v20499_v3 = vsub.s32 2, %v16203_v13 }
 0x30d   : > { %v13878_v28 = vadd.f32 %v4497_v37, %v17558_v18  ;;  %v4499_v32 = vpop.f32.mrb[66].mxu1  ;;  %5130 = vmatpush1.bf16.msra.mxu1 %v12356_v38  ;;  %v1053_v38 = vld [vmem:[%s20396_s2 + $0xdb8] sm:$0xff]  ;;  %13362 = vmatprep.subr.bf16.mxu0 %v14318_v49  ;;  %v14313_v20 = vld [vmem:[%s20339_s3 + $0x288] sm:$0xff]  }
 0x30e   : > { %v5397_v42 = vmul.f32 %v13877_v30, %v16242_v36  ;;  %v13879_v11 = vadd.f32 %v4499_v32, %v17553_v29  ;;  %v4501_v16 = vpop.f32.mrb[67].mxu1  ;;  %5131 = vmatprep.subr.bf16.mxu1 %v12373_v27  ;;  %vm5236_vm6 = vcmp.gt.f32.partialorder %v13877_v30, 0.0 }
 0x30f   : > { %v5398_v51 = vmul.f32 %v13878_v28, %v16242_v36  ;;  %v13880_v1 = vadd.f32 %v4501_v16, %v17558_v18  ;;  %vm5237_vm7 = vcmp.gt.f32.partialorder %v13878_v28, 0.0  ;;  %v12421_v16 = vcombine.high %v1053_v38, %v1061_v14 }
 0x310   : > { %vm5252_vm8 = vcmp.gt.f32.partialorder %v13879_v11, 0.0  ;;  %v5413_v60 = vmul.f32 %v13879_v11, %v16242_v36  ;;  %5105 = vmatmul.mubr.bf16.gmra.mrb[116].mxu1 %v15040_v43  ;;  %v17632_v44 = vsel %vm5236_vm6, %v13877_v30, %v5397_v42  ;;  %v12420_v43 = vcombine.low %v1053_v38, %v1061_v14  ;;  %v1093_v38 = vld [vmem:[%s20396_s2 + $0xef8] sm:$0xff] }
 0x311   : > { %vm5253_vm9 = vcmp.gt.f32.partialorder %v13880_v1, 0.0  ;;  %v5414_v57 = vmul.f32 %v13880_v1, %v16242_v36  ;;  %5132 = vmatpush1.bf16.msra.mxu1 %v12372_v45  ;;  %5147 = vmatprep.mubr.bf16.mxu1 %v15041_v50  ;;  %v17647_v27 = vsel %vm5237_vm7, %v13878_v28, %v5398_v51  ;;  %v12404_v28 = vcombine.low %v1037_v53, %v1045_v6  ;;  %v1077_v53 = vld [vmem:[%s20396_s2 + $0xe78] sm:$0xff] }
 0x312   : > { %5133 = vmatprep.subr.bf16.mxu1 %v12389_v55  ;;  %v17635_v10 = vsel %vm5252_vm8, %v13879_v11, %v5413_v60  ;;  %v14319_v55 = vld [vmem:[%s20339_s3 + $0x310] sm:$0xff]  }
 0x313   : > { %v4505_v25 = vpop.f32.mrb[68].mxu1  ;;  %v17650_v8 = vsel %vm5253_vm9, %v13880_v1, %v5414_v57  ;;  %v5701_v5 = vpack.c.bf16 %v17635_v10, %v17632_v44  ;;  %v1069_v1 = vld [vmem:[%s20396_s2 + $0xe38] sm:$0xff]  ;;  %13363 = vmatpush3.bf16.msra.mxu0 %v14319_v55  ;;  %v14324_v44 = vld [vmem:[%s20339_s3 + $0x2e0] sm:$0xff]  }
 0x314   : > { %v13881_v46 = vadd.f32 %v4505_v25, %v17553_v29  ;;  %v4507_v56 = vpop.f32.mrb[69].mxu1  ;;  %v5702_v30 = vpack.c.bf16 %v17650_v8, %v17647_v27  ;;  %v14322_v57 = vld [vmem:[%s20339_s3 + $0x358] sm:$0xff]   ;;  %v12437_v50 = vcombine.high %v1069_v1, %v1077_v53 }
 0x315   : > { %v13882_v37 = vadd.f32 %v4507_v56, %v17558_v18  ;;  %v4509_v32 = vpop.f32.mrb[70].mxu1  ;;  %5134 = vmatpush1.bf16.msra.mxu1 %v12388_v34  ;;  %v14323_v34 = vld [vmem:[%s20339_s3 + $0x318] sm:$0xff]   ;;  %13364 = vmatprep.subr.bf16.mxu0 %v14322_v57  ;;  %v5372_v56 = vmul.f32 %v20462_v63, %v16242_v36 }
 0x316   : > { %v5429_v45 = vmul.f32 %v13881_v46, %v16242_v36  ;;  %v13883_v42 = vadd.f32 %v4509_v32, %v17553_v29  ;;  %v4511_v11 = vpop.f32.mrb[71].mxu1  ;;  %5135 = vmatprep.subr.bf16.mxu1 %v12405_v52  ;;  %vm5268_vm10 = vcmp.gt.f32.partialorder %v13881_v46, 0.0  ;;  %v14326_v52 = vld [vmem:[%s20339_s3 + $0x360] sm:$0xff]   ;;  %v1085_v25 = vld [vmem:[%s20396_s2 + $0xeb8] sm:$0xff] }
 0x317   : > { %v5430_v62 = vmul.f32 %v13882_v37, %v16242_v36  ;;  %v13884_v51 = vadd.f32 %v4511_v11, %v17558_v18  ;;  %vm5269_vm11 = vcmp.gt.f32.partialorder %v13882_v37, 0.0  ;;  %13365 = vmatpush3.bf16.msra.mxu0 %v14323_v34 }
 0x318   : > { %vm5284_vm12 = vcmp.gt.f32.partialorder %v13883_v42, 0.0  ;;  %v5445_v6 = vmul.f32 %v13883_v42, %v16242_v36  ;;  %v17680_v54 = vsel %vm5268_vm10, %v13881_v46, %v5429_v45  ;;  %13366 = vmatprep.subr.bf16.mxu0 %v14326_v52  ;;  %v14330_v52 = vld [vmem:[%s20339_s3 + $0x368] sm:$0xff]   ;;  %v14335_v45 = vld [vmem:[%s20339_s3 + $0x330] sm:$0xff]  }
 0x319   : > { %vm5285_vm13 = vcmp.gt.f32.partialorder %v13884_v51, 0.0  ;;  %v5446_v60 = vmul.f32 %v13884_v51, %v16242_v36  ;;  %5136 = vmatpush1.bf16.msra.mxu1 %v12404_v28  ;;  %v17694_v14 = vsel %vm5269_vm11, %v13882_v37, %v5430_v62 }
 0x31a   : > { %5137 = vmatprep.subr.bf16.mxu1 %v12421_v16  ;;  %v17682_v33 = vsel %vm5284_vm12, %v13883_v42, %v5445_v6  ;;  %v12436_v16 = vcombine.low %v1069_v1, %v1077_v53  ;;  %v14327_v6 = vld [vmem:[%s20339_s3 + $0x320] sm:$0xff]   ;;  %v1101_v1 = vld [vmem:[%s20396_s2 + $0xf38] sm:$0xff] }
 0x31b   : > { %v4515_v49 = vpop.f32.mrb[72].mxu1  ;;  %v17696_v46 = vsel %vm5285_vm13, %v13884_v51, %v5446_v60  ;;  %v12453_v51 = vcombine.high %v1085_v25, %v1093_v38  ;;  %v1109_v53 = vld [vmem:[%s20396_s2 + $0xf78] sm:$0xff]  ;;  %13367 = vmatpush3.bf16.msra.mxu0 %v14327_v6 }
 0x31c   : > { %v13885_v32 = vadd.f32 %v4515_v49, %v17553_v29  ;;  %v4517_v28 = vpop.f32.mrb[73].mxu1  ;;  %v14331_v49 = vld [vmem:[%s20339_s3 + $0x328] sm:$0xff]   ;;  %v1125_v6 = vld [vmem:[%s20396_s2 + $0xff8] sm:$0xff]  ;;  %13368 = vmatprep.subr.bf16.mxu0 %v14330_v52 }
 0x31d   : > { %v13886_v42 = vadd.f32 %v4517_v28, %v17558_v18  ;;  %v4519_v11 = vpop.f32.mrb[74].mxu1  ;;  %5138 = vmatpush1.bf16.msra.mxu1 %v12420_v43  ;;  %v12469_v28 = vcombine.high %v1101_v1, %v1109_v53 }
 0x31e   : > { %v5461_v37 = vmul.f32 %v13885_v32, %v16242_v36  ;;  %v13887_v55 = vadd.f32 %v4519_v11, %v17553_v29  ;;  %v4521_v62 = vpop.f32.mrb[75].mxu1  ;;  %5139 = vmatprep.subr.bf16.mxu1 %v12437_v50  ;;  %vm5300_vm14 = vcmp.gt.f32.partialorder %v13885_v32, 0.0  ;;  %v12452_v50 = vcombine.low %v1085_v25, %v1093_v38  ;;  %v1117_v38 = vld [vmem:[%s20396_s2 + $0xfb8] sm:$0xff] }
 0x31f   : > { %v5462_v60 = vmul.f32 %v13886_v42, %v16242_v36  ;;  %v13888_v57 = vadd.f32 %v4521_v62, %v17558_v18  ;;  %vm5301_vm15 = vcmp.gt.f32.partialorder %v13886_v42, 0.0  ;;  %13369 = vmatpush3.bf16.msra.mxu0 %v14331_v49  ;;  %v12485_v49 = vcombine.high %v1117_v38, %v1125_v6 }
 0x320   : > { %vm5316_vm0 = vcmp.gt.f32.partialorder %v13887_v55, 0.0  ;;  %v5477_v43 = vmul.f32 %v13887_v55, %v16242_v36  ;;  %v17726_v11 = vsel %vm5300_vm14, %v13885_v32, %v5461_v37 }
 0x321   : > { %vm5317_vm1 = vcmp.gt.f32.partialorder %v13888_v57, 0.0  ;;  %v5478_v34 = vmul.f32 %v13888_v57, %v16242_v36  ;;  %5140 = vmatpush1.bf16.msra.mxu1 %v12436_v16  ;;  %v14334_v16 = vld [vmem:[%s20339_s3 + $0x370] sm:$0xff]  }
 0x322   : > { %5141 = vmatprep.subr.bf16.mxu1 %v12453_v51  ;;  %v17728_v62 = vsel %vm5316_vm0, %v13887_v55, %v5477_v43  ;;  %v17740_v51 = vsel %vm5301_vm15, %v13886_v42, %v5462_v60  ;;  %13370 = vmatprep.subr.bf16.mxu0 %v14334_v16  ;;  %v14338_v16 = vld [vmem:[%s20339_s3 + $0x378] sm:$0xff]   ;;  %vm5306_vm0 = vcmp.gt.f32.partialorder %v16890_v7, 0.0 }
 0x323   : > { %v4525_v25 = vpop.f32.mrb[76].mxu1  ;;  %v17742_v32 = vsel %vm5317_vm1, %v13888_v57, %v5478_v34  ;;  %v12468_v57 = vcombine.low %v1101_v1, %v1109_v53  ;;  %v20463_v34 = vld [vmem:[#allocation22_spill] sm:$0xff]  ;;  %13371 = vmatpush3.bf16.msra.mxu0 %v14335_v45 }
 0x324   : > { %v13889_v55 = vadd.f32 %v4525_v25, %v17553_v29  ;;  %v4527_v43 = vpop.f32.mrb[77].mxu1  ;;  %v5388_v52 = vmul.f32 %v20463_v34, %v16242_v36  ;;  %vm5227_vm3 = vcmp.gt.f32.partialorder %v20463_v34, 0.0  ;;  %13372 = vmatprep.subr.bf16.mxu0 %v14338_v16  ;;  %v20469_v16 = vld [vmem:[#allocation24_spill] sm:$0xff] }
 0x325   : > { %v13890_v42 = vadd.f32 %v4527_v43, %v17558_v18  ;;  %v4529_v60 = vpop.f32.mrb[78].mxu1  ;;  %5142 = vmatpush1.bf16.msra.mxu1 %v12452_v50  ;;  %v14339_v43 = vld [vmem:[%s20339_s3 + $0x338] sm:$0xff]  }
 0x326   : > { %v5493_v25 = vmul.f32 %v13889_v55, %v16242_v36  ;;  %v13891_v37 = vadd.f32 %v4529_v60, %v17553_v29  ;;  %v4531_v4 = vpop.f32.mrb[79].mxu1  ;;  %5143 = vmatprep.subr.bf16.mxu1 %v12469_v28  ;;  %vm5332_vm4 = vcmp.gt.f32.partialorder %v13889_v55, 0.0  ;;  %v12484_v28 = vcombine.low %v1117_v38, %v1125_v6 }
 0x327   : > { %v5494_v1 = vmul.f32 %v13890_v42, %v16242_v36  ;;  %v13892_v53 = vadd.f32 %v4531_v4, %v17558_v18  ;;  %vm5333_vm5 = vcmp.gt.f32.partialorder %v13890_v42, 0.0  ;;  %v5532_v4 = vsel %vm5211_vm2, %v20462_v63, %v5372_v56  ;;  %v14270_v18 = vld [vmem:[%s20339_s3 + $0xc0] sm:$0xff]   ;;  %13373 = vmatpush3.bf16.msra.mxu0 %v14339_v43 }
 0x328   : > { %vm5348_vm6 = vcmp.gt.f32.partialorder %v13891_v37, 0.0  ;;  %v5509_v50 = vmul.f32 %v13891_v37, %v16242_v36  ;;  %v17778_v45 = vsel %vm5332_vm4, %v13889_v55, %v5493_v25  ;;  %v5548_v6 = vsel %vm5227_vm3, %v20463_v34, %v5388_v52  ;;  %v20465_v34 = vld [vmem:[#allocation28_spill] sm:$0xff]  ;;  %v20466_v52 = vld [vmem:[#allocation30_spill] sm:$0xff] }
 0x329   : > { %vm5349_vm7 = vcmp.gt.f32.partialorder %v13892_v53, 0.0  ;;  %v5510_v29 = vmul.f32 %v13892_v53, %v16242_v36  ;;  %5144 = vmatpush1.bf16.msra.mxu1 %v12468_v57  ;;  %v17786_v60 = vsel %vm5333_vm5, %v13890_v42, %v5494_v1  ;;  %v5692_v56 = vpack.c.bf16 %v5548_v6, %v5532_v4  ;;  %v14271_v1 = vld [vmem:[%s20339_s3 + $0x80] sm:$0xff]   ;;  %v15042_v4 = vld [vmem:[%s15255_s17 + $0x8] ss:$16 sps:$4 sm:$0xff]   ;;  %v15043_v6 = vld [vmem:[%s15255_s17 + $0x2c] ss:$16 sps:$4 sm:$0xff]  }
 0x32a   : > { %5145 = vmatprep.subr.bf16.mxu1 %v12485_v49  ;;  %v17780_v38 = vsel %vm5348_vm6, %v13891_v37, %v5509_v50  ;;  %v20464_v37 = vld [vmem:[#allocation27_spill] sm:$0xff]  ;;  %v5404_v42 = vmul.f32 %v20465_v34, %v16242_v36  ;;  %v5420_v49 = vmul.f32 %v20466_v52, %v16242_v36  ;;  %vm5243_vm9 = vcmp.gt.f32.partialorder %v20465_v34, 0.0 }
 0x32b   : > { %v17788_v57 = vsel %vm5349_vm7, %v13892_v53, %v5510_v29  ;;  %v5403_v25 = vmul.f32 %v20464_v37, %v16242_v36  ;;  %7260 = vmatprep.mubr.bf16.mxu0 %v5692_v56  ;;  %vm5242_vm8 = vcmp.gt.f32.partialorder %v20464_v37, 0.0  ;;  %v20467_v53 = vld [vmem:[#allocation29_spill] sm:$0xff]  ;;  %vm5259_vm10 = vcmp.gt.f32.partialorder %v20466_v52, 0.0  ;;  %v14274_v29 = vld [vmem:[%s20339_s3 + $0xc8] sm:$0xff]  }
 0x32c   : > { %v5419_v50 = vmul.f32 %v20467_v53, %v16242_v36  ;;  %vm5258_vm11 = vcmp.gt.f32.partialorder %v20467_v53, 0.0  ;;  %v14275_v56 = vld [vmem:[%s20339_s3 + $0x88] sm:$0xff]   ;;  %v5580_v63 = vsel %vm5259_vm10, %v20466_v52, %v5420_v49  ;;  %vm5323_vm2 = vcmp.gt.f32.partialorder %v16908_v40, 0.0 }
 0x32d   : > { %5146 = vmatpush1.bf16.msra.mxu1 %v12484_v28  ;;  %v20468_v28 = vld [vmem:[#allocation26_spill] sm:$0xff]  ;;  %v5563_v55 = vsel %vm5242_vm8, %v20464_v37, %v5403_v25  ;;  %v20473_v37 = vld [vmem:[#allocation35_spill] sm:$0xff]  ;;  %vm5322_vm3 = vcmp.gt.f32.partialorder %v16905_v26, 0.0  ;;  %vm5338_vm4 = vcmp.gt.f32.partialorder %v16929_v17, 0.0  ;;  %vm5339_vm5 = vcmp.gt.f32.partialorder %v16947_v58, 0.0 }
 0x32e   : > { %13128 = vmatprep.subr.bf16.mxu1 %v14270_v18  ;;  %v20470_v43 = vpack.c.bf16 %v20468_v28, %v20469_v16  ;;  %v5564_v18 = vsel %vm5243_vm9, %v20465_v34, %v5404_v42  ;;  %v14278_v28 = vld [vmem:[%s20339_s3 + $0xd0] sm:$0xff]   ;;  %v20472_v42 = vld [vmem:[#allocation32_spill] sm:$0xff]  ;;  %v5452_v25 = vmul.f32 %v20473_v37, %v16242_v36  ;;  %vm5291_vm14 = vcmp.gt.f32.partialorder %v20473_v37, 0.0 }
 0x32f   : > { %v5708_v16 = vpack.c.bf16 %v5580_v63, %v5564_v18  ;;  %v5436_v52 = vmul.f32 %v20472_v42, %v16242_v36  ;;  %v14279_v63 = vld [vmem:[%s20339_s3 + $0x90] sm:$0xff]   ;;  %vm5275_vm13 = vcmp.gt.f32.partialorder %v20472_v42, 0.0  ;;  %vm5354_vm6 = vcmp.gt.f32.partialorder %v16959_v22, 0.0 }
 0x330   : > { %7261 = vmatmul.mubr.bf16.vlgmr.msra.gmra.mrb[100].mxu0 %v20470_v43  ;;  %5148 = vmatmul.mubr.bf16.vlgmr.msra.gmra.mrb[100].mxu1 %v15042_v4  ;;  %v20471_v4 = vld [vmem:[#allocation31_spill] sm:$0xff]  ;;  %v5612_v18 = vsel %vm5291_vm14, %v20473_v37, %v5452_v25  ;;  %v5483_v25 = vmul.f32 %v16905_v26, %v16242_v36  ;;  %vm5355_vm7 = vcmp.gt.f32.partialorder %v16974_v35, 0.0 }
 0x331   : > { %5157 = vmatprep.mubr.bf16.mxu1 %v15043_v6  ;;  %13129 = vmatpush3.bf16.msra.mxu1 %v14271_v1  ;;  %v5579_v1 = vsel %vm5258_vm11, %v20467_v53, %v5419_v50  ;;  %v5435_v34 = vmul.f32 %v20471_v4, %v16242_v36  ;;  %vm5274_vm12 = vcmp.gt.f32.partialorder %v20471_v4, 0.0  ;;  %v14282_v53 = vld [vmem:[%s20339_s3 + $0xd8] sm:$0xff]  }
 0x332   : > { %13130 = vmatprep.subr.bf16.mxu1 %v14274_v29  ;;  %v5707_v43 = vpack.c.bf16 %v5579_v1, %v5563_v55  ;;  %7268 = vmatprep.mubr.bf16.mxu0 %v5708_v16  ;;  %v20474_v55 = vld [vmem:[#allocation34_spill] sm:$0xff]  ;;  %v14283_v6 = vld [vmem:[%s20339_s3 + $0x98] sm:$0xff]   ;;  %v14284_v16 = vld [vmem:[%s20339_s3 + $0xe0] sm:$0xff]  }
 0x333   : > { %v5451_v49 = vmul.f32 %v20474_v55, %v16242_v36  ;;  %vm5290_vm15 = vcmp.gt.f32.partialorder %v20474_v55, 0.0  ;;  %v15044_v50 = vld [vmem:[%s15255_s17 + $0x28] ss:$16 sps:$4 sm:$0xff]   ;;  %v15045_v29 = vld [vmem:[%s15255_s17 + $0x4c] ss:$16 sps:$4 sm:$0xff]  }
 0x335   : > { %13131 = vmatpush3.bf16.msra.mxu1 %v14275_v56  ;;  %v5596_v56 = vsel %vm5275_vm13, %v20472_v42, %v5436_v52  ;;  %v5467_v42 = vmul.f32 %v16890_v7, %v16242_v36  ;;  %v20475_v52 = vld [vmem:[#allocation39_spill] sm:$0xff] }
 0x336   : > { %13132 = vmatprep.subr.bf16.mxu1 %v14278_v28  ;;  %v5595_v28 = vsel %vm5274_vm12, %v20471_v4, %v5435_v34  ;;  %v5724_v1 = vpack.c.bf16 %v5612_v18, %v5596_v56  ;;  %v5468_v37 = vmul.f32 %v20475_v52, %v16242_v36  ;;  %v5484_v4 = vmul.f32 %v16908_v40, %v16242_v36  ;;  %v14285_v34 = vld [vmem:[%s20339_s3 + $0xa0] sm:$0xff]   ;;  %v14288_v18 = vld [vmem:[%s20339_s3 + $0xf0] sm:$0xff]  }
 0x337   : > { %vm5307_vm1 = vcmp.gt.f32.partialorder %v20475_v52, 0.0  ;;  %v5627_v56 = vsel %vm5306_vm0, %v16890_v7, %v5467_v42  ;;  %v5516_v7 = vmul.f32 %v16974_v35, %v16242_v36  ;;  %v14290_v42 = vld [vmem:[%s20339_s3 + $0xf8] sm:$0xff]  }
 0x338   : > { %7269 = vmatmul.mubr.bf16.gmra.mrb[104].mxu0 %v5707_v43  ;;  %5158 = vmatmul.mubr.bf16.gmra.mrb[104].mxu1 %v15044_v50  ;;  %v5611_v43 = vsel %vm5290_vm15, %v20474_v55, %v5451_v49  ;;  %v14286_v55 = vld [vmem:[%s20339_s3 + $0xe8] sm:$0xff]  }
 0x339   : > { %5167 = vmatprep.mubr.bf16.mxu1 %v15045_v29  ;;  %13133 = vmatpush3.bf16.msra.mxu1 %v14279_v63  ;;  %v5723_v63 = vpack.c.bf16 %v5611_v43, %v5595_v28  ;;  %v15046_v49 = vld [vmem:[%s15255_s17 + $0x48] ss:$16 sps:$4 sm:$0xff]   ;;  %v5628_v29 = vsel %vm5307_vm1, %v20475_v52, %v5468_v37  ;;  %v5499_v43 = vmul.f32 %v16929_v17, %v16242_v36 }
 0x33a   : > { %13134 = vmatprep.subr.bf16.mxu1 %v14282_v53  ;;  %7276 = vmatprep.mubr.bf16.mxu0 %v5724_v1  ;;  %v15047_v53 = vld [vmem:[%s15255_s17 + $0x6c] ss:$16 sps:$4 sm:$0xff]   ;;  %v5676_v37 = vsel %vm5355_vm7, %v16974_v35, %v5516_v7  ;;  %v20477_v35 = vld [vmem:[#allocation19_spill] sm:$0xff]  ;;  %v20488_v7 = vld [vmem:[#allocation37_spill] sm:$0xff] }
 0x33b   : > { %v14287_v50 = vld [vmem:[%s20339_s3 + $0xa8] sm:$0xff]  }
 0x33d   : > { %13135 = vmatpush3.bf16.msra.mxu1 %v14283_v6  ;;  %v5644_v6 = vsel %vm5323_vm2, %v16908_v40, %v5484_v4  ;;  %v5515_v40 = vmul.f32 %v16959_v22, %v16242_v36  ;;  %v5659_v4 = vsel %vm5338_vm4, %v16929_v17, %v5499_v43  ;;  %v20476_v17 = vld [vmem:[#allocation20_spill] sm:$0xff]  ;;  %v20485_v43 = vld [vmem:[#allocation33_spill] sm:$0xff] }
 0x33e   : > { %13136 = vmatprep.subr.bf16.mxu1 %v14284_v16  ;;  %v5740_v28 = vpack.c.bf16 %v5644_v6, %v5628_v29  ;;  %v5643_v16 = vsel %vm5322_vm3, %v16905_v26, %v5483_v25  ;;  %v14289_v26 = vld [vmem:[%s20339_s3 + $0xb0] sm:$0xff]   ;;  %v14291_v25 = vld [vmem:[%s20339_s3 + $0xb8] sm:$0xff]  }
 0x33f   : > { %v5739_v1 = vpack.c.bf16 %v5643_v16, %v5627_v56  ;;  %v20482_v6 = vld [vmem:[#allocation23_spill] sm:$0xff]  ;;  %v20483_v56 = vld [vmem:[#allocation25_spill] sm:$0xff] }
 0x340   : > { %7277 = vmatmul.mubr.bf16.gmra.mrb[108].mxu0 %v5723_v63  ;;  %5168 = vmatmul.mubr.bf16.gmra.mrb[108].mxu1 %v15046_v49  ;;  %v5500_v63 = vmul.f32 %v16947_v58, %v16242_v36  ;;  %v14297_v16 = vld [vmem:[%s20339_s3 + $0x190] sm:$0xff]  }
 0x341   : > { %5177 = vmatprep.mubr.bf16.mxu1 %v15047_v53  ;;  %13137 = vmatpush3.bf16.msra.mxu1 %v14285_v34  ;;  %v5675_v34 = vsel %vm5354_vm6, %v16959_v22, %v5515_v40  ;;  %v20478_v22 = vpack.c.bf16 %v20476_v17, %v20477_v35  ;;  %v20479_v53 = vld [vmem:[#allocation18_spill] sm:$0xff] }
 0x342   : > { %13138 = vmatprep.subr.bf16.mxu1 %v14286_v55  ;;  %7284 = vmatprep.mubr.bf16.mxu0 %v5740_v28  ;;  %v5660_v52 = vsel %vm5339_vm5, %v16947_v58, %v5500_v63  ;;  %v5755_v49 = vpack.c.bf16 %v5675_v34, %v5659_v4  ;;  %v14292_v58 = vld [vmem:[%s20339_s3 + $0x1c0] sm:$0xff]   ;;  %v14296_v28 = vld [vmem:[%s20339_s3 + $0x1d0] sm:$0xff]   ;;  %v20486_v63 = vld [vmem:[#allocation36_spill] sm:$0xff] }
 0x343   : > { %v5756_v55 = vpack.c.bf16 %v5676_v37, %v5660_v52  ;;  %v20487_v40 = vpack.c.bf16 %v20485_v43, %v20486_v63  ;;  %v14299_v52 = vld [vmem:[%s20339_s3 + $0x198] sm:$0xff]   ;;  %v14300_v4 = vld [vmem:[%s20339_s3 + $0x1e0] sm:$0xff]   ;;  %v14302_v35 = vld [vmem:[%s20339_s3 + $0x1e8] sm:$0xff]  }
 0x344   : > { %v14308_v43 = vld [vmem:[%s20339_s3 + $0x2c0] sm:$0xff]  }
 0x345   : > { %13139 = vmatpush3.bf16.msra.mxu1 %v14287_v50  ;;  %v20480_v50 = vld [vmem:[#allocation17_spill] sm:$0xff] }
 0x346   : > { %13140 = vmatprep.subr.bf16.mxu1 %v14288_v18  ;;  %v20481_v29 = vpack.c.bf16 %v20479_v53, %v20480_v50  ;;  %v20484_v18 = vpack.c.bf16 %v20482_v6, %v20483_v56  ;;  %v14304_v50 = vld [vmem:[%s20339_s3 + $0x1f0] sm:$0xff]   ;;  %v14306_v56 = vld [vmem:[%s20339_s3 + $0x1f8] sm:$0xff]  }
 0x348   : > { %7285 = vmatmul.mubr.bf16.gmra.mrb[112].mxu0 %v5739_v1  ;;  %5178 = vmatmul.mubr.bf16.gmra.mrb[112].mxu1 %v17394_v2  ;;  %v14293_v2 = vld [vmem:[%s20339_s3 + $0x180] sm:$0xff]   ;;  %v14298_v1 = vld [vmem:[%s20339_s3 + $0x1d8] sm:$0xff]  }
 0x349   : > { %5187 = vmatprep.mubr.bf16.mxu1 %v17398_v9  ;;  %13141 = vmatpush3.bf16.msra.mxu1 %v14289_v26  ;;  %v14294_v9 = vld [vmem:[%s20339_s3 + $0x1c8] sm:$0xff]  }
 0x34a   : > { %13142 = vmatprep.subr.bf16.mxu1 %v14290_v42  ;;  %7292 = vmatprep.mubr.bf16.mxu0 %v5756_v55  ;;  %v20489_v26 = vld [vmem:[#allocation38_spill] sm:$0xff] }
 0x34b   : > { %v20490_v42 = vpack.c.bf16 %v20488_v7, %v20489_v26  ;;  %v20497_v26 = vld [vmem:[#allocation41_spill] sm:$0xff] }
 0x34d   : > { %13143 = vmatpush3.bf16.msra.mxu1 %v14291_v25 }
 0x34e   : > { %13220 = vmatprep.subr.bf16.mxu1 %v14292_v58  ;;  %v14301_v58 = vld [vmem:[%s20339_s3 + $0x1a0] sm:$0xff]  }
 0x350   : > { %7293 = vmatmul.mubr.bf16.gmra.mrb[116].mxu0 %v5755_v49  ;;  %5188 = vmatmul.mubr.bf16.gmra.mrb[116].mxu1 %v17414_v39  ;;  %v14295_v39 = vld [vmem:[%s20339_s3 + $0x188] sm:$0xff]  }
 0x351   : > { %6895 = vmatprep.mubr.bf16.mxu1 %v20478_v22  ;;  %v20491_v22 = vpack.c.bf16 %v16913_v47, %v16918_v21 }
 0x358   : > { %6896 = vmatmul.mubr.bf16.vlgmr.msra.gmra.mrb[120].mxu1 %v20481_v29 }
 0x359   : > { %6903 = vmatprep.mubr.bf16.mxu1 %v20484_v18  ;;  %13221 = vmatpush3.bf16.msra.mxu1 %v14293_v2  ;;  %v20492_v2 = vpack.c.bf16 %v16926_v12, %v16923_v0  ;;  %v14305_v0 = vld [vmem:[%s20339_s3 + $0x1b0] sm:$0xff]   ;;  %v20493_v18 = vpack.c.bf16 %v16937_v61, %v16934_v59 }
 0x35a   : > { %13222 = vmatprep.subr.bf16.mxu1 %v14294_v9  ;;  %v14303_v9 = vld [vmem:[%s20339_s3 + $0x1a8] sm:$0xff]  }
 0x35d   : > { %13223 = vmatpush3.bf16.msra.mxu1 %v14295_v39  ;;  %v20494_v39 = vld [vmem:[#allocation40_spill] sm:$0xff] }
 0x35e   : > { %13224 = vmatprep.subr.bf16.mxu1 %v14296_v28  ;;  %v20495_v28 = vpack.c.bf16 %v16952_v24, %v20494_v39  ;;  %v20496_v24 = vld [vmem:[#allocation42_spill] sm:$0xff] }
 0x360   : > { %6904 = vmatmul.mubr.bf16.gmra.mrb[124].mxu1 %v20487_v40 }
 0x361   : > { %6911 = vmatprep.mubr.bf16.mxu1 %v20490_v42  ;;  %13225 = vmatpush3.bf16.msra.mxu1 %v14297_v16  ;;  %v14307_v16 = vld [vmem:[%s20339_s3 + $0x1b8] sm:$0xff]   ;;  %v20498_v42 = vpack.c.bf16 %v20496_v24, %v20497_v26 }
 0x362   : > { %v13190_v37 = vpop.f32.mrb[60].mxu0  ;;  %13226 = vmatprep.subr.bf16.mxu1 %v14298_v1  ;;  %v14321_v24 = vld [vmem:[%s20339_s3 + $0x298] sm:$0xff]  }
 0x363   : > { %v13191_v34 = vpop.f32.mrb[61].mxu0 }
 0x364   : > { %v17963_v25 = vadd.f32 %v13191_v34, %v13190_v37  ;;  %v13193_v55 = vpop.f32.mrb[62].mxu0 }
 0x365   : > { %v13194_v49 = vpop.f32.mrb[63].mxu0  ;;  %13227 = vmatpush3.bf16.msra.mxu1 %v14299_v52 }
 0x366   : > { %v17968_v17 = vadd.f32 %v13194_v49, %v13193_v55  ;;  %13228 = vmatprep.subr.bf16.mxu1 %v14300_v4  ;;  %v14309_v49 = vld [vmem:[%s20339_s3 + $0x280] sm:$0xff]  }
 0x368   : > { %6912 = vmatmul.mubr.bf16.gmra.mrb[128].mxu1 %v20491_v22  ;;  %v20500_v22 = vsub.s32 3, %v16203_v13 }
 0x369   : > { %6919 = vmatprep.mubr.bf16.mxu1 %v20492_v2  ;;  %13229 = vmatpush3.bf16.msra.mxu1 %v14301_v58 }
 0x36a   : > { %v13196_v53 = vpop.f32.mrb[64].mxu0  ;;  %13230 = vmatprep.subr.bf16.mxu1 %v14302_v35  ;;  %v14312_v35 = vld [vmem:[%s20339_s3 + $0x2c8] sm:$0xff]   ;;  %v18046_v2 = vrot.slane %v18033_v41, %v20500_v22 }
 0x36b   : > { %v13197_v29 = vpop.f32.mrb[65].mxu0 }
 0x36c   : > { %v17985_v6 = vadd.f32 %v13197_v29, %v13196_v53  ;;  %v13199_v47 = vpop.f32.mrb[66].mxu0 }
 0x36d   : > { %v13200_v21 = vpop.f32.mrb[67].mxu0  ;;  %13231 = vmatpush3.bf16.msra.mxu1 %v14303_v9 }
 0x36e   : > { %v17990_v12 = vadd.f32 %v13200_v21, %v13199_v47  ;;  %13232 = vmatprep.subr.bf16.mxu1 %v14304_v50 }
 0x370   : > { %6920 = vmatmul.mubr.bf16.gmra.mrb[132].mxu1 %v20493_v18 }
 0x371   : > { %6927 = vmatprep.mubr.bf16.mxu1 %v20495_v28  ;;  %13233 = vmatpush3.bf16.msra.mxu1 %v14305_v0  ;;  %v14317_v0 = vld [vmem:[%s20339_s3 + $0x290] sm:$0xff]  }
 0x372   : > { %v13202_v1 = vpop.f32.mrb[68].mxu0  ;;  %13234 = vmatprep.subr.bf16.mxu1 %v14306_v56 }
 0x373   : > { %v13203_v63 = vpop.f32.mrb[69].mxu0 }
 0x374   : > { %v18007_v40 = vadd.f32 %v13203_v63, %v13202_v1  ;;  %v13205_v59 = vpop.f32.mrb[70].mxu0 }
 0x375   : > { %v13206_v61 = vpop.f32.mrb[71].mxu0  ;;  %13235 = vmatpush3.bf16.msra.mxu1 %v14307_v16  ;;  %v14320_v16 = vld [vmem:[%s20339_s3 + $0x2d8] sm:$0xff]  }
 0x376   : > { %v18009_v7 = vadd.f32 %v13206_v61, %v13205_v59  ;;  %13312 = vmatprep.subr.bf16.mxu1 %v14308_v43  ;;  %v20501_v61 = vpack.c.bf16 %v17696_v46, %v17694_v14 }
 0x378   : > { %6928 = vmatmul.mubr.bf16.gmra.mrb[136].mxu1 %v20498_v42 }
 0x379   : > { %7041 = vmatprep.mubr.bf16.mxu1 %v5686_v15  ;;  %v18038_v15 = vrot.slane %v18033_v41, %v20499_v3 }
 0x37a   : > { %v13208_v52 = vpop.f32.mrb[72].mxu0 }
 0x37b   : > { %v13209_v37 = vpop.f32.mrb[73].mxu0 }
 0x37c   : > { %v18017_v4 = vadd.f32 %v13209_v37, %v13208_v52  ;;  %v13211_v34 = vpop.f32.mrb[74].mxu0 }
 0x37d   : > { %v13212_v55 = vpop.f32.mrb[75].mxu0 }
 0x37e   : > { %v18022_v58 = vadd.f32 %v13212_v55, %v13211_v34 }
 0x380   : > { %7042 = vmatmul.mubr.bf16.vlgmr.msra.gmra.mrb[140].mxu1 %v5685_v19  ;;  %v14316_v19 = vld [vmem:[%s20339_s3 + $0x2d0] sm:$0xff]  }
 0x381   : > { %7049 = vmatprep.mubr.bf16.mxu1 %v5702_v30  ;;  %13313 = vmatpush3.bf16.msra.mxu1 %v14309_v49 }
 0x382   : > { %v13214_v31 = vpop.f32.mrb[76].mxu0  ;;  %13314 = vmatprep.subr.bf16.mxu1 %v14312_v35  ;;  %v14325_v35 = vld [vmem:[%s20339_s3 + $0x2a0] sm:$0xff]  }
 0x383   : > { %v4817_v9 = vpop.f32.mrb[80].mxu1  ;;  %v13215_v53 = vpop.f32.mrb[77].mxu0 }
 0x384   : > { %v13913_v27 = vadd.f32 %v4817_v9, %v18038_v15  ;;  %v18055_v8 = vadd.f32 %v13215_v53, %v13214_v31  ;;  %v4819_v30 = vpop.f32.mrb[81].mxu1  ;;  %v13217_v50 = vpop.f32.mrb[78].mxu0  ;;  %v14328_v31 = vld [vmem:[%s20339_s3 + $0x2e8] sm:$0xff]  }
 0x385   : > { %v13914_v29 = vadd.f32 %v4819_v30, %v18046_v2  ;;  %v4821_v47 = vpop.f32.mrb[82].mxu1  ;;  %v13218_v21 = vpop.f32.mrb[79].mxu0  ;;  %13315 = vmatpush3.bf16.msra.mxu1 %v14313_v20 }
 0x386   : > { %v5369_v56 = vmul.f32 %v13913_v27, %v16242_v36  ;;  %v13915_v18 = vadd.f32 %v4821_v47, %v18038_v15  ;;  %v18063_v39 = vadd.f32 %v13218_v21, %v13217_v50  ;;  %v4823_v28 = vpop.f32.mrb[83].mxu1  ;;  %13316 = vmatprep.subr.bf16.mxu1 %v14316_v19  ;;  %vm5208_vm8 = vcmp.gt.f32.partialorder %v13913_v27, 0.0  ;;  %v14332_v47 = vld [vmem:[%s20339_s3 + $0x2f0] sm:$0xff]  }
 0x387   : > { %v5370_v1 = vmul.f32 %v13914_v29, %v16242_v36  ;;  %v13916_v43 = vadd.f32 %v4823_v28, %v18046_v2  ;;  %vm5209_vm9 = vcmp.gt.f32.partialorder %v13914_v29, 0.0  ;;  %v20503_v50 = vpack.c.bf16 %v17742_v32, %v17740_v51 }
 0x388   : > { %vm5224_vm10 = vcmp.gt.f32.partialorder %v13915_v18, 0.0  ;;  %v5385_v63 = vmul.f32 %v13915_v18, %v16242_v36  ;;  %7050 = vmatmul.mubr.bf16.gmra.mrb[144].mxu1 %v5701_v5  ;;  %v18081_v26 = vsel %vm5208_vm8, %v13913_v27, %v5369_v56  ;;  %v20502_v27 = vpack.c.bf16 %v17682_v33, %v17680_v54 }
 0x389   : > { %vm5225_vm11 = vcmp.gt.f32.partialorder %v13916_v43, 0.0  ;;  %v5386_v59 = vmul.f32 %v13916_v43, %v16242_v36  ;;  %7057 = vmatprep.mubr.bf16.mxu1 %v20501_v61  ;;  %13317 = vmatpush3.bf16.msra.mxu1 %v14317_v0  ;;  %v18090_v14 = vsel %vm5209_vm9, %v13914_v29, %v5370_v1  ;;  %v14329_v29 = vld [vmem:[%s20339_s3 + $0x2a8] sm:$0xff]  }
 0x38a   : > { %v18083_v42 = vsel %vm5224_vm10, %v13915_v18, %v5385_v63  ;;  %13318 = vmatprep.subr.bf16.mxu1 %v14320_v16 }
 0x38b   : > { %v5689_v10 = vpack.c.bf16 %v18083_v42, %v18081_v26  ;;  %v4827_v5 = vpop.f32.mrb[84].mxu1  ;;  %v18092_v46 = vsel %vm5225_vm11, %v13916_v43, %v5386_v59  ;;  %v14333_v43 = vld [vmem:[%s20339_s3 + $0x2b0] sm:$0xff]  }
 0x38c   : > { %v13917_v52 = vadd.f32 %v4827_v5, %v18038_v15  ;;  %v4829_v37 = vpop.f32.mrb[85].mxu1  ;;  %v5690_v34 = vpack.c.bf16 %v18092_v46, %v18090_v14  ;;  %v14341_v14 = vld [vmem:[%s20339_s3 + $0x380] sm:$0xff]   ;;  %v14344_v26 = vld [vmem:[%s20339_s3 + $0x3d0] sm:$0xff]  }
 0x38d   : > { %v13918_v55 = vadd.f32 %v4829_v37, %v18046_v2  ;;  %v4831_v49 = vpop.f32.mrb[86].mxu1  ;;  %13319 = vmatpush3.bf16.msra.mxu1 %v14321_v24  ;;  %v14336_v24 = vld [vmem:[%s20339_s3 + $0x2f8] sm:$0xff]   ;;  %v20504_v37 = vpack.c.bf16 %v17728_v62, %v17726_v11  ;;  %v14340_v11 = vld [vmem:[%s20339_s3 + $0x3c0] sm:$0xff]  }
 0x38e   : > { %v5401_v3 = vmul.f32 %v13917_v52, %v16242_v36  ;;  %v13919_v22 = vadd.f32 %v4831_v49, %v18038_v15  ;;  %v4833_v20 = vpop.f32.mrb[87].mxu1  ;;  %13320 = vmatprep.subr.bf16.mxu1 %v14324_v44  ;;  %vm5240_vm12 = vcmp.gt.f32.partialorder %v13917_v52, 0.0  ;;  %v20505_v49 = vpack.c.bf16 %v17788_v57, %v17786_v60 }
 0x38f   : > { %v5402_v19 = vmul.f32 %v13918_v55, %v16242_v36  ;;  %v13920_v9 = vadd.f32 %v4833_v20, %v18046_v2  ;;  %vm5241_vm13 = vcmp.gt.f32.partialorder %v13918_v55, 0.0 }
 0x390   : > { %vm5256_vm14 = vcmp.gt.f32.partialorder %v13919_v22, 0.0  ;;  %v5417_v53 = vmul.f32 %v13919_v22, %v16242_v36  ;;  %7058 = vmatmul.mubr.bf16.gmra.mrb[148].mxu1 %v20502_v27  ;;  %v18122_v21 = vsel %vm5240_vm12, %v13917_v52, %v5401_v3 }
 0x391   : > { %vm5257_vm15 = vcmp.gt.f32.partialorder %v13920_v9, 0.0  ;;  %v5418_v30 = vmul.f32 %v13920_v9, %v16242_v36  ;;  %7065 = vmatprep.mubr.bf16.mxu1 %v20503_v50  ;;  %13321 = vmatpush3.bf16.msra.mxu1 %v14325_v35  ;;  %v18126_v0 = vsel %vm5241_vm13, %v13918_v55, %v5402_v19  ;;  %v14337_v35 = vld [vmem:[%s20339_s3 + $0x2b8] sm:$0xff]  }
 0x392   : > { %13322 = vmatprep.subr.bf16.mxu1 %v14328_v31  ;;  %v18124_v54 = vsel %vm5256_vm14, %v13919_v22, %v5417_v53 }
 0x393   : > { %v4837_v33 = vpop.f32.mrb[88].mxu1  ;;  %v18128_v56 = vsel %vm5257_vm15, %v13920_v9, %v5418_v30  ;;  %v5705_v51 = vpack.c.bf16 %v18124_v54, %v18122_v21  ;;  %v14350_v21 = vld [vmem:[%s20339_s3 + $0x3e8] sm:$0xff]  }
 0x394   : > { %v13921_v32 = vadd.f32 %v4837_v33, %v18038_v15  ;;  %v4839_v18 = vpop.f32.mrb[89].mxu1  ;;  %v5706_v28 = vpack.c.bf16 %v18128_v56, %v18126_v0  ;;  %v14345_v0 = vld [vmem:[%s20339_s3 + $0x390] sm:$0xff]   ;;  %v14346_v56 = vld [vmem:[%s20339_s3 + $0x3d8] sm:$0xff]   ;;  %v14351_v54 = vld [vmem:[%s20339_s3 + $0x3a8] sm:$0xff]  }
 0x395   : > { %v13922_v16 = vadd.f32 %v4839_v18, %v18046_v2  ;;  %v4841_v1 = vpop.f32.mrb[90].mxu1  ;;  %13323 = vmatpush3.bf16.msra.mxu1 %v14329_v29 }
 0x396   : > { %v5433_v63 = vmul.f32 %v13921_v32, %v16242_v36  ;;  %v13923_v59 = vadd.f32 %v4841_v1, %v18038_v15  ;;  %v4843_v61 = vpop.f32.mrb[91].mxu1  ;;  %13324 = vmatprep.subr.bf16.mxu1 %v14332_v47  ;;  %vm5272_vm0 = vcmp.gt.f32.partialorder %v13921_v32, 0.0  ;;  %v13282_v62 = vpop.f32.mrb[80].mxu0 }
 0x397   : > { %v5434_v44 = vmul.f32 %v13922_v16, %v16242_v36  ;;  %v13924_v5 = vadd.f32 %v4843_v61, %v18046_v2  ;;  %vm5273_vm1 = vcmp.gt.f32.partialorder %v13922_v16, 0.0  ;;  %v13283_v19 = vpop.f32.mrb[81].mxu0  ;;  %v20506_v61 = vpack.c.bf16 %v17780_v38, %v17778_v45 }
 0x398   : > { %vm5288_vm2 = vcmp.gt.f32.partialorder %v13923_v59, 0.0  ;;  %v5449_v52 = vmul.f32 %v13923_v59, %v16242_v36  ;;  %7066 = vmatmul.mubr.bf16.gmra.mrb[152].mxu1 %v20504_v37  ;;  %v18157_v3 = vsel %vm5272_vm0, %v13921_v32, %v5433_v63  ;;  %v18173_v30 = vadd.f32 %v13283_v19, %v13282_v62  ;;  %v13285_v50 = vpop.f32.mrb[82].mxu0 }
 0x399   : > { %vm5289_vm3 = vcmp.gt.f32.partialorder %v13924_v5, 0.0  ;;  %v5450_v55 = vmul.f32 %v13924_v5, %v16242_v36  ;;  %7073 = vmatprep.mubr.bf16.mxu1 %v20505_v49  ;;  %13325 = vmatpush3.bf16.msra.mxu1 %v14333_v43  ;;  %v18164_v31 = vsel %vm5273_vm1, %v13922_v16, %v5434_v44  ;;  %v13286_v16 = vpop.f32.mrb[83].mxu0 }
 0x39a   : > { %13326 = vmatprep.subr.bf16.mxu1 %v14336_v24  ;;  %v18159_v22 = vsel %vm5288_vm2, %v13923_v59, %v5449_v52  ;;  %v18180_v63 = vadd.f32 %v13286_v16, %v13285_v50 }
 0x39b   : > { %v4847_v20 = vpop.f32.mrb[92].mxu1  ;;  %v18166_v60 = vsel %vm5289_vm3, %v13924_v5, %v5450_v55  ;;  %v5721_v57 = vpack.c.bf16 %v18159_v22, %v18157_v3  ;;  %v14354_v3 = vld [vmem:[%s20339_s3 + $0x3f8] sm:$0xff]  }
 0x39c   : > { %v13925_v9 = vadd.f32 %v4847_v20, %v18038_v15  ;;  %v4849_v53 = vpop.f32.mrb[93].mxu1  ;;  %v5722_v27 = vpack.c.bf16 %v18166_v60, %v18164_v31  ;;  %v14342_v31 = vld [vmem:[%s20339_s3 + $0x3c8] sm:$0xff]  }
 0x39d   : > { %v13926_v29 = vadd.f32 %v4849_v53, %v18046_v2  ;;  %v4851_v47 = vpop.f32.mrb[94].mxu1  ;;  %13327 = vmatpush3.bf16.msra.mxu1 %v14337_v35 }
 0x39e   : > { %v5465_v33 = vmul.f32 %v13925_v9, %v16242_v36  ;;  %v13927_v32 = vadd.f32 %v4851_v47, %v18038_v15  ;;  %v4853_v18 = vpop.f32.mrb[95].mxu1  ;;  %13404 = vmatprep.subr.bf16.mxu1 %v14340_v11  ;;  %vm5304_vm4 = vcmp.gt.f32.partialorder %v13925_v9, 0.0 }
 0x39f   : > { %v5466_v1 = vmul.f32 %v13926_v29, %v16242_v36  ;;  %v13928_v43 = vadd.f32 %v4853_v18, %v18046_v2  ;;  %vm5305_vm5 = vcmp.gt.f32.partialorder %v13926_v29, 0.0  ;;  %v14353_v18 = vld [vmem:[%s20339_s3 + $0x3b0] sm:$0xff]  }
 0x3a0   : > { %vm5320_vm6 = vcmp.gt.f32.partialorder %v13927_v32, 0.0  ;;  %v5481_v59 = vmul.f32 %v13927_v32, %v16242_v36  ;;  %7074 = vmatmul.mubr.bf16.gmra.mrb[156].mxu1 %v20506_v61  ;;  %v18190_v44 = vsel %vm5304_vm4, %v13925_v9, %v5465_v33  ;;  %v14348_v33 = vld [vmem:[%s20339_s3 + $0x3e0] sm:$0xff]  }
 0x3a1   : > { %vm5321_vm7 = vcmp.gt.f32.partialorder %v13928_v43, 0.0  ;;  %v5482_v24 = vmul.f32 %v13928_v43, %v16242_v36  ;;  %7187 = vmatprep.mubr.bf16.mxu1 %v5690_v34  ;;  %v5626_v37 = vsel %vm5305_vm5, %v13926_v29, %v5466_v1 }
 0x3a2   : > { %v18192_v5 = vsel %vm5320_vm6, %v13927_v32, %v5481_v59  ;;  %v14349_v32 = vld [vmem:[%s20339_s3 + $0x3a0] sm:$0xff]   ;;  %v14355_v59 = vld [vmem:[%s20339_s3 + $0x3b8] sm:$0xff]  }
 0x3a3   : > { %v4857_v52 = vpop.f32.mrb[96].mxu1  ;;  %v5642_v55 = vsel %vm5321_vm7, %v13928_v43, %v5482_v24  ;;  %v5737_v49 = vpack.c.bf16 %v18192_v5, %v18190_v44 }
 0x3a4   : > { %v13929_v45 = vadd.f32 %v4857_v52, %v18038_v15  ;;  %v4859_v38 = vpop.f32.mrb[97].mxu1  ;;  %v5738_v35 = vpack.c.bf16 %v5642_v55, %v5626_v37 }
 0x3a5   : > { %v13930_v11 = vadd.f32 %v4859_v38, %v18046_v2  ;;  %v4861_v62 = vpop.f32.mrb[98].mxu1 }
 0x3a6   : > { %v5497_v46 = vmul.f32 %v13929_v45, %v16242_v36  ;;  %v13931_v34 = vadd.f32 %v4861_v62, %v18038_v15  ;;  %v4863_v20 = vpop.f32.mrb[99].mxu1  ;;  %vm5336_vm8 = vcmp.gt.f32.partialorder %v13929_v45, 0.0 }
 0x3a7   : > { %v5498_v60 = vmul.f32 %v13930_v11, %v16242_v36  ;;  %v13932_v19 = vadd.f32 %v4863_v20, %v18046_v2  ;;  %vm5337_vm9 = vcmp.gt.f32.partialorder %v13930_v11, 0.0  ;;  %v14343_v2 = vld [vmem:[%s20339_s3 + $0x388] sm:$0xff]  }
 0x3a8   : > { %vm5352_vm10 = vcmp.gt.f32.partialorder %v13931_v34, 0.0  ;;  %v5513_v9 = vmul.f32 %v13931_v34, %v16242_v36  ;;  %7188 = vmatmul.mubr.bf16.vlgmr.msra.gmra.mrb[160].mxu1 %v5689_v10  ;;  %v5657_v53 = vsel %vm5336_vm8, %v13929_v45, %v5497_v46 }
 0x3a9   : > { %vm5353_vm11 = vcmp.gt.f32.partialorder %v13932_v19, 0.0  ;;  %v5514_v15 = vmul.f32 %v13932_v19, %v16242_v36  ;;  %7195 = vmatprep.mubr.bf16.mxu1 %v5706_v28  ;;  %13405 = vmatpush3.bf16.msra.mxu1 %v14341_v14  ;;  %v5658_v42 = vsel %vm5337_vm9, %v13930_v11, %v5498_v60  ;;  %v14347_v28 = vld [vmem:[%s20339_s3 + $0x398] sm:$0xff]   ;;  %v20507_v60 = vsub.s32 6, %v16203_v13 }
 0x3aa   : > { %v5673_v50 = vsel %vm5352_vm10, %v13931_v34, %v5513_v9  ;;  %13406 = vmatprep.subr.bf16.mxu1 %v14342_v31  ;;  %v20508_v9 = vsub.s32 7, %v16203_v13 }
 0x3ab   : > { %v5674_v10 = vsel %vm5353_vm11, %v13932_v19, %v5514_v15  ;;  %v5753_v29 = vpack.c.bf16 %v5673_v50, %v5657_v53  ;;  %v18280_v19 = vrot.slane %v18033_v41, %v20507_v60 }
 0x3ac   : > { %v5754_v47 = vpack.c.bf16 %v5674_v10, %v5658_v42  ;;  %v18285_v15 = vrot.slane %v18033_v41, %v20508_v9 }
 0x3ad   : > { %13407 = vmatpush3.bf16.msra.mxu1 %v14343_v2 }
 0x3ae   : > { %13408 = vmatprep.subr.bf16.mxu1 %v14344_v26 }
 0x3b0   : > { %7196 = vmatmul.mubr.bf16.gmra.mrb[164].mxu1 %v5705_v51  ;;  %v14352_v51 = vld [vmem:[%s20339_s3 + $0x3f0] sm:$0xff]  }
 0x3b1   : > { %7203 = vmatprep.mubr.bf16.mxu1 %v5722_v27  ;;  %13409 = vmatpush3.bf16.msra.mxu1 %v14345_v0  ;;  %v13288_v27 = vpop.f32.mrb[84].mxu0 }
 0x3b2   : > { %13410 = vmatprep.subr.bf16.mxu1 %v14346_v56  ;;  %v13289_v16 = vpop.f32.mrb[85].mxu0 }
 0x3b3   : > { %v18258_v22 = vadd.f32 %v13289_v16, %v13288_v27 }
 0x3b5   : > { %13411 = vmatpush3.bf16.msra.mxu1 %v14347_v28 }
 0x3b6   : > { %13412 = vmatprep.subr.bf16.mxu1 %v14348_v33 }
 0x3b8   : > { %7204 = vmatmul.mubr.bf16.gmra.mrb[168].mxu1 %v5721_v57  ;;  %v13291_v57 = vpop.f32.mrb[86].mxu0 }
 0x3b9   : > { %7211 = vmatprep.mubr.bf16.mxu1 %v5738_v35  ;;  %13413 = vmatpush3.bf16.msra.mxu1 %v14349_v32  ;;  %v13292_v1 = vpop.f32.mrb[87].mxu0 }
 0x3ba   : > { %13414 = vmatprep.subr.bf16.mxu1 %v14350_v21  ;;  %v18260_v43 = vadd.f32 %v13292_v1, %v13291_v57 }
 0x3bc   : > { %v13294_v61 = vpop.f32.mrb[88].mxu0 }
 0x3bd   : > { %13415 = vmatpush3.bf16.msra.mxu1 %v14351_v54  ;;  %v13295_v24 = vpop.f32.mrb[89].mxu0 }
 0x3be   : > { %13416 = vmatprep.subr.bf16.mxu1 %v14352_v51  ;;  %v18265_v44 = vadd.f32 %v13295_v24, %v13294_v61  ;;  %v13297_v5 = vpop.f32.mrb[90].mxu0 }
 0x3bf   : > { %v13298_v52 = vpop.f32.mrb[91].mxu0 }
 0x3c0   : > { %7212 = vmatmul.mubr.bf16.gmra.mrb[172].mxu1 %v5737_v49  ;;  %v18267_v37 = vadd.f32 %v13298_v52, %v13297_v5 }
 0x3c1   : > { %7219 = vmatprep.mubr.bf16.mxu1 %v5754_v47  ;;  %13417 = vmatpush3.bf16.msra.mxu1 %v14353_v18 }
 0x3c2   : > { %13418 = vmatprep.subr.bf16.mxu1 %v14354_v3 }
 0x3c5   : > { %13419 = vmatpush3.bf16.msra.mxu1 %v14355_v59  ;;  %v13300_v55 = vpop.f32.mrb[92].mxu0 }
 0x3c6   : > { %v13301_v49 = vpop.f32.mrb[93].mxu0 }
 0x3c7   : > { %v18269_v45 = vadd.f32 %v13301_v49, %v13300_v55  ;;  %v13303_v38 = vpop.f32.mrb[94].mxu0 }
 0x3c8   : > { %7220 = vmatmul.mubr.bf16.gmra.mrb[176].mxu1 %v5753_v29  ;;  %v13304_v35 = vpop.f32.mrb[95].mxu0 }
 0x3c9   : > { %v18271_v11 = vadd.f32 %v13304_v35, %v13303_v38 }
 0x3cd   : > { %v13306_v62 = vpop.f32.mrb[96].mxu0 }
 0x3ce   : > { %v13307_v14 = vpop.f32.mrb[97].mxu0 }
 0x3cf   : > { %v18273_v46 = vadd.f32 %v13307_v14, %v13306_v62  ;;  %v13309_v34 = vpop.f32.mrb[98].mxu0 }
 0x3d0   : > { %v13310_v20 = vpop.f32.mrb[99].mxu0 }
 0x3d1   : > { %v18275_v31 = vadd.f32 %v13310_v20, %v13309_v34 }
 0x403   : > { %v13374_v2 = vpop.f32.mrb[100].mxu0  ;;  %v5149_v53 = vpop.f32.mrb[100].mxu1 }
 0x404   : > { %v13375_v50 = vpop.f32.mrb[101].mxu0  ;;  %v13953_v26 = vadd.f32 %v5149_v53, %v18280_v19  ;;  %v5151_v42 = vpop.f32.mrb[101].mxu1 }
 0x405   : > { %v18288_v10 = vadd.f32 %v13375_v50, %v13374_v2  ;;  %v13377_v29 = vpop.f32.mrb[102].mxu0  ;;  %v13954_v47 = vadd.f32 %v5151_v42, %v18285_v15  ;;  %v5153_v0 = vpop.f32.mrb[102].mxu1 }
 0x406   : > { %v13378_v56 = vpop.f32.mrb[103].mxu0  ;;  %v5373_v28 = vmul.f32 %v13953_v26, %v16242_v36  ;;  %v13955_v13 = vadd.f32 %v5153_v0, %v18280_v19  ;;  %v5155_v33 = vpop.f32.mrb[103].mxu1  ;;  %vm5212_vm12 = vcmp.gt.f32.partialorder %v13953_v26, 0.0 }
 0x407   : > { %v18293_v41 = vadd.f32 %v13378_v56, %v13377_v29  ;;  %v5374_v32 = vmul.f32 %v13954_v47, %v16242_v36  ;;  %v13956_v21 = vadd.f32 %v5155_v33, %v18285_v15  ;;  %vm5213_vm13 = vcmp.gt.f32.partialorder %v13954_v47, 0.0 }
 0x408   : > { %vm5228_vm14 = vcmp.gt.f32.partialorder %v13955_v13, 0.0  ;;  %v5389_v54 = vmul.f32 %v13955_v13, %v16242_v36  ;;  %v5533_v27 = vsel %vm5212_vm12, %v13953_v26, %v5373_v28 }
 0x409   : > { %vm5229_vm15 = vcmp.gt.f32.partialorder %v13956_v21, 0.0  ;;  %v5390_v51 = vmul.f32 %v13956_v21, %v16242_v36  ;;  %v5534_v1 = vsel %vm5213_vm13, %v13954_v47, %v5374_v32 }
 0x40a   : > { %v5549_v18 = vsel %vm5228_vm14, %v13955_v13, %v5389_v54 }
 0x40b   : > { %v13380_v16 = vpop.f32.mrb[104].mxu0  ;;  %v5693_v3 = vpack.c.bf16 %v5549_v18, %v5533_v27  ;;  %v5159_v57 = vpop.f32.mrb[104].mxu1  ;;  %v5550_v59 = vsel %vm5229_vm15, %v13956_v21, %v5390_v51 }
 0x40c   : > { %v13381_v61 = vpop.f32.mrb[105].mxu0  ;;  %v13957_v24 = vadd.f32 %v5159_v57, %v18280_v19  ;;  %v5161_v5 = vpop.f32.mrb[105].mxu1  ;;  %v5694_v52 = vpack.c.bf16 %v5550_v59, %v5534_v1 }
 0x40d   : > { %v18300_v55 = vadd.f32 %v13381_v61, %v13380_v16  ;;  %v13383_v49 = vpop.f32.mrb[106].mxu0  ;;  %v13958_v38 = vadd.f32 %v5161_v5, %v18285_v15  ;;  %v5163_v35 = vpop.f32.mrb[106].mxu1 }
 0x40e   : > { %v13384_v62 = vpop.f32.mrb[107].mxu0  ;;  %v5405_v14 = vmul.f32 %v13957_v24, %v16242_v36  ;;  %v13959_v34 = vadd.f32 %v5163_v35, %v18280_v19  ;;  %v5165_v20 = vpop.f32.mrb[107].mxu1  ;;  %7333 = vmatprep.mubr.bf16.mxu1 %v5694_v52  ;;  %vm5244_vm0 = vcmp.gt.f32.partialorder %v13957_v24, 0.0 }
 0x40f   : > { %v18305_v60 = vadd.f32 %v13384_v62, %v13383_v49  ;;  %v5406_v9 = vmul.f32 %v13958_v38, %v16242_v36  ;;  %v13960_v2 = vadd.f32 %v5165_v20, %v18285_v15  ;;  %7334 = vmatmul.mubr.bf16.vlgmr.msra.gmra.mrb[180].mxu1 %v5693_v3  ;;  %vm5245_vm1 = vcmp.gt.f32.partialorder %v13958_v38, 0.0 }
 0x410   : > { %vm5260_vm2 = vcmp.gt.f32.partialorder %v13959_v34, 0.0  ;;  %v5421_v53 = vmul.f32 %v13959_v34, %v16242_v36  ;;  %v5565_v26 = vsel %vm5244_vm0, %v13957_v24, %v5405_v14 }
 0x411   : > { %vm5261_vm3 = vcmp.gt.f32.partialorder %v13960_v2, 0.0  ;;  %v5422_v50 = vmul.f32 %v13960_v2, %v16242_v36  ;;  %v5566_v0 = vsel %vm5245_vm1, %v13958_v38, %v5406_v9  ;;  %vm7405_vm1 = vcmask 1040384  }
 0x412   : > { %v5581_v42 = vsel %vm5260_vm2, %v13959_v34, %v5421_v53 }
 0x413   : > { %v13386_v29 = vpop.f32.mrb[108].mxu0  ;;  %v5169_v47 = vpop.f32.mrb[108].mxu1  ;;  %v5582_v56 = vsel %vm5261_vm3, %v13960_v2, %v5422_v50  ;;  %v5709_v28 = vpack.c.bf16 %v5581_v42, %v5565_v26  ;;  %vm7408_vm3 = vcmask 1041409  }
 0x414   : > { %v13387_v13 = vpop.f32.mrb[109].mxu0  ;;  %v13961_v33 = vadd.f32 %v5169_v47, %v18280_v19  ;;  %v5171_v32 = vpop.f32.mrb[109].mxu1  ;;  %v5710_v21 = vpack.c.bf16 %v5582_v56, %v5566_v0 }
 0x415   : > { %v18312_v54 = vadd.f32 %v13387_v13, %v13386_v29  ;;  %v13389_v51 = vpop.f32.mrb[110].mxu0  ;;  %v13962_v27 = vadd.f32 %v5171_v32, %v18285_v15  ;;  %v5173_v18 = vpop.f32.mrb[110].mxu1 }
 0x416   : > { %v13390_v16 = vpop.f32.mrb[111].mxu0  ;;  %v5437_v3 = vmul.f32 %v13961_v33, %v16242_v36  ;;  %v13963_v57 = vadd.f32 %v5173_v18, %v18280_v19  ;;  %v5175_v1 = vpop.f32.mrb[111].mxu1  ;;  %7341 = vmatprep.mubr.bf16.mxu1 %v5710_v21  ;;  %vm5276_vm4 = vcmp.gt.f32.partialorder %v13961_v33, 0.0 }
 0x417   : > { %v18317_v59 = vadd.f32 %v13390_v16, %v13389_v51  ;;  %v5438_v61 = vmul.f32 %v13962_v27, %v16242_v36  ;;  %v13964_v24 = vadd.f32 %v5175_v1, %v18285_v15  ;;  %7342 = vmatmul.mubr.bf16.gmra.mrb[184].mxu1 %v5709_v28  ;;  %vm5277_vm5 = vcmp.gt.f32.partialorder %v13962_v27, 0.0 }
 0x418   : > { %vm5292_vm6 = vcmp.gt.f32.partialorder %v13963_v57, 0.0  ;;  %v5453_v5 = vmul.f32 %v13963_v57, %v16242_v36  ;;  %v5597_v49 = vsel %vm5276_vm4, %v13961_v33, %v5437_v3 }
 0x419   : > { %vm5293_vm7 = vcmp.gt.f32.partialorder %v13964_v24, 0.0  ;;  %v5454_v52 = vmul.f32 %v13964_v24, %v16242_v36  ;;  %v5598_v14 = vsel %vm5277_vm5, %v13962_v27, %v5438_v61 }
 0x41a   : > { %v5613_v38 = vsel %vm5292_vm6, %v13963_v57, %v5453_v5  ;;  %vm7411_vm6 = vcmask 1042434  }
 0x41b   : > { %v13392_v35 = vpop.f32.mrb[112].mxu0  ;;  %v5179_v62 = vpop.f32.mrb[112].mxu1  ;;  %v5614_v34 = vsel %vm5293_vm7, %v13964_v24, %v5454_v52  ;;  %v5725_v20 = vpack.c.bf16 %v5613_v38, %v5597_v49 }
 0x41c   : > { %v13393_v9 = vpop.f32.mrb[113].mxu0  ;;  %v13965_v2 = vadd.f32 %v5179_v62, %v18280_v19  ;;  %v5181_v53 = vpop.f32.mrb[113].mxu1  ;;  %v5726_v50 = vpack.c.bf16 %v5614_v34, %v5598_v14 }
 0x41d   : > { %v18324_v26 = vadd.f32 %v13393_v9, %v13392_v35  ;;  %v13395_v42 = vpop.f32.mrb[114].mxu0  ;;  %v13966_v29 = vadd.f32 %v5181_v53, %v18285_v15  ;;  %v5183_v47 = vpop.f32.mrb[114].mxu1 }
 0x41e   : > { %v13396_v0 = vpop.f32.mrb[115].mxu0  ;;  %v5469_v56 = vmul.f32 %v13965_v2, %v16242_v36  ;;  %v13967_v28 = vadd.f32 %v5183_v47, %v18280_v19  ;;  %v5185_v13 = vpop.f32.mrb[115].mxu1  ;;  %7349 = vmatprep.mubr.bf16.mxu1 %v5726_v50  ;;  %vm5308_vm8 = vcmp.gt.f32.partialorder %v13965_v2, 0.0 }
 0x41f   : > { %v18329_v33 = vadd.f32 %v13396_v0, %v13395_v42  ;;  %v5470_v32 = vmul.f32 %v13966_v29, %v16242_v36  ;;  %v13968_v21 = vadd.f32 %v5185_v13, %v18285_v15  ;;  %7350 = vmatmul.mubr.bf16.gmra.mrb[188].mxu1 %v5725_v20  ;;  %vm5309_vm9 = vcmp.gt.f32.partialorder %v13966_v29, 0.0 }
 0x420   : > { %vm5324_vm10 = vcmp.gt.f32.partialorder %v13967_v28, 0.0  ;;  %v5485_v51 = vmul.f32 %v13967_v28, %v16242_v36  ;;  %v5629_v18 = vsel %vm5308_vm8, %v13965_v2, %v5469_v56 }
 0x421   : > { %vm5325_vm11 = vcmp.gt.f32.partialorder %v13968_v21, 0.0  ;;  %v5486_v27 = vmul.f32 %v13968_v21, %v16242_v36  ;;  %v5630_v1 = vsel %vm5309_vm9, %v13966_v29, %v5470_v32 }
 0x422   : > { %v5645_v16 = vsel %vm5324_vm10, %v13967_v28, %v5485_v51 }
 0x423   : > { %v13398_v3 = vpop.f32.mrb[116].mxu0  ;;  %v5189_v57 = vpop.f32.mrb[116].mxu1  ;;  %v5646_v61 = vsel %vm5325_vm11, %v13968_v21, %v5486_v27  ;;  %v5741_v24 = vpack.c.bf16 %v5645_v16, %v5629_v18  ;;  %v20509_v18 = vld [vmem:[#allocation43_spill] sm:$0xff]  ;;  %vm7414_vm11 = vcmask 1043459  }
 0x424   : > { %v13399_v5 = vpop.f32.mrb[117].mxu0  ;;  %v13969_v52 = vadd.f32 %v5189_v57, %v18280_v19  ;;  %v5191_v49 = vpop.f32.mrb[117].mxu1  ;;  %v5742_v38 = vpack.c.bf16 %v5646_v61, %v5630_v1  ;;  %v20510_v61 = vld [vmem:[#allocation44_spill] sm:$0xff] }
 0x425   : > { %v18336_v35 = vadd.f32 %v13399_v5, %v13398_v3  ;;  %v13401_v62 = vpop.f32.mrb[118].mxu0  ;;  %v13970_v14 = vadd.f32 %v5191_v49, %v18285_v15  ;;  %v5193_v34 = vpop.f32.mrb[118].mxu1 }
 0x426   : > { %v13402_v20 = vpop.f32.mrb[119].mxu0  ;;  %v5501_v9 = vmul.f32 %v13969_v52, %v16242_v36  ;;  %v13971_v2 = vadd.f32 %v5193_v34, %v18280_v19  ;;  %v5195_v53 = vpop.f32.mrb[119].mxu1  ;;  %7357 = vmatprep.mubr.bf16.mxu1 %v5742_v38  ;;  %vm5340_vm12 = vcmp.gt.f32.partialorder %v13969_v52, 0.0  ;;  %v20511_v34 = vld [vmem:[#allocation45_spill] sm:$0xff] }
 0x427   : > { %v18341_v50 = vadd.f32 %v13402_v20, %v13401_v62  ;;  %v5502_v42 = vmul.f32 %v13970_v14, %v16242_v36  ;;  %v13972_v29 = vadd.f32 %v5195_v53, %v18285_v15  ;;  %7358 = vmatmul.mubr.bf16.gmra.mrb[192].mxu1 %v5741_v24  ;;  %vm5341_vm13 = vcmp.gt.f32.partialorder %v13970_v14, 0.0  ;;  %v15049_v15 = vld [vmem:[%s20340_s4] ss:$0 sm:$0xff] }
 0x428   : > { %vm5356_vm14 = vcmp.gt.f32.partialorder %v13971_v2, 0.0  ;;  %v5517_v47 = vmul.f32 %v13971_v2, %v16242_v36  ;;  %v5661_v56 = vsel %vm5340_vm12, %v13969_v52, %v5501_v9  ;;  %v6825_v16 = vadd.f32 %v15049_v15, %v20509_v18  ;;  %v20514_v18 = vld [vmem:[#allocation48_spill] sm:$0xff] }
 0x429   : > { %vm5357_vm15 = vcmp.gt.f32.partialorder %v13972_v29, 0.0  ;;  %v5518_v0 = vmul.f32 %v13972_v29, %v16242_v36  ;;  %v5662_v13 = vsel %vm5341_vm13, %v13970_v14, %v5502_v42  ;;  %v6828_v36 = vadd.f32 %v15049_v15, %v20510_v61  ;;  %v20512_v42 = vld [vmem:[#allocation46_spill] sm:$0xff] }
 0x42a   : > { %v5677_v28 = vsel %vm5356_vm14, %v13971_v2, %v5517_v47  ;;  %v6833_v20 = vadd.f32 %v15049_v15, %v20511_v34  ;;  %v20516_v34 = vld [vmem:[#allocation50_spill] sm:$0xff]  ;;  %vm15078_vm14 = vmmov 0  }
 0x42b   : > { %v13144_v19 = vpop.f32.mrb[120].mxu1  ;;  %v5678_v32 = vsel %vm5357_vm15, %v13972_v29, %v5518_v0  ;;  %v5757_v21 = vpack.c.bf16 %v5677_v28, %v5661_v56  ;;  %v6836_v29 = vadd.f32 %v15049_v15, %v20512_v42  ;;  %vm9201_vm15 = vcmask 261120  }
 0x42c   : > { %v13145_v51 = vpop.f32.mrb[121].mxu1  ;;  %v5758_v27 = vpack.c.bf16 %v5678_v32, %v5662_v13  ;;  %v20513_v32 = vld [vmem:[#allocation47_spill] sm:$0xff] }
 0x42d   : > { %v13146_v3 = vadd.f32 %v13145_v51, %v13144_v19  ;;  %v13147_v57 = vpop.f32.mrb[122].mxu1 }
 0x42e   : > { %v13148_v1 = vpop.f32.mrb[123].mxu1  ;;  %7365 = vmatprep.mubr.bf16.mxu1 %v5758_v27 }
 0x42f   : > { %v6898_v24 = vadd.f32 %v13146_v3, %v6825_v16  ;;  %v13149_v5 = vadd.f32 %v13148_v1, %v13147_v57  ;;  %7366 = vmatmul.mubr.bf16.gmra.mrb[196].mxu1 %v5757_v21  ;;  %v6841_v21 = vadd.f32 %v15049_v15, %v20513_v32  ;;  %v6844_v16 = vadd.f32 %v15049_v15, %v20514_v18 }
 0x431   : > { %v6901_v52 = vadd.f32 %v13149_v5, %v6828_v36  ;;  %v6971_v49 = vadd.f32 %v17963_v25, %v6898_v24  ;;  %v20515_v5 = vld [vmem:[#allocation49_spill] sm:$0xff] }
 0x433   : > { %v13150_v38 = vpop.f32.mrb[124].mxu1  ;;  %v6974_v62 = vadd.f32 %v17968_v17, %v6901_v52  ;;  %v6849_v52 = vadd.f32 %v15049_v15, %v20515_v5 }
 0x434   : > { %v13151_v14 = vpop.f32.mrb[125].mxu1 }
 0x435   : > { %v13152_v9 = vadd.f32 %v13151_v14, %v13150_v38  ;;  %v13153_v2 = vpop.f32.mrb[126].mxu1 }
 0x436   : > { %v13154_v53 = vpop.f32.mrb[127].mxu1 }
 0x437   : > { %v6906_v47 = vadd.f32 %v13152_v9, %v6833_v20  ;;  %v13155_v0 = vadd.f32 %v13154_v53, %v13153_v2  ;;  %v6852_v20 = vadd.f32 %v15049_v15, %v20516_v34 }
 0x439   : > { %v6909_v56 = vadd.f32 %v13155_v0, %v6836_v29  ;;  %v6979_v28 = vadd.f32 %v17985_v6, %v6906_v47  ;;  %v20517_v0 = vld [vmem:[#allocation51_spill] sm:$0xff] }
 0x43b   : > { %v13156_v19 = vpop.f32.mrb[128].mxu1  ;;  %v6982_v13 = vadd.f32 %v17990_v12, %v6909_v56  ;;  %v6857_v56 = vadd.f32 %v15049_v15, %v20517_v0 }
 0x43c   : > { %v13157_v25 = vpop.f32.mrb[129].mxu1 }
 0x43d   : > { %v13158_v17 = vadd.f32 %v13157_v25, %v13156_v19  ;;  %v13159_v51 = vpop.f32.mrb[130].mxu1 }
 0x43e   : > { %v13160_v27 = vpop.f32.mrb[131].mxu1 }
 0x43f   : > { %v6914_v3 = vadd.f32 %v13158_v17, %v6841_v21  ;;  %v13161_v57 = vadd.f32 %v13160_v27, %v13159_v51 }
 0x441   : > { %v6917_v1 = vadd.f32 %v13161_v57, %v6844_v16  ;;  %v6987_v61 = vadd.f32 %v18007_v40, %v6914_v3 }
 0x443   : > { %v13162_v36 = vpop.f32.mrb[132].mxu1  ;;  %v6990_v24 = vadd.f32 %v18009_v7, %v6917_v1 }
 0x444   : > { %v13163_v6 = vpop.f32.mrb[133].mxu1 }
 0x445   : > { %v13164_v12 = vadd.f32 %v13163_v6, %v13162_v36  ;;  %v13165_v38 = vpop.f32.mrb[134].mxu1 }
 0x446   : > { %v13166_v14 = vpop.f32.mrb[135].mxu1 }
 0x447   : > { %v6922_v9 = vadd.f32 %v13164_v12, %v6849_v52  ;;  %v13167_v2 = vadd.f32 %v13166_v14, %v13165_v38 }
 0x449   : > { %v6925_v53 = vadd.f32 %v13167_v2, %v6852_v20  ;;  %v6995_v42 = vadd.f32 %v18017_v4, %v6922_v9 }
 0x44b   : > { %v13168_v29 = vpop.f32.mrb[136].mxu1  ;;  %v6998_v47 = vadd.f32 %v18022_v58, %v6925_v53 }
 0x44c   : > { %v13169_v40 = vpop.f32.mrb[137].mxu1 }
 0x44d   : > { %v13170_v7 = vadd.f32 %v13169_v40, %v13168_v29  ;;  %v13171_v19 = vpop.f32.mrb[138].mxu1 }
 0x44e   : > { %v13172_v25 = vpop.f32.mrb[139].mxu1 }
 0x44f   : > { %v6930_v32 = vadd.f32 %v13170_v7, %v6857_v56  ;;  %v13173_v21 = vadd.f32 %v13172_v25, %v13171_v19  ;;  %v14358_v56 = vld [vmem:[%s20341_s5 + $0x48] sm:$0xff]  }
 0x451   : > { %v6933_v17 = vadd.f32 %v13173_v21, %v17186_v48  ;;  %v18369_v51 = vadd.f32 %v18055_v8, %v6930_v32 }
 0x453   : > { %v13236_v27 = vpop.f32.mrb[140].mxu1  ;;  %v18372_v18 = vadd.f32 %v18063_v39, %v6933_v17 }
 0x454   : > { %v13237_v4 = vpop.f32.mrb[141].mxu1 }
 0x455   : > { %v13238_v16 = vadd.f32 %v13237_v4, %v13236_v27  ;;  %v13239_v58 = vpop.f32.mrb[142].mxu1  ;;  %v14361_v4 = vld [vmem:[%s20341_s5 + $0x100] sm:$0xff]  }
 0x456   : > { %v13240_v3 = vpop.f32.mrb[143].mxu1 }
 0x457   : > { %v7044_v57 = vadd.f32 %v13238_v16, %v6971_v49  ;;  %v13241_v15 = vadd.f32 %v13240_v3, %v13239_v58  ;;  %v14356_v49 = vld [vmem:[%s20341_s5 + $0x40] sm:$0xff]   ;;  %v14362_v16 = vld [vmem:[%s20341_s5 + $0x50] sm:$0xff]   ;;  %v14365_v3 = vld [vmem:[%s20341_s5 + $0x108] sm:$0xff]  }
 0x458   : > { %13450 = vmatprep.subr.bf16.mxu1 %v14356_v49 }
 0x459   : > { %v7047_v1 = vadd.f32 %v13241_v15, %v6974_v62  ;;  %v18375_v36 = vadd.f32 %v18173_v30, %v7044_v57  ;;  %v14366_v57 = vld [vmem:[%s20341_s5 + $0x58] sm:$0xff]  }
 0x45b   : > { %v13242_v6 = vpop.f32.mrb[144].mxu1  ;;  %v18378_v48 = vadd.f32 %v18180_v63, %v7047_v1  ;;  %v14367_v1 = vld [vmem:[%s20341_s5 + $0x18] sm:$0xff]  }
 0x45c   : > { %v13243_v8 = vpop.f32.mrb[145].mxu1 }
 0x45d   : > { %v13244_v5 = vadd.f32 %v13243_v8, %v13242_v6  ;;  %v13245_v52 = vpop.f32.mrb[146].mxu1  ;;  %v14368_v6 = vld [vmem:[%s20341_s5 + $0x150] sm:$0xff]  }
 0x45e   : > { %v13246_v12 = vpop.f32.mrb[147].mxu1 }
 0x45f   : > { %v7052_v39 = vadd.f32 %v13244_v5, %v6979_v28  ;;  %v13247_v38 = vadd.f32 %v13246_v12, %v13245_v52 }
 0x461   : > { %v7055_v14 = vadd.f32 %v13247_v38, %v6982_v13  ;;  %v18381_v34 = vadd.f32 %v18258_v22, %v7052_v39  ;;  %v14357_v22 = vld [vmem:[%s20341_s5] sm:$0xff]  }
 0x462   : > { %13451 = vmatpush3.bf16.msra.mxu1 %v14357_v22  ;;  %v14375_v22 = vld [vmem:[%s20341_s5 + $0x68] sm:$0xff]  }
 0x463   : > { %v13248_v30 = vpop.f32.mrb[148].mxu1  ;;  %v18387_v62 = vadd.f32 %v18260_v43, %v7055_v14  ;;  %13452 = vmatprep.subr.bf16.mxu1 %v14358_v56  ;;  %v14369_v14 = vld [vmem:[%s20341_s5 + $0x110] sm:$0xff]   ;;  %v14378_v56 = vld [vmem:[%s20341_s5 + $0x168] sm:$0xff]  }
 0x464   : > { %v13249_v63 = vpop.f32.mrb[149].mxu1 }
 0x465   : > { %v13250_v20 = vadd.f32 %v13249_v63, %v13248_v30  ;;  %v13251_v9 = vpop.f32.mrb[150].mxu1  ;;  %v14373_v63 = vld [vmem:[%s20341_s5 + $0x118] sm:$0xff]  }
 0x466   : > { %v13252_v2 = vpop.f32.mrb[151].mxu1 }
 0x467   : > { %v7060_v53 = vadd.f32 %v13250_v20, %v6987_v61  ;;  %v13253_v28 = vadd.f32 %v13252_v2, %v13251_v9  ;;  %v14359_v61 = vld [vmem:[%s20341_s5 + $0x8] sm:$0xff]   ;;  %v14374_v9 = vld [vmem:[%s20341_s5 + $0x160] sm:$0xff]  }
 0x468   : > { %13453 = vmatpush3.bf16.msra.mxu1 %v14359_v61  ;;  %v14380_v61 = vld [vmem:[%s20341_s5 + $0x70] sm:$0xff]  }
 0x469   : > { %v7063_v29 = vadd.f32 %v13253_v28, %v6990_v24  ;;  %v18390_v13 = vadd.f32 %v18265_v44, %v7060_v53  ;;  %v14360_v44 = vld [vmem:[%s20341_s5 + $0x140] sm:$0xff]   ;;  %13454 = vmatprep.subr.bf16.mxu1 %v14362_v16  ;;  %v14383_v16 = vld [vmem:[%s20341_s5 + $0x130] sm:$0xff]  }
 0x46a   : > { %13494 = vmatprep.subr.bf16.mxu0 %v14360_v44 }
 0x46b   : > { %v13254_v40 = vpop.f32.mrb[152].mxu1  ;;  %v18396_v0 = vadd.f32 %v18267_v37, %v7063_v29  ;;  %13495 = vmatpush3.bf16.msra.mxu0 %v14361_v4 }
 0x46c   : > { %v13255_v43 = vpop.f32.mrb[153].mxu1 }
 0x46d   : > { %v13256_v24 = vadd.f32 %v13255_v43, %v13254_v40  ;;  %v13257_v7 = vpop.f32.mrb[154].mxu1  ;;  %v14376_v40 = vld [vmem:[%s20341_s5 + $0x120] sm:$0xff]  }
 0x46e   : > { %v13258_v19 = vpop.f32.mrb[155].mxu1 }
 0x46f   : > { %v7068_v37 = vadd.f32 %v13256_v24, %v6995_v42  ;;  %v13259_v25 = vadd.f32 %v13258_v19, %v13257_v7  ;;  %v14363_v42 = vld [vmem:[%s20341_s5 + $0x10] sm:$0xff]  }
 0x470   : > { %13455 = vmatpush3.bf16.msra.mxu1 %v14363_v42  ;;  %v14381_v7 = vld [vmem:[%s20341_s5 + $0x30] sm:$0xff]  }
 0x471   : > { %v7071_v32 = vadd.f32 %v13259_v25, %v6998_v47  ;;  %v18408_v21 = vadd.f32 %v18269_v45, %v7068_v37  ;;  %v14364_v45 = vld [vmem:[%s20341_s5 + $0x148] sm:$0xff]   ;;  %13456 = vmatprep.subr.bf16.mxu1 %v14366_v57  ;;  %v14382_v37 = vld [vmem:[%s20341_s5 + $0x170] sm:$0xff]   ;;  %v14388_v57 = vld [vmem:[%s20341_s5 + $0xc0] sm:$0xff]  }
 0x472   : > { %13496 = vmatprep.subr.bf16.mxu0 %v14364_v45 }
 0x473   : > { %v13260_v17 = vpop.f32.mrb[156].mxu1  ;;  %v18411_v27 = vadd.f32 %v18271_v11, %v7071_v32  ;;  %13497 = vmatpush3.bf16.msra.mxu0 %v14365_v3 }
 0x474   : > { %v13261_v58 = vpop.f32.mrb[157].mxu1  ;;  %13457 = vmatpush3.bf16.msra.mxu1 %v14367_v1  ;;  %13498 = vmatprep.subr.bf16.mxu0 %v14368_v6 }
 0x475   : > { %v13262_v47 = vadd.f32 %v13261_v58, %v13260_v17  ;;  %v13263_v11 = vpop.f32.mrb[158].mxu1 }
 0x476   : > { %v13264_v15 = vpop.f32.mrb[159].mxu1 }
 0x477   : > { %v7076_v8 = vadd.f32 %v13262_v47, %v18369_v51  ;;  %v13265_v5 = vadd.f32 %v13264_v15, %v13263_v11  ;;  %v14370_v51 = vld [vmem:[%s20341_s5 + $0x60] sm:$0xff]   ;;  %13499 = vmatpush3.bf16.msra.mxu0 %v14369_v14  ;;  %v14386_v11 = vld [vmem:[%s20341_s5 + $0x178] sm:$0xff]  }
 0x478   : > { %13458 = vmatprep.subr.bf16.mxu1 %v14370_v51  ;;  %v14389_v15 = vld [vmem:[%s20341_s5 + $0x240] sm:$0xff]  }
 0x479   : > { %v7079_v52 = vadd.f32 %v13265_v5, %v18372_v18  ;;  %v18440_v12 = vadd.f32 %v18273_v46, %v7076_v8  ;;  %v14371_v46 = vld [vmem:[%s20341_s5 + $0x158] sm:$0xff]   ;;  %v14372_v18 = vld [vmem:[%s20341_s5 + $0x20] sm:$0xff]  }
 0x47a   : > { %13500 = vmatprep.subr.bf16.mxu0 %v14371_v46  ;;  %13459 = vmatpush3.bf16.msra.mxu1 %v14372_v18 }
 0x47b   : > { %v13328_v39 = vpop.f32.mrb[160].mxu1  ;;  %v18443_v38 = vadd.f32 %v18275_v31, %v7079_v52  ;;  %13501 = vmatpush3.bf16.msra.mxu0 %v14373_v63  ;;  %13460 = vmatprep.subr.bf16.mxu1 %v14375_v22 }
 0x47c   : > { %v13329_v49 = vpop.f32.mrb[161].mxu1  ;;  %13502 = vmatprep.subr.bf16.mxu0 %v14374_v9 }
 0x47d   : > { %v13330_v30 = vadd.f32 %v13329_v49, %v13328_v39  ;;  %v13331_v31 = vpop.f32.mrb[162].mxu1 }
 0x47e   : > { %v13332_v20 = vpop.f32.mrb[163].mxu1 }
 0x47f   : > { %v7190_v2 = vadd.f32 %v13330_v30, %v18375_v36  ;;  %v13333_v53 = vadd.f32 %v13332_v20, %v13331_v31  ;;  %v14377_v36 = vld [vmem:[%s20341_s5 + $0x28] sm:$0xff]   ;;  %13503 = vmatpush3.bf16.msra.mxu0 %v14376_v40 }
 0x480   : > { %13461 = vmatpush3.bf16.msra.mxu1 %v14377_v36  ;;  %13504 = vmatprep.subr.bf16.mxu0 %v14378_v56  ;;  %v18548_v36 = vstv %s11950_s29  ;;  %s11953_s29 = sld [smem:[#allocation2 + $0x4]] }
 0x481   : > { %v7193_v28 = vadd.f32 %v13333_v53, %v18378_v48  ;;  %v18466_v29 = vadd.f32 %v18288_v10, %v7190_v2  ;;  %13462 = vmatprep.subr.bf16.mxu1 %v14380_v61 }
 0x483   : > { %v18478_v43 = vadd.f32 %v18293_v41, %v7193_v28  ;;  %v13334_v48 = vpop.f32.mrb[164].mxu1  ;;  %v14379_v41 = vld [vmem:[%s20341_s5 + $0x128] sm:$0xff]  }
 0x484   : > { %v13335_v10 = vpop.f32.mrb[165].mxu1  ;;  %13505 = vmatpush3.bf16.msra.mxu0 %v14379_v41  ;;  %13463 = vmatpush3.bf16.msra.mxu1 %v14381_v7 }
 0x485   : > { %v13336_v44 = vadd.f32 %v13335_v10, %v13334_v48  ;;  %v13337_v24 = vpop.f32.mrb[166].mxu1  ;;  %13506 = vmatprep.subr.bf16.mxu0 %v14382_v37 }
 0x486   : > { %v13338_v19 = vpop.f32.mrb[167].mxu1 }
 0x487   : > { %v7198_v25 = vadd.f32 %v13336_v44, %v18381_v34  ;;  %v13339_v32 = vadd.f32 %v13338_v19, %v13337_v24 }
 0x488   : > { %13507 = vmatpush3.bf16.msra.mxu0 %v14383_v16 }
 0x489   : > { %v7201_v17 = vadd.f32 %v13339_v32, %v18387_v62  ;;  %v18498_v4 = vadd.f32 %v18300_v55, %v7198_v25  ;;  %v14384_v55 = vld [vmem:[%s20341_s5 + $0x78] sm:$0xff]   ;;  %13508 = vmatprep.subr.bf16.mxu0 %v14386_v11 }
 0x48a   : > { %v14385_v62 = vld [vmem:[%s20341_s5 + $0x38] sm:$0xff]   ;;  %13464 = vmatprep.subr.bf16.mxu1 %v14384_v55 }
 0x48b   : > { %v18504_v58 = vadd.f32 %v18305_v60, %v7201_v17  ;;  %v13340_v42 = vpop.f32.mrb[168].mxu1  ;;  %v14387_v60 = vld [vmem:[%s20341_s5 + $0x138] sm:$0xff]   ;;  %13465 = vmatpush3.bf16.msra.mxu1 %v14385_v62 }
 0x48c   : > { %v13341_v45 = vpop.f32.mrb[169].mxu1  ;;  %13509 = vmatpush3.bf16.msra.mxu0 %v14387_v60  ;;  %13472 = vmatprep.subr.bf16.mxu1 %v14388_v57 }
 0x48d   : > { %v13342_v47 = vadd.f32 %v13341_v45, %v13340_v42  ;;  %v13343_v34 = vpop.f32.mrb[170].mxu1  ;;  %13538 = vmatprep.subr.bf16.mxu0 %v14389_v15 }
 0x48e   : > { %v13344_v3 = vpop.f32.mrb[171].mxu1 }
 0x48f   : > { %v7206_v1 = vadd.f32 %v13342_v47, %v18390_v13  ;;  %v13345_v6 = vadd.f32 %v13344_v3, %v13343_v34 }
 0x491   : > { %v7209_v8 = vadd.f32 %v13345_v6, %v18396_v0  ;;  %v18527_v5 = vadd.f32 %v18312_v54, %v7206_v1 }
 0x493   : > { %v18530_v52 = vadd.f32 %v18317_v59, %v7209_v8  ;;  %v13346_v39 = vpop.f32.mrb[172].mxu1 }
 0x494   : > { %v13347_v14 = vpop.f32.mrb[173].mxu1 }
 0x495   : > { %v13348_v49 = vadd.f32 %v13347_v14, %v13346_v39  ;;  %v13349_v51 = vpop.f32.mrb[174].mxu1 }
 0x496   : > { %v13350_v13 = vpop.f32.mrb[175].mxu1 }
 0x497   : > { %v7214_v46 = vadd.f32 %v13348_v49, %v18408_v21  ;;  %v13351_v18 = vadd.f32 %v13350_v13, %v13349_v51 }
 0x499   : > { %v7217_v30 = vadd.f32 %v13351_v18, %v18411_v27  ;;  %v18535_v0 = vadd.f32 %v18324_v26, %v7214_v46 }
 0x49b   : > { %v18538_v54 = vadd.f32 %v18329_v33, %v7217_v30  ;;  %v13352_v31 = vpop.f32.mrb[176].mxu1 }
 0x49c   : > { %v13353_v63 = vpop.f32.mrb[177].mxu1 }
 0x49d   : > { %v13354_v59 = vadd.f32 %v13353_v63, %v13352_v31  ;;  %v13355_v20 = vpop.f32.mrb[178].mxu1 }
 0x49e   : > { %v13356_v9 = vpop.f32.mrb[179].mxu1 }
 0x49f   : > { %v7222_v2 = vadd.f32 %v13354_v59, %v18440_v12  ;;  %v13357_v53 = vadd.f32 %v13356_v9, %v13355_v20 }
 0x4a1   : > { %v7225_v28 = vadd.f32 %v13357_v53, %v18443_v38  ;;  %v18543_v21 = vadd.f32 %v18336_v35, %v7222_v2 }
 0x4a3   : > { %v18546_v27 = vadd.f32 %v18341_v50, %v7225_v28 }
 0x4e2   : > { %v13420_v26 = vpop.f32.mrb[180].mxu1 }
 0x4e3   : > { %v13421_v33 = vpop.f32.mrb[181].mxu1 }
 0x4e4   : > { %v13422_v22 = vadd.f32 %v13421_v33, %v13420_v26  ;;  %v13423_v40 = vpop.f32.mrb[182].mxu1 }
 0x4e5   : > { %v13424_v48 = vpop.f32.mrb[183].mxu1 }
 0x4e6   : > { %v7336_v10 = vadd.f32 %v13422_v22, %v18466_v29  ;;  %v13425_v12 = vadd.f32 %v13424_v48, %v13423_v40 }
 0x4e8   : > { %vm7374_vm0 = vcmp.gt.f32.partialorder %v7336_v10, 0.0  ;;  %v7385_v38 = vmul.f32 %v18548_v36, %v7336_v10  ;;  %v7339_v35 = vadd.f32 %v13425_v12, %v18478_v43 }
 0x4ea   : > { %v7395_v56 = vsel %vm7374_vm0, %v7336_v10, %v7385_v38  ;;  %vm7375_vm2 = vcmp.gt.f32.partialorder %v7339_v35, 0.0  ;;  %v7386_v50 = vmul.f32 %v18548_v36, %v7339_v35  ;;  %v13426_v61 = vpop.f32.mrb[184].mxu1 }
 0x4eb   : > { %v13427_v44 = vpop.f32.mrb[185].mxu1  ;;  %v7416_v24 = vrot.slane %v7395_v56, 1  ;;  %v7446_v41 = vrot.slane %v7395_v56, 5  ;;  %v7406_v7 = vsel %vm7405_vm1, %v7395_v56, 0.0  ;;  %v7439_v19 = vrot.slane %v7395_v56, 4 }
 0x4ec   : > { %v18555_v29 = vsel %vm7375_vm2, %v7339_v35, %v7386_v50  ;;  %v13428_v37 = vadd.f32 %v13427_v44, %v13426_v61  ;;  %v13429_v25 = vpop.f32.mrb[186].mxu1  ;;  %v7431_v32 = vrot.slane %v7395_v56, 3  ;;  %v7424_v17 = vrot.slane %v7395_v56, 2 }
 0x4ed   : > { %v13430_v43 = vpop.f32.mrb[187].mxu1  ;;  %v7417_v16 = vsel %vm7405_vm1, %v7416_v24, 0.0  ;;  %v7447_v42 = vsel %vm7405_vm1, %v7446_v41, 0.0  ;;  %v7440_v45 = vsel %vm7405_vm1, %v7439_v19, 0.0  ;;  %v7476_v47 = vrot.slane %v18555_v29, 1 }
 0x4ee   : > { %v7344_v34 = vadd.f32 %v13428_v37, %v18498_v4  ;;  %v13431_v55 = vadd.f32 %v13430_v43, %v13429_v25  ;;  %v7432_v62 = vsel %vm7405_vm1, %v7431_v32, 0.0  ;;  %v7425_v11 = vsel %vm7405_vm1, %v7424_v17, 0.0 }
 0x4ef   : > { %v7477_v3 = vsel %vm7405_vm1, %v7476_v47, 0.0  ;;  %v7469_v60 = vsel %vm7405_vm1, %v18555_v29, 0.0  ;;  %v7461_v57 = vrot.slane %v7395_v56, 7  ;;  %v7506_v15 = vrot.slane %v18555_v29, 5 }
 0x4f0   : > { %vm7376_vm4 = vcmp.gt.f32.partialorder %v7344_v34, 0.0  ;;  %v7387_v1 = vmul.f32 %v18548_v36, %v7344_v34  ;;  %v7347_v6 = vadd.f32 %v13431_v55, %v18504_v58  ;;  %v7454_v8 = vrot.slane %v7395_v56, 6 }
 0x4f1   : > { %v7462_v4 = vsel %vm7405_vm1, %v7461_v57, 0.0  ;;  %v18572_v39 = vsel %vm7405_vm1, %v7506_v15, 0.0  ;;  %v7499_v14 = vrot.slane %v18555_v29, 4  ;;  %v7491_v49 = vrot.slane %v18555_v29, 3 }
 0x4f2   : > { %v18576_v51 = vsel %vm7376_vm4, %v7344_v34, %v7387_v1  ;;  %vm7377_vm5 = vcmp.gt.f32.partialorder %v7347_v6, 0.0  ;;  %v7388_v13 = vmul.f32 %v18548_v36, %v7347_v6  ;;  %v13432_v46 = vpop.f32.mrb[188].mxu1  ;;  %v7455_v18 = vsel %vm7405_vm1, %v7454_v8, 0.0 }
 0x4f3   : > { %v7407_v58 = vrot.slane %v18576_v51, 2  ;;  %v7441_v30 = vrot.slane %v18576_v51, 6  ;;  %v13433_v31 = vpop.f32.mrb[189].mxu1  ;;  %v7418_v63 = vrot.slane %v18576_v51, 3  ;;  %v7433_v59 = vrot.slane %v18576_v51, 5 }
 0x4f4   : > { %v18584_v20 = vsel %vm7377_vm5, %v7347_v6, %v7388_v13  ;;  %v13434_v9 = vadd.f32 %v13433_v31, %v13432_v46  ;;  %v13435_v2 = vpop.f32.mrb[190].mxu1  ;;  %v7426_v53 = vrot.slane %v18576_v51, 4  ;;  %v7500_v28 = vsel %vm7405_vm1, %v7499_v14, 0.0 }
 0x4f5   : > { %v13436_v26 = vpop.f32.mrb[191].mxu1  ;;  %v7419_v33 = vsel %vm7408_vm3, %v7418_v63, %v7417_v16  ;;  %v7448_v22 = vrot.slane %v18584_v20, 7  ;;  %v7409_v40 = vsel %vm7408_vm3, %v7407_v58, %v7406_v7  ;;  %v7442_v48 = vsel %vm7408_vm3, %v7441_v30, %v7440_v45 }
 0x4f6   : > { %v7352_v10 = vadd.f32 %v13434_v9, %v18527_v5  ;;  %v13437_v12 = vadd.f32 %v13436_v26, %v13435_v2  ;;  %v7434_v38 = vsel %vm7408_vm3, %v7433_v59, %v7432_v62  ;;  %v7478_v35 = vrot.slane %v18584_v20, 3 }
 0x4f7   : > { %v7449_v56 = vsel %vm7408_vm3, %v7448_v22, %v7447_v42  ;;  %v7427_v50 = vsel %vm7408_vm3, %v7426_v53, %v7425_v11  ;;  %v7470_v61 = vrot.slane %v18584_v20, 2  ;;  %v7463_v44 = vrot.slane %v18584_v20, 1 }
 0x4f8   : > { %vm7378_vm7 = vcmp.gt.f32.partialorder %v7352_v10, 0.0  ;;  %v7389_v24 = vmul.f32 %v18548_v36, %v7352_v10  ;;  %v7355_v41 = vadd.f32 %v13437_v12, %v18530_v52  ;;  %v7479_v5 = vsel %vm7408_vm3, %v7478_v35, %v7477_v3 }
 0x4f9   : > { %v7471_v7 = vsel %vm7408_vm3, %v7470_v61, %v7469_v60  ;;  %v7464_v19 = vsel %vm7408_vm3, %v7463_v44, %v7462_v4  ;;  %v18608_v37 = vsel %vm7408_vm3, %v18584_v20, %v7455_v18  ;;  %v7501_v25 = vrot.slane %v18584_v20, 6 }
 0x4fa   : > { %v18611_v32 = vsel %vm7378_vm7, %v7352_v10, %v7389_v24  ;;  %vm7379_vm8 = vcmp.gt.f32.partialorder %v7355_v41, 0.0  ;;  %v7390_v17 = vmul.f32 %v18548_v36, %v7355_v41  ;;  %v13438_v43 = vpop.f32.mrb[192].mxu1  ;;  %v7492_v52 = vsel %vm7405_vm1, %v7491_v49, 0.0 }
 0x4fb   : > { %v7410_v16 = vrot.slane %v18611_v32, 4  ;;  %v13439_v42 = vpop.f32.mrb[193].mxu1  ;;  %v7420_v45 = vrot.slane %v18611_v32, 5  ;;  %v7508_v47 = vrot.slane %v18611_v32, 7  ;;  %v7502_v34 = vsel %vm7408_vm3, %v7501_v25, %v7500_v28 }
 0x4fc   : > { %v18619_v55 = vsel %vm7379_vm8, %v7355_v41, %v7390_v17  ;;  %v13440_v62 = vadd.f32 %v13439_v42, %v13438_v43  ;;  %v13441_v11 = vpop.f32.mrb[194].mxu1  ;;  %v7493_v3 = vrot.slane %v18584_v20, 5  ;;  %v7536_v60 = vrot.slane %v18576_v51, 1 }
 0x4fd   : > { %v13442_v57 = vpop.f32.mrb[195].mxu1  ;;  %v7421_v15 = vsel %vm7411_vm6, %v7420_v45, %v7419_v33  ;;  %v7450_v1 = vrot.slane %v18619_v55, 1  ;;  %v7412_v6 = vsel %vm7411_vm6, %v7410_v16, %v7409_v40  ;;  %v7443_v8 = vsel %vm7411_vm6, %v18619_v55, %v7442_v48 }
 0x4fe   : > { %v7360_v4 = vadd.f32 %v13440_v62, %v18535_v0  ;;  %v13443_v14 = vadd.f32 %v13442_v57, %v13441_v11  ;;  %v7435_v49 = vrot.slane %v18619_v55, 7  ;;  %v7480_v13 = vrot.slane %v18619_v55, 5 }
 0x4ff   : > { %v7451_v46 = vsel %vm7411_vm6, %v7450_v1, %v7449_v56  ;;  %v7428_v18 = vrot.slane %v18619_v55, 6  ;;  %v7472_v30 = vrot.slane %v18619_v55, 4  ;;  %v7465_v31 = vrot.slane %v18619_v55, 3  ;;  %v14392_v1 = vld [vmem:[%s20341_s5 + $0xc8] sm:$0xff]  }
 0x500   : > { %vm7380_vm9 = vcmp.gt.f32.partialorder %v7360_v4, 0.0  ;;  %v7391_v63 = vmul.f32 %v18548_v36, %v7360_v4  ;;  %v7363_v59 = vadd.f32 %v13443_v14, %v18538_v54  ;;  %v7436_v0 = vsel %vm7411_vm6, %v7435_v49, %v7434_v38 }
 0x501   : > { %v18641_v9 = vsel %vm7411_vm6, %v7480_v13, %v7479_v5  ;;  %v7429_v2 = vsel %vm7411_vm6, %v7428_v18, %v7427_v50  ;;  %v18645_v53 = vsel %vm7411_vm6, %v7472_v30, %v7471_v7  ;;  %v18648_v28 = vsel %vm7411_vm6, %v7465_v31, %v7464_v19 }
 0x502   : > { %v18650_v26 = vsel %vm7380_vm9, %v7360_v4, %v7391_v63  ;;  %vm7381_vm10 = vcmp.gt.f32.partialorder %v7363_v59, 0.0  ;;  %v7392_v33 = vmul.f32 %v18548_v36, %v7363_v59  ;;  %v13444_v22 = vpop.f32.mrb[196].mxu1  ;;  %v7509_v54 = vsel %vm7408_vm3, %v7508_v47, %v18572_v39  ;;  %v14395_v63 = vld [vmem:[%s20341_s5 + $0x208] sm:$0xff]  }
 0x503   : > { %v13445_v40 = vpop.f32.mrb[197].mxu1  ;;  %v7510_v48 = vrot.slane %v18650_v26, 1  ;;  %v18658_v10 = vsel %vm7411_vm6, %v18650_v26, %v7502_v34  ;;  %v18661_v12 = vsel %vm7408_vm3, %v7493_v3, %v7492_v52  ;;  %v7457_v50 = vrot.slane %v18619_v55, 2  ;;  %v14390_v55 = vld [vmem:[%s20341_s5 + $0x80] sm:$0xff]  }
 0x504   : > { %v18663_v38 = vsel %vm7381_vm10, %v7363_v59, %v7392_v33  ;;  %v13446_v35 = vadd.f32 %v13445_v40, %v13444_v22  ;;  %v13447_v56 = vpop.f32.mrb[198].mxu1  ;;  %v18667_v61 = vsel %vm7405_vm1, %v7536_v60, 0.0  ;;  %vm9378_vm2 = vcmask 523264  }
 0x505   : > { %v13448_v39 = vpop.f32.mrb[199].mxu1  ;;  %v7422_v44 = vrot.slane %v18663_v38, 7  ;;  %v7452_v24 = vrot.slane %v18663_v38, 3  ;;  %v7413_v41 = vrot.slane %v18663_v38, 6  ;;  %v7444_v5 = vrot.slane %v18663_v38, 2 }
 0x506   : > { %v7368_v7 = vadd.f32 %v13446_v35, %v18543_v21  ;;  %v13449_v19 = vadd.f32 %v13448_v39, %v13447_v56  ;;  %v7437_v25 = vrot.slane %v18663_v38, 1  ;;  %v18677_v17 = vsel %vm7414_vm11, %v18663_v38, %v7429_v2  ;;  %v14400_v39 = vld [vmem:[%s20341_s5 + $0xd8] sm:$0xff]  }
 0x507   : > { %v18680_v43 = vsel %vm7414_vm11, %v7422_v44, %v7421_v15  ;;  %v18683_v52 = vsel %vm7414_vm11, %v7452_v24, %v7451_v46  ;;  %v18688_v42 = vsel %vm7414_vm11, %v7413_v41, %v7412_v6  ;;  %v18691_v21 = vsel %vm7414_vm11, %v7444_v5, %v7443_v8  ;;  %v14393_v6 = vld [vmem:[%s20341_s5 + $0x248] sm:$0xff]  }
 0x508   : > { %vm7382_vm12 = vcmp.gt.f32.partialorder %v7368_v7, 0.0  ;;  %v7393_v45 = vmul.f32 %v18548_v36, %v7368_v7  ;;  %v7371_v47 = vadd.f32 %v13449_v19, %v18546_v27  ;;  %v7549_v34 = vpack.c.bf16 %v18680_v43, %v18680_v43  ;;  %v14391_v27 = vld [vmem:[%s20341_s5 + $0x200] sm:$0xff]   ;;  %v14394_v46 = vld [vmem:[%s20341_s5 + $0x88] sm:$0xff]   ;;  %v14401_v19 = vld [vmem:[%s20341_s5 + $0x258] sm:$0xff]  }
 0x509   : > { %v7553_v62 = vpack.c.bf16 %v18683_v52, %v18683_v52  ;;  %v7548_v11 = vpack.c.bf16 %v18688_v42, %v18688_v42  ;;  %v7552_v3 = vpack.c.bf16 %v18691_v21, %v18691_v21  ;;  %v18710_v60 = vsel %vm7414_vm11, %v7437_v25, %v7436_v0  ;;  %v14396_v0 = vld [vmem:[%s20341_s5 + $0xd0] sm:$0xff]  }
 0x50a   : > { %v18712_v57 = vsel %vm7382_vm12, %v7368_v7, %v7393_v45  ;;  %vm7383_vm13 = vcmp.gt.f32.partialorder %v7371_v47, 0.0  ;;  %v7394_v15 = vmul.f32 %v18548_v36, %v7371_v47  ;;  %8822 = vmatprep.mubr.bf16.mxu1 %v7549_v34  ;;  %v7495_v8 = vrot.slane %v18650_v26, 7 }
 0x50b   : > { %8902 = vmatprep.mubr.bf16.mxu0 %v7553_v62  ;;  %8823 = vmatmul.mubr.bf16.vlgmr.msra.gmra.mrb[200].mxu1 %v7548_v11  ;;  %v7551_v4 = vpack.c.bf16 %v18710_v60, %v18710_v60  ;;  %v7482_v14 = vrot.slane %v18712_v57, 7  ;;  %v7474_v36 = vrot.slane %v18712_v57, 6  ;;  %v7467_v49 = vrot.slane %v18712_v57, 5  ;;  %v14402_v62 = vld [vmem:[%s20341_s5 + $0x98] sm:$0xff]  }
 0x50c   : > { %v18727_v13 = vsel %vm7383_vm13, %v7371_v47, %v7394_v15  ;;  %13473 = vmatpush3.bf16.msra.mxu1 %v14390_v55  ;;  %8903 = vmatmul.mubr.bf16.vlgmr.msra.gmra.mrb[120].mxu0 %v7552_v3  ;;  %v7511_v18 = vsel %vm7411_vm6, %v7510_v48, %v7509_v54  ;;  %v7512_v30 = vrot.slane %v18712_v57, 3  ;;  %v7458_v31 = vsel %vm7411_vm6, %v7457_v50, %v18608_v37  ;;  %v14398_v48 = vld [vmem:[%s20341_s5 + $0x90] sm:$0xff]   ;;  %v14404_v15 = vld [vmem:[%s20341_s5 + $0xe0] sm:$0xff]  }
 0x50d   : > { %13539 = vmatpush3.bf16.msra.mxu0 %v14391_v27  ;;  %8862 = vmatprep.mubr.bf16.mxu1 %v7551_v4  ;;  %v18741_v59 = vsel %vm7414_vm11, %v7482_v14, %v18641_v9  ;;  %v18748_v2 = vsel %vm7414_vm11, %v7474_v36, %v18645_v53  ;;  %v18752_v37 = vsel %vm7414_vm11, %v7467_v49, %v18648_v28  ;;  %v14397_v9 = vld [vmem:[%s20341_s5 + $0x250] sm:$0xff]   ;;  %v7459_v22 = vrot.slane %v18663_v38, 4  ;;  %v14405_v4 = vld [vmem:[%s20341_s5 + $0x260] sm:$0xff]  }
 0x50e   : > { %13474 = vmatprep.subr.bf16.mxu1 %v14392_v1  ;;  %13540 = vmatprep.subr.bf16.mxu0 %v14393_v6  ;;  %v7557_v33 = vpack.c.bf16 %v18741_v59, %v18741_v59  ;;  %v18761_v54 = vsel %vm7414_vm11, %v7512_v30, %v7511_v18  ;;  %v7504_v53 = vrot.slane %v18712_v57, 2  ;;  %v7496_v28 = vsel %vm7411_vm6, %v7495_v8, %v18661_v12  ;;  %v14399_v12 = vld [vmem:[%s20341_s5 + $0x210] sm:$0xff]  }
 0x50f   : > { %v7497_v40 = vrot.slane %v18712_v57, 1  ;;  %v18771_v35 = vsel %vm7414_vm11, %v7459_v22, %v7458_v31  ;;  %v7538_v56 = vrot.slane %v18611_v32, 3  ;;  %v7540_v50 = vrot.slane %v18650_v26, 5  ;;  %v14413_v38 = vld [vmem:[%s20341_s5 + $0x270] sm:$0xff]  }
 0x510   : > { %13475 = vmatpush3.bf16.msra.mxu1 %v14394_v46  ;;  %8982 = vmatprep.mubr.bf16.mxu0 %v7557_v33  ;;  %v18783_v44 = vsel %vm7414_vm11, %v7504_v53, %v18658_v10  ;;  %v7542_v5 = vrot.slane %v18727_v13, 7  ;;  %v7534_v7 = vrot.slane %v18727_v13, 6  ;;  %v7484_v45 = vrot.slane %v18555_v29, 2  ;;  %v14407_v53 = vld [vmem:[%s20341_s5 + $0x220] sm:$0xff]  }
 0x511   : > { %13541 = vmatpush3.bf16.msra.mxu0 %v14395_v63  ;;  %13476 = vmatprep.subr.bf16.mxu1 %v14396_v0  ;;  %v18786_v24 = vsel %vm7414_vm11, %v7497_v40, %v7496_v28  ;;  %v7539_v25 = vsel %vm7408_vm3, %v7538_v56, %v18667_v61  ;;  %v7486_v47 = vrot.slane %v18584_v20, 4  ;;  %v7488_v34 = vrot.slane %v18650_v26, 6  ;;  %v14403_v20 = vld [vmem:[%s20341_s5 + $0x218] sm:$0xff]   ;;  %v14406_v0 = vld [vmem:[%s20341_s5 + $0xa0] sm:$0xff]  }
 0x512   : > { %13542 = vmatprep.subr.bf16.mxu0 %v14397_v9  ;;  %v7541_v10 = vsel %vm7411_vm6, %v7540_v50, %v7539_v25  ;;  %v7529_v55 = vsel %vm7405_vm1, %v18576_v51, 0.0  ;;  %v7485_v61 = vsel %vm7405_vm1, %v7484_v45, 0.0  ;;  %v7530_v3 = vrot.slane %v18611_v32, 2  ;;  %v14417_v25 = vld [vmem:[%s20341_s5 + $0x278] sm:$0xff]  }
 0x513   : > { %v18805_v11 = vsel %vm7414_vm11, %v7542_v5, %v7541_v10  ;;  %v7532_v27 = vrot.slane %v18650_v26, 4  ;;  %v7487_v1 = vsel %vm7408_vm3, %v7486_v47, %v7485_v61  ;;  %v7521_v6 = vrot.slane %v18555_v29, 7  ;;  %v14410_v5 = vld [vmem:[%s20341_s5 + $0xa8] sm:$0xff]   ;;  %v14418_v45 = vld [vmem:[%s20341_s5 + $0xb8] sm:$0xff]   ;;  %v14420_v47 = vld [vmem:[%s20341_s5 + $0x1c0] sm:$0xff]  }
 0x514   : > { %13477 = vmatpush3.bf16.msra.mxu1 %v14398_v48  ;;  %v7523_v8 = vrot.slane %v18611_v32, 1  ;;  %v7489_v14 = vsel %vm7411_vm6, %v7488_v34, %v7487_v1  ;;  %v7531_v36 = vsel %vm7408_vm3, %v7530_v3, %v7529_v55  ;;  %v7525_v49 = vrot.slane %v18650_v26, 3  ;;  %v14419_v10 = vld [vmem:[%s20341_s5 + $0x238] sm:$0xff]   ;;  %v14421_v34 = vld [vmem:[%s20341_s5 + $0x340] sm:$0xff]  }
 0x515   : > { %13543 = vmatpush3.bf16.msra.mxu0 %v14399_v12  ;;  %13478 = vmatprep.subr.bf16.mxu1 %v14400_v39  ;;  %v7527_v46 = vrot.slane %v18727_v13, 5  ;;  %v18828_v18 = vsel %vm7414_vm11, %v18712_v57, %v7489_v14  ;;  %v7533_v30 = vsel %vm7411_vm6, %v7532_v27, %v7531_v36  ;;  %v7522_v31 = vsel %vm7405_vm1, %v7521_v6, 0.0  ;;  %v14422_v55 = vld [vmem:[%s20341_s5 + $0x180] sm:$0xff]   ;;  %v14424_v27 = vld [vmem:[%s20341_s5 + $0x1c8] sm:$0xff]   ;;  %v14429_v14 = vld [vmem:[%s20341_s5 + $0x350] sm:$0xff]  }
 0x516   : > { %13544 = vmatprep.subr.bf16.mxu0 %v14401_v19  ;;  %v7514_v63 = vrot.slane %v18555_v29, 6  ;;  %v18837_v33 = vsel %vm7414_vm11, %v7534_v7, %v7533_v30  ;;  %v7524_v9 = vsel %vm7408_vm3, %v7523_v8, %v7522_v31  ;;  %v7517_v22 = vrot.slane %v18650_v26, 2  ;;  %v14408_v29 = vld [vmem:[%s20341_s5 + $0xe8] sm:$0xff]   ;;  %v14415_v19 = vld [vmem:[%s20341_s5 + $0x230] sm:$0xff]   ;;  %v14423_v61 = vld [vmem:[%s20341_s5 + $0x300] sm:$0xff]  }
 0x517   : > { %v7526_v28 = vsel %vm7411_vm6, %v7525_v49, %v7524_v9  ;;  %v7519_v48 = vrot.slane %v18712_v57, 4  ;;  %v14409_v26 = vld [vmem:[%s20341_s5 + $0x268] sm:$0xff]   ;;  %v7544_v12 = vsel %vm7405_vm1, %v7407_v58, 0.0  ;;  %v7556_v3 = vpack.c.bf16 %v18748_v2, %v18748_v2  ;;  %v14430_v36 = vld [vmem:[%s20341_s5 + $0x190] sm:$0xff]   ;;  %v14433_v30 = vld [vmem:[%s20341_s5 + $0x358] sm:$0xff]  }
 0x518   : > { %13479 = vmatpush3.bf16.msra.mxu1 %v14402_v62  ;;  %v7515_v40 = vsel %vm7405_vm1, %v7514_v63, 0.0  ;;  %v18854_v56 = vsel %vm7414_vm11, %v7527_v46, %v7526_v28  ;;  %v7545_v57 = vsel %vm7408_vm3, %v7410_v16, %v7544_v12  ;;  %v14411_v58 = vld [vmem:[%s20341_s5 + $0x228] sm:$0xff]   ;;  %v7550_v62 = vpack.c.bf16 %v18677_v17, %v18677_v17  ;;  %v14431_v49 = vld [vmem:[%s20341_s5 + $0x310] sm:$0xff]   ;;  %v14432_v46 = vld [vmem:[%s20341_s5 + $0x1d8] sm:$0xff]  }
 0x519   : > { %13545 = vmatpush3.bf16.msra.mxu0 %v14403_v20  ;;  %13480 = vmatprep.subr.bf16.mxu1 %v14404_v15  ;;  %v7516_v50 = vsel %vm7408_vm3, %v18611_v32, %v7515_v40  ;;  %v7546_v51 = vsel %vm7411_vm6, %v7413_v41, %v7545_v57  ;;  %v14412_v32 = vld [vmem:[%s20341_s5 + $0xf0] sm:$0xff]   ;;  %v7555_v20 = vpack.c.bf16 %v18752_v37, %v18752_v37  ;;  %v14425_v15 = vld [vmem:[%s20341_s5 + $0x348] sm:$0xff]   ;;  %v14434_v31 = vld [vmem:[%s20341_s5 + $0x198] sm:$0xff]   ;;  %vm9287_vm1 = vcmask 64512  }
 0x51a   : > { %13546 = vmatprep.subr.bf16.mxu0 %v14405_v4  ;;  %v7518_v39 = vsel %vm7411_vm6, %v7517_v22, %v7516_v50  ;;  %v18882_v16 = vsel %vm7414_vm11, %v18727_v13, %v7546_v51  ;;  %v14414_v41 = vld [vmem:[%s20341_s5 + $0xb0] sm:$0xff]   ;;  %v14416_v13 = vld [vmem:[%s20341_s5 + $0xf8] sm:$0xff]   ;;  %v7561_v1 = vpack.c.bf16 %v18761_v54, %v18761_v54  ;;  %v14426_v6 = vld [vmem:[%s20341_s5 + $0x188] sm:$0xff]   ;;  %vm9380_vm3 = vcmask 785408  }
 0x51b   : > { %v18869_v7 = vsel %vm7414_vm11, %v7519_v48, %v7518_v39  ;;  %v14427_v8 = vld [vmem:[%s20341_s5 + $0x308] sm:$0xff]   ;;  %v14428_v4 = vld [vmem:[%s20341_s5 + $0x1d0] sm:$0xff]   ;;  %v14435_v63 = vld [vmem:[%s20341_s5 + $0x318] sm:$0xff]   ;;  %vm11874_vm7 = vcmask 11264  }
 0x51c   : > { %13481 = vmatpush3.bf16.msra.mxu1 %v14406_v0  ;;  %v14436_v0 = vld [vmem:[%s20341_s5 + $0x1e0] sm:$0xff]   ;;  %v14441_v28 = vld [vmem:[%s20341_s5 + $0x368] sm:$0xff]   ;;  %v14445_v50 = vld [vmem:[%s20341_s5 + $0x370] sm:$0xff]  }
 0x51d   : > { %13547 = vmatpush3.bf16.msra.mxu0 %v14407_v53  ;;  %13482 = vmatprep.subr.bf16.mxu1 %v14408_v29  ;;  %v14437_v9 = vld [vmem:[%s20341_s5 + $0x360] sm:$0xff]   ;;  %v14440_v29 = vld [vmem:[%s20341_s5 + $0x1e8] sm:$0xff]   ;;  %v14446_v12 = vld [vmem:[%s20341_s5 + $0x1b0] sm:$0xff]  }
 0x51e   : > { %13548 = vmatprep.subr.bf16.mxu0 %v14409_v26  ;;  %v14438_v22 = vld [vmem:[%s20341_s5 + $0x1a0] sm:$0xff]   ;;  %v14442_v40 = vld [vmem:[%s20341_s5 + $0x1a8] sm:$0xff]   ;;  %v14444_v26 = vld [vmem:[%s20341_s5 + $0x1f0] sm:$0xff]  }
 0x51f   : > { %v14439_v53 = vld [vmem:[%s20341_s5 + $0x320] sm:$0xff]   ;;  %v14443_v48 = vld [vmem:[%s20341_s5 + $0x328] sm:$0xff]   ;;  %v14447_v39 = vld [vmem:[%s20341_s5 + $0x330] sm:$0xff]  }
 0x520   : > { %13483 = vmatpush3.bf16.msra.mxu1 %v14410_v5  ;;  %v14448_v57 = vld [vmem:[%s20341_s5 + $0x1f8] sm:$0xff]  }
 0x521   : > { %13549 = vmatpush3.bf16.msra.mxu0 %v14411_v58  ;;  %13484 = vmatprep.subr.bf16.mxu1 %v14412_v32  ;;  %v14449_v5 = vld [vmem:[%s20341_s5 + $0x378] sm:$0xff]   ;;  %v14452_v32 = vld [vmem:[%s20341_s5 + $0x2c0] sm:$0xff]  }
 0x522   : > { %13550 = vmatprep.subr.bf16.mxu0 %v14413_v38  ;;  %v14450_v51 = vld [vmem:[%s20341_s5 + $0x1b8] sm:$0xff]   ;;  %v14453_v38 = vld [vmem:[%s20341_s5 + $0x440] sm:$0xff]  }
 0x523   : > { %v14451_v58 = vld [vmem:[%s20341_s5 + $0x338] sm:$0xff]  }
 0x524   : > { %13485 = vmatpush3.bf16.msra.mxu1 %v14414_v41  ;;  %v14454_v41 = vld [vmem:[%s20341_s5 + $0x280] sm:$0xff]  }
 0x525   : > { %13551 = vmatpush3.bf16.msra.mxu0 %v14415_v19  ;;  %13486 = vmatprep.subr.bf16.mxu1 %v14416_v13  ;;  %v7554_v19 = vpack.c.bf16 %v18771_v35, %v18771_v35  ;;  %v14455_v13 = vld [vmem:[%s20341_s5 + $0x400] sm:$0xff]  }
 0x526   : > { %13552 = vmatprep.subr.bf16.mxu0 %v14417_v25  ;;  %v7560_v25 = vpack.c.bf16 %v18783_v44, %v18783_v44 }
 0x528   : > { %13487 = vmatpush3.bf16.msra.mxu1 %v14418_v45  ;;  %v14456_v45 = vld [vmem:[%s20341_s5 + $0x2c8] sm:$0xff]  }
 0x529   : > { %13553 = vmatpush3.bf16.msra.mxu0 %v14419_v10  ;;  %13516 = vmatprep.subr.bf16.mxu1 %v14420_v47  ;;  %v7559_v10 = vpack.c.bf16 %v18786_v24, %v18786_v24  ;;  %v14457_v47 = vld [vmem:[%s20341_s5 + $0x448] sm:$0xff]  }
 0x52a   : > { %13582 = vmatprep.subr.bf16.mxu0 %v14421_v34  ;;  %v7565_v34 = vpack.c.bf16 %v18805_v11, %v18805_v11 }
 0x52b   : > { %8863 = vmatmul.mubr.bf16.vlgmr.msra.gmra.mrb[204].mxu1 %v7550_v62  ;;  %v14459_v62 = vld [vmem:[%s20341_s5 + $0x408] sm:$0xff]  }
 0x52c   : > { %8983 = vmatmul.mubr.bf16.vlgmr.msra.gmra.mrb[124].mxu0 %v7556_v3  ;;  %13517 = vmatpush3.bf16.msra.mxu1 %v14422_v55  ;;  %v14458_v55 = vld [vmem:[%s20341_s5 + $0x288] sm:$0xff]   ;;  %v14461_v3 = vld [vmem:[%s20341_s5 + $0x450] sm:$0xff]  }
 0x52d   : > { %8942 = vmatprep.mubr.bf16.mxu1 %v7555_v20  ;;  %13583 = vmatpush3.bf16.msra.mxu0 %v14423_v61  ;;  %v14460_v61 = vld [vmem:[%s20341_s5 + $0x2d0] sm:$0xff]  }
 0x52e   : > { %9062 = vmatprep.mubr.bf16.mxu0 %v7561_v1  ;;  %13518 = vmatprep.subr.bf16.mxu1 %v14424_v27  ;;  %v14462_v27 = vld [vmem:[%s20341_s5 + $0x290] sm:$0xff]   ;;  %v14465_v1 = vld [vmem:[%s20341_s5 + $0x458] sm:$0xff]  }
 0x52f   : > { %13584 = vmatprep.subr.bf16.mxu0 %v14425_v15  ;;  %v14463_v20 = vld [vmem:[%s20341_s5 + $0x410] sm:$0xff]   ;;  %v14464_v15 = vld [vmem:[%s20341_s5 + $0x2d8] sm:$0xff]  }
 0x530   : > { %13519 = vmatpush3.bf16.msra.mxu1 %v14426_v6  ;;  %v14466_v6 = vld [vmem:[%s20341_s5 + $0x298] sm:$0xff]  }
 0x531   : > { %13585 = vmatpush3.bf16.msra.mxu0 %v14427_v8  ;;  %13520 = vmatprep.subr.bf16.mxu1 %v14428_v4  ;;  %v14467_v8 = vld [vmem:[%s20341_s5 + $0x418] sm:$0xff]   ;;  %v14468_v4 = vld [vmem:[%s20341_s5 + $0x2e0] sm:$0xff]  }
 0x532   : > { %13586 = vmatprep.subr.bf16.mxu0 %v14429_v14  ;;  %v14469_v14 = vld [vmem:[%s20341_s5 + $0x460] sm:$0xff]  }
 0x534   : > { %13521 = vmatpush3.bf16.msra.mxu1 %v14430_v36  ;;  %v14470_v36 = vld [vmem:[%s20341_s5 + $0x2a0] sm:$0xff]  }
 0x535   : > { %13587 = vmatpush3.bf16.msra.mxu0 %v14431_v49  ;;  %13522 = vmatprep.subr.bf16.mxu1 %v14432_v46  ;;  %v14471_v49 = vld [vmem:[%s20341_s5 + $0x420] sm:$0xff]   ;;  %v14472_v46 = vld [vmem:[%s20341_s5 + $0x2e8] sm:$0xff]  }
 0x536   : > { %13588 = vmatprep.subr.bf16.mxu0 %v14433_v30  ;;  %v14473_v30 = vld [vmem:[%s20341_s5 + $0x468] sm:$0xff]  }
 0x538   : > { %13523 = vmatpush3.bf16.msra.mxu1 %v14434_v31  ;;  %v14474_v31 = vld [vmem:[%s20341_s5 + $0x2a8] sm:$0xff]  }
 0x539   : > { %13589 = vmatpush3.bf16.msra.mxu0 %v14435_v63  ;;  %13524 = vmatprep.subr.bf16.mxu1 %v14436_v0  ;;  %v14475_v63 = vld [vmem:[%s20341_s5 + $0x428] sm:$0xff]   ;;  %v14476_v0 = vld [vmem:[%s20341_s5 + $0x2f0] sm:$0xff]  }
 0x53a   : > { %13590 = vmatprep.subr.bf16.mxu0 %v14437_v9  ;;  %v14477_v9 = vld [vmem:[%s20341_s5 + $0x470] sm:$0xff]  }
 0x53c   : > { %13525 = vmatpush3.bf16.msra.mxu1 %v14438_v22  ;;  %v14478_v22 = vld [vmem:[%s20341_s5 + $0x2b0] sm:$0xff]  }
 0x53d   : > { %13591 = vmatpush3.bf16.msra.mxu0 %v14439_v53  ;;  %13526 = vmatprep.subr.bf16.mxu1 %v14440_v29  ;;  %v14479_v53 = vld [vmem:[%s20341_s5 + $0x430] sm:$0xff]   ;;  %v14480_v29 = vld [vmem:[%s20341_s5 + $0x2f8] sm:$0xff]  }
 0x53e   : > { %13592 = vmatprep.subr.bf16.mxu0 %v14441_v28  ;;  %v14481_v28 = vld [vmem:[%s20341_s5 + $0x478] sm:$0xff]  }
 0x540   : > { %13527 = vmatpush3.bf16.msra.mxu1 %v14442_v40  ;;  %v14482_v40 = vld [vmem:[%s20341_s5 + $0x2b8] sm:$0xff]  }
 0x541   : > { %13593 = vmatpush3.bf16.msra.mxu0 %v14443_v48  ;;  %13528 = vmatprep.subr.bf16.mxu1 %v14444_v26  ;;  %v14483_v48 = vld [vmem:[%s20341_s5 + $0x438] sm:$0xff]   ;;  %v14484_v26 = vld [vmem:[%s20341_s5 + $0x3c0] sm:$0xff]  }
 0x542   : > { %13594 = vmatprep.subr.bf16.mxu0 %v14445_v50  ;;  %v14485_v50 = vld [vmem:[%s20341_s5 + $0x380] sm:$0xff]  }
 0x544   : > { %13529 = vmatpush3.bf16.msra.mxu1 %v14446_v12  ;;  %v7558_v12 = vpack.c.bf16 %v18828_v18, %v18828_v18 }
 0x545   : > { %13595 = vmatpush3.bf16.msra.mxu0 %v14447_v39  ;;  %13530 = vmatprep.subr.bf16.mxu1 %v14448_v57  ;;  %v14486_v39 = vld [vmem:[%s20341_s5 + $0x3c8] sm:$0xff]   ;;  %v7564_v57 = vpack.c.bf16 %v18837_v33, %v18837_v33 }
 0x546   : > { %13596 = vmatprep.subr.bf16.mxu0 %v14449_v5  ;;  %v7563_v5 = vpack.c.bf16 %v18854_v56, %v18854_v56 }
 0x548   : > { %13531 = vmatpush3.bf16.msra.mxu1 %v14450_v51  ;;  %v14487_v51 = vld [vmem:[%s20341_s5 + $0x388] sm:$0xff]  }
 0x549   : > { %13597 = vmatpush3.bf16.msra.mxu0 %v14451_v58  ;;  %13560 = vmatprep.subr.bf16.mxu1 %v14452_v32  ;;  %v14488_v58 = vld [vmem:[%s20341_s5 + $0x3d0] sm:$0xff]   ;;  %v15079_v32 = vmov 0.0  }
 0x54a   : > { %13626 = vmatprep.subr.bf16.mxu0 %v14453_v38  ;;  %v14489_v38 = vld [vmem:[%s20341_s5 + $0x390] sm:$0xff]  }
 0x54b   : > { %8943 = vmatmul.mubr.bf16.vlgmr.msra.gmra.mrb[208].mxu1 %v7554_v19  ;;  %v14491_v19 = vld [vmem:[%s20341_s5 + $0x398] sm:$0xff]  }
 0x54c   : > { %9063 = vmatmul.mubr.bf16.vlgmr.msra.gmra.mrb[128].mxu0 %v7560_v25  ;;  %13561 = vmatpush3.bf16.msra.mxu1 %v14454_v41  ;;  %v14490_v41 = vld [vmem:[%s20341_s5 + $0x3d8] sm:$0xff]   ;;  %v14493_v25 = vld [vmem:[%s20341_s5 + $0x3a0] sm:$0xff]  }
 0x54d   : > { %9022 = vmatprep.mubr.bf16.mxu1 %v7559_v10  ;;  %13627 = vmatpush3.bf16.msra.mxu0 %v14455_v13  ;;  %v14492_v13 = vld [vmem:[%s20341_s5 + $0x3e0] sm:$0xff]   ;;  %v14495_v10 = vld [vmem:[%s20341_s5 + $0x3a8] sm:$0xff]  }
 0x54e   : > { %9142 = vmatprep.mubr.bf16.mxu0 %v7565_v34  ;;  %13562 = vmatprep.subr.bf16.mxu1 %v14456_v45  ;;  %v14494_v45 = vld [vmem:[%s20341_s5 + $0x3e8] sm:$0xff]   ;;  %v14497_v34 = vld [vmem:[%s20341_s5 + $0x3b0] sm:$0xff]  }
 0x54f   : > { %13628 = vmatprep.subr.bf16.mxu0 %v14457_v47  ;;  %v14496_v47 = vld [vmem:[%s20341_s5 + $0x3f0] sm:$0xff]  }
 0x550   : > { %13563 = vmatpush3.bf16.msra.mxu1 %v14458_v55  ;;  %v14498_v55 = vld [vmem:[%s20341_s5 + $0x3f8] sm:$0xff]  }
 0x551   : > { %13629 = vmatpush3.bf16.msra.mxu0 %v14459_v62  ;;  %13564 = vmatprep.subr.bf16.mxu1 %v14460_v61  ;;  %v14499_v62 = vld [vmem:[%s20341_s5 + $0x3b8] sm:$0xff]   ;;  %v14500_v61 = vld [vmem:[%s20341_s5 + $0x480] sm:$0xff]  }
 0x552   : > { %13630 = vmatprep.subr.bf16.mxu0 %v14461_v3  ;;  %v7562_v3 = vpack.c.bf16 %v18869_v7, %v18869_v7 }
 0x554   : > { %13565 = vmatpush3.bf16.msra.mxu1 %v14462_v27  ;;  %v14501_v27 = vld [vmem:[%s20341_s5 + $0x488] sm:$0xff]  }
 0x555   : > { %13631 = vmatpush3.bf16.msra.mxu0 %v14463_v20  ;;  %13566 = vmatprep.subr.bf16.mxu1 %v14464_v15  ;;  %v14502_v20 = vld [vmem:[%s20341_s5 + $0x490] sm:$0xff]   ;;  %v14503_v15 = vld [vmem:[%s20341_s5 + $0x498] sm:$0xff]  }
 0x556   : > { %13632 = vmatprep.subr.bf16.mxu0 %v14465_v1  ;;  %v14504_v1 = vld [vmem:[%s20341_s5 + $0x4a0] sm:$0xff]  }
 0x558   : > { %13567 = vmatpush3.bf16.msra.mxu1 %v14466_v6  ;;  %v14505_v6 = vld [vmem:[%s20341_s5 + $0x4a8] sm:$0xff]  }
 0x559   : > { %13633 = vmatpush3.bf16.msra.mxu0 %v14467_v8  ;;  %13568 = vmatprep.subr.bf16.mxu1 %v14468_v4  ;;  %v14506_v8 = vld [vmem:[%s20341_s5 + $0x4b0] sm:$0xff]   ;;  %v14507_v4 = vld [vmem:[%s20341_s5 + $0x4b8] sm:$0xff]  }
 0x55a   : > { %13634 = vmatprep.subr.bf16.mxu0 %v14469_v14  ;;  %v7566_v14 = vpack.c.bf16 %v18882_v16, %v18882_v16 }
 0x55c   : > { %13569 = vmatpush3.bf16.msra.mxu1 %v14470_v36 }
 0x55d   : > { %13635 = vmatpush3.bf16.msra.mxu0 %v14471_v49  ;;  %13570 = vmatprep.subr.bf16.mxu1 %v14472_v46 }
 0x55e   : > { %13636 = vmatprep.subr.bf16.mxu0 %v14473_v30 }
 0x560   : > { %13571 = vmatpush3.bf16.msra.mxu1 %v14474_v31 }
 0x561   : > { %13637 = vmatpush3.bf16.msra.mxu0 %v14475_v63  ;;  %13572 = vmatprep.subr.bf16.mxu1 %v14476_v0 }
 0x562   : > { %13638 = vmatprep.subr.bf16.mxu0 %v14477_v9 }
 0x564   : > { %13573 = vmatpush3.bf16.msra.mxu1 %v14478_v22 }
 0x565   : > { %13639 = vmatpush3.bf16.msra.mxu0 %v14479_v53  ;;  %13574 = vmatprep.subr.bf16.mxu1 %v14480_v29  ;;  %v9190_v29 = vld [vmem:[%s20343_s7] sm:$0xff] }
 0x566   : > { %13640 = vmatprep.subr.bf16.mxu0 %v14481_v28  ;;  %v9191_v28 = vld [vmem:[%s20343_s7 + $0x8] sm:$0xff] }
 0x568   : > { %13575 = vmatpush3.bf16.msra.mxu1 %v14482_v40  ;;  %v9192_v40 = vld [vmem:[%s20343_s7 + $0x10] sm:$0xff] }
 0x569   : > { %13641 = vmatpush3.bf16.msra.mxu0 %v14483_v48  ;;  %13604 = vmatprep.subr.bf16.mxu1 %v14484_v26  ;;  %v15080_v48 = vmov 0.0|0.0   ;;  %v13764_v26 = vpack.c.bf16 %v9191_v28, %v9190_v29 }
 0x56a   : > { %13763 = vmatprep.subr.bf16.mxu0 %v15080_v48 }
 0x56b   : > { %9023 = vmatmul.mubr.bf16.vlgmr.msra.gmra.mrb[212].mxu1 %v7558_v12 }
 0x56c   : > { %9143 = vmatmul.mubr.bf16.vlgmr.msra.gmra.mrb[132].mxu0 %v7564_v57  ;;  %13605 = vmatpush3.bf16.msra.mxu1 %v14485_v50  ;;  %v9193_v50 = vld [vmem:[%s20343_s7 + $0x18] sm:$0xff] }
 0x56d   : > { %9102 = vmatprep.mubr.bf16.mxu1 %v7563_v5  ;;  %13606 = vmatprep.subr.bf16.mxu1 %v14486_v39  ;;  %v13767_v12 = vpack.c.bf16 %v9193_v50, %v9192_v40  ;;  %v12615_v39 = vld [vmem:[%s20342_s6] ss:$0 sm:$0xff] }
 0x56e   : > { %13736 = vmatprep.mubr.msk.f32.mxu0 %vm15078_vm14, %v15079_v32  ;;  %13765 = vmatpush3.bf16.msra.mxu0 %v13764_v26 }
 0x56f   : > { %13766 = vmatprep.subr.bf16.mxu0 %v15080_v48 }
 0x570   : > { %13607 = vmatpush3.bf16.msra.mxu1 %v14487_v51 }
 0x571   : > { %13608 = vmatprep.subr.bf16.mxu1 %v14488_v58 }
 0x572   : > { %13768 = vmatpush3.bf16.msra.mxu0 %v13767_v12 }
 0x573   : > { %13739 = vmatprep.subr.mxu0 %v15079_v32 }
 0x574   : > { %13609 = vmatpush3.bf16.msra.mxu1 %v14489_v38 }
 0x575   : > { %13610 = vmatprep.subr.bf16.mxu1 %v14490_v41 }
 0x578   : > { %13611 = vmatpush3.bf16.msra.mxu1 %v14491_v19 }
 0x579   : > { %13612 = vmatprep.subr.bf16.mxu1 %v14492_v13 }
 0x57c   : > { %13613 = vmatpush3.bf16.msra.mxu1 %v14493_v25 }
 0x57d   : > { %13614 = vmatprep.subr.bf16.mxu1 %v14494_v45 }
 0x580   : > { %13615 = vmatpush3.bf16.msra.mxu1 %v14495_v10 }
 0x581   : > { %13616 = vmatprep.subr.bf16.mxu1 %v14496_v47 }
 0x584   : > { %13617 = vmatpush3.bf16.msra.mxu1 %v14497_v34 }
 0x585   : > { %13618 = vmatprep.subr.bf16.mxu1 %v14498_v55 }
 0x588   : > { %13619 = vmatpush3.bf16.msra.mxu1 %v14499_v62 }
 0x589   : > { %13708 = vmatprep.subr.bf16.mxu1 %v15079_v32 }
 0x58b   : > { %9103 = vmatmul.mubr.bf16.vlgmr.msra.gmra.mrb[216].mxu1 %v7562_v3 }
 0x58c   : > { %13709 = vmatpush3.bf16.msra.mxu1 %v14500_v61  ;;  %13724 = vmatprep.mubr.msk.bf16.mxu1 %vm15078_vm14, %v15079_v32 }
 0x58d   : > { %13710 = vmatprep.subr.bf16.mxu1 %v15079_v32 }
 0x590   : > { %13711 = vmatpush3.bf16.msra.mxu1 %v14501_v27 }
 0x591   : > { %13712 = vmatprep.subr.bf16.mxu1 %v15079_v32 }
 0x594   : > { %13713 = vmatpush3.bf16.msra.mxu1 %v14502_v20 }
 0x595   : > { %13714 = vmatprep.subr.bf16.mxu1 %v15079_v32 }
 0x598   : > { %13715 = vmatpush3.bf16.msra.mxu1 %v14503_v15 }
 0x599   : > { %13716 = vmatprep.subr.bf16.mxu1 %v15079_v32 }
 0x59c   : > { %13717 = vmatpush3.bf16.msra.mxu1 %v14504_v1 }
 0x59d   : > { %13718 = vmatprep.subr.bf16.mxu1 %v15079_v32 }
 0x5a0   : > { %13719 = vmatpush3.bf16.msra.mxu1 %v14505_v6 }
 0x5a1   : > { %13720 = vmatprep.subr.bf16.mxu1 %v15079_v32 }
 0x5a4   : > { %13721 = vmatpush3.bf16.msra.mxu1 %v14506_v8 }
 0x5a5   : > { %13722 = vmatprep.subr.bf16.mxu1 %v15079_v32 }
 0x5a8   : > { %13723 = vmatpush3.bf16.msra.mxu1 %v14507_v4 }
 0x5ab   : > { %13725 = vmatmul.mubr.bf16.vlgmr.msra.gmra.mrb[220].mxu1 %v7566_v14 }
 0x5de   : > { %v13466_v36 = vpop.f32.mrb[200].mxu1 }
 0x5df   : > { %v13510_v49 = vpop.f32.mrb[120].mxu0  ;;  %v13467_v46 = vpop.f32.mrb[201].mxu1 }
 0x5e0   : > { %v13468_v30 = vadd.f32 %v13467_v46, %v13466_v36  ;;  %v13511_v31 = vpop.f32.mrb[121].mxu0  ;;  %v13469_v63 = vpop.f32.mrb[202].mxu1 }
 0x5e1   : > { %v13512_v0 = vadd.f32 %v13511_v31, %v13510_v49  ;;  %v13513_v9 = vpop.f32.mrb[122].mxu0  ;;  %v13470_v22 = vpop.f32.mrb[203].mxu1 }
 0x5e2   : > { %v13514_v53 = vpop.f32.mrb[123].mxu0  ;;  %v8825_v58 = vadd.f32 %v13468_v30, %v12615_v39 }
 0x5fe   : > { %v13488_v57 = vpop.f32.mrb[204].mxu1 }
 0x5ff   : > { %v13554_v5 = vpop.f32.mrb[124].mxu0  ;;  %v13489_v51 = vpop.f32.mrb[205].mxu1 }
 0x600   : > { %v13490_v38 = vadd.f32 %v13489_v51, %v13488_v57  ;;  %v13555_v41 = vpop.f32.mrb[125].mxu0  ;;  %v13491_v19 = vpop.f32.mrb[206].mxu1 }
 0x601   : > { %v13556_v13 = vadd.f32 %v13555_v41, %v13554_v5  ;;  %v13557_v25 = vpop.f32.mrb[126].mxu0  ;;  %v13492_v45 = vpop.f32.mrb[207].mxu1 }
 0x602   : > { %v8865_v10 = vadd.f32 %v13490_v38, %v8825_v58  ;;  %v13558_v47 = vpop.f32.mrb[127].mxu0  ;;  %v12768_v25 = vld [vmem:[%s20344_s8] ss:$0 sm:$0xff] }
 0x604   : > { %v8905_v34 = vadd.f32 %v13512_v0, %v8865_v10  ;;  %v9276_v10 = vstv %s11951_s22  ;;  %s15082_s22 = smov 32  }
 0x61e   : > { %v13532_v55 = vpop.f32.mrb[208].mxu1 }
 0x61f   : > { %v13598_v62 = vpop.f32.mrb[128].mxu0  ;;  %v13533_v61 = vpop.f32.mrb[209].mxu1 }
 0x620   : > { %v13534_v3 = vadd.f32 %v13533_v61, %v13532_v55  ;;  %v13599_v27 = vpop.f32.mrb[129].mxu0  ;;  %v13535_v20 = vpop.f32.mrb[210].mxu1  ;;  %v14508_v61 = vld [vmem:[%s20347_s11] ss:$8 sps:$4 sm:$0xff]  }
 0x621   : > { %v13600_v15 = vadd.f32 %v13599_v27, %v13598_v62  ;;  %v13601_v1 = vpop.f32.mrb[130].mxu0  ;;  %v13536_v6 = vpop.f32.mrb[211].mxu1  ;;  %v14513_v27 = vld [vmem:[%s20347_s11 + $0x14] ss:$8 sps:$4 sm:$0xff]   ;;  %v14511_v20 = vld [vmem:[%s20347_s11 + $0x10] ss:$8 sps:$4 sm:$0xff]  }
 0x622   : > { %v8945_v8 = vadd.f32 %v13534_v3, %v8905_v34  ;;  %v13602_v4 = vpop.f32.mrb[131].mxu0  ;;  %v14510_v3 = vld [vmem:[%s20347_s11 + $0x4] ss:$8 sps:$4 sm:$0xff]   ;;  %v14514_v1 = vld [vmem:[%s20347_s11 + $0x20] ss:$8 sps:$4 sm:$0xff]  }
 0x623   : > { %v14519_v6 = vld [vmem:[%s20347_s11 + $0x34] ss:$8 sps:$4 sm:$0xff]   ;;  %v14522_v4 = vld [vmem:[%s20347_s11 + $0x44] ss:$8 sps:$4 sm:$0xff]  }
 0x624   : > { %v8985_v14 = vadd.f32 %v13556_v13, %v8945_v8  ;;  %v9279_v13 = vld [vmem:[%s20345_s9] sm:$0xff]  ;;  %v14517_v8 = vld [vmem:[%s20347_s11 + $0x30] ss:$8 sps:$4 sm:$0xff]  }
 0x63e   : > { %v13576_v36 = vpop.f32.mrb[212].mxu1 }
 0x63f   : > { %v13642_v49 = vpop.f32.mrb[132].mxu0  ;;  %v13577_v46 = vpop.f32.mrb[213].mxu1 }
 0x640   : > { %v13578_v30 = vadd.f32 %v13577_v46, %v13576_v36  ;;  %v13643_v31 = vpop.f32.mrb[133].mxu0  ;;  %v13579_v63 = vpop.f32.mrb[214].mxu1  ;;  %v14525_v36 = vld [vmem:[%s20347_s11 + $0x54] ss:$8 sps:$4 sm:$0xff]   ;;  %v14528_v46 = vld [vmem:[%s20347_s11 + $0x64] ss:$8 sps:$4 sm:$0xff]  }
 0x641   : > { %v13644_v9 = vadd.f32 %v13643_v31, %v13642_v49  ;;  %v13645_v0 = vpop.f32.mrb[134].mxu0  ;;  %v13580_v22 = vpop.f32.mrb[215].mxu1  ;;  %v14523_v49 = vld [vmem:[%s20347_s11 + $0x50] ss:$8 sps:$4 sm:$0xff]   ;;  %v14531_v31 = vld [vmem:[%s20347_s11 + $0x74] ss:$8 sps:$4 sm:$0xff]  }
 0x642   : > { %v9025_v53 = vadd.f32 %v13578_v30, %v8985_v14  ;;  %v13646_v29 = vpop.f32.mrb[135].mxu0  ;;  %v14520_v14 = vld [vmem:[%s20347_s11 + $0x40] ss:$8 sps:$4 sm:$0xff]   ;;  %v14529_v63 = vld [vmem:[%s20347_s11 + $0x70] ss:$8 sps:$4 sm:$0xff]  }
 0x643   : > { %v14526_v30 = vld [vmem:[%s20347_s11 + $0x60] ss:$8 sps:$4 sm:$0xff]   ;;  %v14537_v22 = vld [vmem:[%s20347_s11 + $0x94] ss:$8 sps:$4 sm:$0xff]   ;;  %v14540_v29 = vld [vmem:[%s20347_s11 + $0xa4] ss:$8 sps:$4 sm:$0xff]  }
 0x644   : > { %v9065_v28 = vadd.f32 %v13600_v15, %v9025_v53  ;;  %v14516_v15 = vld [vmem:[%s20347_s11 + $0x24] ss:$8 sps:$4 sm:$0xff]   ;;  %v14532_v0 = vld [vmem:[%s20347_s11 + $0x80] ss:$8 sps:$4 sm:$0xff]   ;;  %v14535_v53 = vld [vmem:[%s20347_s11 + $0x90] ss:$8 sps:$4 sm:$0xff]  }
 0x65e   : > { %v13620_v40 = vpop.f32.mrb[216].mxu1 }
 0x65f   : > { %v13621_v26 = vpop.f32.mrb[217].mxu1 }
 0x660   : > { %v13622_v50 = vadd.f32 %v13621_v26, %v13620_v40  ;;  %v13623_v12 = vpop.f32.mrb[218].mxu1  ;;  %v14543_v40 = vld [vmem:[%s20347_s11 + $0xb4] ss:$8 sps:$4 sm:$0xff]   ;;  %v14541_v26 = vld [vmem:[%s20347_s11 + $0xb0] ss:$8 sps:$4 sm:$0xff]  }
 0x661   : > { %v13624_v39 = vpop.f32.mrb[219].mxu1  ;;  %v14544_v12 = vld [vmem:[%s20347_s11 + $0xc0] ss:$8 sps:$4 sm:$0xff]  }
 0x662   : > { %v9105_v57 = vadd.f32 %v13622_v50, %v9065_v28  ;;  %v14538_v28 = vld [vmem:[%s20347_s11 + $0xa0] ss:$8 sps:$4 sm:$0xff]   ;;  %v14546_v50 = vld [vmem:[%s20347_s11 + $0xc4] ss:$8 sps:$4 sm:$0xff]   ;;  %v14549_v39 = vld [vmem:[%s20347_s11 + $0xd4] ss:$8 sps:$4 sm:$0xff]  }
 0x664   : > { %v9145_v5 = vadd.f32 %v13644_v9, %v9105_v57  ;;  %v14534_v9 = vld [vmem:[%s20347_s11 + $0x84] ss:$8 sps:$4 sm:$0xff]   ;;  %v14547_v57 = vld [vmem:[%s20347_s11 + $0xd0] ss:$8 sps:$4 sm:$0xff]  }
 0x67e   : > { %v9184_v51 = vpop.f32.mrb[220].mxu1 }
 0x67f   : > { %v9185_v58 = vadd.f32 %v9184_v51, %v9145_v5  ;;  %v13726_v38 = vpop.f32.mrb[221].mxu1  ;;  %v12770_v5 = vld [vmem:[%s20346_s10] ss:$0 sm:$0xff] }
 0x680   : > { %v9187_v41 = vpop.f32.mrb[222].mxu1 }
 0x681   : > { %v13727_v19 = vpop.f32.mrb[223].mxu1  ;;  %13737 = vmatmul.mubr.msk.f32.vlgmr.msra.gmra.mrb[136].mxu0 %vm9201_vm15, %v9185_v58 }
 0x682   : > { %13741 = vmatprep.mubr.msk.f32.mxu0 %vm15078_vm14, %v15079_v32  ;;  %13740 = vmatpush3.msra.mxu0 %v9279_v13 }
 0x683   : > { %11256 = vmatprep.subr.bf16.mxu0 %v14510_v3 }
 0x754   : > { %v9271_v45 = vpop.f32.mrb[136].mxu0 }
 0x755   : > { %v9272_v47 = vadd.f32 %v12768_v25, %v9271_v45  ;;  %v13738_v34 = vpop.f32.mrb[137].mxu0  ;;  %v14550_v25 = vld [vmem:[%s20347_s11 + $0xe0] ss:$8 sps:$4 sm:$0xff]   ;;  %v14552_v45 = vld [vmem:[%s20347_s11 + $0xe4] ss:$8 sps:$4 sm:$0xff]  }
 0x756   : > { %v14558_v34 = vld [vmem:[%s20347_s11 + $0x104] ss:$8 sps:$4 sm:$0xff]  }
 0x757   : > { %vm9275_vm0 = vcmp.gt.f32.partialorder %v9272_v47, 0.0  ;;  %v9277_v55 = vmul.f32 %v9276_v10, %v9272_v47  ;;  %v14553_v10 = vld [vmem:[%s20347_s11 + $0xf0] ss:$8 sps:$4 sm:$0xff]  }
 0x759   : > { %v9278_v62 = vsel %vm9275_vm0, %v9272_v47, %v9277_v55  ;;  %v14555_v47 = vld [vmem:[%s20347_s11 + $0xf4] ss:$8 sps:$4 sm:$0xff]  }
 0x75a   : > { %13742 = vmatmul.mubr.msk.f32.vlgmr.msra.gmra.mrb[138].mxu0 %vm9287_vm1, %v9278_v62 }
 0x75b   : > { %11257 = vmatpush1.bf16.msra.mxu0 %v14508_v61 }
 0x75c   : > { %11258 = vmatprep.subr.bf16.mxu0 %v14513_v27 }
 0x75f   : > { %11259 = vmatpush1.bf16.msra.mxu0 %v14511_v20 }
 0x760   : > { %11260 = vmatprep.subr.bf16.mxu0 %v14516_v15 }
 0x763   : > { %11261 = vmatpush1.bf16.msra.mxu0 %v14514_v1 }
 0x764   : > { %11262 = vmatprep.subr.bf16.mxu0 %v14519_v6 }
 0x767   : > { %11263 = vmatpush1.bf16.msra.mxu0 %v14517_v8 }
 0x768   : > { %11264 = vmatprep.subr.bf16.mxu0 %v14522_v4 }
 0x76b   : > { %11265 = vmatpush1.bf16.msra.mxu0 %v14520_v14  ;;  %v14556_v14 = vld [vmem:[%s20347_s11 + $0x100] ss:$8 sps:$4 sm:$0xff]  }
 0x76c   : > { %11266 = vmatprep.subr.bf16.mxu0 %v14525_v36 }
 0x76f   : > { %11267 = vmatpush1.bf16.msra.mxu0 %v14523_v49  ;;  %v14561_v49 = vld [vmem:[%s20347_s11 + $0x114] ss:$8 sps:$4 sm:$0xff]  }
 0x770   : > { %11268 = vmatprep.subr.bf16.mxu0 %v14528_v46 }
 0x773   : > { %11269 = vmatpush1.bf16.msra.mxu0 %v14526_v30  ;;  %v14567_v30 = vld [vmem:[%s20347_s11 + $0x134] ss:$8 sps:$4 sm:$0xff]  }
 0x774   : > { %11270 = vmatprep.subr.bf16.mxu0 %v14531_v31  ;;  %v14565_v31 = vld [vmem:[%s20347_s11 + $0x130] ss:$8 sps:$4 sm:$0xff]  }
 0x777   : > { %11271 = vmatpush1.bf16.msra.mxu0 %v14529_v63  ;;  %v14570_v63 = vld [vmem:[%s20347_s11 + $0x144] ss:$8 sps:$4 sm:$0xff]  }
 0x778   : > { %11272 = vmatprep.subr.bf16.mxu0 %v14534_v9  ;;  %v14568_v9 = vld [vmem:[%s20347_s11 + $0x140] ss:$8 sps:$4 sm:$0xff]  }
 0x77b   : > { %11273 = vmatpush1.bf16.msra.mxu0 %v14532_v0  ;;  %v14573_v0 = vld [vmem:[%s20347_s11 + $0x154] ss:$8 sps:$4 sm:$0xff]  }
 0x77c   : > { %11274 = vmatprep.subr.bf16.mxu0 %v14537_v22  ;;  %v14571_v22 = vld [vmem:[%s20347_s11 + $0x150] ss:$8 sps:$4 sm:$0xff]  }
 0x77f   : > { %11275 = vmatpush1.bf16.msra.mxu0 %v14535_v53  ;;  %v14576_v53 = vld [vmem:[%s20347_s11 + $0x164] ss:$8 sps:$4 sm:$0xff]  }
 0x780   : > { %11276 = vmatprep.subr.bf16.mxu0 %v14540_v29  ;;  %v14574_v29 = vld [vmem:[%s20347_s11 + $0x160] ss:$8 sps:$4 sm:$0xff]  }
 0x783   : > { %11277 = vmatpush1.bf16.msra.mxu0 %v14538_v28  ;;  %v14579_v28 = vld [vmem:[%s20347_s11 + $0x174] ss:$8 sps:$4 sm:$0xff]  }
 0x784   : > { %11278 = vmatprep.subr.bf16.mxu0 %v14543_v40  ;;  %v14577_v40 = vld [vmem:[%s20347_s11 + $0x170] ss:$8 sps:$4 sm:$0xff]  }
 0x787   : > { %11279 = vmatpush1.bf16.msra.mxu0 %v14541_v26  ;;  %v14582_v26 = vld [vmem:[%s20347_s11 + $0x184] ss:$8 sps:$4 sm:$0xff]  }
 0x788   : > { %11280 = vmatprep.subr.bf16.mxu0 %v14546_v50  ;;  %v14580_v50 = vld [vmem:[%s20347_s11 + $0x180] ss:$8 sps:$4 sm:$0xff]  }
 0x78b   : > { %11281 = vmatpush1.bf16.msra.mxu0 %v14544_v12  ;;  %v14585_v12 = vld [vmem:[%s20347_s11 + $0x194] ss:$8 sps:$4 sm:$0xff]  }
 0x78c   : > { %11282 = vmatprep.subr.bf16.mxu0 %v14549_v39  ;;  %v14583_v39 = vld [vmem:[%s20347_s11 + $0x190] ss:$8 sps:$4 sm:$0xff]  }
 0x78f   : > { %11283 = vmatpush1.bf16.msra.mxu0 %v14547_v57  ;;  %v14588_v57 = vld [vmem:[%s20347_s11 + $0x1a4] ss:$8 sps:$4 sm:$0xff]  }
 0x790   : > { %11284 = vmatprep.subr.bf16.mxu0 %v14552_v45  ;;  %v14598_v45 = vld [vmem:[%s20347_s11 + $0x1e0] ss:$8 sps:$4 sm:$0xff]  }
 0x793   : > { %11285 = vmatpush1.bf16.msra.mxu0 %v14550_v25  ;;  %v14600_v25 = vld [vmem:[%s20347_s11 + $0x1e4] ss:$8 sps:$4 sm:$0xff]  }
 0x794   : > { %11286 = vmatprep.subr.bf16.mxu0 %v14555_v47  ;;  %v14601_v47 = vld [vmem:[%s20347_s11 + $0x1f0] ss:$8 sps:$4 sm:$0xff]  }
 0x797   : > { %11287 = vmatpush1.bf16.msra.mxu0 %v14553_v10  ;;  %v14603_v10 = vld [vmem:[%s20347_s11 + $0x1f4] ss:$8 sps:$4 sm:$0xff]  }
 0x798   : > { %11297 = vmatprep.subr.bf16.mxu0 %v14558_v34 }
 0x82d   : > { %v9357_v51 = vpop.f32.mrb[138].mxu0 }
 0x82e   : > { %v9358_v58 = vadd.f32 %v12770_v5, %v9357_v51  ;;  %v13743_v38 = vpop.f32.mrb[139].mxu0  ;;  %v14586_v5 = vld [vmem:[%s20347_s11 + $0x1a0] ss:$8 sps:$4 sm:$0xff]   ;;  %v14591_v51 = vld [vmem:[%s20347_s11 + $0x1b4] ss:$8 sps:$4 sm:$0xff]  }
 0x82f   : > { %v14594_v38 = vld [vmem:[%s20347_s11 + $0x1c4] ss:$8 sps:$4 sm:$0xff]  }
 0x830   : > { %v12772_v41 = vmul.f32 -1.442695, %v9358_v58  ;;  %v14589_v58 = vld [vmem:[%s20347_s11 + $0x1b0] ss:$8 sps:$4 sm:$0xff]  }
 0x832   : > { %14964 = vpow2.f32 %v12772_v41  ;;  %v14592_v41 = vld [vmem:[%s20347_s11 + $0x1c0] ss:$8 sps:$4 sm:$0xff]  }
 0x83c   : > { %v14965_v19 = vpop.eup %14964 }
 0x83d   : > { %v9364_v13 = vadd.f32 1.0, %v14965_v19  ;;  %v14597_v19 = vld [vmem:[%s20347_s11 + $0x1d4] ss:$8 sps:$4 sm:$0xff]  }
 0x83f   : > { %14966 = vrcp.f32 %v9364_v13  ;;  %v14595_v13 = vld [vmem:[%s20347_s11 + $0x1d0] ss:$8 sps:$4 sm:$0xff]  }
 0x849   : > { %v14967_v55 = vpop.eup %14966 }
 0x84a   : > { %9374 = vrot.lane.b32.xlu1 %v14967_v55, %s15081_s21  ;;  %9368 = vrot.lane.b32.xlu0 %v14967_v55, %s15082_s22  ;;  %s587_s21 = scalar_lea.vmem %s20354_s18, %s11949_s0 }
 0x84e   : > { %9371 = vrot.lane.b32.xlu0 %v14967_v55, %s15083_s23 }
 0x8bc   : > { %v9369_v62 = vpop.permute.xlu0 %9368  ;;  %v9375_v27 = vpop.permute.xlu1 %9374 }
 0x8bd   : > { %v9377_v61 = vsel %vm9201_vm15, %v14967_v55, %v9369_v62  ;;  %v14606_v55 = vld [vmem:[%s20347_s11 + $0x204] ss:$8 sps:$4 sm:$0xff]  }
 0x8c0   : > { %v9372_v3 = vpop.permute.xlu0 %9371 }
 0x8c1   : > { %v9379_v20 = vsel %vm9378_vm2, %v9377_v61, %v9372_v3  ;;  %v14604_v61 = vld [vmem:[%s20347_s11 + $0x200] ss:$8 sps:$4 sm:$0xff]  }
 0x8c2   : > { %v19338_v15 = vsel %vm9380_vm3, %v9379_v20, %v9375_v27  ;;  %v14609_v27 = vld [vmem:[%s20347_s11 + $0x214] ss:$8 sps:$4 sm:$0xff]  }
 0x8c3   : > { %v9383_v1 = vmul.f32 %v19338_v15, %v18680_v43  ;;  %v9382_v6 = vmul.f32 %v19338_v15, %v18688_v42  ;;  %v9385_v8 = vmul.f32 %v19338_v15, %v18710_v60  ;;  %v14559_v43 = vld [vmem:[%s20347_s11 + $0x110] ss:$8 sps:$4 sm:$0xff]   ;;  %v14564_v42 = vld [vmem:[%s20347_s11 + $0x124] ss:$8 sps:$4 sm:$0xff]   ;;  %v14562_v60 = vld [vmem:[%s20347_s11 + $0x120] ss:$8 sps:$4 sm:$0xff]   ;;  %v9384_v34 = vmul.f32 %v19338_v15, %v18677_v17 }
 0x8c4   : > { %v9387_v62 = vmul.f32 %v19338_v15, %v18683_v52  ;;  %v14607_v17 = vld [vmem:[%s20347_s11 + $0x210] ss:$8 sps:$4 sm:$0xff]   ;;  %v14612_v52 = vld [vmem:[%s20347_s11 + $0x224] ss:$8 sps:$4 sm:$0xff]  }
 0x8c5   : > { %v9402_v4 = vpack.c.bf16 %v9383_v1, %v9383_v1  ;;  %v9401_v36 = vpack.c.bf16 %v9382_v6, %v9382_v6  ;;  %v9404_v46 = vpack.c.bf16 %v9385_v8, %v9385_v8  ;;  %v9403_v3 = vpack.c.bf16 %v9384_v34, %v9384_v34  ;;  %v14610_v1 = vld [vmem:[%s20347_s11 + $0x220] ss:$8 sps:$4 sm:$0xff]   ;;  %v14615_v6 = vld [vmem:[%s20347_s11 + $0x234] ss:$8 sps:$4 sm:$0xff]   ;;  %v14613_v8 = vld [vmem:[%s20347_s11 + $0x230] ss:$8 sps:$4 sm:$0xff]  }
 0x8c6   : > { %v9406_v20 = vpack.c.bf16 %v9387_v62, %v9387_v62  ;;  %v14666_v34 = vld [vmem:[%s20347_s11 + $0x344] ss:$8 sps:$4 sm:$0xff]   ;;  %v14669_v62 = vld [vmem:[%s20347_s11 + $0x354] ss:$8 sps:$4 sm:$0xff]  }
 0x8c7   : > { %11288 = vmatprep.mubr.bf16.mxu0 %v9402_v4  ;;  %v14618_v4 = vld [vmem:[%s20347_s11 + $0x244] ss:$8 sps:$4 sm:$0xff]  }
 0x8c8   : > { %11289 = vmatmul.mubr.bf16.vlgmr.msra.gmra.mrb[140].mxu0 %v9401_v36  ;;  %v14621_v36 = vld [vmem:[%s20347_s11 + $0x254] ss:$8 sps:$4 sm:$0xff]  }
 0x8c9   : > { %11298 = vmatpush1.bf16.msra.mxu0 %v14556_v14  ;;  %11329 = vmatprep.mubr.bf16.mxu0 %v9404_v46  ;;  %v14616_v14 = vld [vmem:[%s20347_s11 + $0x240] ss:$8 sps:$4 sm:$0xff]   ;;  %v14624_v46 = vld [vmem:[%s20347_s11 + $0x264] ss:$8 sps:$4 sm:$0xff]  }
 0x8ca   : > { %11299 = vmatprep.subr.bf16.mxu0 %v14561_v49  ;;  %v14619_v49 = vld [vmem:[%s20347_s11 + $0x250] ss:$8 sps:$4 sm:$0xff]  }
 0x8cd   : > { %11300 = vmatpush1.bf16.msra.mxu0 %v14559_v43  ;;  %v14622_v43 = vld [vmem:[%s20347_s11 + $0x260] ss:$8 sps:$4 sm:$0xff]  }
 0x8ce   : > { %11301 = vmatprep.subr.bf16.mxu0 %v14564_v42  ;;  %v14627_v42 = vld [vmem:[%s20347_s11 + $0x274] ss:$8 sps:$4 sm:$0xff]  }
 0x8d1   : > { %11302 = vmatpush1.bf16.msra.mxu0 %v14562_v60  ;;  %v14625_v60 = vld [vmem:[%s20347_s11 + $0x270] ss:$8 sps:$4 sm:$0xff]  }
 0x8d2   : > { %11303 = vmatprep.subr.bf16.mxu0 %v14567_v30  ;;  %v14630_v30 = vld [vmem:[%s20347_s11 + $0x284] ss:$8 sps:$4 sm:$0xff]  }
 0x8d5   : > { %11304 = vmatpush1.bf16.msra.mxu0 %v14565_v31  ;;  %v14628_v31 = vld [vmem:[%s20347_s11 + $0x280] ss:$8 sps:$4 sm:$0xff]  }
 0x8d6   : > { %11305 = vmatprep.subr.bf16.mxu0 %v14570_v63  ;;  %v14633_v63 = vld [vmem:[%s20347_s11 + $0x294] ss:$8 sps:$4 sm:$0xff]  }
 0x8d9   : > { %11306 = vmatpush1.bf16.msra.mxu0 %v14568_v9  ;;  %v14631_v9 = vld [vmem:[%s20347_s11 + $0x290] ss:$8 sps:$4 sm:$0xff]  }
 0x8da   : > { %11307 = vmatprep.subr.bf16.mxu0 %v14573_v0  ;;  %v14636_v0 = vld [vmem:[%s20347_s11 + $0x2a4] ss:$8 sps:$4 sm:$0xff]  }
 0x8dd   : > { %11308 = vmatpush1.bf16.msra.mxu0 %v14571_v22  ;;  %v14634_v22 = vld [vmem:[%s20347_s11 + $0x2a0] ss:$8 sps:$4 sm:$0xff]  }
 0x8de   : > { %11309 = vmatprep.subr.bf16.mxu0 %v14576_v53  ;;  %v14639_v53 = vld [vmem:[%s20347_s11 + $0x2b4] ss:$8 sps:$4 sm:$0xff]  }
 0x8e1   : > { %11310 = vmatpush1.bf16.msra.mxu0 %v14574_v29  ;;  %v14637_v29 = vld [vmem:[%s20347_s11 + $0x2b0] ss:$8 sps:$4 sm:$0xff]  }
 0x8e2   : > { %11311 = vmatprep.subr.bf16.mxu0 %v14579_v28  ;;  %v14642_v28 = vld [vmem:[%s20347_s11 + $0x2c4] ss:$8 sps:$4 sm:$0xff]  }
 0x8e5   : > { %11312 = vmatpush1.bf16.msra.mxu0 %v14577_v40  ;;  %v14640_v40 = vld [vmem:[%s20347_s11 + $0x2c0] ss:$8 sps:$4 sm:$0xff]  }
 0x8e6   : > { %11313 = vmatprep.subr.bf16.mxu0 %v14582_v26  ;;  %v14645_v26 = vld [vmem:[%s20347_s11 + $0x2d4] ss:$8 sps:$4 sm:$0xff]  }
 0x8e9   : > { %11314 = vmatpush1.bf16.msra.mxu0 %v14580_v50  ;;  %v14643_v50 = vld [vmem:[%s20347_s11 + $0x2d0] ss:$8 sps:$4 sm:$0xff]  }
 0x8ea   : > { %11315 = vmatprep.subr.bf16.mxu0 %v14585_v12  ;;  %v14648_v12 = vld [vmem:[%s20347_s11 + $0x2e4] ss:$8 sps:$4 sm:$0xff]  }
 0x8ed   : > { %11316 = vmatpush1.bf16.msra.mxu0 %v14583_v39  ;;  %v14646_v39 = vld [vmem:[%s20347_s11 + $0x2e0] ss:$8 sps:$4 sm:$0xff]  }
 0x8ee   : > { %11317 = vmatprep.subr.bf16.mxu0 %v14588_v57  ;;  %v14651_v57 = vld [vmem:[%s20347_s11 + $0x2f4] ss:$8 sps:$4 sm:$0xff]  }
 0x8f1   : > { %11318 = vmatpush1.bf16.msra.mxu0 %v14586_v5  ;;  %v14649_v5 = vld [vmem:[%s20347_s11 + $0x2f0] ss:$8 sps:$4 sm:$0xff]  }
 0x8f2   : > { %11319 = vmatprep.subr.bf16.mxu0 %v14591_v51  ;;  %v9386_v51 = vmul.f32 %v19338_v15, %v18691_v21  ;;  %v14655_v21 = vld [vmem:[%s20347_s11 + $0x310] ss:$8 sps:$4 sm:$0xff]  }
 0x8f5   : > { %11320 = vmatpush1.bf16.msra.mxu0 %v14589_v58  ;;  %v14654_v58 = vld [vmem:[%s20347_s11 + $0x304] ss:$8 sps:$4 sm:$0xff]  }
 0x8f6   : > { %11321 = vmatprep.subr.bf16.mxu0 %v14594_v38  ;;  %v9389_v38 = vmul.f32 %v19338_v15, %v18752_v37  ;;  %v14660_v37 = vld [vmem:[%s20347_s11 + $0x324] ss:$8 sps:$4 sm:$0xff]  }
 0x8f9   : > { %11322 = vmatpush1.bf16.msra.mxu0 %v14592_v41  ;;  %v14652_v41 = vld [vmem:[%s20347_s11 + $0x300] ss:$8 sps:$4 sm:$0xff]  }
 0x8fa   : > { %11323 = vmatprep.subr.bf16.mxu0 %v14597_v19  ;;  %v9405_v19 = vpack.c.bf16 %v9386_v51, %v9386_v51  ;;  %v14717_v51 = vld [vmem:[%s20347_s11 + $0x454] ss:$8 sps:$4 sm:$0xff]  }
 0x8fd   : > { %11324 = vmatpush1.bf16.msra.mxu0 %v14595_v13  ;;  %v14657_v13 = vld [vmem:[%s20347_s11 + $0x314] ss:$8 sps:$4 sm:$0xff]  }
 0x8fe   : > { %11325 = vmatprep.subr.bf16.mxu0 %v14600_v25  ;;  %v9408_v25 = vpack.c.bf16 %v9389_v38, %v9389_v38  ;;  %v14720_v38 = vld [vmem:[%s20347_s11 + $0x464] ss:$8 sps:$4 sm:$0xff]  }
 0x901   : > { %11326 = vmatpush1.bf16.msra.mxu0 %v14598_v45  ;;  %v14658_v45 = vld [vmem:[%s20347_s11 + $0x320] ss:$8 sps:$4 sm:$0xff]  }
 0x902   : > { %11327 = vmatprep.subr.bf16.mxu0 %v14603_v10  ;;  %v14663_v10 = vld [vmem:[%s20347_s11 + $0x334] ss:$8 sps:$4 sm:$0xff]  }
 0x905   : > { %11328 = vmatpush1.bf16.msra.mxu0 %v14601_v47  ;;  %v14661_v47 = vld [vmem:[%s20347_s11 + $0x330] ss:$8 sps:$4 sm:$0xff]  }
 0x906   : > { %11338 = vmatprep.subr.bf16.mxu0 %v14606_v55  ;;  %v14664_v55 = vld [vmem:[%s20347_s11 + $0x340] ss:$8 sps:$4 sm:$0xff]  }
 0x908   : > { %11330 = vmatmul.mubr.bf16.vlgmr.msra.gmra.mrb[140].mxu0 %v9403_v3  ;;  %v14672_v3 = vld [vmem:[%s20347_s11 + $0x364] ss:$8 sps:$4 sm:$0xff]  }
 0x909   : > { %11339 = vmatpush1.bf16.msra.mxu0 %v14604_v61  ;;  %11370 = vmatprep.mubr.bf16.mxu0 %v9406_v20  ;;  %v14667_v61 = vld [vmem:[%s20347_s11 + $0x350] ss:$8 sps:$4 sm:$0xff]   ;;  %v14675_v20 = vld [vmem:[%s20347_s11 + $0x374] ss:$8 sps:$4 sm:$0xff]  }
 0x90a   : > { %11340 = vmatprep.subr.bf16.mxu0 %v14609_v27  ;;  %v14670_v27 = vld [vmem:[%s20347_s11 + $0x360] ss:$8 sps:$4 sm:$0xff]  }
 0x90d   : > { %11341 = vmatpush1.bf16.msra.mxu0 %v14607_v17  ;;  %v14673_v17 = vld [vmem:[%s20347_s11 + $0x370] ss:$8 sps:$4 sm:$0xff]  }
 0x90e   : > { %11342 = vmatprep.subr.bf16.mxu0 %v14612_v52  ;;  %v14678_v52 = vld [vmem:[%s20347_s11 + $0x384] ss:$8 sps:$4 sm:$0xff]  }
 0x911   : > { %11343 = vmatpush1.bf16.msra.mxu0 %v14610_v1  ;;  %v14676_v1 = vld [vmem:[%s20347_s11 + $0x380] ss:$8 sps:$4 sm:$0xff]  }
 0x912   : > { %11344 = vmatprep.subr.bf16.mxu0 %v14615_v6  ;;  %v14681_v6 = vld [vmem:[%s20347_s11 + $0x394] ss:$8 sps:$4 sm:$0xff]  }
 0x915   : > { %11345 = vmatpush1.bf16.msra.mxu0 %v14613_v8  ;;  %v14679_v8 = vld [vmem:[%s20347_s11 + $0x390] ss:$8 sps:$4 sm:$0xff]  }
 0x916   : > { %11346 = vmatprep.subr.bf16.mxu0 %v14618_v4  ;;  %v14684_v4 = vld [vmem:[%s20347_s11 + $0x3a4] ss:$8 sps:$4 sm:$0xff]  }
 0x919   : > { %11347 = vmatpush1.bf16.msra.mxu0 %v14616_v14  ;;  %v14682_v14 = vld [vmem:[%s20347_s11 + $0x3a0] ss:$8 sps:$4 sm:$0xff]  }
 0x91a   : > { %11348 = vmatprep.subr.bf16.mxu0 %v14621_v36  ;;  %v14687_v36 = vld [vmem:[%s20347_s11 + $0x3b4] ss:$8 sps:$4 sm:$0xff]  }
 0x91d   : > { %11349 = vmatpush1.bf16.msra.mxu0 %v14619_v49  ;;  %v14685_v49 = vld [vmem:[%s20347_s11 + $0x3b0] ss:$8 sps:$4 sm:$0xff]  }
 0x91e   : > { %11350 = vmatprep.subr.bf16.mxu0 %v14624_v46  ;;  %v14690_v46 = vld [vmem:[%s20347_s11 + $0x3c4] ss:$8 sps:$4 sm:$0xff]  }
 0x921   : > { %11351 = vmatpush1.bf16.msra.mxu0 %v14622_v43  ;;  %v14688_v43 = vld [vmem:[%s20347_s11 + $0x3c0] ss:$8 sps:$4 sm:$0xff]  }
 0x922   : > { %11352 = vmatprep.subr.bf16.mxu0 %v14627_v42  ;;  %v14693_v42 = vld [vmem:[%s20347_s11 + $0x3d4] ss:$8 sps:$4 sm:$0xff]  }
 0x925   : > { %11353 = vmatpush1.bf16.msra.mxu0 %v14625_v60  ;;  %v14691_v60 = vld [vmem:[%s20347_s11 + $0x3d0] ss:$8 sps:$4 sm:$0xff]  }
 0x926   : > { %11354 = vmatprep.subr.bf16.mxu0 %v14630_v30  ;;  %v14696_v30 = vld [vmem:[%s20347_s11 + $0x3e4] ss:$8 sps:$4 sm:$0xff]  }
 0x929   : > { %11355 = vmatpush1.bf16.msra.mxu0 %v14628_v31  ;;  %v14694_v31 = vld [vmem:[%s20347_s11 + $0x3e0] ss:$8 sps:$4 sm:$0xff]  }
 0x92a   : > { %11356 = vmatprep.subr.bf16.mxu0 %v14633_v63  ;;  %v14699_v63 = vld [vmem:[%s20347_s11 + $0x3f4] ss:$8 sps:$4 sm:$0xff]  }
 0x92d   : > { %11357 = vmatpush1.bf16.msra.mxu0 %v14631_v9  ;;  %v14697_v9 = vld [vmem:[%s20347_s11 + $0x3f0] ss:$8 sps:$4 sm:$0xff]  }
 0x92e   : > { %11358 = vmatprep.subr.bf16.mxu0 %v14636_v0  ;;  %v9388_v0 = vmul.f32 %v19338_v15, %v18771_v35  ;;  %v14703_v35 = vld [vmem:[%s20347_s11 + $0x410] ss:$8 sps:$4 sm:$0xff]  }
 0x931   : > { %11359 = vmatpush1.bf16.msra.mxu0 %v14634_v22  ;;  %v14702_v22 = vld [vmem:[%s20347_s11 + $0x404] ss:$8 sps:$4 sm:$0xff]  }
 0x932   : > { %11360 = vmatprep.subr.bf16.mxu0 %v14639_v53  ;;  %v9391_v53 = vmul.f32 %v19338_v15, %v18741_v59  ;;  %v14708_v59 = vld [vmem:[%s20347_s11 + $0x424] ss:$8 sps:$4 sm:$0xff]  }
 0x935   : > { %11361 = vmatpush1.bf16.msra.mxu0 %v14637_v29  ;;  %v14700_v29 = vld [vmem:[%s20347_s11 + $0x400] ss:$8 sps:$4 sm:$0xff]  }
 0x936   : > { %11362 = vmatprep.subr.bf16.mxu0 %v14642_v28  ;;  %v9407_v28 = vpack.c.bf16 %v9388_v0, %v9388_v0  ;;  %v14768_v0 = vld [vmem:[%s20347_s11 + $0x564] ss:$8 sps:$4 sm:$0xff]  }
 0x939   : > { %11363 = vmatpush1.bf16.msra.mxu0 %v14640_v40  ;;  %v14705_v40 = vld [vmem:[%s20347_s11 + $0x414] ss:$8 sps:$4 sm:$0xff]  }
 0x93a   : > { %11364 = vmatprep.subr.bf16.mxu0 %v14645_v26  ;;  %v9410_v26 = vpack.c.bf16 %v9391_v53, %v9391_v53  ;;  %v14771_v53 = vld [vmem:[%s20347_s11 + $0x574] ss:$8 sps:$4 sm:$0xff]  }
 0x93d   : > { %11365 = vmatpush1.bf16.msra.mxu0 %v14643_v50  ;;  %v14706_v50 = vld [vmem:[%s20347_s11 + $0x420] ss:$8 sps:$4 sm:$0xff]  }
 0x93e   : > { %11366 = vmatprep.subr.bf16.mxu0 %v14648_v12  ;;  %v14711_v12 = vld [vmem:[%s20347_s11 + $0x434] ss:$8 sps:$4 sm:$0xff]  }
 0x941   : > { %11367 = vmatpush1.bf16.msra.mxu0 %v14646_v39  ;;  %v14709_v39 = vld [vmem:[%s20347_s11 + $0x430] ss:$8 sps:$4 sm:$0xff]  }
 0x942   : > { %11368 = vmatprep.subr.bf16.mxu0 %v14651_v57  ;;  %v14714_v57 = vld [vmem:[%s20347_s11 + $0x444] ss:$8 sps:$4 sm:$0xff]  }
 0x945   : > { %11369 = vmatpush1.bf16.msra.mxu0 %v14649_v5  ;;  %v14712_v5 = vld [vmem:[%s20347_s11 + $0x440] ss:$8 sps:$4 sm:$0xff]  }
 0x946   : > { %11379 = vmatprep.subr.bf16.mxu0 %v14654_v58  ;;  %v14715_v58 = vld [vmem:[%s20347_s11 + $0x450] ss:$8 sps:$4 sm:$0xff]  }
 0x948   : > { %11371 = vmatmul.mubr.bf16.vlgmr.msra.gmra.mrb[140].mxu0 %v9405_v19  ;;  %v14723_v19 = vld [vmem:[%s20347_s11 + $0x474] ss:$8 sps:$4 sm:$0xff]  }
 0x949   : > { %11380 = vmatpush1.bf16.msra.mxu0 %v14652_v41  ;;  %11411 = vmatprep.mubr.bf16.mxu0 %v9408_v25  ;;  %v14718_v41 = vld [vmem:[%s20347_s11 + $0x460] ss:$8 sps:$4 sm:$0xff]   ;;  %v14726_v25 = vld [vmem:[%s20347_s11 + $0x484] ss:$8 sps:$4 sm:$0xff]  }
 0x94a   : > { %11381 = vmatprep.subr.bf16.mxu0 %v14657_v13  ;;  %v14721_v13 = vld [vmem:[%s20347_s11 + $0x470] ss:$8 sps:$4 sm:$0xff]  }
 0x94d   : > { %11382 = vmatpush1.bf16.msra.mxu0 %v14655_v21  ;;  %v14724_v21 = vld [vmem:[%s20347_s11 + $0x480] ss:$8 sps:$4 sm:$0xff]  }
 0x94e   : > { %11383 = vmatprep.subr.bf16.mxu0 %v14660_v37  ;;  %v14729_v37 = vld [vmem:[%s20347_s11 + $0x494] ss:$8 sps:$4 sm:$0xff]  }
 0x951   : > { %11384 = vmatpush1.bf16.msra.mxu0 %v14658_v45  ;;  %v14727_v45 = vld [vmem:[%s20347_s11 + $0x490] ss:$8 sps:$4 sm:$0xff]  }
 0x952   : > { %11385 = vmatprep.subr.bf16.mxu0 %v14663_v10  ;;  %v14732_v10 = vld [vmem:[%s20347_s11 + $0x4a4] ss:$8 sps:$4 sm:$0xff]  }
 0x955   : > { %11386 = vmatpush1.bf16.msra.mxu0 %v14661_v47  ;;  %v14730_v47 = vld [vmem:[%s20347_s11 + $0x4a0] ss:$8 sps:$4 sm:$0xff]  }
 0x956   : > { %11387 = vmatprep.subr.bf16.mxu0 %v14666_v34  ;;  %v14735_v34 = vld [vmem:[%s20347_s11 + $0x4b4] ss:$8 sps:$4 sm:$0xff]  }
 0x959   : > { %11388 = vmatpush1.bf16.msra.mxu0 %v14664_v55  ;;  %v14733_v55 = vld [vmem:[%s20347_s11 + $0x4b0] ss:$8 sps:$4 sm:$0xff]  }
 0x95a   : > { %11389 = vmatprep.subr.bf16.mxu0 %v14669_v62  ;;  %v14738_v62 = vld [vmem:[%s20347_s11 + $0x4c4] ss:$8 sps:$4 sm:$0xff]  }
 0x95d   : > { %11390 = vmatpush1.bf16.msra.mxu0 %v14667_v61  ;;  %v14736_v61 = vld [vmem:[%s20347_s11 + $0x4c0] ss:$8 sps:$4 sm:$0xff]  }
 0x95e   : > { %11391 = vmatprep.subr.bf16.mxu0 %v14672_v3  ;;  %v14741_v3 = vld [vmem:[%s20347_s11 + $0x4d4] ss:$8 sps:$4 sm:$0xff]  }
 0x961   : > { %11392 = vmatpush1.bf16.msra.mxu0 %v14670_v27  ;;  %v14739_v27 = vld [vmem:[%s20347_s11 + $0x4d0] ss:$8 sps:$4 sm:$0xff]  }
 0x962   : > { %11393 = vmatprep.subr.bf16.mxu0 %v14675_v20  ;;  %v14744_v20 = vld [vmem:[%s20347_s11 + $0x4e4] ss:$8 sps:$4 sm:$0xff]  }
 0x965   : > { %11394 = vmatpush1.bf16.msra.mxu0 %v14673_v17  ;;  %v14742_v17 = vld [vmem:[%s20347_s11 + $0x4e0] ss:$8 sps:$4 sm:$0xff]  }
 0x966   : > { %11395 = vmatprep.subr.bf16.mxu0 %v14678_v52  ;;  %v14747_v52 = vld [vmem:[%s20347_s11 + $0x4f4] ss:$8 sps:$4 sm:$0xff]  }
 0x969   : > { %11396 = vmatpush1.bf16.msra.mxu0 %v14676_v1  ;;  %v14745_v1 = vld [vmem:[%s20347_s11 + $0x4f0] ss:$8 sps:$4 sm:$0xff]  }
 0x96a   : > { %11397 = vmatprep.subr.bf16.mxu0 %v14681_v6  ;;  %v9390_v6 = vmul.f32 %v19338_v15, %v18748_v2  ;;  %v14751_v2 = vld [vmem:[%s20347_s11 + $0x510] ss:$8 sps:$4 sm:$0xff]  }
 0x96d   : > { %11398 = vmatpush1.bf16.msra.mxu0 %v14679_v8  ;;  %v14750_v8 = vld [vmem:[%s20347_s11 + $0x504] ss:$8 sps:$4 sm:$0xff]  }
 0x96e   : > { %11399 = vmatprep.subr.bf16.mxu0 %v14684_v4  ;;  %v9393_v4 = vmul.f32 %v19338_v15, %v18786_v24  ;;  %v14756_v24 = vld [vmem:[%s20347_s11 + $0x524] ss:$8 sps:$4 sm:$0xff]  }
 0x971   : > { %11400 = vmatpush1.bf16.msra.mxu0 %v14682_v14  ;;  %v14748_v14 = vld [vmem:[%s20347_s11 + $0x500] ss:$8 sps:$4 sm:$0xff]  }
 0x972   : > { %11401 = vmatprep.subr.bf16.mxu0 %v14687_v36  ;;  %v9409_v36 = vpack.c.bf16 %v9390_v6, %v9390_v6  ;;  %v14819_v6 = vld [vmem:[%s20347_s11 + $0x674] ss:$8 sps:$4 sm:$0xff]  }
 0x975   : > { %11402 = vmatpush1.bf16.msra.mxu0 %v14685_v49  ;;  %v14753_v49 = vld [vmem:[%s20347_s11 + $0x514] ss:$8 sps:$4 sm:$0xff]  }
 0x976   : > { %11403 = vmatprep.subr.bf16.mxu0 %v14690_v46  ;;  %v9412_v46 = vpack.c.bf16 %v9393_v4, %v9393_v4  ;;  %v14822_v4 = vld [vmem:[%s20347_s11 + $0x684] ss:$8 sps:$4 sm:$0xff]  }
 0x979   : > { %11404 = vmatpush1.bf16.msra.mxu0 %v14688_v43  ;;  %v14754_v43 = vld [vmem:[%s20347_s11 + $0x520] ss:$8 sps:$4 sm:$0xff]  }
 0x97a   : > { %11405 = vmatprep.subr.bf16.mxu0 %v14693_v42  ;;  %v14759_v42 = vld [vmem:[%s20347_s11 + $0x534] ss:$8 sps:$4 sm:$0xff]  }
 0x97d   : > { %11406 = vmatpush1.bf16.msra.mxu0 %v14691_v60  ;;  %v14757_v60 = vld [vmem:[%s20347_s11 + $0x530] ss:$8 sps:$4 sm:$0xff]  }
 0x97e   : > { %11407 = vmatprep.subr.bf16.mxu0 %v14696_v30  ;;  %v14762_v30 = vld [vmem:[%s20347_s11 + $0x544] ss:$8 sps:$4 sm:$0xff]  }
 0x981   : > { %11408 = vmatpush1.bf16.msra.mxu0 %v14694_v31  ;;  %v14760_v31 = vld [vmem:[%s20347_s11 + $0x540] ss:$8 sps:$4 sm:$0xff]  }
 0x982   : > { %11409 = vmatprep.subr.bf16.mxu0 %v14699_v63  ;;  %v14765_v63 = vld [vmem:[%s20347_s11 + $0x554] ss:$8 sps:$4 sm:$0xff]  }
 0x985   : > { %11410 = vmatpush1.bf16.msra.mxu0 %v14697_v9  ;;  %v14763_v9 = vld [vmem:[%s20347_s11 + $0x550] ss:$8 sps:$4 sm:$0xff]  }
 0x986   : > { %11420 = vmatprep.subr.bf16.mxu0 %v14702_v22  ;;  %v14766_v22 = vld [vmem:[%s20347_s11 + $0x560] ss:$8 sps:$4 sm:$0xff]  }
 0x988   : > { %11412 = vmatmul.mubr.bf16.vlgmr.msra.gmra.mrb[140].mxu0 %v9407_v28  ;;  %v14774_v28 = vld [vmem:[%s20347_s11 + $0x584] ss:$8 sps:$4 sm:$0xff]  }
 0x989   : > { %11421 = vmatpush1.bf16.msra.mxu0 %v14700_v29  ;;  %11452 = vmatprep.mubr.bf16.mxu0 %v9410_v26  ;;  %v14769_v29 = vld [vmem:[%s20347_s11 + $0x570] ss:$8 sps:$4 sm:$0xff]   ;;  %v14777_v26 = vld [vmem:[%s20347_s11 + $0x594] ss:$8 sps:$4 sm:$0xff]  }
 0x98a   : > { %11422 = vmatprep.subr.bf16.mxu0 %v14705_v40  ;;  %v14772_v40 = vld [vmem:[%s20347_s11 + $0x580] ss:$8 sps:$4 sm:$0xff]  }
 0x98d   : > { %11423 = vmatpush1.bf16.msra.mxu0 %v14703_v35  ;;  %v14775_v35 = vld [vmem:[%s20347_s11 + $0x590] ss:$8 sps:$4 sm:$0xff]  }
 0x98e   : > { %11424 = vmatprep.subr.bf16.mxu0 %v14708_v59  ;;  %v14780_v59 = vld [vmem:[%s20347_s11 + $0x5a4] ss:$8 sps:$4 sm:$0xff]  }
 0x991   : > { %11425 = vmatpush1.bf16.msra.mxu0 %v14706_v50  ;;  %v14778_v50 = vld [vmem:[%s20347_s11 + $0x5a0] ss:$8 sps:$4 sm:$0xff]  }
 0x992   : > { %11426 = vmatprep.subr.bf16.mxu0 %v14711_v12  ;;  %v14783_v12 = vld [vmem:[%s20347_s11 + $0x5b4] ss:$8 sps:$4 sm:$0xff]  }
 0x995   : > { %11427 = vmatpush1.bf16.msra.mxu0 %v14709_v39  ;;  %v14781_v39 = vld [vmem:[%s20347_s11 + $0x5b0] ss:$8 sps:$4 sm:$0xff]  }
 0x996   : > { %11428 = vmatprep.subr.bf16.mxu0 %v14714_v57  ;;  %v14786_v57 = vld [vmem:[%s20347_s11 + $0x5c4] ss:$8 sps:$4 sm:$0xff]  }
 0x999   : > { %11429 = vmatpush1.bf16.msra.mxu0 %v14712_v5  ;;  %v14784_v5 = vld [vmem:[%s20347_s11 + $0x5c0] ss:$8 sps:$4 sm:$0xff]  }
 0x99a   : > { %11430 = vmatprep.subr.bf16.mxu0 %v14717_v51  ;;  %v14789_v51 = vld [vmem:[%s20347_s11 + $0x5d4] ss:$8 sps:$4 sm:$0xff]  }
 0x99d   : > { %11431 = vmatpush1.bf16.msra.mxu0 %v14715_v58  ;;  %v14787_v58 = vld [vmem:[%s20347_s11 + $0x5d0] ss:$8 sps:$4 sm:$0xff]  }
 0x99e   : > { %11432 = vmatprep.subr.bf16.mxu0 %v14720_v38  ;;  %v14792_v38 = vld [vmem:[%s20347_s11 + $0x5e4] ss:$8 sps:$4 sm:$0xff]  }
 0x9a1   : > { %11433 = vmatpush1.bf16.msra.mxu0 %v14718_v41  ;;  %v14790_v41 = vld [vmem:[%s20347_s11 + $0x5e0] ss:$8 sps:$4 sm:$0xff]  }
 0x9a2   : > { %11434 = vmatprep.subr.bf16.mxu0 %v14723_v19  ;;  %v14795_v19 = vld [vmem:[%s20347_s11 + $0x5f4] ss:$8 sps:$4 sm:$0xff]  }
 0x9a5   : > { %11435 = vmatpush1.bf16.msra.mxu0 %v14721_v13  ;;  %v14793_v13 = vld [vmem:[%s20347_s11 + $0x5f0] ss:$8 sps:$4 sm:$0xff]  }
 0x9a6   : > { %11436 = vmatprep.subr.bf16.mxu0 %v14726_v25  ;;  %v9392_v25 = vmul.f32 %v19338_v15, %v18828_v18  ;;  %v14799_v18 = vld [vmem:[%s20347_s11 + $0x610] ss:$8 sps:$4 sm:$0xff]  }
 0x9a9   : > { %11437 = vmatpush1.bf16.msra.mxu0 %v14724_v21  ;;  %v14798_v21 = vld [vmem:[%s20347_s11 + $0x604] ss:$8 sps:$4 sm:$0xff]  }
 0x9aa   : > { %11438 = vmatprep.subr.bf16.mxu0 %v14729_v37  ;;  %v9395_v37 = vmul.f32 %v19338_v15, %v18761_v54  ;;  %v14804_v54 = vld [vmem:[%s20347_s11 + $0x624] ss:$8 sps:$4 sm:$0xff]  }
 0x9ad   : > { %11439 = vmatpush1.bf16.msra.mxu0 %v14727_v45  ;;  %v14796_v45 = vld [vmem:[%s20347_s11 + $0x600] ss:$8 sps:$4 sm:$0xff]  }
 0x9ae   : > { %11440 = vmatprep.subr.bf16.mxu0 %v14732_v10  ;;  %v9411_v10 = vpack.c.bf16 %v9392_v25, %v9392_v25  ;;  %v14870_v25 = vld [vmem:[%s20347_s11 + $0x784] ss:$8 sps:$4 sm:$0xff]  }
 0x9b1   : > { %11441 = vmatpush1.bf16.msra.mxu0 %v14730_v47  ;;  %v14801_v47 = vld [vmem:[%s20347_s11 + $0x614] ss:$8 sps:$4 sm:$0xff]  }
 0x9b2   : > { %11442 = vmatprep.subr.bf16.mxu0 %v14735_v34  ;;  %v9414_v34 = vpack.c.bf16 %v9395_v37, %v9395_v37  ;;  %v14873_v37 = vld [vmem:[%s20347_s11 + $0x794] ss:$8 sps:$4 sm:$0xff]  }
 0x9b5   : > { %11443 = vmatpush1.bf16.msra.mxu0 %v14733_v55  ;;  %v14802_v55 = vld [vmem:[%s20347_s11 + $0x620] ss:$8 sps:$4 sm:$0xff]  }
 0x9b6   : > { %11444 = vmatprep.subr.bf16.mxu0 %v14738_v62  ;;  %v14807_v62 = vld [vmem:[%s20347_s11 + $0x634] ss:$8 sps:$4 sm:$0xff]  }
 0x9b9   : > { %11445 = vmatpush1.bf16.msra.mxu0 %v14736_v61  ;;  %v14805_v61 = vld [vmem:[%s20347_s11 + $0x630] ss:$8 sps:$4 sm:$0xff]  }
 0x9ba   : > { %11446 = vmatprep.subr.bf16.mxu0 %v14741_v3  ;;  %v14810_v3 = vld [vmem:[%s20347_s11 + $0x644] ss:$8 sps:$4 sm:$0xff]  }
 0x9bd   : > { %11447 = vmatpush1.bf16.msra.mxu0 %v14739_v27  ;;  %v14808_v27 = vld [vmem:[%s20347_s11 + $0x640] ss:$8 sps:$4 sm:$0xff]  }
 0x9be   : > { %11448 = vmatprep.subr.bf16.mxu0 %v14744_v20  ;;  %v14813_v20 = vld [vmem:[%s20347_s11 + $0x654] ss:$8 sps:$4 sm:$0xff]  }
 0x9c1   : > { %11449 = vmatpush1.bf16.msra.mxu0 %v14742_v17  ;;  %v14811_v17 = vld [vmem:[%s20347_s11 + $0x650] ss:$8 sps:$4 sm:$0xff]  }
 0x9c2   : > { %11450 = vmatprep.subr.bf16.mxu0 %v14747_v52  ;;  %v14816_v52 = vld [vmem:[%s20347_s11 + $0x664] ss:$8 sps:$4 sm:$0xff]  }
 0x9c5   : > { %11451 = vmatpush1.bf16.msra.mxu0 %v14745_v1  ;;  %v14814_v1 = vld [vmem:[%s20347_s11 + $0x660] ss:$8 sps:$4 sm:$0xff]  }
 0x9c6   : > { %11461 = vmatprep.subr.bf16.mxu0 %v14750_v8  ;;  %v14817_v8 = vld [vmem:[%s20347_s11 + $0x670] ss:$8 sps:$4 sm:$0xff]  }
 0x9c8   : > { %11453 = vmatmul.mubr.bf16.vlgmr.msra.gmra.mrb[140].mxu0 %v9409_v36  ;;  %v14825_v36 = vld [vmem:[%s20347_s11 + $0x694] ss:$8 sps:$4 sm:$0xff]  }
 0x9c9   : > { %11462 = vmatpush1.bf16.msra.mxu0 %v14748_v14  ;;  %11493 = vmatprep.mubr.bf16.mxu0 %v9412_v46  ;;  %v14820_v14 = vld [vmem:[%s20347_s11 + $0x680] ss:$8 sps:$4 sm:$0xff]   ;;  %v14828_v46 = vld [vmem:[%s20347_s11 + $0x6a4] ss:$8 sps:$4 sm:$0xff]  }
 0x9ca   : > { %11463 = vmatprep.subr.bf16.mxu0 %v14753_v49  ;;  %v14823_v49 = vld [vmem:[%s20347_s11 + $0x690] ss:$8 sps:$4 sm:$0xff]  }
 0x9cd   : > { %11464 = vmatpush1.bf16.msra.mxu0 %v14751_v2  ;;  %v14826_v2 = vld [vmem:[%s20347_s11 + $0x6a0] ss:$8 sps:$4 sm:$0xff]  }
 0x9ce   : > { %11465 = vmatprep.subr.bf16.mxu0 %v14756_v24  ;;  %v14831_v24 = vld [vmem:[%s20347_s11 + $0x6b4] ss:$8 sps:$4 sm:$0xff]  }
 0x9d1   : > { %11466 = vmatpush1.bf16.msra.mxu0 %v14754_v43  ;;  %v14829_v43 = vld [vmem:[%s20347_s11 + $0x6b0] ss:$8 sps:$4 sm:$0xff]  }
 0x9d2   : > { %11467 = vmatprep.subr.bf16.mxu0 %v14759_v42  ;;  %v14834_v42 = vld [vmem:[%s20347_s11 + $0x6c4] ss:$8 sps:$4 sm:$0xff]  }
 0x9d5   : > { %11468 = vmatpush1.bf16.msra.mxu0 %v14757_v60  ;;  %v14832_v60 = vld [vmem:[%s20347_s11 + $0x6c0] ss:$8 sps:$4 sm:$0xff]  }
 0x9d6   : > { %11469 = vmatprep.subr.bf16.mxu0 %v14762_v30  ;;  %v14837_v30 = vld [vmem:[%s20347_s11 + $0x6d4] ss:$8 sps:$4 sm:$0xff]  }
 0x9d9   : > { %11470 = vmatpush1.bf16.msra.mxu0 %v14760_v31  ;;  %v14835_v31 = vld [vmem:[%s20347_s11 + $0x6d0] ss:$8 sps:$4 sm:$0xff]  }
 0x9da   : > { %11471 = vmatprep.subr.bf16.mxu0 %v14765_v63  ;;  %v14840_v63 = vld [vmem:[%s20347_s11 + $0x6e4] ss:$8 sps:$4 sm:$0xff]  }
 0x9dd   : > { %11472 = vmatpush1.bf16.msra.mxu0 %v14763_v9  ;;  %v14838_v9 = vld [vmem:[%s20347_s11 + $0x6e0] ss:$8 sps:$4 sm:$0xff]  }
 0x9de   : > { %11473 = vmatprep.subr.bf16.mxu0 %v14768_v0  ;;  %v14843_v0 = vld [vmem:[%s20347_s11 + $0x6f4] ss:$8 sps:$4 sm:$0xff]  }
 0x9e1   : > { %11474 = vmatpush1.bf16.msra.mxu0 %v14766_v22  ;;  %v14841_v22 = vld [vmem:[%s20347_s11 + $0x6f0] ss:$8 sps:$4 sm:$0xff]  }
 0x9e2   : > { %11475 = vmatprep.subr.bf16.mxu0 %v14771_v53  ;;  %v9394_v53 = vmul.f32 %v19338_v15, %v18783_v44  ;;  %v14847_v44 = vld [vmem:[%s20347_s11 + $0x710] ss:$8 sps:$4 sm:$0xff]  }
 0x9e5   : > { %11476 = vmatpush1.bf16.msra.mxu0 %v14769_v29  ;;  %v14846_v29 = vld [vmem:[%s20347_s11 + $0x704] ss:$8 sps:$4 sm:$0xff]  }
 0x9e6   : > { %11477 = vmatprep.subr.bf16.mxu0 %v14774_v28  ;;  %v9397_v28 = vmul.f32 %v19338_v15, %v18854_v56  ;;  %v14852_v56 = vld [vmem:[%s20347_s11 + $0x724] ss:$8 sps:$4 sm:$0xff]  }
 0x9e9   : > { %11478 = vmatpush1.bf16.msra.mxu0 %v14772_v40  ;;  %v14844_v40 = vld [vmem:[%s20347_s11 + $0x700] ss:$8 sps:$4 sm:$0xff]  }
 0x9ea   : > { %11479 = vmatprep.subr.bf16.mxu0 %v14777_v26  ;;  %v9413_v26 = vpack.c.bf16 %v9394_v53, %v9394_v53 }
 0x9ed   : > { %11480 = vmatpush1.bf16.msra.mxu0 %v14775_v35  ;;  %v14849_v35 = vld [vmem:[%s20347_s11 + $0x714] ss:$8 sps:$4 sm:$0xff]  }
 0x9ee   : > { %11481 = vmatprep.subr.bf16.mxu0 %v14780_v59  ;;  %v9416_v59 = vpack.c.bf16 %v9397_v28, %v9397_v28  ;;  %v11682_v28 = vld [vmem:[%s20349_s13 + $0x48] sm:$0xff] }
 0x9f1   : > { %11482 = vmatpush1.bf16.msra.mxu0 %v14778_v50  ;;  %v14850_v50 = vld [vmem:[%s20347_s11 + $0x720] ss:$8 sps:$4 sm:$0xff]  }
 0x9f2   : > { %11483 = vmatprep.subr.bf16.mxu0 %v14783_v12  ;;  %v14855_v12 = vld [vmem:[%s20347_s11 + $0x734] ss:$8 sps:$4 sm:$0xff]  }
 0x9f5   : > { %11484 = vmatpush1.bf16.msra.mxu0 %v14781_v39  ;;  %v14853_v39 = vld [vmem:[%s20347_s11 + $0x730] ss:$8 sps:$4 sm:$0xff]  }
 0x9f6   : > { %11485 = vmatprep.subr.bf16.mxu0 %v14786_v57  ;;  %v14858_v57 = vld [vmem:[%s20347_s11 + $0x744] ss:$8 sps:$4 sm:$0xff]  }
 0x9f9   : > { %11486 = vmatpush1.bf16.msra.mxu0 %v14784_v5  ;;  %v14856_v5 = vld [vmem:[%s20347_s11 + $0x740] ss:$8 sps:$4 sm:$0xff]  }
 0x9fa   : > { %11487 = vmatprep.subr.bf16.mxu0 %v14789_v51  ;;  %v14861_v51 = vld [vmem:[%s20347_s11 + $0x754] ss:$8 sps:$4 sm:$0xff]  }
 0x9fd   : > { %11488 = vmatpush1.bf16.msra.mxu0 %v14787_v58  ;;  %v14859_v58 = vld [vmem:[%s20347_s11 + $0x750] ss:$8 sps:$4 sm:$0xff]  }
 0x9fe   : > { %11489 = vmatprep.subr.bf16.mxu0 %v14792_v38  ;;  %v14864_v38 = vld [vmem:[%s20347_s11 + $0x764] ss:$8 sps:$4 sm:$0xff]  }
 0xa01   : > { %11490 = vmatpush1.bf16.msra.mxu0 %v14790_v41  ;;  %v14862_v41 = vld [vmem:[%s20347_s11 + $0x760] ss:$8 sps:$4 sm:$0xff]  }
 0xa02   : > { %11491 = vmatprep.subr.bf16.mxu0 %v14795_v19  ;;  %v14867_v19 = vld [vmem:[%s20347_s11 + $0x774] ss:$8 sps:$4 sm:$0xff]  }
 0xa05   : > { %11492 = vmatpush1.bf16.msra.mxu0 %v14793_v13  ;;  %v14865_v13 = vld [vmem:[%s20347_s11 + $0x770] ss:$8 sps:$4 sm:$0xff]  }
 0xa06   : > { %11502 = vmatprep.subr.bf16.mxu0 %v14798_v21  ;;  %v14868_v21 = vld [vmem:[%s20347_s11 + $0x780] ss:$8 sps:$4 sm:$0xff]  }
 0xa08   : > { %11494 = vmatmul.mubr.bf16.vlgmr.msra.gmra.mrb[140].mxu0 %v9411_v10  ;;  %v14876_v10 = vld [vmem:[%s20347_s11 + $0x7a4] ss:$8 sps:$4 sm:$0xff]  }
 0xa09   : > { %11503 = vmatpush1.bf16.msra.mxu0 %v14796_v45  ;;  %11534 = vmatprep.mubr.bf16.mxu0 %v9414_v34  ;;  %v14871_v45 = vld [vmem:[%s20347_s11 + $0x790] ss:$8 sps:$4 sm:$0xff]   ;;  %v11690_v34 = vld [vmem:[%s20349_s13 + $0x88] sm:$0xff] }
 0xa0a   : > { %11504 = vmatprep.subr.bf16.mxu0 %v14801_v47  ;;  %v11689_v47 = vld [vmem:[%s20349_s13 + $0x80] sm:$0xff] }
 0xa0d   : > { %11505 = vmatpush1.bf16.msra.mxu0 %v14799_v18  ;;  %v11673_v18 = vld [vmem:[%s20349_s13] sm:$0xff] }
 0xa0e   : > { %11506 = vmatprep.subr.bf16.mxu0 %v14804_v54  ;;  %v13769_v54 = vpack.c.bf16 %v11690_v34, %v11689_v47  ;;  %v14901_v47 = vld [vmem:[%s20347_s11 + $0x830] ss:$8 sps:$4 sm:$0xff]   ;;  %v14906_v34 = vld [vmem:[%s20347_s11 + $0x844] ss:$8 sps:$4 sm:$0xff]  }
 0xa10   : > { %13770 = vmatprep.subr.bf16.mxu1 %v13769_v54  ;;  %v14909_v54 = vld [vmem:[%s20347_s11 + $0x854] ss:$8 sps:$4 sm:$0xff]  }
 0xa11   : > { %11507 = vmatpush1.bf16.msra.mxu0 %v14802_v55  ;;  %v11674_v55 = vld [vmem:[%s20349_s13 + $0x8] sm:$0xff] }
 0xa12   : > { %11508 = vmatprep.subr.bf16.mxu0 %v14807_v62  ;;  %v11691_v62 = vld [vmem:[%s20349_s13 + $0x90] sm:$0xff] }
 0xa15   : > { %11509 = vmatpush1.bf16.msra.mxu0 %v14805_v61  ;;  %v11692_v61 = vld [vmem:[%s20349_s13 + $0x98] sm:$0xff] }
 0xa16   : > { %11510 = vmatprep.subr.bf16.mxu0 %v14810_v3  ;;  %v13771_v3 = vpack.c.bf16 %v11674_v55, %v11673_v18  ;;  %v14904_v18 = vld [vmem:[%s20347_s11 + $0x840] ss:$8 sps:$4 sm:$0xff]   ;;  %v14907_v55 = vld [vmem:[%s20347_s11 + $0x850] ss:$8 sps:$4 sm:$0xff]  }
 0xa18   : > { %13772 = vmatpush3.bf16.msra.mxu1 %v13771_v3  ;;  %v14915_v3 = vld [vmem:[%s20347_s11 + $0x874] ss:$8 sps:$4 sm:$0xff]  }
 0xa19   : > { %11511 = vmatpush1.bf16.msra.mxu0 %v14808_v27  ;;  %v13773_v27 = vpack.c.bf16 %v11692_v61, %v11691_v62  ;;  %v14912_v62 = vld [vmem:[%s20347_s11 + $0x864] ss:$8 sps:$4 sm:$0xff]   ;;  %v14910_v61 = vld [vmem:[%s20347_s11 + $0x860] ss:$8 sps:$4 sm:$0xff]  }
 0xa1a   : > { %11512 = vmatprep.subr.bf16.mxu0 %v14813_v20  ;;  %v11675_v20 = vld [vmem:[%s20349_s13 + $0x10] sm:$0xff] }
 0xa1b   : > { %13774 = vmatprep.subr.bf16.mxu1 %v13773_v27  ;;  %v14913_v27 = vld [vmem:[%s20347_s11 + $0x870] ss:$8 sps:$4 sm:$0xff]  }
 0xa1d   : > { %11513 = vmatpush1.bf16.msra.mxu0 %v14811_v17  ;;  %v11676_v17 = vld [vmem:[%s20349_s13 + $0x18] sm:$0xff] }
 0xa1e   : > { %11514 = vmatprep.subr.bf16.mxu0 %v14816_v52  ;;  %v11693_v52 = vld [vmem:[%s20349_s13 + $0xa0] sm:$0xff] }
 0xa21   : > { %11515 = vmatpush1.bf16.msra.mxu0 %v14814_v1  ;;  %v11694_v1 = vld [vmem:[%s20349_s13 + $0xa8] sm:$0xff] }
 0xa22   : > { %11516 = vmatprep.subr.bf16.mxu0 %v14819_v6  ;;  %v13775_v6 = vpack.c.bf16 %v11676_v17, %v11675_v20  ;;  %v14918_v20 = vld [vmem:[%s20347_s11 + $0x884] ss:$8 sps:$4 sm:$0xff]   ;;  %v14916_v17 = vld [vmem:[%s20347_s11 + $0x880] ss:$8 sps:$4 sm:$0xff]  }
 0xa24   : > { %13776 = vmatpush3.bf16.msra.mxu1 %v13775_v6  ;;  %v14924_v6 = vld [vmem:[%s20347_s11 + $0x8a4] ss:$8 sps:$4 sm:$0xff]  }
 0xa25   : > { %11517 = vmatpush1.bf16.msra.mxu0 %v14817_v8  ;;  %v14874_v8 = vld [vmem:[%s20347_s11 + $0x7a0] ss:$8 sps:$4 sm:$0xff]  }
 0xa26   : > { %11518 = vmatprep.subr.bf16.mxu0 %v14822_v4  ;;  %v13777_v4 = vpack.c.bf16 %v11694_v1, %v11693_v52  ;;  %v14921_v52 = vld [vmem:[%s20347_s11 + $0x894] ss:$8 sps:$4 sm:$0xff]   ;;  %v14919_v1 = vld [vmem:[%s20347_s11 + $0x890] ss:$8 sps:$4 sm:$0xff]  }
 0xa28   : > { %13778 = vmatprep.subr.bf16.mxu1 %v13777_v4  ;;  %v14927_v4 = vld [vmem:[%s20347_s11 + $0x8b4] ss:$8 sps:$4 sm:$0xff]  }
 0xa29   : > { %11519 = vmatpush1.bf16.msra.mxu0 %v14820_v14  ;;  %v11677_v14 = vld [vmem:[%s20349_s13 + $0x20] sm:$0xff] }
 0xa2a   : > { %11520 = vmatprep.subr.bf16.mxu0 %v14825_v36  ;;  %v11678_v36 = vld [vmem:[%s20349_s13 + $0x28] sm:$0xff] }
 0xa2d   : > { %11521 = vmatpush1.bf16.msra.mxu0 %v14823_v49  ;;  %v14879_v49 = vld [vmem:[%s20347_s11 + $0x7b4] ss:$8 sps:$4 sm:$0xff]  }
 0xa2e   : > { %11522 = vmatprep.subr.bf16.mxu0 %v14828_v46  ;;  %v11695_v46 = vld [vmem:[%s20349_s13 + $0xb0] sm:$0xff] }
 0xa31   : > { %11523 = vmatpush1.bf16.msra.mxu0 %v14826_v2  ;;  %v11696_v2 = vld [vmem:[%s20349_s13 + $0xb8] sm:$0xff] }
 0xa32   : > { %11524 = vmatprep.subr.bf16.mxu0 %v14831_v24  ;;  %v13779_v24 = vpack.c.bf16 %v11678_v36, %v11677_v14  ;;  %v14925_v14 = vld [vmem:[%s20347_s11 + $0x8b0] ss:$8 sps:$4 sm:$0xff]   ;;  %v14930_v36 = vld [vmem:[%s20347_s11 + $0x8c4] ss:$8 sps:$4 sm:$0xff]  }
 0xa34   : > { %13780 = vmatpush3.bf16.msra.mxu1 %v13779_v24  ;;  %v14936_v24 = vld [vmem:[%s20347_s11 + $0x8e4] ss:$8 sps:$4 sm:$0xff]  }
 0xa35   : > { %11525 = vmatpush1.bf16.msra.mxu0 %v14829_v43  ;;  %v14877_v43 = vld [vmem:[%s20347_s11 + $0x7b0] ss:$8 sps:$4 sm:$0xff]  }
 0xa36   : > { %11526 = vmatprep.subr.bf16.mxu0 %v14834_v42  ;;  %v13781_v42 = vpack.c.bf16 %v11696_v2, %v11695_v46  ;;  %v14933_v46 = vld [vmem:[%s20347_s11 + $0x8d4] ss:$8 sps:$4 sm:$0xff]   ;;  %v14931_v2 = vld [vmem:[%s20347_s11 + $0x8d0] ss:$8 sps:$4 sm:$0xff]  }
 0xa38   : > { %13782 = vmatprep.subr.bf16.mxu1 %v13781_v42  ;;  %v14939_v42 = vld [vmem:[%s20347_s11 + $0x8f4] ss:$8 sps:$4 sm:$0xff]  }
 0xa39   : > { %11527 = vmatpush1.bf16.msra.mxu0 %v14832_v60  ;;  %v11679_v60 = vld [vmem:[%s20349_s13 + $0x30] sm:$0xff] }
 0xa3a   : > { %11528 = vmatprep.subr.bf16.mxu0 %v14837_v30  ;;  %v11680_v30 = vld [vmem:[%s20349_s13 + $0x38] sm:$0xff] }
 0xa3d   : > { %11529 = vmatpush1.bf16.msra.mxu0 %v14835_v31  ;;  %v14882_v31 = vld [vmem:[%s20347_s11 + $0x7c4] ss:$8 sps:$4 sm:$0xff]  }
 0xa3e   : > { %11530 = vmatprep.subr.bf16.mxu0 %v14840_v63  ;;  %v11697_v63 = vld [vmem:[%s20349_s13 + $0xc0] sm:$0xff] }
 0xa41   : > { %11531 = vmatpush1.bf16.msra.mxu0 %v14838_v9  ;;  %v11698_v9 = vld [vmem:[%s20349_s13 + $0xc8] sm:$0xff] }
 0xa42   : > { %11532 = vmatprep.subr.bf16.mxu0 %v14843_v0  ;;  %v13783_v0 = vpack.c.bf16 %v11680_v30, %v11679_v60  ;;  %v13785_v53 = vpack.c.bf16 %v11698_v9, %v11697_v63  ;;  %v14937_v60 = vld [vmem:[%s20347_s11 + $0x8f0] ss:$8 sps:$4 sm:$0xff]   ;;  %v9398_v30 = vmul.f32 %v19338_v15, %v18837_v33  ;;  %v14940_v63 = vld [vmem:[%s20347_s11 + $0x900] ss:$8 sps:$4 sm:$0xff]  }
 0xa43   : > { %v14943_v33 = vld [vmem:[%s20347_s11 + $0x910] ss:$8 sps:$4 sm:$0xff]  }
 0xa44   : > { %13784 = vmatpush3.bf16.msra.mxu1 %v13783_v0  ;;  %v9417_v9 = vpack.c.bf16 %v9398_v30, %v9398_v30  ;;  %v14945_v0 = vld [vmem:[%s20347_s11 + $0x914] ss:$8 sps:$4 sm:$0xff]  }
 0xa45   : > { %11533 = vmatpush1.bf16.msra.mxu0 %v14841_v22  ;;  %v14880_v22 = vld [vmem:[%s20347_s11 + $0x7c0] ss:$8 sps:$4 sm:$0xff]   ;;  %13786 = vmatprep.subr.bf16.mxu1 %v13785_v53  ;;  %v14948_v53 = vld [vmem:[%s20347_s11 + $0x924] ss:$8 sps:$4 sm:$0xff]  }
 0xa46   : > { %11543 = vmatprep.subr.bf16.mxu0 %v14846_v29  ;;  %v11681_v29 = vld [vmem:[%s20349_s13 + $0x40] sm:$0xff] }
 0xa48   : > { %11535 = vmatmul.mubr.bf16.vlgmr.msra.gmra.mrb[140].mxu0 %v9413_v26  ;;  %v11699_v26 = vld [vmem:[%s20349_s13 + $0xd0] sm:$0xff] }
 0xa49   : > { %11544 = vmatpush1.bf16.msra.mxu0 %v14844_v40  ;;  %11575 = vmatprep.mubr.bf16.mxu0 %v9416_v59  ;;  %v14885_v40 = vld [vmem:[%s20347_s11 + $0x7d4] ss:$8 sps:$4 sm:$0xff]   ;;  %v13787_v59 = vpack.c.bf16 %v11682_v28, %v11681_v29  ;;  %v14946_v29 = vld [vmem:[%s20347_s11 + $0x920] ss:$8 sps:$4 sm:$0xff]  }
 0xa4a   : > { %11545 = vmatprep.subr.bf16.mxu0 %v14849_v35  ;;  %v11700_v35 = vld [vmem:[%s20349_s13 + $0xd8] sm:$0xff] }
 0xa4b   : > { %13788 = vmatpush3.bf16.msra.mxu1 %v13787_v59  ;;  %v14951_v28 = vld [vmem:[%s20347_s11 + $0x934] ss:$8 sps:$4 sm:$0xff]  }
 0xa4c   : > { %v14957_v59 = vld [vmem:[%s20347_s11 + $0x954] ss:$8 sps:$4 sm:$0xff]  }
 0xa4d   : > { %11546 = vmatpush1.bf16.msra.mxu0 %v14847_v44  ;;  %v14883_v44 = vld [vmem:[%s20347_s11 + $0x7d0] ss:$8 sps:$4 sm:$0xff]  }
 0xa4e   : > { %11547 = vmatprep.subr.bf16.mxu0 %v14852_v56  ;;  %v13789_v56 = vpack.c.bf16 %v11700_v35, %v11699_v26  ;;  %v14954_v26 = vld [vmem:[%s20347_s11 + $0x944] ss:$8 sps:$4 sm:$0xff]   ;;  %v14952_v35 = vld [vmem:[%s20347_s11 + $0x940] ss:$8 sps:$4 sm:$0xff]  }
 0xa50   : > { %13790 = vmatprep.subr.bf16.mxu1 %v13789_v56  ;;  %v14960_v56 = vld [vmem:[%s20347_s11 + $0x964] ss:$8 sps:$4 sm:$0xff]  }
 0xa51   : > { %11548 = vmatpush1.bf16.msra.mxu0 %v14850_v50  ;;  %v11683_v50 = vld [vmem:[%s20349_s13 + $0x50] sm:$0xff] }
 0xa52   : > { %11549 = vmatprep.subr.bf16.mxu0 %v14855_v12  ;;  %v11684_v12 = vld [vmem:[%s20349_s13 + $0x58] sm:$0xff] }
 0xa55   : > { %11550 = vmatpush1.bf16.msra.mxu0 %v14853_v39  ;;  %v14888_v39 = vld [vmem:[%s20347_s11 + $0x7e4] ss:$8 sps:$4 sm:$0xff]  }
 0xa56   : > { %11551 = vmatprep.subr.bf16.mxu0 %v14858_v57  ;;  %v13791_v57 = vpack.c.bf16 %v11684_v12, %v11683_v50  ;;  %v14958_v50 = vld [vmem:[%s20347_s11 + $0x960] ss:$8 sps:$4 sm:$0xff]   ;;  %v14963_v12 = vld [vmem:[%s20347_s11 + $0x974] ss:$8 sps:$4 sm:$0xff]  }
 0xa58   : > { %13792 = vmatpush3.bf16.msra.mxu1 %v13791_v57  ;;  %v9400_v57 = vmul.f32 %v19338_v15, %v18882_v16  ;;  %v11686_v16 = vld [vmem:[%s20349_s13 + $0x68] sm:$0xff] }
 0xa59   : > { %11552 = vmatpush1.bf16.msra.mxu0 %v14856_v5  ;;  %v14886_v5 = vld [vmem:[%s20347_s11 + $0x7e0] ss:$8 sps:$4 sm:$0xff]  }
 0xa5a   : > { %11553 = vmatprep.subr.bf16.mxu0 %v14861_v51  ;;  %v14891_v51 = vld [vmem:[%s20347_s11 + $0x7f4] ss:$8 sps:$4 sm:$0xff]  }
 0xa5d   : > { %11554 = vmatpush1.bf16.msra.mxu0 %v14859_v58  ;;  %v14889_v58 = vld [vmem:[%s20347_s11 + $0x7f0] ss:$8 sps:$4 sm:$0xff]  }
 0xa5e   : > { %11555 = vmatprep.subr.bf16.mxu0 %v14864_v38  ;;  %v9396_v38 = vmul.f32 %v19338_v15, %v18869_v7  ;;  %v14895_v7 = vld [vmem:[%s20347_s11 + $0x810] ss:$8 sps:$4 sm:$0xff]  }
 0xa61   : > { %11556 = vmatpush1.bf16.msra.mxu0 %v14862_v41  ;;  %v14894_v41 = vld [vmem:[%s20347_s11 + $0x804] ss:$8 sps:$4 sm:$0xff]  }
 0xa62   : > { %11557 = vmatprep.subr.bf16.mxu0 %v14867_v19  ;;  %v9399_v19 = vmul.f32 %v19338_v15, %v18805_v11  ;;  %v14900_v11 = vld [vmem:[%s20347_s11 + $0x824] ss:$8 sps:$4 sm:$0xff]   ;;  %v11703_v15 = vld [vmem:[%s20349_s13 + $0xf0] sm:$0xff] }
 0xa65   : > { %11558 = vmatpush1.bf16.msra.mxu0 %v14865_v13  ;;  %v14892_v13 = vld [vmem:[%s20347_s11 + $0x800] ss:$8 sps:$4 sm:$0xff]  }
 0xa66   : > { %11559 = vmatprep.subr.bf16.mxu0 %v14870_v25  ;;  %v9415_v25 = vpack.c.bf16 %v9396_v38, %v9396_v38 }
 0xa69   : > { %11560 = vmatpush1.bf16.msra.mxu0 %v14868_v21  ;;  %v14897_v21 = vld [vmem:[%s20347_s11 + $0x814] ss:$8 sps:$4 sm:$0xff]  }
 0xa6a   : > { %11561 = vmatprep.subr.bf16.mxu0 %v14873_v37  ;;  %v9418_v37 = vpack.c.bf16 %v9399_v19, %v9399_v19 }
 0xa6d   : > { %11562 = vmatpush1.bf16.msra.mxu0 %v14871_v45  ;;  %v14898_v45 = vld [vmem:[%s20347_s11 + $0x820] ss:$8 sps:$4 sm:$0xff]  }
 0xa6e   : > { %11563 = vmatprep.subr.bf16.mxu0 %v14876_v10  ;;  %v14903_v10 = vld [vmem:[%s20347_s11 + $0x834] ss:$8 sps:$4 sm:$0xff]  }
 0xa71   : > { %11564 = vmatpush1.bf16.msra.mxu0 %v14874_v8  ;;  %v14922_v8 = vld [vmem:[%s20347_s11 + $0x8a0] ss:$8 sps:$4 sm:$0xff]  }
 0xa72   : > { %11565 = vmatprep.subr.bf16.mxu0 %v14879_v49  ;;  %v14928_v49 = vld [vmem:[%s20347_s11 + $0x8c0] ss:$8 sps:$4 sm:$0xff]  }
 0xa75   : > { %11566 = vmatpush1.bf16.msra.mxu0 %v14877_v43  ;;  %v14934_v43 = vld [vmem:[%s20347_s11 + $0x8e0] ss:$8 sps:$4 sm:$0xff]  }
 0xa76   : > { %11567 = vmatprep.subr.bf16.mxu0 %v14882_v31  ;;  %v14942_v31 = vld [vmem:[%s20347_s11 + $0x904] ss:$8 sps:$4 sm:$0xff]  }
 0xa79   : > { %11568 = vmatpush1.bf16.msra.mxu0 %v14880_v22  ;;  %v15084_v22 = vmov 0  }
 0xa7a   : > { %11569 = vmatprep.subr.bf16.mxu0 %v14885_v40  ;;  %v14949_v40 = vld [vmem:[%s20347_s11 + $0x930] ss:$8 sps:$4 sm:$0xff]  }
 0xa7d   : > { %11570 = vmatpush1.bf16.msra.mxu0 %v14883_v44  ;;  %v14955_v44 = vld [vmem:[%s20347_s11 + $0x950] ss:$8 sps:$4 sm:$0xff]  }
 0xa7e   : > { %11571 = vmatprep.subr.bf16.mxu0 %v14888_v39  ;;  %v14961_v39 = vld [vmem:[%s20347_s11 + $0x970] ss:$8 sps:$4 sm:$0xff]  }
 0xa81   : > { %11572 = vmatpush1.bf16.msra.mxu0 %v14886_v5  ;;  %v9419_v5 = vpack.c.bf16 %v9400_v57, %v9400_v57 }
 0xa82   : > { %11573 = vmatprep.subr.bf16.mxu0 %v14891_v51  ;;  %v11701_v51 = vld [vmem:[%s20349_s13 + $0xe0] sm:$0xff] }
 0xa85   : > { %11574 = vmatpush1.bf16.msra.mxu0 %v14889_v58  ;;  %v11702_v58 = vld [vmem:[%s20349_s13 + $0xe8] sm:$0xff] }
 0xa86   : > { %11584 = vmatprep.subr.bf16.mxu0 %v14894_v41  ;;  %v13793_v38 = vpack.c.bf16 %v11702_v58, %v11701_v51  ;;  %v11685_v41 = vld [vmem:[%s20349_s13 + $0x60] sm:$0xff] }
 0xa87   : > { %v13795_v19 = vpack.c.bf16 %v11686_v16, %v11685_v41 }
 0xa88   : > { %11576 = vmatmul.mubr.bf16.vlgmr.msra.gmra.mrb[140].mxu0 %v9415_v25  ;;  %v11687_v25 = vld [vmem:[%s20349_s13 + $0x70] sm:$0xff]  ;;  %13794 = vmatprep.subr.bf16.mxu1 %v13793_v38 }
 0xa89   : > { %11585 = vmatpush1.bf16.msra.mxu0 %v14892_v13  ;;  %11616 = vmatprep.mubr.bf16.mxu0 %v9418_v37  ;;  %v11704_v13 = vld [vmem:[%s20349_s13 + $0xf8] sm:$0xff] }
 0xa8a   : > { %11586 = vmatprep.subr.bf16.mxu0 %v14897_v21  ;;  %v11688_v21 = vld [vmem:[%s20349_s13 + $0x78] sm:$0xff]  ;;  %v13797_v37 = vpack.c.bf16 %v11704_v13, %v11703_v15  ;;  %13796 = vmatpush3.bf16.msra.mxu1 %v13795_v19 }
 0xa8c   : > { %13798 = vmatprep.subr.bf16.mxu1 %v13797_v37 }
 0xa8d   : > { %11587 = vmatpush1.bf16.msra.mxu0 %v14895_v7  ;;  %v13799_v7 = vpack.c.bf16 %v11688_v21, %v11687_v25 }
 0xa8e   : > { %11588 = vmatprep.subr.bf16.mxu0 %v14900_v11  ;;  %v9724_v11 = vld [vmem:[%s20348_s12] sm:$0x3] }
 0xa8f   : > { %13800 = vmatpush3.bf16.msra.mxu1 %v13799_v7 }
 0xa90   : > { %13801 = vmatprep.subr.bf16.mxu1 %v15080_v48 }
 0xa91   : > { %11589 = vmatpush1.bf16.msra.mxu0 %v14898_v45  ;;  %v20518_v45 = vld [vmem:[#allocation5_spill] sm:$0xff] }
 0xa92   : > { %11590 = vmatprep.subr.bf16.mxu0 %v14903_v10  ;;  %v9729_v10 = vrot.slane %v9724_v11, %v20518_v45 }
 0xa95   : > { %11591 = vmatpush1.bf16.msra.mxu0 %v14901_v47  ;;  %v9733_v47 = vrot.slane %v9724_v11, %v16220_v23 }
 0xa96   : > { %11592 = vmatprep.subr.bf16.mxu0 %v14906_v34 }
 0xa99   : > { %11593 = vmatpush1.bf16.msra.mxu0 %v14904_v18  ;;  %v11668_v18 = vstv %s11952_s1 }
 0xa9a   : > { %11594 = vmatprep.subr.bf16.mxu0 %v14909_v54 }
 0xa9d   : > { %11595 = vmatpush1.bf16.msra.mxu0 %v14907_v55 }
 0xa9e   : > { %11596 = vmatprep.subr.bf16.mxu0 %v14912_v62 }
 0xaa1   : > { %11597 = vmatpush1.bf16.msra.mxu0 %v14910_v61 }
 0xaa2   : > { %11598 = vmatprep.subr.bf16.mxu0 %v14915_v3  ;;  %v11786_v3 = vld [vmem:[%s20351_s15] sm:$0xff] }
 0xaa5   : > { %11599 = vmatpush1.bf16.msra.mxu0 %v14913_v27  ;;  %v11787_v27 = vld [vmem:[%s20351_s15 + $0x8] sm:$0xff] }
 0xaa6   : > { %11600 = vmatprep.subr.bf16.mxu0 %v14918_v20  ;;  %v13802_v23 = vpack.c.bf16 %v11787_v27, %v11786_v3 }
 0xaa9   : > { %11601 = vmatpush1.bf16.msra.mxu0 %v14916_v17 }
 0xaaa   : > { %11602 = vmatprep.subr.bf16.mxu0 %v14921_v52 }
 0xaad   : > { %11603 = vmatpush1.bf16.msra.mxu0 %v14919_v1 }
 0xaae   : > { %11604 = vmatprep.subr.bf16.mxu0 %v14924_v6  ;;  %v11788_v6 = vld [vmem:[%s20351_s15 + $0x10] sm:$0xff] }
 0xab1   : > { %11605 = vmatpush1.bf16.msra.mxu0 %v14922_v8  ;;  %v11789_v8 = vld [vmem:[%s20351_s15 + $0x18] sm:$0xff] }
 0xab2   : > { %11606 = vmatprep.subr.bf16.mxu0 %v14927_v4 }
 0xab5   : > { %11607 = vmatpush1.bf16.msra.mxu0 %v14925_v14  ;;  %v13805_v14 = vpack.c.bf16 %v11789_v8, %v11788_v6 }
 0xab6   : > { %11608 = vmatprep.subr.bf16.mxu0 %v14930_v36  ;;  %v11790_v36 = vld [vmem:[%s20351_s15 + $0x20] sm:$0xff] }
 0xab9   : > { %11609 = vmatpush1.bf16.msra.mxu0 %v14928_v49  ;;  %v11791_v49 = vld [vmem:[%s20351_s15 + $0x28] sm:$0xff] }
 0xaba   : > { %11610 = vmatprep.subr.bf16.mxu0 %v14933_v46  ;;  %v11792_v46 = vld [vmem:[%s20351_s15 + $0x30] sm:$0xff] }
 0xabd   : > { %11611 = vmatpush1.bf16.msra.mxu0 %v14931_v2  ;;  %v13808_v2 = vpack.c.bf16 %v11791_v49, %v11790_v36 }
 0xabe   : > { %11612 = vmatprep.subr.bf16.mxu0 %v14936_v24 }
 0xac1   : > { %11613 = vmatpush1.bf16.msra.mxu0 %v14934_v43 }
 0xac2   : > { %11614 = vmatprep.subr.bf16.mxu0 %v14939_v42  ;;  %v13077_v42 = vld [vmem:[%s20350_s14] ss:$0 sm:$0xff] }
 0xac5   : > { %11615 = vmatpush1.bf16.msra.mxu0 %v14937_v60 }
 0xac6   : > { %11625 = vmatprep.subr.bf16.mxu0 %v14942_v31  ;;  %v11783_v31 = vstv %s11953_s29 }
 0xac8   : > { %11617 = vmatmul.mubr.bf16.vlgmr.msra.gmra.mrb[140].mxu0 %v9417_v9 }
 0xac9   : > { %11626 = vmatpush1.bf16.msra.mxu0 %v14940_v63  ;;  %11657 = vmatprep.mubr.bf16.mxu0 %v15084_v22 }
 0xaca   : > { %11627 = vmatprep.subr.bf16.mxu0 %v14945_v0 }
 0xacd   : > { %11628 = vmatpush1.bf16.msra.mxu0 %v14943_v33 }
 0xace   : > { %11629 = vmatprep.subr.bf16.mxu0 %v14948_v53 }
 0xad1   : > { %11630 = vmatpush1.bf16.msra.mxu0 %v14946_v29 }
 0xad2   : > { %11631 = vmatprep.subr.bf16.mxu0 %v14951_v28 }
 0xad5   : > { %11632 = vmatpush1.bf16.msra.mxu0 %v14949_v40 }
 0xad6   : > { %11633 = vmatprep.subr.bf16.mxu0 %v14954_v26 }
 0xad9   : > { %11634 = vmatpush1.bf16.msra.mxu0 %v14952_v35 }
 0xada   : > { %11635 = vmatprep.subr.bf16.mxu0 %v14957_v59 }
 0xadd   : > { %11636 = vmatpush1.bf16.msra.mxu0 %v14955_v44 }
 0xade   : > { %11637 = vmatprep.subr.bf16.mxu0 %v14960_v56 }
 0xae1   : > { %11638 = vmatpush1.bf16.msra.mxu0 %v14958_v50 }
 0xae2   : > { %11639 = vmatprep.subr.bf16.mxu0 %v14963_v12 }
 0xae5   : > { %11640 = vmatpush1.bf16.msra.mxu0 %v14961_v39 }
 0xae8   : > { %11658 = vmatmul.mubr.bf16.vlgmr.msra.gmra.mrb[140].mxu0 %v9419_v5 }
 0xbbb   : > { %v11659_v34 = vpop.f32.mrb[140].mxu0 }
 0xbbc   : > { %v13973_v54 = vadd.f32 %v11659_v34, %v9729_v10  ;;  %v11661_v55 = vpop.f32.mrb[141].mxu0 }
 0xbbd   : > { %v13974_v62 = vadd.f32 %v11661_v55, %v9733_v47  ;;  %v11663_v61 = vpop.f32.mrb[142].mxu0 }
 0xbbe   : > { %v11669_v20 = vmul.f32 %v13973_v54, %v11668_v18  ;;  %v11664_v17 = vpop.f32.mrb[143].mxu0  ;;  %vm11666_vm4 = vcmp.gt.f32.partialorder %v13973_v54, 0.0 }
 0xbbf   : > { %v11670_v52 = vmul.f32 %v13974_v62, %v11668_v18  ;;  %vm11667_vm5 = vcmp.gt.f32.partialorder %v13974_v62, 0.0 }
 0xbc0   : > { %v11671_v4 = vsel %vm11666_vm4, %v13973_v54, %v11669_v20 }
 0xbc1   : > { %v11672_v1 = vsel %vm11667_vm5, %v13974_v62, %v11670_v52 }
 0xbc2   : > { %11776 = vmatprep.mubr.f32.mxu1 %v11672_v1 }
 0xbc3   : > { %11777 = vmatmul.mubr.f32.vlgmr.msra.gmra.mrb[224].mxu1 %v11671_v4 }
 0xbc4   : > { %13803 = vmatpush3.bf16.msra.mxu1 %v13802_v23  ;;  %13760 = vmatprep.mubr.msk.f32.mxu1 %vm15078_vm14, %v15079_v32  ;;  %v11793_v32 = vld [vmem:[%s20351_s15 + $0x38] sm:$0xff] }
 0xbc5   : > { %13804 = vmatprep.subr.bf16.mxu1 %v15080_v48  ;;  %v13811_v24 = vpack.c.bf16 %v11793_v32, %v11792_v46 }
 0xbc8   : > { %13806 = vmatpush3.bf16.msra.mxu1 %v13805_v14 }
 0xbc9   : > { %13807 = vmatprep.subr.bf16.mxu1 %v15080_v48 }
 0xbcc   : > { %13809 = vmatpush3.bf16.msra.mxu1 %v13808_v2 }
 0xbcd   : > { %13810 = vmatprep.subr.bf16.mxu1 %v15080_v48  ;;  %v13078_v48 = vld [vmem:[%s20352_s16] ss:$0 sm:$0xff] }
 0xbd0   : > { %13812 = vmatpush3.bf16.msra.mxu1 %v13811_v24 }
 0xc96   : > { %v13696_v43 = vpop.f32.mrb[224].mxu1 }
 0xc97   : > { %v13697_v60 = vpop.f32.mrb[225].mxu1 }
 0xc98   : > { %v13698_v30 = vadd.f32 %v13697_v60, %v13696_v43 }
 0xc9a   : > { %v11779_v63 = vadd.f32 %v13698_v30, %v13077_v42 }
 0xc9c   : > { %vm11782_vm6 = vcmp.gt.f32.partialorder %v11779_v63, 0.0  ;;  %v11784_v9 = vmul.f32 %v11783_v31, %v11779_v63 }
 0xc9e   : > { %v11785_v0 = vsel %vm11782_vm6, %v11779_v63, %v11784_v9 }
 0xc9f   : > { %13761 = vmatmul.mubr.msk.f32.vlgmr.msra.gmra.mrb[226].mxu1 %vm9378_vm2, %v11785_v0 }
 0xd72   : > { %v11870_v33 = vpop.f32.mrb[226].mxu1 }
 0xd73   : > { %v11871_v22 = vadd.f32 %v13078_v48, %v11870_v33  ;;  %v13762_v53 = vpop.f32.mrb[227].mxu1 }
 0xd75   : > { %11875 = vst.msk [vmem:[%s587_s21] sm:$0xf] %vm11874_vm7, %v11871_v22 }
 0xd76 PF: > { %s29_s27 = sadd.s32 1, %s15075_s27  }
 0xd77   : > { %p26_p1 = scmp.ge.s32.totalorder %s29_s27, 4  }
 0xd79   :  { %28 = sbr.rel (!%p26_p1) target bundleno = 6 (0x6), region = 127 }
 0xd80   :  { %11895 = vsyncpa [#allocation3], 1 }
 0xd81   :  { %11897 = vsyncpa [#allocation3 + $0x1], 1 }

</bundles_post_ra>
